<compile_context>
chip_gen: v7x
topology: tpu7x:2x2x1
jax: 0.10.0
libtpu: 0.0.40
codegen_flags: <defaults>
</compile_context>

<pallas_src>
import functools
import math

import jax
import jax.numpy as jnp
from jax.experimental import pallas as pl
from jax.experimental.pallas import tpu as pltpu


# ----------------------------- helpers -----------------------------

def _mxu(a_bf16, b_bf16):
    """MXU matmul: bf16 operands, f32 accumulation (a[m,k] @ b[k,n])."""
    return jax.lax.dot_general(
        a_bf16, b_bf16,
        dimension_numbers=(((1,), (0,)), ((), ())),
        preferred_element_type=jnp.float32)


def _layer_norm(x, g, b):
    """LayerNorm with f32 statistics, eps=1e-5 (matches CLIP)."""
    mu = jnp.mean(x, axis=-1, keepdims=True)
    var = jnp.mean(jnp.square(x - mu), axis=-1, keepdims=True)
    return (x - mu) * jax.lax.rsqrt(var + 1e-5) * g + b


# ----------------------------- fused forward kernel -----------------------------

def _clip_fwd_kernel(patches_ref, tok_ref, patch_w_ref,
                     ln_pre_g_ref, ln_pre_b_ref,
                     ln1_g_ref, ln1_b_ref,
                     q_w_ref, q_b_ref, k_w_ref, k_b_ref, v_w_ref, v_b_ref,
                     out_w_ref, out_b_ref,
                     ln2_g_ref, ln2_b_ref,
                     fc_w_ref, fc_b_ref, proj_w_ref, proj_b_ref,
                     ln_post_g_ref, ln_post_b_ref,
                     vproj_ref, cls_w_ref, cls_b_ref,
                     o_ref, merged_ref, *, n_tokens):
    """One grid step == one batch tile; residual stream [B_tile*T_pad, W] stays in VMEM."""
    bt, t_pad, cpp = patches_ref.shape
    width = patch_w_ref.shape[1]
    layers, heads = q_w_ref.shape[0], q_w_ref.shape[1]
    hd = q_w_ref.shape[3]
    m = bt * t_pad
    scale = 1.0 / math.sqrt(hd)
    bf16 = jnp.bfloat16

    # Key-padding mask: padded token columns get -1e30 before softmax.
    kidx = jax.lax.broadcasted_iota(jnp.int32, (1, 1, t_pad), 2)
    kmask = jnp.where(kidx < n_tokens, 0.0, -1e30).astype(jnp.float32)

    # --- patch embedding (bf16 x bf16 -> f32) + cls/pos additive slab ---
    pe = _mxu(patches_ref[...].reshape(m, cpp), patch_w_ref[...])      # [M, W] f32
    x = pe + tok_ref[...]                                              # [M, W] f32

    # --- ln_pre ---
    x = _layer_norm(x, ln_pre_g_ref[...], ln_pre_b_ref[...])

    for l in range(layers):
        # ---- residual attention: x = x + out_proj(attn(ln_1(x))) ----
        y = _layer_norm(x, ln1_g_ref[l], ln1_b_ref[l]).astype(bf16)    # cast once / layer
        for h in range(heads):
            q = (_mxu(y, q_w_ref[l, h]) + q_b_ref[l, h]).astype(bf16)  # [M, hd]
            k = (_mxu(y, k_w_ref[l, h]) + k_b_ref[l, h]).astype(bf16)
            v = (_mxu(y, v_w_ref[l, h]) + v_b_ref[l, h]).astype(bf16)
            q3 = q.reshape(bt, t_pad, hd)                               # free sublane split
            k3 = k.reshape(bt, t_pad, hd)
            v3 = v.reshape(bt, t_pad, hd)
            # scores / softmax stats in f32; operands bf16 for the MXU
            s = jnp.einsum('bqd,bkd->bqk', q3, k3,
                           preferred_element_type=jnp.float32) * scale + kmask
            s = s - jnp.max(s, axis=-1, keepdims=True)
            p = jnp.exp(s)
            p = p * pl.reciprocal(jnp.sum(p, axis=-1, keepdims=True), approx=True)
            o3 = jnp.einsum('bqk,bkd->bqd', p.astype(bf16), v3,
                            preferred_element_type=jnp.float32)         # [bt, T_pad, hd]
            # head merge: static lane-offset store into VMEM scratch (no tiny-K matmul)
            merged_ref[:, h * hd:(h + 1) * hd] = o3.reshape(m, hd)
        attn = _mxu(merged_ref[...].astype(bf16), out_w_ref[l]) + out_b_ref[l]
        x = x + attn

        # ---- residual MLP: x = x + proj(QuickGELU(fc(ln_2(x)))) ----
        y = _layer_norm(x, ln2_g_ref[l], ln2_b_ref[l]).astype(bf16)
        h1 = _mxu(y, fc_w_ref[l]) + fc_b_ref[l]                         # [M, 4W] f32
        h1 = h1 * jax.nn.sigmoid(1.702 * h1)                            # QuickGELU (f32)
        x = x + _mxu(h1.astype(bf16), proj_w_ref[l]) + proj_b_ref[l]

    # ---- head: ln_post on CLS tokens -> visual projection -> classifier ----
    cls_tok = jnp.concatenate(
        [x[b * t_pad:b * t_pad + 1, :] for b in range(bt)], axis=0)     # [B_tile, W]
    feat = _layer_norm(cls_tok, ln_post_g_ref[...], ln_post_b_ref[...])
    feat = _mxu(feat.astype(bf16), vproj_ref[...])                      # [B_tile, E]
    logits = _mxu(feat.astype(bf16), cls_w_ref[...]) + cls_b_ref[...]   # [B_tile, C]
    o_ref[...] = logits.astype(o_ref.dtype)


# ----------------------------- parameters -----------------------------

def init_params(key, *, img_size=16, patch=8, in_ch=3, width=32, layers=2,
                heads=4, embed_dim=16, n_classes=4):
    """Weights pre-transposed / per-head-split / layer-stacked; matmul weights in bf16."""
    grid = img_size // patch
    n_tok = grid * grid + 1
    hd = width // heads
    keys = iter(jax.random.split(key, 20))

    def nrm(shape, scale, dtype=jnp.float32):
        return (scale * jax.random.normal(next(keys), shape, jnp.float32)).astype(dtype)

    bf = jnp.bfloat16
    L, W = layers, width
    return {
        # conv1 weight pre-transposed: [C*patch*patch, width], bf16
        "patch_w": nrm((in_ch * patch * patch, W), W ** -0.5, bf),
        "cls": nrm((1, W), W ** -0.5),
        "pos": nrm((n_tok, W), W ** -0.5),
        "ln_pre_g": jnp.ones((1, W)), "ln_pre_b": jnp.zeros((1, W)),
        "ln1_g": jnp.ones((L, 1, W)), "ln1_b": jnp.zeros((L, 1, W)),
        # qkv weights pre-split per head and per q/k/v: kernel never lane-slices activations
        "q_w": nrm((L, heads, W, hd), W ** -0.5, bf),
        "q_b": jnp.zeros((L, heads, 1, hd)),
        "k_w": nrm((L, heads, W, hd), W ** -0.5, bf),
        "k_b": jnp.zeros((L, heads, 1, hd)),
        "v_w": nrm((L, heads, W, hd), W ** -0.5, bf),
        "v_b": jnp.zeros((L, heads, 1, hd)),
        "out_w": nrm((L, W, W), W ** -0.5, bf),
        "out_b": jnp.zeros((L, 1, W)),
        "ln2_g": jnp.ones((L, 1, W)), "ln2_b": jnp.zeros((L, 1, W)),
        "fc_w": nrm((L, W, 4 * W), W ** -0.5, bf),
        "fc_b": jnp.zeros((L, 1, 4 * W)),
        "proj_w": nrm((L, 4 * W, W), (4 * W) ** -0.5, bf),
        "proj_b": jnp.zeros((L, 1, W)),
        "ln_post_g": jnp.ones((1, W)), "ln_post_b": jnp.zeros((1, W)),
        "visual_proj": nrm((W, embed_dim), W ** -0.5, bf),
        # self.classifier = nn.Linear(text_projection.shape[1]=embed_dim, n_classes)
        "cls_w": nrm((embed_dim, n_classes), embed_dim ** -0.5, bf),
        "cls_b": jnp.zeros((1, n_classes)),
    }


_WEIGHT_ORDER = ("patch_w", "ln_pre_g", "ln_pre_b",
                 "ln1_g", "ln1_b",
                 "q_w", "q_b", "k_w", "k_b", "v_w", "v_b",
                 "out_w", "out_b",
                 "ln2_g", "ln2_b", "fc_w", "fc_b", "proj_w", "proj_b",
                 "ln_post_g", "ln_post_b", "visual_proj", "cls_w", "cls_b")


# ----------------------------- forward (single pallas_call) -----------------------------

def custom_clip_forward(params, image, *, patch=8, batch_tile=8):
    """image: [B, 3, H, W] float32 -> logits [B, n_classes] float32."""
    B, C, H, _ = image.shape
    G = H // patch
    GG = G * G
    CPP = C * patch * patch
    n_tok = GG + 1
    t_pad = 8 * pl.cdiv(n_tok, 8)              # token axis padded to sublane multiple
    width = params["patch_w"].shape[1]
    n_classes = params["cls_w"].shape[1]
    bt = min(batch_tile, B)
    assert B % bt == 0, "batch must be divisible by batch_tile"
    nb = B // bt
    m = bt * t_pad

    # patchify: NCHW -> [B, GG, C*p*p] with (c, dh, dw) flatten order (matches conv weight),
    # pad to t_pad token slots (row 0 = CLS slot, tail = padding), cast to bf16 (halves DMA).
    patches = image.reshape(B, C, G, patch, G, patch)
    patches = patches.transpose(0, 2, 4, 1, 3, 5).reshape(B, GG, CPP)
    patches = jnp.pad(patches, ((0, 0), (1, t_pad - n_tok), (0, 0))).astype(jnp.bfloat16)

    # additive class-token + positional-embedding slab, padded & pre-tiled per batch tile
    tok = jnp.concatenate([params["cls"] + params["pos"][:1], params["pos"][1:]], axis=0)
    tok = jnp.pad(tok, ((0, t_pad - n_tok), (0, 0)))
    tok = jnp.tile(tok, (bt, 1)).astype(jnp.float32)            # [m, width]

    weights = [params[k] for k in _WEIGHT_ORDER]

    def _resident(arr):
        # full-array block, same block index every grid step -> stays VMEM-resident
        return pl.BlockSpec(arr.shape, lambda i, _z=(0,) * arr.ndim: _z)

    in_specs = ([pl.BlockSpec((bt, t_pad, CPP), lambda i: (i, 0, 0)),
                 _resident(tok)]
                + [_resident(w) for w in weights])
    out_spec = pl.BlockSpec((None, bt, n_classes), lambda i: (i, 0, 0))

    kernel = functools.partial(_clip_fwd_kernel, n_tokens=n_tok)

    logits = pl.pallas_call(
        kernel,
        grid=(nb,),
        in_specs=in_specs,
        out_specs=out_spec,
        out_shape=jax.ShapeDtypeStruct((nb, bt, n_classes), jnp.float32),
        scratch_shapes=[pltpu.VMEM((m, width), jnp.float32)],   # merged head outputs
        compiler_params=pltpu.CompilerParams(
            dimension_semantics=("parallel",),
            vmem_limit_bytes=32 * 1024 * 1024),
    )(patches, tok, *weights)
    return logits.reshape(B, n_classes)


# ----------------------------- main -----------------------------

if __name__ == "__main__":
    key = jax.random.PRNGKey(0)
    pkey, xkey = jax.random.split(key)

    params = init_params(pkey, img_size=16, patch=8, in_ch=3, width=32,
                         layers=2, heads=4, embed_dim=16, n_classes=4)
    image = jax.random.normal(xkey, (16, 3, 16, 16), jnp.float32)

    logits = jax.jit(custom_clip_forward)(params, image)
    jax.block_until_ready(logits)

    assert logits.shape == (16, 4) and logits.dtype == jnp.float32
    assert bool(jnp.all(jnp.isfinite(logits)))
    print("KERNEL_OK")
</pallas_src>

<mosaic_0001>
module attributes {stable_mosaic.version = 11 : i64} {
  func.func @_clip_fwd_kernel(%arg0: i32, %arg1: memref<8x8x192xbf16, #tpu.memory_space<vmem>>, %arg2: memref<64x32xf32, #tpu.memory_space<vmem>>, %arg3: memref<192x32xbf16, #tpu.memory_space<vmem>>, %arg4: memref<1x32xf32, #tpu.memory_space<vmem>>, %arg5: memref<1x32xf32, #tpu.memory_space<vmem>>, %arg6: memref<2x1x32xf32, #tpu.memory_space<vmem>>, %arg7: memref<2x1x32xf32, #tpu.memory_space<vmem>>, %arg8: memref<2x4x32x8xbf16, #tpu.memory_space<vmem>>, %arg9: memref<2x4x1x8xf32, #tpu.memory_space<vmem>>, %arg10: memref<2x4x32x8xbf16, #tpu.memory_space<vmem>>, %arg11: memref<2x4x1x8xf32, #tpu.memory_space<vmem>>, %arg12: memref<2x4x32x8xbf16, #tpu.memory_space<vmem>>, %arg13: memref<2x4x1x8xf32, #tpu.memory_space<vmem>>, %arg14: memref<2x32x32xbf16, #tpu.memory_space<vmem>>, %arg15: memref<2x1x32xf32, #tpu.memory_space<vmem>>, %arg16: memref<2x1x32xf32, #tpu.memory_space<vmem>>, %arg17: memref<2x1x32xf32, #tpu.memory_space<vmem>>, %arg18: memref<2x32x128xbf16, #tpu.memory_space<vmem>>, %arg19: memref<2x1x128xf32, #tpu.memory_space<vmem>>, %arg20: memref<2x128x32xbf16, #tpu.memory_space<vmem>>, %arg21: memref<2x1x32xf32, #tpu.memory_space<vmem>>, %arg22: memref<1x32xf32, #tpu.memory_space<vmem>>, %arg23: memref<1x32xf32, #tpu.memory_space<vmem>>, %arg24: memref<32x16xbf16, #tpu.memory_space<vmem>>, %arg25: memref<16x4xbf16, #tpu.memory_space<vmem>>, %arg26: memref<1x4xf32, #tpu.memory_space<vmem>>, %arg27: memref<1x8x4xf32, #tpu.memory_space<vmem>>, %arg28: memref<64x32xf32, #tpu.memory_space<vmem>>) attributes {dimension_semantics = [#tpu.dimension_semantics<parallel>], iteration_bounds = array<i64: 2>, scalar_prefetch = 0 : i64, scratch_operands = 1 : i64, tpu.core_type = #tpu.core_type<tc>, window_params = [{transform_indices = @transform_0, window_bounds = array<i64: 8, 8, 192>}, {pipeline_mode = #tpu.pipeline_mode<synchronous>, transform_indices = @transform_1, window_bounds = array<i64: 64, 32>}, {pipeline_mode = #tpu.pipeline_mode<synchronous>, transform_indices = @transform_2, window_bounds = array<i64: 192, 32>}, {pipeline_mode = #tpu.pipeline_mode<synchronous>, transform_indices = @transform_3, window_bounds = array<i64: 1, 32>}, {pipeline_mode = #tpu.pipeline_mode<synchronous>, transform_indices = @transform_4, window_bounds = array<i64: 1, 32>}, {pipeline_mode = #tpu.pipeline_mode<synchronous>, transform_indices = @transform_5, window_bounds = array<i64: 2, 1, 32>}, {pipeline_mode = #tpu.pipeline_mode<synchronous>, transform_indices = @transform_6, window_bounds = array<i64: 2, 1, 32>}, {pipeline_mode = #tpu.pipeline_mode<synchronous>, transform_indices = @transform_7, window_bounds = array<i64: 2, 4, 32, 8>}, {pipeline_mode = #tpu.pipeline_mode<synchronous>, transform_indices = @transform_8, window_bounds = array<i64: 2, 4, 1, 8>}, {pipeline_mode = #tpu.pipeline_mode<synchronous>, transform_indices = @transform_9, window_bounds = array<i64: 2, 4, 32, 8>}, {pipeline_mode = #tpu.pipeline_mode<synchronous>, transform_indices = @transform_10, window_bounds = array<i64: 2, 4, 1, 8>}, {pipeline_mode = #tpu.pipeline_mode<synchronous>, transform_indices = @transform_11, window_bounds = array<i64: 2, 4, 32, 8>}, {pipeline_mode = #tpu.pipeline_mode<synchronous>, transform_indices = @transform_12, window_bounds = array<i64: 2, 4, 1, 8>}, {pipeline_mode = #tpu.pipeline_mode<synchronous>, transform_indices = @transform_13, window_bounds = array<i64: 2, 32, 32>}, {pipeline_mode = #tpu.pipeline_mode<synchronous>, transform_indices = @transform_14, window_bounds = array<i64: 2, 1, 32>}, {pipeline_mode = #tpu.pipeline_mode<synchronous>, transform_indices = @transform_15, window_bounds = array<i64: 2, 1, 32>}, {pipeline_mode = #tpu.pipeline_mode<synchronous>, transform_indices = @transform_16, window_bounds = array<i64: 2, 1, 32>}, {pipeline_mode = #tpu.pipeline_mode<synchronous>, transform_indices = @transform_17, window_bounds = array<i64: 2, 32, 128>}, {pipeline_mode = #tpu.pipeline_mode<synchronous>, transform_indices = @transform_18, window_bounds = array<i64: 2, 1, 128>}, {pipeline_mode = #tpu.pipeline_mode<synchronous>, transform_indices = @transform_19, window_bounds = array<i64: 2, 128, 32>}, {pipeline_mode = #tpu.pipeline_mode<synchronous>, transform_indices = @transform_20, window_bounds = array<i64: 2, 1, 32>}, {pipeline_mode = #tpu.pipeline_mode<synchronous>, transform_indices = @transform_21, window_bounds = array<i64: 1, 32>}, {pipeline_mode = #tpu.pipeline_mode<synchronous>, transform_indices = @transform_22, window_bounds = array<i64: 1, 32>}, {pipeline_mode = #tpu.pipeline_mode<synchronous>, transform_indices = @transform_23, window_bounds = array<i64: 32, 16>}, {pipeline_mode = #tpu.pipeline_mode<synchronous>, transform_indices = @transform_24, window_bounds = array<i64: 16, 4>}, {pipeline_mode = #tpu.pipeline_mode<synchronous>, transform_indices = @transform_25, window_bounds = array<i64: 1, 4>}, {transform_indices = @transform_26, window_bounds = array<i64: 1, 8, 4>}]} {
    %0 = tpu.iota {dimensions = array<i32: 2>} : vector<1x1x8xi32>
    %c5_i32 = arith.constant 5 : i32
    %1 = vector.broadcast %c5_i32 : i32 to vector<1x1x8xi32>
    %2 = arith.cmpi slt, %0, %1 : vector<1x1x8xi32>
    %cst = arith.constant 0.000000e+00 : f32
    %cst_0 = arith.constant -1.000000e+30 : f32
    %3 = vector.broadcast %cst : f32 to vector<1x1x8xf32>
    %4 = vector.broadcast %cst_0 : f32 to vector<1x1x8xf32>
    %5 = arith.select %2, %3, %4 : vector<1x1x8xi1>, vector<1x1x8xf32>
    %c0 = arith.constant 0 : index
    %c0_1 = arith.constant 0 : index
    %c0_2 = arith.constant 0 : index
    %6 = vector.load %arg1[%c0, %c0_1, %c0_2] : memref<8x8x192xbf16, #tpu.memory_space<vmem>>, vector<8x8x192xbf16>
    %7 = vector.shape_cast %6 : vector<8x8x192xbf16> to vector<64x192xbf16>
    %c0_3 = arith.constant 0 : index
    %c0_4 = arith.constant 0 : index
    %8 = vector.load %arg3[%c0_3, %c0_4] : memref<192x32xbf16, #tpu.memory_space<vmem>>, vector<192x32xbf16>
    %cst_5 = arith.constant dense<0.000000e+00> : vector<64x32xf32>
    %9 = tpu.matmul %7, %8, %cst_5 {dimension_numbers = #tpu.dot_dimension_numbers<[1], [0], [0], [1], [0, 0, 1, 1], [], []>} : vector<64x192xbf16>, vector<192x32xbf16>, vector<64x32xf32> -> vector<64x32xf32>
    %c0_6 = arith.constant 0 : index
    %c0_7 = arith.constant 0 : index
    %10 = vector.load %arg2[%c0_6, %c0_7] : memref<64x32xf32, #tpu.memory_space<vmem>>, vector<64x32xf32>
    %11 = arith.addf %9, %10 : vector<64x32xf32>
    %c0_8 = arith.constant 0 : index
    %c0_9 = arith.constant 0 : index
    %12 = vector.load %arg4[%c0_8, %c0_9] : memref<1x32xf32, #tpu.memory_space<vmem>>, vector<1x32xf32>
    %c0_10 = arith.constant 0 : index
    %c0_11 = arith.constant 0 : index
    %13 = vector.load %arg5[%c0_10, %c0_11] : memref<1x32xf32, #tpu.memory_space<vmem>>, vector<1x32xf32>
    %cst_12 = arith.constant dense<0.000000e+00> : vector<64xf32>
    %14 = vector.multi_reduction <add>, %11, %cst_12 [1] : vector<64x32xf32> to vector<64xf32>
    %15 = vector.shape_cast %14 : vector<64xf32> to vector<64x1xf32>
    %cst_13 = arith.constant 3.200000e+01 : f32
    %16 = vector.broadcast %cst_13 : f32 to vector<64x1xf32>
    %17 = arith.divf %15, %16 : vector<64x1xf32>
    %18 = vector.broadcast %17 : vector<64x1xf32> to vector<64x32xf32>
    %19 = arith.subf %11, %18 : vector<64x32xf32>
    %20 = arith.mulf %19, %19 : vector<64x32xf32>
    %cst_14 = arith.constant dense<0.000000e+00> : vector<64xf32>
    %21 = vector.multi_reduction <add>, %20, %cst_14 [1] : vector<64x32xf32> to vector<64xf32>
    %22 = vector.shape_cast %21 : vector<64xf32> to vector<64x1xf32>
    %cst_15 = arith.constant 3.200000e+01 : f32
    %23 = vector.broadcast %cst_15 : f32 to vector<64x1xf32>
    %24 = arith.divf %22, %23 : vector<64x1xf32>
    %25 = vector.broadcast %17 : vector<64x1xf32> to vector<64x32xf32>
    %26 = arith.subf %11, %25 : vector<64x32xf32>
    %cst_16 = arith.constant 9.99999974E-6 : f32
    %27 = vector.broadcast %cst_16 : f32 to vector<64x1xf32>
    %28 = arith.addf %24, %27 : vector<64x1xf32>
    %29 = math.rsqrt %28 : vector<64x1xf32>
    %30 = vector.broadcast %29 : vector<64x1xf32> to vector<64x32xf32>
    %31 = arith.mulf %26, %30 : vector<64x32xf32>
    %32 = vector.broadcast %12 : vector<1x32xf32> to vector<64x32xf32>
    %33 = arith.mulf %31, %32 : vector<64x32xf32>
    %34 = vector.broadcast %13 : vector<1x32xf32> to vector<64x32xf32>
    %35 = arith.addf %33, %34 : vector<64x32xf32>
    %c0_17 = arith.constant 0 : index
    %c0_18 = arith.constant 0 : index
    %c0_19 = arith.constant 0 : index
    %36 = vector.load %arg6[%c0_17, %c0_18, %c0_19] : memref<2x1x32xf32, #tpu.memory_space<vmem>>, vector<1x1x32xf32>
    %37 = vector.shape_cast %36 : vector<1x1x32xf32> to vector<1x32xf32>
    %c0_20 = arith.constant 0 : index
    %c0_21 = arith.constant 0 : index
    %c0_22 = arith.constant 0 : index
    %38 = vector.load %arg7[%c0_20, %c0_21, %c0_22] : memref<2x1x32xf32, #tpu.memory_space<vmem>>, vector<1x1x32xf32>
    %39 = vector.shape_cast %38 : vector<1x1x32xf32> to vector<1x32xf32>
    %cst_23 = arith.constant dense<0.000000e+00> : vector<64xf32>
    %40 = vector.multi_reduction <add>, %35, %cst_23 [1] : vector<64x32xf32> to vector<64xf32>
    %41 = vector.shape_cast %40 : vector<64xf32> to vector<64x1xf32>
    %cst_24 = arith.constant 3.200000e+01 : f32
    %42 = vector.broadcast %cst_24 : f32 to vector<64x1xf32>
    %43 = arith.divf %41, %42 : vector<64x1xf32>
    %44 = vector.broadcast %43 : vector<64x1xf32> to vector<64x32xf32>
    %45 = arith.subf %35, %44 : vector<64x32xf32>
    %46 = arith.mulf %45, %45 : vector<64x32xf32>
    %cst_25 = arith.constant dense<0.000000e+00> : vector<64xf32>
    %47 = vector.multi_reduction <add>, %46, %cst_25 [1] : vector<64x32xf32> to vector<64xf32>
    %48 = vector.shape_cast %47 : vector<64xf32> to vector<64x1xf32>
    %cst_26 = arith.constant 3.200000e+01 : f32
    %49 = vector.broadcast %cst_26 : f32 to vector<64x1xf32>
    %50 = arith.divf %48, %49 : vector<64x1xf32>
    %51 = vector.broadcast %43 : vector<64x1xf32> to vector<64x32xf32>
    %52 = arith.subf %35, %51 : vector<64x32xf32>
    %cst_27 = arith.constant 9.99999974E-6 : f32
    %53 = vector.broadcast %cst_27 : f32 to vector<64x1xf32>
    %54 = arith.addf %50, %53 : vector<64x1xf32>
    %55 = math.rsqrt %54 : vector<64x1xf32>
    %56 = vector.broadcast %55 : vector<64x1xf32> to vector<64x32xf32>
    %57 = arith.mulf %52, %56 : vector<64x32xf32>
    %58 = vector.broadcast %37 : vector<1x32xf32> to vector<64x32xf32>
    %59 = arith.mulf %57, %58 : vector<64x32xf32>
    %60 = vector.broadcast %39 : vector<1x32xf32> to vector<64x32xf32>
    %61 = arith.addf %59, %60 : vector<64x32xf32>
    %62 = arith.truncf %61 : vector<64x32xf32> to vector<64x32xbf16>
    %c0_28 = arith.constant 0 : index
    %c0_29 = arith.constant 0 : index
    %c0_30 = arith.constant 0 : index
    %c0_31 = arith.constant 0 : index
    %63 = vector.load %arg8[%c0_28, %c0_29, %c0_30, %c0_31] : memref<2x4x32x8xbf16, #tpu.memory_space<vmem>>, vector<1x1x32x8xbf16>
    %64 = vector.shape_cast %63 : vector<1x1x32x8xbf16> to vector<32x8xbf16>
    %cst_32 = arith.constant dense<0.000000e+00> : vector<64x8xf32>
    %65 = tpu.matmul %62, %64, %cst_32 {dimension_numbers = #tpu.dot_dimension_numbers<[1], [0], [0], [1], [0, 0, 1, 1], [], []>} : vector<64x32xbf16>, vector<32x8xbf16>, vector<64x8xf32> -> vector<64x8xf32>
    %c0_33 = arith.constant 0 : index
    %c0_34 = arith.constant 0 : index
    %c0_35 = arith.constant 0 : index
    %c0_36 = arith.constant 0 : index
    %66 = vector.load %arg9[%c0_33, %c0_34, %c0_35, %c0_36] : memref<2x4x1x8xf32, #tpu.memory_space<vmem>>, vector<1x1x1x8xf32>
    %67 = vector.shape_cast %66 : vector<1x1x1x8xf32> to vector<1x8xf32>
    %68 = vector.broadcast %67 : vector<1x8xf32> to vector<64x8xf32>
    %69 = arith.addf %65, %68 : vector<64x8xf32>
    %70 = arith.truncf %69 : vector<64x8xf32> to vector<64x8xbf16>
    %c0_37 = arith.constant 0 : index
    %c0_38 = arith.constant 0 : index
    %c0_39 = arith.constant 0 : index
    %c0_40 = arith.constant 0 : index
    %71 = vector.load %arg10[%c0_37, %c0_38, %c0_39, %c0_40] : memref<2x4x32x8xbf16, #tpu.memory_space<vmem>>, vector<1x1x32x8xbf16>
    %72 = vector.shape_cast %71 : vector<1x1x32x8xbf16> to vector<32x8xbf16>
    %cst_41 = arith.constant dense<0.000000e+00> : vector<64x8xf32>
    %73 = tpu.matmul %62, %72, %cst_41 {dimension_numbers = #tpu.dot_dimension_numbers<[1], [0], [0], [1], [0, 0, 1, 1], [], []>} : vector<64x32xbf16>, vector<32x8xbf16>, vector<64x8xf32> -> vector<64x8xf32>
    %c0_42 = arith.constant 0 : index
    %c0_43 = arith.constant 0 : index
    %c0_44 = arith.constant 0 : index
    %c0_45 = arith.constant 0 : index
    %74 = vector.load %arg11[%c0_42, %c0_43, %c0_44, %c0_45] : memref<2x4x1x8xf32, #tpu.memory_space<vmem>>, vector<1x1x1x8xf32>
    %75 = vector.shape_cast %74 : vector<1x1x1x8xf32> to vector<1x8xf32>
    %76 = vector.broadcast %75 : vector<1x8xf32> to vector<64x8xf32>
    %77 = arith.addf %73, %76 : vector<64x8xf32>
    %78 = arith.truncf %77 : vector<64x8xf32> to vector<64x8xbf16>
    %c0_46 = arith.constant 0 : index
    %c0_47 = arith.constant 0 : index
    %c0_48 = arith.constant 0 : index
    %c0_49 = arith.constant 0 : index
    %79 = vector.load %arg12[%c0_46, %c0_47, %c0_48, %c0_49] : memref<2x4x32x8xbf16, #tpu.memory_space<vmem>>, vector<1x1x32x8xbf16>
    %80 = vector.shape_cast %79 : vector<1x1x32x8xbf16> to vector<32x8xbf16>
    %cst_50 = arith.constant dense<0.000000e+00> : vector<64x8xf32>
    %81 = tpu.matmul %62, %80, %cst_50 {dimension_numbers = #tpu.dot_dimension_numbers<[1], [0], [0], [1], [0, 0, 1, 1], [], []>} : vector<64x32xbf16>, vector<32x8xbf16>, vector<64x8xf32> -> vector<64x8xf32>
    %c0_51 = arith.constant 0 : index
    %c0_52 = arith.constant 0 : index
    %c0_53 = arith.constant 0 : index
    %c0_54 = arith.constant 0 : index
    %82 = vector.load %arg13[%c0_51, %c0_52, %c0_53, %c0_54] : memref<2x4x1x8xf32, #tpu.memory_space<vmem>>, vector<1x1x1x8xf32>
    %83 = vector.shape_cast %82 : vector<1x1x1x8xf32> to vector<1x8xf32>
    %84 = vector.broadcast %83 : vector<1x8xf32> to vector<64x8xf32>
    %85 = arith.addf %81, %84 : vector<64x8xf32>
    %86 = arith.truncf %85 : vector<64x8xf32> to vector<64x8xbf16>
    %87 = vector.shape_cast %70 : vector<64x8xbf16> to vector<8x8x8xbf16>
    %88 = vector.shape_cast %78 : vector<64x8xbf16> to vector<8x8x8xbf16>
    %89 = vector.shape_cast %86 : vector<64x8xbf16> to vector<8x8x8xbf16>
    "tpu.trace_start"() <{level = 10 : i32, message = "bqd,bkd->bqk"}> : () -> ()
    %cst_55 = arith.constant dense<0.000000e+00> : vector<8x8x8xf32>
    %90 = tpu.matmul %87, %88, %cst_55 {dimension_numbers = #tpu.dot_dimension_numbers<[2], [2], [1], [1], [0, 0, 0, 1, 1, 1], [0], [0]>} : vector<8x8x8xbf16>, vector<8x8x8xbf16>, vector<8x8x8xf32> -> vector<8x8x8xf32>
    "tpu.trace_stop"() : () -> ()
    %cst_56 = arith.constant 0.353553385 : f32
    %91 = vector.broadcast %cst_56 : f32 to vector<8x8x8xf32>
    %92 = arith.mulf %90, %91 : vector<8x8x8xf32>
    %93 = vector.broadcast %5 : vector<1x1x8xf32> to vector<8x8x8xf32>
    %94 = arith.addf %92, %93 : vector<8x8x8xf32>
    %cst_57 = arith.constant dense<0xFF800000> : vector<8x8xf32>
    %95 = vector.multi_reduction <maximumf>, %94, %cst_57 [2] : vector<8x8x8xf32> to vector<8x8xf32>
    %96 = vector.shape_cast %95 : vector<8x8xf32> to vector<8x8x1xf32>
    %97 = vector.broadcast %96 : vector<8x8x1xf32> to vector<8x8x8xf32>
    %98 = arith.subf %94, %97 : vector<8x8x8xf32>
    %99 = math.exp %98 : vector<8x8x8xf32>
    %cst_58 = arith.constant dense<0.000000e+00> : vector<8x8xf32>
    %100 = vector.multi_reduction <add>, %99, %cst_58 [2] : vector<8x8x8xf32> to vector<8x8xf32>
    %101 = vector.shape_cast %100 : vector<8x8xf32> to vector<8x8x1xf32>
    %102 = tpu.reciprocal %101 {approx = true} : vector<8x8x1xf32> -> vector<8x8x1xf32>
    %103 = vector.broadcast %102 : vector<8x8x1xf32> to vector<8x8x8xf32>
    %104 = arith.mulf %99, %103 : vector<8x8x8xf32>
    %105 = arith.truncf %104 : vector<8x8x8xf32> to vector<8x8x8xbf16>
    "tpu.trace_start"() <{level = 10 : i32, message = "bqk,bkd->bqd"}> : () -> ()
    %cst_59 = arith.constant dense<0.000000e+00> : vector<8x8x8xf32>
    %106 = tpu.matmul %105, %89, %cst_59 {dimension_numbers = #tpu.dot_dimension_numbers<[2], [1], [1], [2], [0, 0, 0, 1, 1, 2], [0], [0]>} : vector<8x8x8xbf16>, vector<8x8x8xbf16>, vector<8x8x8xf32> -> vector<8x8x8xf32>
    "tpu.trace_stop"() : () -> ()
    %107 = vector.shape_cast %106 : vector<8x8x8xf32> to vector<64x8xf32>
    %c0_60 = arith.constant 0 : index
    %c0_61 = arith.constant 0 : index
    %108 = vector.load %arg28[%c0_60, %c0_61] : memref<64x32xf32, #tpu.memory_space<vmem>>, vector<64x8xf32>
    tpu.vector_store %arg28[%c0_60, %c0_61], %107 {strides = array<i32>} : memref<64x32xf32, #tpu.memory_space<vmem>>, vector<64x8xf32>,
    %c0_62 = arith.constant 0 : index
    %c1 = arith.constant 1 : index
    %c0_63 = arith.constant 0 : index
    %c0_64 = arith.constant 0 : index
    %109 = vector.load %arg8[%c0_62, %c1, %c0_63, %c0_64] : memref<2x4x32x8xbf16, #tpu.memory_space<vmem>>, vector<1x1x32x8xbf16>
    %110 = vector.shape_cast %109 : vector<1x1x32x8xbf16> to vector<32x8xbf16>
    %cst_65 = arith.constant dense<0.000000e+00> : vector<64x8xf32>
    %111 = tpu.matmul %62, %110, %cst_65 {dimension_numbers = #tpu.dot_dimension_numbers<[1], [0], [0], [1], [0, 0, 1, 1], [], []>} : vector<64x32xbf16>, vector<32x8xbf16>, vector<64x8xf32> -> vector<64x8xf32>
    %c0_66 = arith.constant 0 : index
    %c1_67 = arith.constant 1 : index
    %c0_68 = arith.constant 0 : index
    %c0_69 = arith.constant 0 : index
    %112 = vector.load %arg9[%c0_66, %c1_67, %c0_68, %c0_69] : memref<2x4x1x8xf32, #tpu.memory_space<vmem>>, vector<1x1x1x8xf32>
    %113 = vector.shape_cast %112 : vector<1x1x1x8xf32> to vector<1x8xf32>
    %114 = vector.broadcast %113 : vector<1x8xf32> to vector<64x8xf32>
    %115 = arith.addf %111, %114 : vector<64x8xf32>
    %116 = arith.truncf %115 : vector<64x8xf32> to vector<64x8xbf16>
    %c0_70 = arith.constant 0 : index
    %c1_71 = arith.constant 1 : index
    %c0_72 = arith.constant 0 : index
    %c0_73 = arith.constant 0 : index
    %117 = vector.load %arg10[%c0_70, %c1_71, %c0_72, %c0_73] : memref<2x4x32x8xbf16, #tpu.memory_space<vmem>>, vector<1x1x32x8xbf16>
    %118 = vector.shape_cast %117 : vector<1x1x32x8xbf16> to vector<32x8xbf16>
    %cst_74 = arith.constant dense<0.000000e+00> : vector<64x8xf32>
    %119 = tpu.matmul %62, %118, %cst_74 {dimension_numbers = #tpu.dot_dimension_numbers<[1], [0], [0], [1], [0, 0, 1, 1], [], []>} : vector<64x32xbf16>, vector<32x8xbf16>, vector<64x8xf32> -> vector<64x8xf32>
    %c0_75 = arith.constant 0 : index
    %c1_76 = arith.constant 1 : index
    %c0_77 = arith.constant 0 : index
    %c0_78 = arith.constant 0 : index
    %120 = vector.load %arg11[%c0_75, %c1_76, %c0_77, %c0_78] : memref<2x4x1x8xf32, #tpu.memory_space<vmem>>, vector<1x1x1x8xf32>
    %121 = vector.shape_cast %120 : vector<1x1x1x8xf32> to vector<1x8xf32>
    %122 = vector.broadcast %121 : vector<1x8xf32> to vector<64x8xf32>
    %123 = arith.addf %119, %122 : vector<64x8xf32>
    %124 = arith.truncf %123 : vector<64x8xf32> to vector<64x8xbf16>
    %c0_79 = arith.constant 0 : index
    %c1_80 = arith.constant 1 : index
    %c0_81 = arith.constant 0 : index
    %c0_82 = arith.constant 0 : index
    %125 = vector.load %arg12[%c0_79, %c1_80, %c0_81, %c0_82] : memref<2x4x32x8xbf16, #tpu.memory_space<vmem>>, vector<1x1x32x8xbf16>
    %126 = vector.shape_cast %125 : vector<1x1x32x8xbf16> to vector<32x8xbf16>
    %cst_83 = arith.constant dense<0.000000e+00> : vector<64x8xf32>
    %127 = tpu.matmul %62, %126, %cst_83 {dimension_numbers = #tpu.dot_dimension_numbers<[1], [0], [0], [1], [0, 0, 1, 1], [], []>} : vector<64x32xbf16>, vector<32x8xbf16>, vector<64x8xf32> -> vector<64x8xf32>
    %c0_84 = arith.constant 0 : index
    %c1_85 = arith.constant 1 : index
    %c0_86 = arith.constant 0 : index
    %c0_87 = arith.constant 0 : index
    %128 = vector.load %arg13[%c0_84, %c1_85, %c0_86, %c0_87] : memref<2x4x1x8xf32, #tpu.memory_space<vmem>>, vector<1x1x1x8xf32>
    %129 = vector.shape_cast %128 : vector<1x1x1x8xf32> to vector<1x8xf32>
    %130 = vector.broadcast %129 : vector<1x8xf32> to vector<64x8xf32>
    %131 = arith.addf %127, %130 : vector<64x8xf32>
    %132 = arith.truncf %131 : vector<64x8xf32> to vector<64x8xbf16>
    %133 = vector.shape_cast %116 : vector<64x8xbf16> to vector<8x8x8xbf16>
    %134 = vector.shape_cast %124 : vector<64x8xbf16> to vector<8x8x8xbf16>
    %135 = vector.shape_cast %132 : vector<64x8xbf16> to vector<8x8x8xbf16>
    "tpu.trace_start"() <{level = 10 : i32, message = "bqd,bkd->bqk"}> : () -> ()
    %cst_88 = arith.constant dense<0.000000e+00> : vector<8x8x8xf32>
    %136 = tpu.matmul %133, %134, %cst_88 {dimension_numbers = #tpu.dot_dimension_numbers<[2], [2], [1], [1], [0, 0, 0, 1, 1, 1], [0], [0]>} : vector<8x8x8xbf16>, vector<8x8x8xbf16>, vector<8x8x8xf32> -> vector<8x8x8xf32>
    "tpu.trace_stop"() : () -> ()
    %cst_89 = arith.constant 0.353553385 : f32
    %137 = vector.broadcast %cst_89 : f32 to vector<8x8x8xf32>
    %138 = arith.mulf %136, %137 : vector<8x8x8xf32>
    %139 = vector.broadcast %5 : vector<1x1x8xf32> to vector<8x8x8xf32>
    %140 = arith.addf %138, %139 : vector<8x8x8xf32>
    %cst_90 = arith.constant dense<0xFF800000> : vector<8x8xf32>
    %141 = vector.multi_reduction <maximumf>, %140, %cst_90 [2] : vector<8x8x8xf32> to vector<8x8xf32>
    %142 = vector.shape_cast %141 : vector<8x8xf32> to vector<8x8x1xf32>
    %143 = vector.broadcast %142 : vector<8x8x1xf32> to vector<8x8x8xf32>
    %144 = arith.subf %140, %143 : vector<8x8x8xf32>
    %145 = math.exp %144 : vector<8x8x8xf32>
    %cst_91 = arith.constant dense<0.000000e+00> : vector<8x8xf32>
    %146 = vector.multi_reduction <add>, %145, %cst_91 [2] : vector<8x8x8xf32> to vector<8x8xf32>
    %147 = vector.shape_cast %146 : vector<8x8xf32> to vector<8x8x1xf32>
    %148 = tpu.reciprocal %147 {approx = true} : vector<8x8x1xf32> -> vector<8x8x1xf32>
    %149 = vector.broadcast %148 : vector<8x8x1xf32> to vector<8x8x8xf32>
    %150 = arith.mulf %145, %149 : vector<8x8x8xf32>
    %151 = arith.truncf %150 : vector<8x8x8xf32> to vector<8x8x8xbf16>
    "tpu.trace_start"() <{level = 10 : i32, message = "bqk,bkd->bqd"}> : () -> ()
    %cst_92 = arith.constant dense<0.000000e+00> : vector<8x8x8xf32>
    %152 = tpu.matmul %151, %135, %cst_92 {dimension_numbers = #tpu.dot_dimension_numbers<[2], [1], [1], [2], [0, 0, 0, 1, 1, 2], [0], [0]>} : vector<8x8x8xbf16>, vector<8x8x8xbf16>, vector<8x8x8xf32> -> vector<8x8x8xf32>
    "tpu.trace_stop"() : () -> ()
    %153 = vector.shape_cast %152 : vector<8x8x8xf32> to vector<64x8xf32>
    %c0_93 = arith.constant 0 : index
    %c8 = arith.constant 8 : index
    %154 = vector.load %arg28[%c0_93, %c8] : memref<64x32xf32, #tpu.memory_space<vmem>>, vector<64x8xf32>
    tpu.vector_store %arg28[%c0_93, %c8], %153 {strides = array<i32>} : memref<64x32xf32, #tpu.memory_space<vmem>>, vector<64x8xf32>,
    %c0_94 = arith.constant 0 : index
    %c2 = arith.constant 2 : index
    %c0_95 = arith.constant 0 : index
    %c0_96 = arith.constant 0 : index
    %155 = vector.load %arg8[%c0_94, %c2, %c0_95, %c0_96] : memref<2x4x32x8xbf16, #tpu.memory_space<vmem>>, vector<1x1x32x8xbf16>
    %156 = vector.shape_cast %155 : vector<1x1x32x8xbf16> to vector<32x8xbf16>
    %cst_97 = arith.constant dense<0.000000e+00> : vector<64x8xf32>
    %157 = tpu.matmul %62, %156, %cst_97 {dimension_numbers = #tpu.dot_dimension_numbers<[1], [0], [0], [1], [0, 0, 1, 1], [], []>} : vector<64x32xbf16>, vector<32x8xbf16>, vector<64x8xf32> -> vector<64x8xf32>
    %c0_98 = arith.constant 0 : index
    %c2_99 = arith.constant 2 : index
    %c0_100 = arith.constant 0 : index
    %c0_101 = arith.constant 0 : index
    %158 = vector.load %arg9[%c0_98, %c2_99, %c0_100, %c0_101] : memref<2x4x1x8xf32, #tpu.memory_space<vmem>>, vector<1x1x1x8xf32>
    %159 = vector.shape_cast %158 : vector<1x1x1x8xf32> to vector<1x8xf32>
    %160 = vector.broadcast %159 : vector<1x8xf32> to vector<64x8xf32>
    %161 = arith.addf %157, %160 : vector<64x8xf32>
    %162 = arith.truncf %161 : vector<64x8xf32> to vector<64x8xbf16>
    %c0_102 = arith.constant 0 : index
    %c2_103 = arith.constant 2 : index
    %c0_104 = arith.constant 0 : index
    %c0_105 = arith.constant 0 : index
    %163 = vector.load %arg10[%c0_102, %c2_103, %c0_104, %c0_105] : memref<2x4x32x8xbf16, #tpu.memory_space<vmem>>, vector<1x1x32x8xbf16>
    %164 = vector.shape_cast %163 : vector<1x1x32x8xbf16> to vector<32x8xbf16>
    %cst_106 = arith.constant dense<0.000000e+00> : vector<64x8xf32>
    %165 = tpu.matmul %62, %164, %cst_106 {dimension_numbers = #tpu.dot_dimension_numbers<[1], [0], [0], [1], [0, 0, 1, 1], [], []>} : vector<64x32xbf16>, vector<32x8xbf16>, vector<64x8xf32> -> vector<64x8xf32>
    %c0_107 = arith.constant 0 : index
    %c2_108 = arith.constant 2 : index
    %c0_109 = arith.constant 0 : index
    %c0_110 = arith.constant 0 : index
    %166 = vector.load %arg11[%c0_107, %c2_108, %c0_109, %c0_110] : memref<2x4x1x8xf32, #tpu.memory_space<vmem>>, vector<1x1x1x8xf32>
    %167 = vector.shape_cast %166 : vector<1x1x1x8xf32> to vector<1x8xf32>
    %168 = vector.broadcast %167 : vector<1x8xf32> to vector<64x8xf32>
    %169 = arith.addf %165, %168 : vector<64x8xf32>
    %170 = arith.truncf %169 : vector<64x8xf32> to vector<64x8xbf16>
    %c0_111 = arith.constant 0 : index
    %c2_112 = arith.constant 2 : index
    %c0_113 = arith.constant 0 : index
    %c0_114 = arith.constant 0 : index
    %171 = vector.load %arg12[%c0_111, %c2_112, %c0_113, %c0_114] : memref<2x4x32x8xbf16, #tpu.memory_space<vmem>>, vector<1x1x32x8xbf16>
    %172 = vector.shape_cast %171 : vector<1x1x32x8xbf16> to vector<32x8xbf16>
    %cst_115 = arith.constant dense<0.000000e+00> : vector<64x8xf32>
    %173 = tpu.matmul %62, %172, %cst_115 {dimension_numbers = #tpu.dot_dimension_numbers<[1], [0], [0], [1], [0, 0, 1, 1], [], []>} : vector<64x32xbf16>, vector<32x8xbf16>, vector<64x8xf32> -> vector<64x8xf32>
    %c0_116 = arith.constant 0 : index
    %c2_117 = arith.constant 2 : index
    %c0_118 = arith.constant 0 : index
    %c0_119 = arith.constant 0 : index
    %174 = vector.load %arg13[%c0_116, %c2_117, %c0_118, %c0_119] : memref<2x4x1x8xf32, #tpu.memory_space<vmem>>, vector<1x1x1x8xf32>
    %175 = vector.shape_cast %174 : vector<1x1x1x8xf32> to vector<1x8xf32>
    %176 = vector.broadcast %175 : vector<1x8xf32> to vector<64x8xf32>
    %177 = arith.addf %173, %176 : vector<64x8xf32>
    %178 = arith.truncf %177 : vector<64x8xf32> to vector<64x8xbf16>
    %179 = vector.shape_cast %162 : vector<64x8xbf16> to vector<8x8x8xbf16>
    %180 = vector.shape_cast %170 : vector<64x8xbf16> to vector<8x8x8xbf16>
    %181 = vector.shape_cast %178 : vector<64x8xbf16> to vector<8x8x8xbf16>
    "tpu.trace_start"() <{level = 10 : i32, message = "bqd,bkd->bqk"}> : () -> ()
    %cst_120 = arith.constant dense<0.000000e+00> : vector<8x8x8xf32>
    %182 = tpu.matmul %179, %180, %cst_120 {dimension_numbers = #tpu.dot_dimension_numbers<[2], [2], [1], [1], [0, 0, 0, 1, 1, 1], [0], [0]>} : vector<8x8x8xbf16>, vector<8x8x8xbf16>, vector<8x8x8xf32> -> vector<8x8x8xf32>
    "tpu.trace_stop"() : () -> ()
    %cst_121 = arith.constant 0.353553385 : f32
    %183 = vector.broadcast %cst_121 : f32 to vector<8x8x8xf32>
    %184 = arith.mulf %182, %183 : vector<8x8x8xf32>
    %185 = vector.broadcast %5 : vector<1x1x8xf32> to vector<8x8x8xf32>
    %186 = arith.addf %184, %185 : vector<8x8x8xf32>
    %cst_122 = arith.constant dense<0xFF800000> : vector<8x8xf32>
    %187 = vector.multi_reduction <maximumf>, %186, %cst_122 [2] : vector<8x8x8xf32> to vector<8x8xf32>
    %188 = vector.shape_cast %187 : vector<8x8xf32> to vector<8x8x1xf32>
    %189 = vector.broadcast %188 : vector<8x8x1xf32> to vector<8x8x8xf32>
    %190 = arith.subf %186, %189 : vector<8x8x8xf32>
    %191 = math.exp %190 : vector<8x8x8xf32>
    %cst_123 = arith.constant dense<0.000000e+00> : vector<8x8xf32>
    %192 = vector.multi_reduction <add>, %191, %cst_123 [2] : vector<8x8x8xf32> to vector<8x8xf32>
    %193 = vector.shape_cast %192 : vector<8x8xf32> to vector<8x8x1xf32>
    %194 = tpu.reciprocal %193 {approx = true} : vector<8x8x1xf32> -> vector<8x8x1xf32>
    %195 = vector.broadcast %194 : vector<8x8x1xf32> to vector<8x8x8xf32>
    %196 = arith.mulf %191, %195 : vector<8x8x8xf32>
    %197 = arith.truncf %196 : vector<8x8x8xf32> to vector<8x8x8xbf16>
    "tpu.trace_start"() <{level = 10 : i32, message = "bqk,bkd->bqd"}> : () -> ()
    %cst_124 = arith.constant dense<0.000000e+00> : vector<8x8x8xf32>
    %198 = tpu.matmul %197, %181, %cst_124 {dimension_numbers = #tpu.dot_dimension_numbers<[2], [1], [1], [2], [0, 0, 0, 1, 1, 2], [0], [0]>} : vector<8x8x8xbf16>, vector<8x8x8xbf16>, vector<8x8x8xf32> -> vector<8x8x8xf32>
    "tpu.trace_stop"() : () -> ()
    %199 = vector.shape_cast %198 : vector<8x8x8xf32> to vector<64x8xf32>
    %c0_125 = arith.constant 0 : index
    %c16 = arith.constant 16 : index
    %200 = vector.load %arg28[%c0_125, %c16] : memref<64x32xf32, #tpu.memory_space<vmem>>, vector<64x8xf32>
    tpu.vector_store %arg28[%c0_125, %c16], %199 {strides = array<i32>} : memref<64x32xf32, #tpu.memory_space<vmem>>, vector<64x8xf32>,
    %c0_126 = arith.constant 0 : index
    %c3 = arith.constant 3 : index
    %c0_127 = arith.constant 0 : index
    %c0_128 = arith.constant 0 : index
    %201 = vector.load %arg8[%c0_126, %c3, %c0_127, %c0_128] : memref<2x4x32x8xbf16, #tpu.memory_space<vmem>>, vector<1x1x32x8xbf16>
    %202 = vector.shape_cast %201 : vector<1x1x32x8xbf16> to vector<32x8xbf16>
    %cst_129 = arith.constant dense<0.000000e+00> : vector<64x8xf32>
    %203 = tpu.matmul %62, %202, %cst_129 {dimension_numbers = #tpu.dot_dimension_numbers<[1], [0], [0], [1], [0, 0, 1, 1], [], []>} : vector<64x32xbf16>, vector<32x8xbf16>, vector<64x8xf32> -> vector<64x8xf32>
    %c0_130 = arith.constant 0 : index
    %c3_131 = arith.constant 3 : index
    %c0_132 = arith.constant 0 : index
    %c0_133 = arith.constant 0 : index
    %204 = vector.load %arg9[%c0_130, %c3_131, %c0_132, %c0_133] : memref<2x4x1x8xf32, #tpu.memory_space<vmem>>, vector<1x1x1x8xf32>
    %205 = vector.shape_cast %204 : vector<1x1x1x8xf32> to vector<1x8xf32>
    %206 = vector.broadcast %205 : vector<1x8xf32> to vector<64x8xf32>
    %207 = arith.addf %203, %206 : vector<64x8xf32>
    %208 = arith.truncf %207 : vector<64x8xf32> to vector<64x8xbf16>
    %c0_134 = arith.constant 0 : index
    %c3_135 = arith.constant 3 : index
    %c0_136 = arith.constant 0 : index
    %c0_137 = arith.constant 0 : index
    %209 = vector.load %arg10[%c0_134, %c3_135, %c0_136, %c0_137] : memref<2x4x32x8xbf16, #tpu.memory_space<vmem>>, vector<1x1x32x8xbf16>
    %210 = vector.shape_cast %209 : vector<1x1x32x8xbf16> to vector<32x8xbf16>
    %cst_138 = arith.constant dense<0.000000e+00> : vector<64x8xf32>
    %211 = tpu.matmul %62, %210, %cst_138 {dimension_numbers = #tpu.dot_dimension_numbers<[1], [0], [0], [1], [0, 0, 1, 1], [], []>} : vector<64x32xbf16>, vector<32x8xbf16>, vector<64x8xf32> -> vector<64x8xf32>
    %c0_139 = arith.constant 0 : index
    %c3_140 = arith.constant 3 : index
    %c0_141 = arith.constant 0 : index
    %c0_142 = arith.constant 0 : index
    %212 = vector.load %arg11[%c0_139, %c3_140, %c0_141, %c0_142] : memref<2x4x1x8xf32, #tpu.memory_space<vmem>>, vector<1x1x1x8xf32>
    %213 = vector.shape_cast %212 : vector<1x1x1x8xf32> to vector<1x8xf32>
    %214 = vector.broadcast %213 : vector<1x8xf32> to vector<64x8xf32>
    %215 = arith.addf %211, %214 : vector<64x8xf32>
    %216 = arith.truncf %215 : vector<64x8xf32> to vector<64x8xbf16>
    %c0_143 = arith.constant 0 : index
    %c3_144 = arith.constant 3 : index
    %c0_145 = arith.constant 0 : index
    %c0_146 = arith.constant 0 : index
    %217 = vector.load %arg12[%c0_143, %c3_144, %c0_145, %c0_146] : memref<2x4x32x8xbf16, #tpu.memory_space<vmem>>, vector<1x1x32x8xbf16>
    %218 = vector.shape_cast %217 : vector<1x1x32x8xbf16> to vector<32x8xbf16>
    %cst_147 = arith.constant dense<0.000000e+00> : vector<64x8xf32>
    %219 = tpu.matmul %62, %218, %cst_147 {dimension_numbers = #tpu.dot_dimension_numbers<[1], [0], [0], [1], [0, 0, 1, 1], [], []>} : vector<64x32xbf16>, vector<32x8xbf16>, vector<64x8xf32> -> vector<64x8xf32>
    %c0_148 = arith.constant 0 : index
    %c3_149 = arith.constant 3 : index
    %c0_150 = arith.constant 0 : index
    %c0_151 = arith.constant 0 : index
    %220 = vector.load %arg13[%c0_148, %c3_149, %c0_150, %c0_151] : memref<2x4x1x8xf32, #tpu.memory_space<vmem>>, vector<1x1x1x8xf32>
    %221 = vector.shape_cast %220 : vector<1x1x1x8xf32> to vector<1x8xf32>
    %222 = vector.broadcast %221 : vector<1x8xf32> to vector<64x8xf32>
    %223 = arith.addf %219, %222 : vector<64x8xf32>
    %224 = arith.truncf %223 : vector<64x8xf32> to vector<64x8xbf16>
    %225 = vector.shape_cast %208 : vector<64x8xbf16> to vector<8x8x8xbf16>
    %226 = vector.shape_cast %216 : vector<64x8xbf16> to vector<8x8x8xbf16>
    %227 = vector.shape_cast %224 : vector<64x8xbf16> to vector<8x8x8xbf16>
    "tpu.trace_start"() <{level = 10 : i32, message = "bqd,bkd->bqk"}> : () -> ()
    %cst_152 = arith.constant dense<0.000000e+00> : vector<8x8x8xf32>
    %228 = tpu.matmul %225, %226, %cst_152 {dimension_numbers = #tpu.dot_dimension_numbers<[2], [2], [1], [1], [0, 0, 0, 1, 1, 1], [0], [0]>} : vector<8x8x8xbf16>, vector<8x8x8xbf16>, vector<8x8x8xf32> -> vector<8x8x8xf32>
    "tpu.trace_stop"() : () -> ()
    %cst_153 = arith.constant 0.353553385 : f32
    %229 = vector.broadcast %cst_153 : f32 to vector<8x8x8xf32>
    %230 = arith.mulf %228, %229 : vector<8x8x8xf32>
    %231 = vector.broadcast %5 : vector<1x1x8xf32> to vector<8x8x8xf32>
    %232 = arith.addf %230, %231 : vector<8x8x8xf32>
    %cst_154 = arith.constant dense<0xFF800000> : vector<8x8xf32>
    %233 = vector.multi_reduction <maximumf>, %232, %cst_154 [2] : vector<8x8x8xf32> to vector<8x8xf32>
    %234 = vector.shape_cast %233 : vector<8x8xf32> to vector<8x8x1xf32>
    %235 = vector.broadcast %234 : vector<8x8x1xf32> to vector<8x8x8xf32>
    %236 = arith.subf %232, %235 : vector<8x8x8xf32>
    %237 = math.exp %236 : vector<8x8x8xf32>
    %cst_155 = arith.constant dense<0.000000e+00> : vector<8x8xf32>
    %238 = vector.multi_reduction <add>, %237, %cst_155 [2] : vector<8x8x8xf32> to vector<8x8xf32>
    %239 = vector.shape_cast %238 : vector<8x8xf32> to vector<8x8x1xf32>
    %240 = tpu.reciprocal %239 {approx = true} : vector<8x8x1xf32> -> vector<8x8x1xf32>
    %241 = vector.broadcast %240 : vector<8x8x1xf32> to vector<8x8x8xf32>
    %242 = arith.mulf %237, %241 : vector<8x8x8xf32>
    %243 = arith.truncf %242 : vector<8x8x8xf32> to vector<8x8x8xbf16>
    "tpu.trace_start"() <{level = 10 : i32, message = "bqk,bkd->bqd"}> : () -> ()
    %cst_156 = arith.constant dense<0.000000e+00> : vector<8x8x8xf32>
    %244 = tpu.matmul %243, %227, %cst_156 {dimension_numbers = #tpu.dot_dimension_numbers<[2], [1], [1], [2], [0, 0, 0, 1, 1, 2], [0], [0]>} : vector<8x8x8xbf16>, vector<8x8x8xbf16>, vector<8x8x8xf32> -> vector<8x8x8xf32>
    "tpu.trace_stop"() : () -> ()
    %245 = vector.shape_cast %244 : vector<8x8x8xf32> to vector<64x8xf32>
    %c0_157 = arith.constant 0 : index
    %c24 = arith.constant 24 : index
    %246 = vector.load %arg28[%c0_157, %c24] : memref<64x32xf32, #tpu.memory_space<vmem>>, vector<64x8xf32>
    tpu.vector_store %arg28[%c0_157, %c24], %245 {strides = array<i32>} : memref<64x32xf32, #tpu.memory_space<vmem>>, vector<64x8xf32>,
    %c0_158 = arith.constant 0 : index
    %c0_159 = arith.constant 0 : index
    %247 = vector.load %arg28[%c0_158, %c0_159] : memref<64x32xf32, #tpu.memory_space<vmem>>, vector<64x32xf32>
    %248 = arith.truncf %247 : vector<64x32xf32> to vector<64x32xbf16>
    %c0_160 = arith.constant 0 : index
    %c0_161 = arith.constant 0 : index
    %c0_162 = arith.constant 0 : index
    %249 = vector.load %arg14[%c0_160, %c0_161, %c0_162] : memref<2x32x32xbf16, #tpu.memory_space<vmem>>, vector<1x32x32xbf16>
    %250 = vector.shape_cast %249 : vector<1x32x32xbf16> to vector<32x32xbf16>
    %cst_163 = arith.constant dense<0.000000e+00> : vector<64x32xf32>
    %251 = tpu.matmul %248, %250, %cst_163 {dimension_numbers = #tpu.dot_dimension_numbers<[1], [0], [0], [1], [0, 0, 1, 1], [], []>} : vector<64x32xbf16>, vector<32x32xbf16>, vector<64x32xf32> -> vector<64x32xf32>
    %c0_164 = arith.constant 0 : index
    %c0_165 = arith.constant 0 : index
    %c0_166 = arith.constant 0 : index
    %252 = vector.load %arg15[%c0_164, %c0_165, %c0_166] : memref<2x1x32xf32, #tpu.memory_space<vmem>>, vector<1x1x32xf32>
    %253 = vector.shape_cast %252 : vector<1x1x32xf32> to vector<1x32xf32>
    %254 = vector.broadcast %253 : vector<1x32xf32> to vector<64x32xf32>
    %255 = arith.addf %251, %254 : vector<64x32xf32>
    %256 = arith.addf %35, %255 : vector<64x32xf32>
    %c0_167 = arith.constant 0 : index
    %c0_168 = arith.constant 0 : index
    %c0_169 = arith.constant 0 : index
    %257 = vector.load %arg16[%c0_167, %c0_168, %c0_169] : memref<2x1x32xf32, #tpu.memory_space<vmem>>, vector<1x1x32xf32>
    %258 = vector.shape_cast %257 : vector<1x1x32xf32> to vector<1x32xf32>
    %c0_170 = arith.constant 0 : index
    %c0_171 = arith.constant 0 : index
    %c0_172 = arith.constant 0 : index
    %259 = vector.load %arg17[%c0_170, %c0_171, %c0_172] : memref<2x1x32xf32, #tpu.memory_space<vmem>>, vector<1x1x32xf32>
    %260 = vector.shape_cast %259 : vector<1x1x32xf32> to vector<1x32xf32>
    %cst_173 = arith.constant dense<0.000000e+00> : vector<64xf32>
    %261 = vector.multi_reduction <add>, %256, %cst_173 [1] : vector<64x32xf32> to vector<64xf32>
    %262 = vector.shape_cast %261 : vector<64xf32> to vector<64x1xf32>
    %cst_174 = arith.constant 3.200000e+01 : f32
    %263 = vector.broadcast %cst_174 : f32 to vector<64x1xf32>
    %264 = arith.divf %262, %263 : vector<64x1xf32>
    %265 = vector.broadcast %264 : vector<64x1xf32> to vector<64x32xf32>
    %266 = arith.subf %256, %265 : vector<64x32xf32>
    %267 = arith.mulf %266, %266 : vector<64x32xf32>
    %cst_175 = arith.constant dense<0.000000e+00> : vector<64xf32>
    %268 = vector.multi_reduction <add>, %267, %cst_175 [1] : vector<64x32xf32> to vector<64xf32>
    %269 = vector.shape_cast %268 : vector<64xf32> to vector<64x1xf32>
    %cst_176 = arith.constant 3.200000e+01 : f32
    %270 = vector.broadcast %cst_176 : f32 to vector<64x1xf32>
    %271 = arith.divf %269, %270 : vector<64x1xf32>
    %272 = vector.broadcast %264 : vector<64x1xf32> to vector<64x32xf32>
    %273 = arith.subf %256, %272 : vector<64x32xf32>
    %cst_177 = arith.constant 9.99999974E-6 : f32
    %274 = vector.broadcast %cst_177 : f32 to vector<64x1xf32>
    %275 = arith.addf %271, %274 : vector<64x1xf32>
    %276 = math.rsqrt %275 : vector<64x1xf32>
    %277 = vector.broadcast %276 : vector<64x1xf32> to vector<64x32xf32>
    %278 = arith.mulf %273, %277 : vector<64x32xf32>
    %279 = vector.broadcast %258 : vector<1x32xf32> to vector<64x32xf32>
    %280 = arith.mulf %278, %279 : vector<64x32xf32>
    %281 = vector.broadcast %260 : vector<1x32xf32> to vector<64x32xf32>
    %282 = arith.addf %280, %281 : vector<64x32xf32>
    %283 = arith.truncf %282 : vector<64x32xf32> to vector<64x32xbf16>
    %c0_178 = arith.constant 0 : index
    %c0_179 = arith.constant 0 : index
    %c0_180 = arith.constant 0 : index
    %284 = vector.load %arg18[%c0_178, %c0_179, %c0_180] : memref<2x32x128xbf16, #tpu.memory_space<vmem>>, vector<1x32x128xbf16>
    %285 = vector.shape_cast %284 : vector<1x32x128xbf16> to vector<32x128xbf16>
    %cst_181 = arith.constant dense<0.000000e+00> : vector<64x128xf32>
    %286 = tpu.matmul %283, %285, %cst_181 {dimension_numbers = #tpu.dot_dimension_numbers<[1], [0], [0], [1], [0, 0, 1, 1], [], []>} : vector<64x32xbf16>, vector<32x128xbf16>, vector<64x128xf32> -> vector<64x128xf32>
    %c0_182 = arith.constant 0 : index
    %c0_183 = arith.constant 0 : index
    %c0_184 = arith.constant 0 : index
    %287 = vector.load %arg19[%c0_182, %c0_183, %c0_184] : memref<2x1x128xf32, #tpu.memory_space<vmem>>, vector<1x1x128xf32>
    %288 = vector.shape_cast %287 : vector<1x1x128xf32> to vector<1x128xf32>
    %289 = vector.broadcast %288 : vector<1x128xf32> to vector<64x128xf32>
    %290 = arith.addf %286, %289 : vector<64x128xf32>
    %cst_185 = arith.constant 1.702000e+00 : f32
    %291 = vector.broadcast %cst_185 : f32 to vector<64x128xf32>
    %292 = arith.mulf %291, %290 : vector<64x128xf32>
    %293 = arith.negf %292 : vector<64x128xf32>
    %294 = math.exp %293 : vector<64x128xf32>
    %cst_186 = arith.constant 1.000000e+00 : f32
    %295 = vector.broadcast %cst_186 : f32 to vector<64x128xf32>
    %296 = arith.addf %295, %294 : vector<64x128xf32>
    %297 = arith.divf %295, %296 : vector<64x128xf32>
    %298 = arith.mulf %290, %297 : vector<64x128xf32>
    %299 = arith.truncf %298 : vector<64x128xf32> to vector<64x128xbf16>
    %c0_187 = arith.constant 0 : index
    %c0_188 = arith.constant 0 : index
    %c0_189 = arith.constant 0 : index
    %300 = vector.load %arg20[%c0_187, %c0_188, %c0_189] : memref<2x128x32xbf16, #tpu.memory_space<vmem>>, vector<1x128x32xbf16>
    %301 = vector.shape_cast %300 : vector<1x128x32xbf16> to vector<128x32xbf16>
    %cst_190 = arith.constant dense<0.000000e+00> : vector<64x32xf32>
    %302 = tpu.matmul %299, %301, %cst_190 {dimension_numbers = #tpu.dot_dimension_numbers<[1], [0], [0], [1], [0, 0, 1, 1], [], []>} : vector<64x128xbf16>, vector<128x32xbf16>, vector<64x32xf32> -> vector<64x32xf32>
    %303 = arith.addf %256, %302 : vector<64x32xf32>
    %c0_191 = arith.constant 0 : index
    %c0_192 = arith.constant 0 : index
    %c0_193 = arith.constant 0 : index
    %304 = vector.load %arg21[%c0_191, %c0_192, %c0_193] : memref<2x1x32xf32, #tpu.memory_space<vmem>>, vector<1x1x32xf32>
    %305 = vector.shape_cast %304 : vector<1x1x32xf32> to vector<1x32xf32>
    %306 = vector.broadcast %305 : vector<1x32xf32> to vector<64x32xf32>
    %307 = arith.addf %303, %306 : vector<64x32xf32>
    %c1_194 = arith.constant 1 : index
    %c0_195 = arith.constant 0 : index
    %c0_196 = arith.constant 0 : index
    %308 = vector.load %arg6[%c1_194, %c0_195, %c0_196] : memref<2x1x32xf32, #tpu.memory_space<vmem>>, vector<1x1x32xf32>
    %309 = vector.shape_cast %308 : vector<1x1x32xf32> to vector<1x32xf32>
    %c1_197 = arith.constant 1 : index
    %c0_198 = arith.constant 0 : index
    %c0_199 = arith.constant 0 : index
    %310 = vector.load %arg7[%c1_197, %c0_198, %c0_199] : memref<2x1x32xf32, #tpu.memory_space<vmem>>, vector<1x1x32xf32>
    %311 = vector.shape_cast %310 : vector<1x1x32xf32> to vector<1x32xf32>
    %cst_200 = arith.constant dense<0.000000e+00> : vector<64xf32>
    %312 = vector.multi_reduction <add>, %307, %cst_200 [1] : vector<64x32xf32> to vector<64xf32>
    %313 = vector.shape_cast %312 : vector<64xf32> to vector<64x1xf32>
    %cst_201 = arith.constant 3.200000e+01 : f32
    %314 = vector.broadcast %cst_201 : f32 to vector<64x1xf32>
    %315 = arith.divf %313, %314 : vector<64x1xf32>
    %316 = vector.broadcast %315 : vector<64x1xf32> to vector<64x32xf32>
    %317 = arith.subf %307, %316 : vector<64x32xf32>
    %318 = arith.mulf %317, %317 : vector<64x32xf32>
    %cst_202 = arith.constant dense<0.000000e+00> : vector<64xf32>
    %319 = vector.multi_reduction <add>, %318, %cst_202 [1] : vector<64x32xf32> to vector<64xf32>
    %320 = vector.shape_cast %319 : vector<64xf32> to vector<64x1xf32>
    %cst_203 = arith.constant 3.200000e+01 : f32
    %321 = vector.broadcast %cst_203 : f32 to vector<64x1xf32>
    %322 = arith.divf %320, %321 : vector<64x1xf32>
    %323 = vector.broadcast %315 : vector<64x1xf32> to vector<64x32xf32>
    %324 = arith.subf %307, %323 : vector<64x32xf32>
    %cst_204 = arith.constant 9.99999974E-6 : f32
    %325 = vector.broadcast %cst_204 : f32 to vector<64x1xf32>
    %326 = arith.addf %322, %325 : vector<64x1xf32>
    %327 = math.rsqrt %326 : vector<64x1xf32>
    %328 = vector.broadcast %327 : vector<64x1xf32> to vector<64x32xf32>
    %329 = arith.mulf %324, %328 : vector<64x32xf32>
    %330 = vector.broadcast %309 : vector<1x32xf32> to vector<64x32xf32>
    %331 = arith.mulf %329, %330 : vector<64x32xf32>
    %332 = vector.broadcast %311 : vector<1x32xf32> to vector<64x32xf32>
    %333 = arith.addf %331, %332 : vector<64x32xf32>
    %334 = arith.truncf %333 : vector<64x32xf32> to vector<64x32xbf16>
    %c1_205 = arith.constant 1 : index
    %c0_206 = arith.constant 0 : index
    %c0_207 = arith.constant 0 : index
    %c0_208 = arith.constant 0 : index
    %335 = vector.load %arg8[%c1_205, %c0_206, %c0_207, %c0_208] : memref<2x4x32x8xbf16, #tpu.memory_space<vmem>>, vector<1x1x32x8xbf16>
    %336 = vector.shape_cast %335 : vector<1x1x32x8xbf16> to vector<32x8xbf16>
    %cst_209 = arith.constant dense<0.000000e+00> : vector<64x8xf32>
    %337 = tpu.matmul %334, %336, %cst_209 {dimension_numbers = #tpu.dot_dimension_numbers<[1], [0], [0], [1], [0, 0, 1, 1], [], []>} : vector<64x32xbf16>, vector<32x8xbf16>, vector<64x8xf32> -> vector<64x8xf32>
    %c1_210 = arith.constant 1 : index
    %c0_211 = arith.constant 0 : index
    %c0_212 = arith.constant 0 : index
    %c0_213 = arith.constant 0 : index
    %338 = vector.load %arg9[%c1_210, %c0_211, %c0_212, %c0_213] : memref<2x4x1x8xf32, #tpu.memory_space<vmem>>, vector<1x1x1x8xf32>
    %339 = vector.shape_cast %338 : vector<1x1x1x8xf32> to vector<1x8xf32>
    %340 = vector.broadcast %339 : vector<1x8xf32> to vector<64x8xf32>
    %341 = arith.addf %337, %340 : vector<64x8xf32>
    %342 = arith.truncf %341 : vector<64x8xf32> to vector<64x8xbf16>
    %c1_214 = arith.constant 1 : index
    %c0_215 = arith.constant 0 : index
    %c0_216 = arith.constant 0 : index
    %c0_217 = arith.constant 0 : index
    %343 = vector.load %arg10[%c1_214, %c0_215, %c0_216, %c0_217] : memref<2x4x32x8xbf16, #tpu.memory_space<vmem>>, vector<1x1x32x8xbf16>
    %344 = vector.shape_cast %343 : vector<1x1x32x8xbf16> to vector<32x8xbf16>
    %cst_218 = arith.constant dense<0.000000e+00> : vector<64x8xf32>
    %345 = tpu.matmul %334, %344, %cst_218 {dimension_numbers = #tpu.dot_dimension_numbers<[1], [0], [0], [1], [0, 0, 1, 1], [], []>} : vector<64x32xbf16>, vector<32x8xbf16>, vector<64x8xf32> -> vector<64x8xf32>
    %c1_219 = arith.constant 1 : index
    %c0_220 = arith.constant 0 : index
    %c0_221 = arith.constant 0 : index
    %c0_222 = arith.constant 0 : index
    %346 = vector.load %arg11[%c1_219, %c0_220, %c0_221, %c0_222] : memref<2x4x1x8xf32, #tpu.memory_space<vmem>>, vector<1x1x1x8xf32>
    %347 = vector.shape_cast %346 : vector<1x1x1x8xf32> to vector<1x8xf32>
    %348 = vector.broadcast %347 : vector<1x8xf32> to vector<64x8xf32>
    %349 = arith.addf %345, %348 : vector<64x8xf32>
    %350 = arith.truncf %349 : vector<64x8xf32> to vector<64x8xbf16>
    %c1_223 = arith.constant 1 : index
    %c0_224 = arith.constant 0 : index
    %c0_225 = arith.constant 0 : index
    %c0_226 = arith.constant 0 : index
    %351 = vector.load %arg12[%c1_223, %c0_224, %c0_225, %c0_226] : memref<2x4x32x8xbf16, #tpu.memory_space<vmem>>, vector<1x1x32x8xbf16>
    %352 = vector.shape_cast %351 : vector<1x1x32x8xbf16> to vector<32x8xbf16>
    %cst_227 = arith.constant dense<0.000000e+00> : vector<64x8xf32>
    %353 = tpu.matmul %334, %352, %cst_227 {dimension_numbers = #tpu.dot_dimension_numbers<[1], [0], [0], [1], [0, 0, 1, 1], [], []>} : vector<64x32xbf16>, vector<32x8xbf16>, vector<64x8xf32> -> vector<64x8xf32>
    %c1_228 = arith.constant 1 : index
    %c0_229 = arith.constant 0 : index
    %c0_230 = arith.constant 0 : index
    %c0_231 = arith.constant 0 : index
    %354 = vector.load %arg13[%c1_228, %c0_229, %c0_230, %c0_231] : memref<2x4x1x8xf32, #tpu.memory_space<vmem>>, vector<1x1x1x8xf32>
    %355 = vector.shape_cast %354 : vector<1x1x1x8xf32> to vector<1x8xf32>
    %356 = vector.broadcast %355 : vector<1x8xf32> to vector<64x8xf32>
    %357 = arith.addf %353, %356 : vector<64x8xf32>
    %358 = arith.truncf %357 : vector<64x8xf32> to vector<64x8xbf16>
    %359 = vector.shape_cast %342 : vector<64x8xbf16> to vector<8x8x8xbf16>
    %360 = vector.shape_cast %350 : vector<64x8xbf16> to vector<8x8x8xbf16>
    %361 = vector.shape_cast %358 : vector<64x8xbf16> to vector<8x8x8xbf16>
    "tpu.trace_start"() <{level = 10 : i32, message = "bqd,bkd->bqk"}> : () -> ()
    %cst_232 = arith.constant dense<0.000000e+00> : vector<8x8x8xf32>
    %362 = tpu.matmul %359, %360, %cst_232 {dimension_numbers = #tpu.dot_dimension_numbers<[2], [2], [1], [1], [0, 0, 0, 1, 1, 1], [0], [0]>} : vector<8x8x8xbf16>, vector<8x8x8xbf16>, vector<8x8x8xf32> -> vector<8x8x8xf32>
    "tpu.trace_stop"() : () -> ()
    %cst_233 = arith.constant 0.353553385 : f32
    %363 = vector.broadcast %cst_233 : f32 to vector<8x8x8xf32>
    %364 = arith.mulf %362, %363 : vector<8x8x8xf32>
    %365 = vector.broadcast %5 : vector<1x1x8xf32> to vector<8x8x8xf32>
    %366 = arith.addf %364, %365 : vector<8x8x8xf32>
    %cst_234 = arith.constant dense<0xFF800000> : vector<8x8xf32>
    %367 = vector.multi_reduction <maximumf>, %366, %cst_234 [2] : vector<8x8x8xf32> to vector<8x8xf32>
    %368 = vector.shape_cast %367 : vector<8x8xf32> to vector<8x8x1xf32>
    %369 = vector.broadcast %368 : vector<8x8x1xf32> to vector<8x8x8xf32>
    %370 = arith.subf %366, %369 : vector<8x8x8xf32>
    %371 = math.exp %370 : vector<8x8x8xf32>
    %cst_235 = arith.constant dense<0.000000e+00> : vector<8x8xf32>
    %372 = vector.multi_reduction <add>, %371, %cst_235 [2] : vector<8x8x8xf32> to vector<8x8xf32>
    %373 = vector.shape_cast %372 : vector<8x8xf32> to vector<8x8x1xf32>
    %374 = tpu.reciprocal %373 {approx = true} : vector<8x8x1xf32> -> vector<8x8x1xf32>
    %375 = vector.broadcast %374 : vector<8x8x1xf32> to vector<8x8x8xf32>
    %376 = arith.mulf %371, %375 : vector<8x8x8xf32>
    %377 = arith.truncf %376 : vector<8x8x8xf32> to vector<8x8x8xbf16>
    "tpu.trace_start"() <{level = 10 : i32, message = "bqk,bkd->bqd"}> : () -> ()
    %cst_236 = arith.constant dense<0.000000e+00> : vector<8x8x8xf32>
    %378 = tpu.matmul %377, %361, %cst_236 {dimension_numbers = #tpu.dot_dimension_numbers<[2], [1], [1], [2], [0, 0, 0, 1, 1, 2], [0], [0]>} : vector<8x8x8xbf16>, vector<8x8x8xbf16>, vector<8x8x8xf32> -> vector<8x8x8xf32>
    "tpu.trace_stop"() : () -> ()
    %379 = vector.shape_cast %378 : vector<8x8x8xf32> to vector<64x8xf32>
    %c0_237 = arith.constant 0 : index
    %c0_238 = arith.constant 0 : index
    %380 = vector.load %arg28[%c0_237, %c0_238] : memref<64x32xf32, #tpu.memory_space<vmem>>, vector<64x8xf32>
    tpu.vector_store %arg28[%c0_237, %c0_238], %379 {strides = array<i32>} : memref<64x32xf32, #tpu.memory_space<vmem>>, vector<64x8xf32>,
    %c1_239 = arith.constant 1 : index
    %c1_240 = arith.constant 1 : index
    %c0_241 = arith.constant 0 : index
    %c0_242 = arith.constant 0 : index
    %381 = vector.load %arg8[%c1_239, %c1_240, %c0_241, %c0_242] : memref<2x4x32x8xbf16, #tpu.memory_space<vmem>>, vector<1x1x32x8xbf16>
    %382 = vector.shape_cast %381 : vector<1x1x32x8xbf16> to vector<32x8xbf16>
    %cst_243 = arith.constant dense<0.000000e+00> : vector<64x8xf32>
    %383 = tpu.matmul %334, %382, %cst_243 {dimension_numbers = #tpu.dot_dimension_numbers<[1], [0], [0], [1], [0, 0, 1, 1], [], []>} : vector<64x32xbf16>, vector<32x8xbf16>, vector<64x8xf32> -> vector<64x8xf32>
    %c1_244 = arith.constant 1 : index
    %c1_245 = arith.constant 1 : index
    %c0_246 = arith.constant 0 : index
    %c0_247 = arith.constant 0 : index
    %384 = vector.load %arg9[%c1_244, %c1_245, %c0_246, %c0_247] : memref<2x4x1x8xf32, #tpu.memory_space<vmem>>, vector<1x1x1x8xf32>
    %385 = vector.shape_cast %384 : vector<1x1x1x8xf32> to vector<1x8xf32>
    %386 = vector.broadcast %385 : vector<1x8xf32> to vector<64x8xf32>
    %387 = arith.addf %383, %386 : vector<64x8xf32>
    %388 = arith.truncf %387 : vector<64x8xf32> to vector<64x8xbf16>
    %c1_248 = arith.constant 1 : index
    %c1_249 = arith.constant 1 : index
    %c0_250 = arith.constant 0 : index
    %c0_251 = arith.constant 0 : index
    %389 = vector.load %arg10[%c1_248, %c1_249, %c0_250, %c0_251] : memref<2x4x32x8xbf16, #tpu.memory_space<vmem>>, vector<1x1x32x8xbf16>
    %390 = vector.shape_cast %389 : vector<1x1x32x8xbf16> to vector<32x8xbf16>
    %cst_252 = arith.constant dense<0.000000e+00> : vector<64x8xf32>
    %391 = tpu.matmul %334, %390, %cst_252 {dimension_numbers = #tpu.dot_dimension_numbers<[1], [0], [0], [1], [0, 0, 1, 1], [], []>} : vector<64x32xbf16>, vector<32x8xbf16>, vector<64x8xf32> -> vector<64x8xf32>
    %c1_253 = arith.constant 1 : index
    %c1_254 = arith.constant 1 : index
    %c0_255 = arith.constant 0 : index
    %c0_256 = arith.constant 0 : index
    %392 = vector.load %arg11[%c1_253, %c1_254, %c0_255, %c0_256] : memref<2x4x1x8xf32, #tpu.memory_space<vmem>>, vector<1x1x1x8xf32>
    %393 = vector.shape_cast %392 : vector<1x1x1x8xf32> to vector<1x8xf32>
    %394 = vector.broadcast %393 : vector<1x8xf32> to vector<64x8xf32>
    %395 = arith.addf %391, %394 : vector<64x8xf32>
    %396 = arith.truncf %395 : vector<64x8xf32> to vector<64x8xbf16>
    %c1_257 = arith.constant 1 : index
    %c1_258 = arith.constant 1 : index
    %c0_259 = arith.constant 0 : index
    %c0_260 = arith.constant 0 : index
    %397 = vector.load %arg12[%c1_257, %c1_258, %c0_259, %c0_260] : memref<2x4x32x8xbf16, #tpu.memory_space<vmem>>, vector<1x1x32x8xbf16>
    %398 = vector.shape_cast %397 : vector<1x1x32x8xbf16> to vector<32x8xbf16>
    %cst_261 = arith.constant dense<0.000000e+00> : vector<64x8xf32>
    %399 = tpu.matmul %334, %398, %cst_261 {dimension_numbers = #tpu.dot_dimension_numbers<[1], [0], [0], [1], [0, 0, 1, 1], [], []>} : vector<64x32xbf16>, vector<32x8xbf16>, vector<64x8xf32> -> vector<64x8xf32>
    %c1_262 = arith.constant 1 : index
    %c1_263 = arith.constant 1 : index
    %c0_264 = arith.constant 0 : index
    %c0_265 = arith.constant 0 : index
    %400 = vector.load %arg13[%c1_262, %c1_263, %c0_264, %c0_265] : memref<2x4x1x8xf32, #tpu.memory_space<vmem>>, vector<1x1x1x8xf32>
    %401 = vector.shape_cast %400 : vector<1x1x1x8xf32> to vector<1x8xf32>
    %402 = vector.broadcast %401 : vector<1x8xf32> to vector<64x8xf32>
    %403 = arith.addf %399, %402 : vector<64x8xf32>
    %404 = arith.truncf %403 : vector<64x8xf32> to vector<64x8xbf16>
    %405 = vector.shape_cast %388 : vector<64x8xbf16> to vector<8x8x8xbf16>
    %406 = vector.shape_cast %396 : vector<64x8xbf16> to vector<8x8x8xbf16>
    %407 = vector.shape_cast %404 : vector<64x8xbf16> to vector<8x8x8xbf16>
    "tpu.trace_start"() <{level = 10 : i32, message = "bqd,bkd->bqk"}> : () -> ()
    %cst_266 = arith.constant dense<0.000000e+00> : vector<8x8x8xf32>
    %408 = tpu.matmul %405, %406, %cst_266 {dimension_numbers = #tpu.dot_dimension_numbers<[2], [2], [1], [1], [0, 0, 0, 1, 1, 1], [0], [0]>} : vector<8x8x8xbf16>, vector<8x8x8xbf16>, vector<8x8x8xf32> -> vector<8x8x8xf32>
    "tpu.trace_stop"() : () -> ()
    %cst_267 = arith.constant 0.353553385 : f32
    %409 = vector.broadcast %cst_267 : f32 to vector<8x8x8xf32>
    %410 = arith.mulf %408, %409 : vector<8x8x8xf32>
    %411 = vector.broadcast %5 : vector<1x1x8xf32> to vector<8x8x8xf32>
    %412 = arith.addf %410, %411 : vector<8x8x8xf32>
    %cst_268 = arith.constant dense<0xFF800000> : vector<8x8xf32>
    %413 = vector.multi_reduction <maximumf>, %412, %cst_268 [2] : vector<8x8x8xf32> to vector<8x8xf32>
    %414 = vector.shape_cast %413 : vector<8x8xf32> to vector<8x8x1xf32>
    %415 = vector.broadcast %414 : vector<8x8x1xf32> to vector<8x8x8xf32>
    %416 = arith.subf %412, %415 : vector<8x8x8xf32>
    %417 = math.exp %416 : vector<8x8x8xf32>
    %cst_269 = arith.constant dense<0.000000e+00> : vector<8x8xf32>
    %418 = vector.multi_reduction <add>, %417, %cst_269 [2] : vector<8x8x8xf32> to vector<8x8xf32>
    %419 = vector.shape_cast %418 : vector<8x8xf32> to vector<8x8x1xf32>
    %420 = tpu.reciprocal %419 {approx = true} : vector<8x8x1xf32> -> vector<8x8x1xf32>
    %421 = vector.broadcast %420 : vector<8x8x1xf32> to vector<8x8x8xf32>
    %422 = arith.mulf %417, %421 : vector<8x8x8xf32>
    %423 = arith.truncf %422 : vector<8x8x8xf32> to vector<8x8x8xbf16>
    "tpu.trace_start"() <{level = 10 : i32, message = "bqk,bkd->bqd"}> : () -> ()
    %cst_270 = arith.constant dense<0.000000e+00> : vector<8x8x8xf32>
    %424 = tpu.matmul %423, %407, %cst_270 {dimension_numbers = #tpu.dot_dimension_numbers<[2], [1], [1], [2], [0, 0, 0, 1, 1, 2], [0], [0]>} : vector<8x8x8xbf16>, vector<8x8x8xbf16>, vector<8x8x8xf32> -> vector<8x8x8xf32>
    "tpu.trace_stop"() : () -> ()
    %425 = vector.shape_cast %424 : vector<8x8x8xf32> to vector<64x8xf32>
    %c0_271 = arith.constant 0 : index
    %c8_272 = arith.constant 8 : index
    %426 = vector.load %arg28[%c0_271, %c8_272] : memref<64x32xf32, #tpu.memory_space<vmem>>, vector<64x8xf32>
    tpu.vector_store %arg28[%c0_271, %c8_272], %425 {strides = array<i32>} : memref<64x32xf32, #tpu.memory_space<vmem>>, vector<64x8xf32>,
    %c1_273 = arith.constant 1 : index
    %c2_274 = arith.constant 2 : index
    %c0_275 = arith.constant 0 : index
    %c0_276 = arith.constant 0 : index
    %427 = vector.load %arg8[%c1_273, %c2_274, %c0_275, %c0_276] : memref<2x4x32x8xbf16, #tpu.memory_space<vmem>>, vector<1x1x32x8xbf16>
    %428 = vector.shape_cast %427 : vector<1x1x32x8xbf16> to vector<32x8xbf16>
    %cst_277 = arith.constant dense<0.000000e+00> : vector<64x8xf32>
    %429 = tpu.matmul %334, %428, %cst_277 {dimension_numbers = #tpu.dot_dimension_numbers<[1], [0], [0], [1], [0, 0, 1, 1], [], []>} : vector<64x32xbf16>, vector<32x8xbf16>, vector<64x8xf32> -> vector<64x8xf32>
    %c1_278 = arith.constant 1 : index
    %c2_279 = arith.constant 2 : index
    %c0_280 = arith.constant 0 : index
    %c0_281 = arith.constant 0 : index
    %430 = vector.load %arg9[%c1_278, %c2_279, %c0_280, %c0_281] : memref<2x4x1x8xf32, #tpu.memory_space<vmem>>, vector<1x1x1x8xf32>
    %431 = vector.shape_cast %430 : vector<1x1x1x8xf32> to vector<1x8xf32>
    %432 = vector.broadcast %431 : vector<1x8xf32> to vector<64x8xf32>
    %433 = arith.addf %429, %432 : vector<64x8xf32>
    %434 = arith.truncf %433 : vector<64x8xf32> to vector<64x8xbf16>
    %c1_282 = arith.constant 1 : index
    %c2_283 = arith.constant 2 : index
    %c0_284 = arith.constant 0 : index
    %c0_285 = arith.constant 0 : index
    %435 = vector.load %arg10[%c1_282, %c2_283, %c0_284, %c0_285] : memref<2x4x32x8xbf16, #tpu.memory_space<vmem>>, vector<1x1x32x8xbf16>
    %436 = vector.shape_cast %435 : vector<1x1x32x8xbf16> to vector<32x8xbf16>
    %cst_286 = arith.constant dense<0.000000e+00> : vector<64x8xf32>
    %437 = tpu.matmul %334, %436, %cst_286 {dimension_numbers = #tpu.dot_dimension_numbers<[1], [0], [0], [1], [0, 0, 1, 1], [], []>} : vector<64x32xbf16>, vector<32x8xbf16>, vector<64x8xf32> -> vector<64x8xf32>
    %c1_287 = arith.constant 1 : index
    %c2_288 = arith.constant 2 : index
    %c0_289 = arith.constant 0 : index
    %c0_290 = arith.constant 0 : index
    %438 = vector.load %arg11[%c1_287, %c2_288, %c0_289, %c0_290] : memref<2x4x1x8xf32, #tpu.memory_space<vmem>>, vector<1x1x1x8xf32>
    %439 = vector.shape_cast %438 : vector<1x1x1x8xf32> to vector<1x8xf32>
    %440 = vector.broadcast %439 : vector<1x8xf32> to vector<64x8xf32>
    %441 = arith.addf %437, %440 : vector<64x8xf32>
    %442 = arith.truncf %441 : vector<64x8xf32> to vector<64x8xbf16>
    %c1_291 = arith.constant 1 : index
    %c2_292 = arith.constant 2 : index
    %c0_293 = arith.constant 0 : index
    %c0_294 = arith.constant 0 : index
    %443 = vector.load %arg12[%c1_291, %c2_292, %c0_293, %c0_294] : memref<2x4x32x8xbf16, #tpu.memory_space<vmem>>, vector<1x1x32x8xbf16>
    %444 = vector.shape_cast %443 : vector<1x1x32x8xbf16> to vector<32x8xbf16>
    %cst_295 = arith.constant dense<0.000000e+00> : vector<64x8xf32>
    %445 = tpu.matmul %334, %444, %cst_295 {dimension_numbers = #tpu.dot_dimension_numbers<[1], [0], [0], [1], [0, 0, 1, 1], [], []>} : vector<64x32xbf16>, vector<32x8xbf16>, vector<64x8xf32> -> vector<64x8xf32>
    %c1_296 = arith.constant 1 : index
    %c2_297 = arith.constant 2 : index
    %c0_298 = arith.constant 0 : index
    %c0_299 = arith.constant 0 : index
    %446 = vector.load %arg13[%c1_296, %c2_297, %c0_298, %c0_299] : memref<2x4x1x8xf32, #tpu.memory_space<vmem>>, vector<1x1x1x8xf32>
    %447 = vector.shape_cast %446 : vector<1x1x1x8xf32> to vector<1x8xf32>
    %448 = vector.broadcast %447 : vector<1x8xf32> to vector<64x8xf32>
    %449 = arith.addf %445, %448 : vector<64x8xf32>
    %450 = arith.truncf %449 : vector<64x8xf32> to vector<64x8xbf16>
    %451 = vector.shape_cast %434 : vector<64x8xbf16> to vector<8x8x8xbf16>
    %452 = vector.shape_cast %442 : vector<64x8xbf16> to vector<8x8x8xbf16>
    %453 = vector.shape_cast %450 : vector<64x8xbf16> to vector<8x8x8xbf16>
    "tpu.trace_start"() <{level = 10 : i32, message = "bqd,bkd->bqk"}> : () -> ()
    %cst_300 = arith.constant dense<0.000000e+00> : vector<8x8x8xf32>
    %454 = tpu.matmul %451, %452, %cst_300 {dimension_numbers = #tpu.dot_dimension_numbers<[2], [2], [1], [1], [0, 0, 0, 1, 1, 1], [0], [0]>} : vector<8x8x8xbf16>, vector<8x8x8xbf16>, vector<8x8x8xf32> -> vector<8x8x8xf32>
    "tpu.trace_stop"() : () -> ()
    %cst_301 = arith.constant 0.353553385 : f32
    %455 = vector.broadcast %cst_301 : f32 to vector<8x8x8xf32>
    %456 = arith.mulf %454, %455 : vector<8x8x8xf32>
    %457 = vector.broadcast %5 : vector<1x1x8xf32> to vector<8x8x8xf32>
    %458 = arith.addf %456, %457 : vector<8x8x8xf32>
    %cst_302 = arith.constant dense<0xFF800000> : vector<8x8xf32>
    %459 = vector.multi_reduction <maximumf>, %458, %cst_302 [2] : vector<8x8x8xf32> to vector<8x8xf32>
    %460 = vector.shape_cast %459 : vector<8x8xf32> to vector<8x8x1xf32>
    %461 = vector.broadcast %460 : vector<8x8x1xf32> to vector<8x8x8xf32>
    %462 = arith.subf %458, %461 : vector<8x8x8xf32>
    %463 = math.exp %462 : vector<8x8x8xf32>
    %cst_303 = arith.constant dense<0.000000e+00> : vector<8x8xf32>
    %464 = vector.multi_reduction <add>, %463, %cst_303 [2] : vector<8x8x8xf32> to vector<8x8xf32>
    %465 = vector.shape_cast %464 : vector<8x8xf32> to vector<8x8x1xf32>
    %466 = tpu.reciprocal %465 {approx = true} : vector<8x8x1xf32> -> vector<8x8x1xf32>
    %467 = vector.broadcast %466 : vector<8x8x1xf32> to vector<8x8x8xf32>
    %468 = arith.mulf %463, %467 : vector<8x8x8xf32>
    %469 = arith.truncf %468 : vector<8x8x8xf32> to vector<8x8x8xbf16>
    "tpu.trace_start"() <{level = 10 : i32, message = "bqk,bkd->bqd"}> : () -> ()
    %cst_304 = arith.constant dense<0.000000e+00> : vector<8x8x8xf32>
    %470 = tpu.matmul %469, %453, %cst_304 {dimension_numbers = #tpu.dot_dimension_numbers<[2], [1], [1], [2], [0, 0, 0, 1, 1, 2], [0], [0]>} : vector<8x8x8xbf16>, vector<8x8x8xbf16>, vector<8x8x8xf32> -> vector<8x8x8xf32>
    "tpu.trace_stop"() : () -> ()
    %471 = vector.shape_cast %470 : vector<8x8x8xf32> to vector<64x8xf32>
    %c0_305 = arith.constant 0 : index
    %c16_306 = arith.constant 16 : index
    %472 = vector.load %arg28[%c0_305, %c16_306] : memref<64x32xf32, #tpu.memory_space<vmem>>, vector<64x8xf32>
    tpu.vector_store %arg28[%c0_305, %c16_306], %471 {strides = array<i32>} : memref<64x32xf32, #tpu.memory_space<vmem>>, vector<64x8xf32>,
    %c1_307 = arith.constant 1 : index
    %c3_308 = arith.constant 3 : index
    %c0_309 = arith.constant 0 : index
    %c0_310 = arith.constant 0 : index
    %473 = vector.load %arg8[%c1_307, %c3_308, %c0_309, %c0_310] : memref<2x4x32x8xbf16, #tpu.memory_space<vmem>>, vector<1x1x32x8xbf16>
    %474 = vector.shape_cast %473 : vector<1x1x32x8xbf16> to vector<32x8xbf16>
    %cst_311 = arith.constant dense<0.000000e+00> : vector<64x8xf32>
    %475 = tpu.matmul %334, %474, %cst_311 {dimension_numbers = #tpu.dot_dimension_numbers<[1], [0], [0], [1], [0, 0, 1, 1], [], []>} : vector<64x32xbf16>, vector<32x8xbf16>, vector<64x8xf32> -> vector<64x8xf32>
    %c1_312 = arith.constant 1 : index
    %c3_313 = arith.constant 3 : index
    %c0_314 = arith.constant 0 : index
    %c0_315 = arith.constant 0 : index
    %476 = vector.load %arg9[%c1_312, %c3_313, %c0_314, %c0_315] : memref<2x4x1x8xf32, #tpu.memory_space<vmem>>, vector<1x1x1x8xf32>
    %477 = vector.shape_cast %476 : vector<1x1x1x8xf32> to vector<1x8xf32>
    %478 = vector.broadcast %477 : vector<1x8xf32> to vector<64x8xf32>
    %479 = arith.addf %475, %478 : vector<64x8xf32>
    %480 = arith.truncf %479 : vector<64x8xf32> to vector<64x8xbf16>
    %c1_316 = arith.constant 1 : index
    %c3_317 = arith.constant 3 : index
    %c0_318 = arith.constant 0 : index
    %c0_319 = arith.constant 0 : index
    %481 = vector.load %arg10[%c1_316, %c3_317, %c0_318, %c0_319] : memref<2x4x32x8xbf16, #tpu.memory_space<vmem>>, vector<1x1x32x8xbf16>
    %482 = vector.shape_cast %481 : vector<1x1x32x8xbf16> to vector<32x8xbf16>
    %cst_320 = arith.constant dense<0.000000e+00> : vector<64x8xf32>
    %483 = tpu.matmul %334, %482, %cst_320 {dimension_numbers = #tpu.dot_dimension_numbers<[1], [0], [0], [1], [0, 0, 1, 1], [], []>} : vector<64x32xbf16>, vector<32x8xbf16>, vector<64x8xf32> -> vector<64x8xf32>
    %c1_321 = arith.constant 1 : index
    %c3_322 = arith.constant 3 : index
    %c0_323 = arith.constant 0 : index
    %c0_324 = arith.constant 0 : index
    %484 = vector.load %arg11[%c1_321, %c3_322, %c0_323, %c0_324] : memref<2x4x1x8xf32, #tpu.memory_space<vmem>>, vector<1x1x1x8xf32>
    %485 = vector.shape_cast %484 : vector<1x1x1x8xf32> to vector<1x8xf32>
    %486 = vector.broadcast %485 : vector<1x8xf32> to vector<64x8xf32>
    %487 = arith.addf %483, %486 : vector<64x8xf32>
    %488 = arith.truncf %487 : vector<64x8xf32> to vector<64x8xbf16>
    %c1_325 = arith.constant 1 : index
    %c3_326 = arith.constant 3 : index
    %c0_327 = arith.constant 0 : index
    %c0_328 = arith.constant 0 : index
    %489 = vector.load %arg12[%c1_325, %c3_326, %c0_327, %c0_328] : memref<2x4x32x8xbf16, #tpu.memory_space<vmem>>, vector<1x1x32x8xbf16>
    %490 = vector.shape_cast %489 : vector<1x1x32x8xbf16> to vector<32x8xbf16>
    %cst_329 = arith.constant dense<0.000000e+00> : vector<64x8xf32>
    %491 = tpu.matmul %334, %490, %cst_329 {dimension_numbers = #tpu.dot_dimension_numbers<[1], [0], [0], [1], [0, 0, 1, 1], [], []>} : vector<64x32xbf16>, vector<32x8xbf16>, vector<64x8xf32> -> vector<64x8xf32>
    %c1_330 = arith.constant 1 : index
    %c3_331 = arith.constant 3 : index
    %c0_332 = arith.constant 0 : index
    %c0_333 = arith.constant 0 : index
    %492 = vector.load %arg13[%c1_330, %c3_331, %c0_332, %c0_333] : memref<2x4x1x8xf32, #tpu.memory_space<vmem>>, vector<1x1x1x8xf32>
    %493 = vector.shape_cast %492 : vector<1x1x1x8xf32> to vector<1x8xf32>
    %494 = vector.broadcast %493 : vector<1x8xf32> to vector<64x8xf32>
    %495 = arith.addf %491, %494 : vector<64x8xf32>
    %496 = arith.truncf %495 : vector<64x8xf32> to vector<64x8xbf16>
    %497 = vector.shape_cast %480 : vector<64x8xbf16> to vector<8x8x8xbf16>
    %498 = vector.shape_cast %488 : vector<64x8xbf16> to vector<8x8x8xbf16>
    %499 = vector.shape_cast %496 : vector<64x8xbf16> to vector<8x8x8xbf16>
    "tpu.trace_start"() <{level = 10 : i32, message = "bqd,bkd->bqk"}> : () -> ()
    %cst_334 = arith.constant dense<0.000000e+00> : vector<8x8x8xf32>
    %500 = tpu.matmul %497, %498, %cst_334 {dimension_numbers = #tpu.dot_dimension_numbers<[2], [2], [1], [1], [0, 0, 0, 1, 1, 1], [0], [0]>} : vector<8x8x8xbf16>, vector<8x8x8xbf16>, vector<8x8x8xf32> -> vector<8x8x8xf32>
    "tpu.trace_stop"() : () -> ()
    %cst_335 = arith.constant 0.353553385 : f32
    %501 = vector.broadcast %cst_335 : f32 to vector<8x8x8xf32>
    %502 = arith.mulf %500, %501 : vector<8x8x8xf32>
    %503 = vector.broadcast %5 : vector<1x1x8xf32> to vector<8x8x8xf32>
    %504 = arith.addf %502, %503 : vector<8x8x8xf32>
    %cst_336 = arith.constant dense<0xFF800000> : vector<8x8xf32>
    %505 = vector.multi_reduction <maximumf>, %504, %cst_336 [2] : vector<8x8x8xf32> to vector<8x8xf32>
    %506 = vector.shape_cast %505 : vector<8x8xf32> to vector<8x8x1xf32>
    %507 = vector.broadcast %506 : vector<8x8x1xf32> to vector<8x8x8xf32>
    %508 = arith.subf %504, %507 : vector<8x8x8xf32>
    %509 = math.exp %508 : vector<8x8x8xf32>
    %cst_337 = arith.constant dense<0.000000e+00> : vector<8x8xf32>
    %510 = vector.multi_reduction <add>, %509, %cst_337 [2] : vector<8x8x8xf32> to vector<8x8xf32>
    %511 = vector.shape_cast %510 : vector<8x8xf32> to vector<8x8x1xf32>
    %512 = tpu.reciprocal %511 {approx = true} : vector<8x8x1xf32> -> vector<8x8x1xf32>
    %513 = vector.broadcast %512 : vector<8x8x1xf32> to vector<8x8x8xf32>
    %514 = arith.mulf %509, %513 : vector<8x8x8xf32>
    %515 = arith.truncf %514 : vector<8x8x8xf32> to vector<8x8x8xbf16>
    "tpu.trace_start"() <{level = 10 : i32, message = "bqk,bkd->bqd"}> : () -> ()
    %cst_338 = arith.constant dense<0.000000e+00> : vector<8x8x8xf32>
    %516 = tpu.matmul %515, %499, %cst_338 {dimension_numbers = #tpu.dot_dimension_numbers<[2], [1], [1], [2], [0, 0, 0, 1, 1, 2], [0], [0]>} : vector<8x8x8xbf16>, vector<8x8x8xbf16>, vector<8x8x8xf32> -> vector<8x8x8xf32>
    "tpu.trace_stop"() : () -> ()
    %517 = vector.shape_cast %516 : vector<8x8x8xf32> to vector<64x8xf32>
    %c0_339 = arith.constant 0 : index
    %c24_340 = arith.constant 24 : index
    %518 = vector.load %arg28[%c0_339, %c24_340] : memref<64x32xf32, #tpu.memory_space<vmem>>, vector<64x8xf32>
    tpu.vector_store %arg28[%c0_339, %c24_340], %517 {strides = array<i32>} : memref<64x32xf32, #tpu.memory_space<vmem>>, vector<64x8xf32>,
    %c0_341 = arith.constant 0 : index
    %c0_342 = arith.constant 0 : index
    %519 = vector.load %arg28[%c0_341, %c0_342] : memref<64x32xf32, #tpu.memory_space<vmem>>, vector<64x32xf32>
    %520 = arith.truncf %519 : vector<64x32xf32> to vector<64x32xbf16>
    %c1_343 = arith.constant 1 : index
    %c0_344 = arith.constant 0 : index
    %c0_345 = arith.constant 0 : index
    %521 = vector.load %arg14[%c1_343, %c0_344, %c0_345] : memref<2x32x32xbf16, #tpu.memory_space<vmem>>, vector<1x32x32xbf16>
    %522 = vector.shape_cast %521 : vector<1x32x32xbf16> to vector<32x32xbf16>
    %cst_346 = arith.constant dense<0.000000e+00> : vector<64x32xf32>
    %523 = tpu.matmul %520, %522, %cst_346 {dimension_numbers = #tpu.dot_dimension_numbers<[1], [0], [0], [1], [0, 0, 1, 1], [], []>} : vector<64x32xbf16>, vector<32x32xbf16>, vector<64x32xf32> -> vector<64x32xf32>
    %c1_347 = arith.constant 1 : index
    %c0_348 = arith.constant 0 : index
    %c0_349 = arith.constant 0 : index
    %524 = vector.load %arg15[%c1_347, %c0_348, %c0_349] : memref<2x1x32xf32, #tpu.memory_space<vmem>>, vector<1x1x32xf32>
    %525 = vector.shape_cast %524 : vector<1x1x32xf32> to vector<1x32xf32>
    %526 = vector.broadcast %525 : vector<1x32xf32> to vector<64x32xf32>
    %527 = arith.addf %523, %526 : vector<64x32xf32>
    %528 = arith.addf %307, %527 : vector<64x32xf32>
    %c1_350 = arith.constant 1 : index
    %c0_351 = arith.constant 0 : index
    %c0_352 = arith.constant 0 : index
    %529 = vector.load %arg16[%c1_350, %c0_351, %c0_352] : memref<2x1x32xf32, #tpu.memory_space<vmem>>, vector<1x1x32xf32>
    %530 = vector.shape_cast %529 : vector<1x1x32xf32> to vector<1x32xf32>
    %c1_353 = arith.constant 1 : index
    %c0_354 = arith.constant 0 : index
    %c0_355 = arith.constant 0 : index
    %531 = vector.load %arg17[%c1_353, %c0_354, %c0_355] : memref<2x1x32xf32, #tpu.memory_space<vmem>>, vector<1x1x32xf32>
    %532 = vector.shape_cast %531 : vector<1x1x32xf32> to vector<1x32xf32>
    %cst_356 = arith.constant dense<0.000000e+00> : vector<64xf32>
    %533 = vector.multi_reduction <add>, %528, %cst_356 [1] : vector<64x32xf32> to vector<64xf32>
    %534 = vector.shape_cast %533 : vector<64xf32> to vector<64x1xf32>
    %cst_357 = arith.constant 3.200000e+01 : f32
    %535 = vector.broadcast %cst_357 : f32 to vector<64x1xf32>
    %536 = arith.divf %534, %535 : vector<64x1xf32>
    %537 = vector.broadcast %536 : vector<64x1xf32> to vector<64x32xf32>
    %538 = arith.subf %528, %537 : vector<64x32xf32>
    %539 = arith.mulf %538, %538 : vector<64x32xf32>
    %cst_358 = arith.constant dense<0.000000e+00> : vector<64xf32>
    %540 = vector.multi_reduction <add>, %539, %cst_358 [1] : vector<64x32xf32> to vector<64xf32>
    %541 = vector.shape_cast %540 : vector<64xf32> to vector<64x1xf32>
    %cst_359 = arith.constant 3.200000e+01 : f32
    %542 = vector.broadcast %cst_359 : f32 to vector<64x1xf32>
    %543 = arith.divf %541, %542 : vector<64x1xf32>
    %544 = vector.broadcast %536 : vector<64x1xf32> to vector<64x32xf32>
    %545 = arith.subf %528, %544 : vector<64x32xf32>
    %cst_360 = arith.constant 9.99999974E-6 : f32
    %546 = vector.broadcast %cst_360 : f32 to vector<64x1xf32>
    %547 = arith.addf %543, %546 : vector<64x1xf32>
    %548 = math.rsqrt %547 : vector<64x1xf32>
    %549 = vector.broadcast %548 : vector<64x1xf32> to vector<64x32xf32>
    %550 = arith.mulf %545, %549 : vector<64x32xf32>
    %551 = vector.broadcast %530 : vector<1x32xf32> to vector<64x32xf32>
    %552 = arith.mulf %550, %551 : vector<64x32xf32>
    %553 = vector.broadcast %532 : vector<1x32xf32> to vector<64x32xf32>
    %554 = arith.addf %552, %553 : vector<64x32xf32>
    %555 = arith.truncf %554 : vector<64x32xf32> to vector<64x32xbf16>
    %c1_361 = arith.constant 1 : index
    %c0_362 = arith.constant 0 : index
    %c0_363 = arith.constant 0 : index
    %556 = vector.load %arg18[%c1_361, %c0_362, %c0_363] : memref<2x32x128xbf16, #tpu.memory_space<vmem>>, vector<1x32x128xbf16>
    %557 = vector.shape_cast %556 : vector<1x32x128xbf16> to vector<32x128xbf16>
    %cst_364 = arith.constant dense<0.000000e+00> : vector<64x128xf32>
    %558 = tpu.matmul %555, %557, %cst_364 {dimension_numbers = #tpu.dot_dimension_numbers<[1], [0], [0], [1], [0, 0, 1, 1], [], []>} : vector<64x32xbf16>, vector<32x128xbf16>, vector<64x128xf32> -> vector<64x128xf32>
    %c1_365 = arith.constant 1 : index
    %c0_366 = arith.constant 0 : index
    %c0_367 = arith.constant 0 : index
    %559 = vector.load %arg19[%c1_365, %c0_366, %c0_367] : memref<2x1x128xf32, #tpu.memory_space<vmem>>, vector<1x1x128xf32>
    %560 = vector.shape_cast %559 : vector<1x1x128xf32> to vector<1x128xf32>
    %561 = vector.broadcast %560 : vector<1x128xf32> to vector<64x128xf32>
    %562 = arith.addf %558, %561 : vector<64x128xf32>
    %cst_368 = arith.constant 1.702000e+00 : f32
    %563 = vector.broadcast %cst_368 : f32 to vector<64x128xf32>
    %564 = arith.mulf %563, %562 : vector<64x128xf32>
    %565 = arith.negf %564 : vector<64x128xf32>
    %566 = math.exp %565 : vector<64x128xf32>
    %cst_369 = arith.constant 1.000000e+00 : f32
    %567 = vector.broadcast %cst_369 : f32 to vector<64x128xf32>
    %568 = arith.addf %567, %566 : vector<64x128xf32>
    %569 = arith.divf %567, %568 : vector<64x128xf32>
    %570 = arith.mulf %562, %569 : vector<64x128xf32>
    %571 = arith.truncf %570 : vector<64x128xf32> to vector<64x128xbf16>
    %c1_370 = arith.constant 1 : index
    %c0_371 = arith.constant 0 : index
    %c0_372 = arith.constant 0 : index
    %572 = vector.load %arg20[%c1_370, %c0_371, %c0_372] : memref<2x128x32xbf16, #tpu.memory_space<vmem>>, vector<1x128x32xbf16>
    %573 = vector.shape_cast %572 : vector<1x128x32xbf16> to vector<128x32xbf16>
    %cst_373 = arith.constant dense<0.000000e+00> : vector<64x32xf32>
    %574 = tpu.matmul %571, %573, %cst_373 {dimension_numbers = #tpu.dot_dimension_numbers<[1], [0], [0], [1], [0, 0, 1, 1], [], []>} : vector<64x128xbf16>, vector<128x32xbf16>, vector<64x32xf32> -> vector<64x32xf32>
    %575 = arith.addf %528, %574 : vector<64x32xf32>
    %c1_374 = arith.constant 1 : index
    %c0_375 = arith.constant 0 : index
    %c0_376 = arith.constant 0 : index
    %576 = vector.load %arg21[%c1_374, %c0_375, %c0_376] : memref<2x1x32xf32, #tpu.memory_space<vmem>>, vector<1x1x32xf32>
    %577 = vector.shape_cast %576 : vector<1x1x32xf32> to vector<1x32xf32>
    %578 = vector.broadcast %577 : vector<1x32xf32> to vector<64x32xf32>
    %579 = arith.addf %575, %578 : vector<64x32xf32>
    %580 = vector.extract_strided_slice %579 {offsets = [0, 0], sizes = [1, 32], strides = [1, 1]} : vector<64x32xf32> to vector<1x32xf32>
    %581 = vector.extract_strided_slice %579 {offsets = [8, 0], sizes = [1, 32], strides = [1, 1]} : vector<64x32xf32> to vector<1x32xf32>
    %582 = vector.extract_strided_slice %579 {offsets = [16, 0], sizes = [1, 32], strides = [1, 1]} : vector<64x32xf32> to vector<1x32xf32>
    %583 = vector.extract_strided_slice %579 {offsets = [24, 0], sizes = [1, 32], strides = [1, 1]} : vector<64x32xf32> to vector<1x32xf32>
    %584 = vector.extract_strided_slice %579 {offsets = [32, 0], sizes = [1, 32], strides = [1, 1]} : vector<64x32xf32> to vector<1x32xf32>
    %585 = vector.extract_strided_slice %579 {offsets = [40, 0], sizes = [1, 32], strides = [1, 1]} : vector<64x32xf32> to vector<1x32xf32>
    %586 = vector.extract_strided_slice %579 {offsets = [48, 0], sizes = [1, 32], strides = [1, 1]} : vector<64x32xf32> to vector<1x32xf32>
    %587 = vector.extract_strided_slice %579 {offsets = [56, 0], sizes = [1, 32], strides = [1, 1]} : vector<64x32xf32> to vector<1x32xf32>
    %588 = tpu.concatenate %580, %581, %582, %583, %584, %585, %586, %587 in 0 : vector<1x32xf32>, vector<1x32xf32>, vector<1x32xf32>, vector<1x32xf32>, vector<1x32xf32>, vector<1x32xf32>, vector<1x32xf32>, vector<1x32xf32> -> vector<8x32xf32>
    %c0_377 = arith.constant 0 : index
    %c0_378 = arith.constant 0 : index
    %589 = vector.load %arg22[%c0_377, %c0_378] : memref<1x32xf32, #tpu.memory_space<vmem>>, vector<1x32xf32>
    %c0_379 = arith.constant 0 : index
    %c0_380 = arith.constant 0 : index
    %590 = vector.load %arg23[%c0_379, %c0_380] : memref<1x32xf32, #tpu.memory_space<vmem>>, vector<1x32xf32>
    %cst_381 = arith.constant dense<0.000000e+00> : vector<8xf32>
    %591 = vector.multi_reduction <add>, %588, %cst_381 [1] : vector<8x32xf32> to vector<8xf32>
    %592 = vector.shape_cast %591 : vector<8xf32> to vector<8x1xf32>
    %cst_382 = arith.constant 3.200000e+01 : f32
    %593 = vector.broadcast %cst_382 : f32 to vector<8x1xf32>
    %594 = arith.divf %592, %593 : vector<8x1xf32>
    %595 = vector.broadcast %594 : vector<8x1xf32> to vector<8x32xf32>
    %596 = arith.subf %588, %595 : vector<8x32xf32>
    %597 = arith.mulf %596, %596 : vector<8x32xf32>
    %cst_383 = arith.constant dense<0.000000e+00> : vector<8xf32>
    %598 = vector.multi_reduction <add>, %597, %cst_383 [1] : vector<8x32xf32> to vector<8xf32>
    %599 = vector.shape_cast %598 : vector<8xf32> to vector<8x1xf32>
    %cst_384 = arith.constant 3.200000e+01 : f32
    %600 = vector.broadcast %cst_384 : f32 to vector<8x1xf32>
    %601 = arith.divf %599, %600 : vector<8x1xf32>
    %602 = vector.broadcast %594 : vector<8x1xf32> to vector<8x32xf32>
    %603 = arith.subf %588, %602 : vector<8x32xf32>
    %cst_385 = arith.constant 9.99999974E-6 : f32
    %604 = vector.broadcast %cst_385 : f32 to vector<8x1xf32>
    %605 = arith.addf %601, %604 : vector<8x1xf32>
    %606 = math.rsqrt %605 : vector<8x1xf32>
    %607 = vector.broadcast %606 : vector<8x1xf32> to vector<8x32xf32>
    %608 = arith.mulf %603, %607 : vector<8x32xf32>
    %609 = vector.broadcast %589 : vector<1x32xf32> to vector<8x32xf32>
    %610 = arith.mulf %608, %609 : vector<8x32xf32>
    %611 = vector.broadcast %590 : vector<1x32xf32> to vector<8x32xf32>
    %612 = arith.addf %610, %611 : vector<8x32xf32>
    %613 = arith.truncf %612 : vector<8x32xf32> to vector<8x32xbf16>
    %c0_386 = arith.constant 0 : index
    %c0_387 = arith.constant 0 : index
    %614 = vector.load %arg24[%c0_386, %c0_387] : memref<32x16xbf16, #tpu.memory_space<vmem>>, vector<32x16xbf16>
    %cst_388 = arith.constant dense<0.000000e+00> : vector<8x16xf32>
    %615 = tpu.matmul %613, %614, %cst_388 {dimension_numbers = #tpu.dot_dimension_numbers<[1], [0], [0], [1], [0, 0, 1, 1], [], []>} : vector<8x32xbf16>, vector<32x16xbf16>, vector<8x16xf32> -> vector<8x16xf32>
    %616 = arith.truncf %615 : vector<8x16xf32> to vector<8x16xbf16>
    %c0_389 = arith.constant 0 : index
    %c0_390 = arith.constant 0 : index
    %617 = vector.load %arg25[%c0_389, %c0_390] : memref<16x4xbf16, #tpu.memory_space<vmem>>, vector<16x4xbf16>
    %cst_391 = arith.constant dense<0.000000e+00> : vector<8x4xf32>
    %618 = tpu.matmul %616, %617, %cst_391 {dimension_numbers = #tpu.dot_dimension_numbers<[1], [0], [0], [1], [0, 0, 1, 1], [], []>} : vector<8x16xbf16>, vector<16x4xbf16>, vector<8x4xf32> -> vector<8x4xf32>
    %c0_392 = arith.constant 0 : index
    %c0_393 = arith.constant 0 : index
    %619 = vector.load %arg26[%c0_392, %c0_393] : memref<1x4xf32, #tpu.memory_space<vmem>>, vector<1x4xf32>
    %620 = vector.broadcast %619 : vector<1x4xf32> to vector<8x4xf32>
    %621 = arith.addf %618, %620 : vector<8x4xf32>
    %c0_394 = arith.constant 0 : index
    %c0_395 = arith.constant 0 : index
    %c0_396 = arith.constant 0 : index
    %622 = vector.load %arg27[%c0_394, %c0_395, %c0_396] : memref<1x8x4xf32, #tpu.memory_space<vmem>>, vector<1x8x4xf32>
    %623 = vector.shape_cast %622 : vector<1x8x4xf32> to vector<8x4xf32>
    %624 = vector.shape_cast %621 : vector<8x4xf32> to vector<1x8x4xf32>
    tpu.vector_store %arg27[%c0_394, %c0_395, %c0_396], %624 {strides = array<i32>} : memref<1x8x4xf32, #tpu.memory_space<vmem>>, vector<1x8x4xf32>,
    return
  }
  func.func @transform_0(%arg0: i32) -> (i32, i32, i32) {
    %c0_i32 = arith.constant 0 : i32
    %c0_i32_0 = arith.constant 0 : i32
    %c0_i32_1 = arith.constant 0 : i32
    return %arg0, %c0_i32, %c0_i32_0 : i32, i32, i32
  }
  func.func @transform_1(%arg0: i32) -> (i32, i32) {
    %c0_i32 = arith.constant 0 : i32
    %c0_i32_0 = arith.constant 0 : i32
    %c0_i32_1 = arith.constant 0 : i32
    return %c0_i32, %c0_i32_0 : i32, i32
  }
  func.func @transform_2(%arg0: i32) -> (i32, i32) {
    %c0_i32 = arith.constant 0 : i32
    %c0_i32_0 = arith.constant 0 : i32
    %c0_i32_1 = arith.constant 0 : i32
    return %c0_i32, %c0_i32_0 : i32, i32
  }
  func.func @transform_3(%arg0: i32) -> (i32, i32) {
    %c0_i32 = arith.constant 0 : i32
    %c0_i32_0 = arith.constant 0 : i32
    %c0_i32_1 = arith.constant 0 : i32
    return %c0_i32, %c0_i32_0 : i32, i32
  }
  func.func @transform_4(%arg0: i32) -> (i32, i32) {
    %c0_i32 = arith.constant 0 : i32
    %c0_i32_0 = arith.constant 0 : i32
    %c0_i32_1 = arith.constant 0 : i32
    return %c0_i32, %c0_i32_0 : i32, i32
  }
  func.func @transform_5(%arg0: i32) -> (i32, i32, i32) {
    %c0_i32 = arith.constant 0 : i32
    %c0_i32_0 = arith.constant 0 : i32
    %c0_i32_1 = arith.constant 0 : i32
    %c0_i32_2 = arith.constant 0 : i32
    return %c0_i32, %c0_i32_0, %c0_i32_1 : i32, i32, i32
  }
  func.func @transform_6(%arg0: i32) -> (i32, i32, i32) {
    %c0_i32 = arith.constant 0 : i32
    %c0_i32_0 = arith.constant 0 : i32
    %c0_i32_1 = arith.constant 0 : i32
    %c0_i32_2 = arith.constant 0 : i32
    return %c0_i32, %c0_i32_0, %c0_i32_1 : i32, i32, i32
  }
  func.func @transform_7(%arg0: i32) -> (i32, i32, i32, i32) {
    %c0_i32 = arith.constant 0 : i32
    %c0_i32_0 = arith.constant 0 : i32
    %c0_i32_1 = arith.constant 0 : i32
    %c0_i32_2 = arith.constant 0 : i32
    %c0_i32_3 = arith.constant 0 : i32
    return %c0_i32, %c0_i32_0, %c0_i32_1, %c0_i32_2 : i32, i32, i32, i32
  }
  func.func @transform_8(%arg0: i32) -> (i32, i32, i32, i32) {
    %c0_i32 = arith.constant 0 : i32
    %c0_i32_0 = arith.constant 0 : i32
    %c0_i32_1 = arith.constant 0 : i32
    %c0_i32_2 = arith.constant 0 : i32
    %c0_i32_3 = arith.constant 0 : i32
    return %c0_i32, %c0_i32_0, %c0_i32_1, %c0_i32_2 : i32, i32, i32, i32
  }
  func.func @transform_9(%arg0: i32) -> (i32, i32, i32, i32) {
    %c0_i32 = arith.constant 0 : i32
    %c0_i32_0 = arith.constant 0 : i32
    %c0_i32_1 = arith.constant 0 : i32
    %c0_i32_2 = arith.constant 0 : i32
    %c0_i32_3 = arith.constant 0 : i32
    return %c0_i32, %c0_i32_0, %c0_i32_1, %c0_i32_2 : i32, i32, i32, i32
  }
  func.func @transform_10(%arg0: i32) -> (i32, i32, i32, i32) {
    %c0_i32 = arith.constant 0 : i32
    %c0_i32_0 = arith.constant 0 : i32
    %c0_i32_1 = arith.constant 0 : i32
    %c0_i32_2 = arith.constant 0 : i32
    %c0_i32_3 = arith.constant 0 : i32
    return %c0_i32, %c0_i32_0, %c0_i32_1, %c0_i32_2 : i32, i32, i32, i32
  }
  func.func @transform_11(%arg0: i32) -> (i32, i32, i32, i32) {
    %c0_i32 = arith.constant 0 : i32
    %c0_i32_0 = arith.constant 0 : i32
    %c0_i32_1 = arith.constant 0 : i32
    %c0_i32_2 = arith.constant 0 : i32
    %c0_i32_3 = arith.constant 0 : i32
    return %c0_i32, %c0_i32_0, %c0_i32_1, %c0_i32_2 : i32, i32, i32, i32
  }
  func.func @transform_12(%arg0: i32) -> (i32, i32, i32, i32) {
    %c0_i32 = arith.constant 0 : i32
    %c0_i32_0 = arith.constant 0 : i32
    %c0_i32_1 = arith.constant 0 : i32
    %c0_i32_2 = arith.constant 0 : i32
    %c0_i32_3 = arith.constant 0 : i32
    return %c0_i32, %c0_i32_0, %c0_i32_1, %c0_i32_2 : i32, i32, i32, i32
  }
  func.func @transform_13(%arg0: i32) -> (i32, i32, i32) {
    %c0_i32 = arith.constant 0 : i32
    %c0_i32_0 = arith.constant 0 : i32
    %c0_i32_1 = arith.constant 0 : i32
    %c0_i32_2 = arith.constant 0 : i32
    return %c0_i32, %c0_i32_0, %c0_i32_1 : i32, i32, i32
  }
  func.func @transform_14(%arg0: i32) -> (i32, i32, i32) {
    %c0_i32 = arith.constant 0 : i32
    %c0_i32_0 = arith.constant 0 : i32
    %c0_i32_1 = arith.constant 0 : i32
    %c0_i32_2 = arith.constant 0 : i32
    return %c0_i32, %c0_i32_0, %c0_i32_1 : i32, i32, i32
  }
  func.func @transform_15(%arg0: i32) -> (i32, i32, i32) {
    %c0_i32 = arith.constant 0 : i32
    %c0_i32_0 = arith.constant 0 : i32
    %c0_i32_1 = arith.constant 0 : i32
    %c0_i32_2 = arith.constant 0 : i32
    return %c0_i32, %c0_i32_0, %c0_i32_1 : i32, i32, i32
  }
  func.func @transform_16(%arg0: i32) -> (i32, i32, i32) {
    %c0_i32 = arith.constant 0 : i32
    %c0_i32_0 = arith.constant 0 : i32
    %c0_i32_1 = arith.constant 0 : i32
    %c0_i32_2 = arith.constant 0 : i32
    return %c0_i32, %c0_i32_0, %c0_i32_1 : i32, i32, i32
  }
  func.func @transform_17(%arg0: i32) -> (i32, i32, i32) {
    %c0_i32 = arith.constant 0 : i32
    %c0_i32_0 = arith.constant 0 : i32
    %c0_i32_1 = arith.constant 0 : i32
    %c0_i32_2 = arith.constant 0 : i32
    return %c0_i32, %c0_i32_0, %c0_i32_1 : i32, i32, i32
  }
  func.func @transform_18(%arg0: i32) -> (i32, i32, i32) {
    %c0_i32 = arith.constant 0 : i32
    %c0_i32_0 = arith.constant 0 : i32
    %c0_i32_1 = arith.constant 0 : i32
    %c0_i32_2 = arith.constant 0 : i32
    return %c0_i32, %c0_i32_0, %c0_i32_1 : i32, i32, i32
  }
  func.func @transform_19(%arg0: i32) -> (i32, i32, i32) {
    %c0_i32 = arith.constant 0 : i32
    %c0_i32_0 = arith.constant 0 : i32
    %c0_i32_1 = arith.constant 0 : i32
    %c0_i32_2 = arith.constant 0 : i32
    return %c0_i32, %c0_i32_0, %c0_i32_1 : i32, i32, i32
  }
  func.func @transform_20(%arg0: i32) -> (i32, i32, i32) {
    %c0_i32 = arith.constant 0 : i32
    %c0_i32_0 = arith.constant 0 : i32
    %c0_i32_1 = arith.constant 0 : i32
    %c0_i32_2 = arith.constant 0 : i32
    return %c0_i32, %c0_i32_0, %c0_i32_1 : i32, i32, i32
  }
  func.func @transform_21(%arg0: i32) -> (i32, i32) {
    %c0_i32 = arith.constant 0 : i32
    %c0_i32_0 = arith.constant 0 : i32
    %c0_i32_1 = arith.constant 0 : i32
    return %c0_i32, %c0_i32_0 : i32, i32
  }
  func.func @transform_22(%arg0: i32) -> (i32, i32) {
    %c0_i32 = arith.constant 0 : i32
    %c0_i32_0 = arith.constant 0 : i32
    %c0_i32_1 = arith.constant 0 : i32
    return %c0_i32, %c0_i32_0 : i32, i32
  }
  func.func @transform_23(%arg0: i32) -> (i32, i32) {
    %c0_i32 = arith.constant 0 : i32
    %c0_i32_0 = arith.constant 0 : i32
    %c0_i32_1 = arith.constant 0 : i32
    return %c0_i32, %c0_i32_0 : i32, i32
  }
  func.func @transform_24(%arg0: i32) -> (i32, i32) {
    %c0_i32 = arith.constant 0 : i32
    %c0_i32_0 = arith.constant 0 : i32
    %c0_i32_1 = arith.constant 0 : i32
    return %c0_i32, %c0_i32_0 : i32, i32
  }
  func.func @transform_25(%arg0: i32) -> (i32, i32) {
    %c0_i32 = arith.constant 0 : i32
    %c0_i32_0 = arith.constant 0 : i32
    %c0_i32_1 = arith.constant 0 : i32
    return %c0_i32, %c0_i32_0 : i32, i32
  }
  func.func @transform_26(%arg0: i32) -> (i32, i32, i32) {
    %c0_i32 = arith.constant 0 : i32
    %c0_i32_0 = arith.constant 0 : i32
    %c0_i32_1 = arith.constant 0 : i32
    return %arg0, %c0_i32, %c0_i32_0 : i32, i32, i32
  }
}

</mosaic_0001>

<bundles_post_ra>
// kernel: custom_clip_forward.1
= control target key start
LH: loop header
LB: loop body
LE: loop exit
PB: predicated region body
PF: predicated region fallthrough
CT: control target
= control target key end

     0   :  { %s15858_s27 = smov 0   ;;  %s18735_s0 = inlined_call_operand.vmem [shape: bf16[16,8,192], index: 0, kind: input, shape index: {}]   ;;  %s18736_s1 = inlined_call_operand.vmem [shape: f32[64,32], index: 1, kind: input, shape index: {}]   ;;  %s18737_s2 = inlined_call_operand.vmem [shape: bf16[192,32], index: 2, kind: input, shape index: {}]   ;;  %s18738_s3 = inlined_call_operand.vmem [shape: f32[1,32], index: 3, kind: input, shape index: {}]   ;;  %s18739_s4 = inlined_call_operand.vmem [shape: f32[1,32], index: 4, kind: input, shape index: {}]   ;;  %s18740_s5 = inlined_call_operand.vmem [shape: f32[2,1,32], index: 5, kind: input, shape index: {}]   ;;  %s18741_s6 = inlined_call_operand.vmem [shape: f32[2,1,32], index: 6, kind: input, shape index: {}]   ;;  %s18742_s7 = inlined_call_operand.vmem [shape: bf16[2,4,32,8], index: 7, kind: input, shape index: {}]   ;;  %s18743_s8 = inlined_call_operand.vmem [shape: f32[2,4,1,8], index: 8, kind: input, shape index: {}]   ;;  %s18744_s9 = inlined_call_operand.vmem [shape: bf16[2,4,32,8], index: 9, kind: input, shape index: {}]   ;;  %s18745_s10 = inlined_call_operand.vmem [shape: f32[2,4,1,8], index: 10, kind: input, shape index: {}]   ;;  %s18746_s11 = inlined_call_operand.vmem [shape: bf16[2,4,32,8], index: 11, kind: input, shape index: {}]   ;;  %s18747_s12 = inlined_call_operand.vmem [shape: f32[2,4,1,8], index: 12, kind: input, shape index: {}]   ;;  %s18748_s13 = inlined_call_operand.vmem [shape: bf16[2,32,32], index: 13, kind: input, shape index: {}]   ;;  %s18749_s14 = inlined_call_operand.vmem [shape: f32[2,1,32], index: 14, kind: input, shape index: {}]   ;;  %s18750_s15 = inlined_call_operand.vmem [shape: f32[2,1,32], index: 15, kind: input, shape index: {}]   ;;  %s18751_s16 = inlined_call_operand.vmem [shape: f32[2,1,32], index: 16, kind: input, shape index: {}]   ;;  %s18752_s17 = inlined_call_operand.vmem [shape: bf16[2,32,128], index: 17, kind: input, shape index: {}]   ;;  %s18753_s18 = inlined_call_operand.vmem [shape: f32[2,1,128], index: 18, kind: input, shape index: {}]   ;;  %s18754_s19 = inlined_call_operand.vmem [shape: bf16[2,128,32], index: 19, kind: input, shape index: {}]   ;;  %s18755_s20 = inlined_call_operand.vmem [shape: f32[2,1,32], index: 20, kind: input, shape index: {}]   ;;  %s18756_s21 = inlined_call_operand.vmem [shape: f32[1,32], index: 21, kind: input, shape index: {}]   ;;  %s18757_s22 = inlined_call_operand.vmem [shape: f32[1,32], index: 22, kind: input, shape index: {}]   ;;  %s18758_s23 = inlined_call_operand.vmem [shape: bf16[32,16], index: 23, kind: input, shape index: {}]   ;;  %s18759_s24 = inlined_call_operand.vmem [shape: bf16[16,4], index: 24, kind: input, shape index: {}]   ;;  %s18760_s25 = inlined_call_operand.vmem [shape: f32[1,4], index: 25, kind: input, shape index: {}]   ;;  %s18761_s26 = inlined_call_operand.vmem [shape: f32[2,8,4], index: 26, kind: output, shape index: {}]  }
   0x1   :  { %18779 = sst [smem:[#allocation4_spill]] %s18735_s0 }
   0x2   :  { %18780 = sst [smem:[#allocation5_spill]] %s18736_s1 }
   0x3   :  { %18781 = sst [smem:[#allocation6_spill]] %s18737_s2 }
   0x4   :  { %18782 = sst [smem:[#allocation7_spill]] %s18738_s3 }
   0x5   :  { %18783 = sst [smem:[#allocation8_spill]] %s18739_s4 }
   0x6   :  { %18784 = sst [smem:[#allocation9_spill]] %s18740_s5 }
   0x7   :  { %18785 = sst [smem:[#allocation10_spill]] %s18741_s6 }
   0x8   :  { %18786 = sst [smem:[#allocation11_spill]] %s18742_s7 }
   0x9   :  { %18787 = sst [smem:[#allocation12_spill]] %s18743_s8 }
   0xa   :  { %18788 = sst [smem:[#allocation13_spill]] %s18744_s9 }
   0xb   :  { %18789 = sst [smem:[#allocation14_spill]] %s18745_s10 }
   0xc LB: > { %18790 = sst [smem:[#allocation3_spill]] %s15714_s27  ;;  %s15864_s3 = sadd.s32 4294967295, %s15714_s27   ;;  %s15714_s27 = sphi %s15858_s27, %s36_s27  }
   0xd   : > { %p12645_p0 = scmp.ge.s32.totalorder %s15714_s27, 1  ;;  %p714_p1 = scmp.lt.s32.totalorder %s15714_s27, 3 }
   0xf   : > { %p715_p2 = pnand %p12645_p0, %p714_p1 }
  0x10   : > { %s18791_s8 = sld [smem:[#allocation6_spill]] (!%p715_p2)  ;;  %v15716_v1 = vmov (!%p715_p2), 0   ;;  %s12646_s4 = sshll.u32 (!%p715_p2), %s15864_s3, 3  ;;  %vm948_vm0 = vcmask (!%p715_p2), 523264   ;;  %vm1028_vm1 = vcmask (!%p715_p2), 261120   ;;  %vm15718_vm2 = vmmov (!%p715_p2), 0  }
  0x11   : > { %718 = sbr.rel (%p715_p2) target bundleno = 11083 (0x2b4b), region = 124  ;;  %961 = vmatprep.subr.bf16.mxu0 (!%p715_p2), %v15716_v1  ;;  %p785_p3 = scmp.lt.s32.totalorder (!%p715_p2), %s12646_s4, 15  ;;  %vm1648_vm3 = vcmask (!%p715_p2), 64512   ;;  %vm2132_vm4 = vcmask (!%p715_p2), 1043456   ;;  %vm3728_vm6 = vcmask (!%p715_p2), 130112   ;;  %vm4959_vm7 = vcmask (!%p715_p2), 195712  }
  0x12   : > { %s18792_s7 = sld [smem:[#allocation4_spill]] (!%p715_p2)  ;;  %s18793_s10 = sld [smem:[#allocation5_spill]] (!%p715_p2)  ;;  %vm6190_vm8 = vcmask (!%p715_p2), 261312   ;;  %vm12424_vm9 = vcmask (!%p715_p2), 1040384   ;;  %vm12426_vm10 = vcmask (!%p715_p2), 1041408   ;;  %vm12428_vm11 = vcmask (!%p715_p2), 1042432  }
  0x13   : > { %s18794_s0 = sld [smem:[#allocation7_spill]] (!%p715_p2)  ;;  %s18795_s30 = sld [smem:[#allocation8_spill]] (!%p715_p2)  ;;  %vm12431_vm12 = vcmask (!%p715_p2), 1044480   ;;  %vm12433_vm13 = vcmask (!%p715_p2), 1045504   ;;  %vm12435_vm14 = vcmask (!%p715_p2), 1046528   ;;  %vm12542_vm15 = vcmask (!%p715_p2), 130048  }
  0x14   : > { %s18796_s6 = sld [smem:[#allocation11_spill]] (!%p715_p2)  ;;  %s18799_s1 = sld [smem:[#allocation10_spill]] (!%p715_p2) }
  0x15   : > { %s18801_s9 = sld [smem:[#allocation12_spill]] (!%p715_p2)  ;;  %s18771_s29 = smov (!%p715_p2), 16  }
  0x16   : > { %v15207_v0 = vld [vmem:[%s18791_s8] sm:$0xff] (!%p715_p2)   ;;  %v15208_v2 = vld [vmem:[%s18791_s8 + $0x8] sm:$0xff] (!%p715_p2)   ;;  %v15209_v3 = vld [vmem:[%s18791_s8 + $0x10] sm:$0xff] (!%p715_p2)   ;;  %s18802_s5 = smov (!%p715_p2), 8   ;;  %p791_p4 = scmp.lt.s32.totalorder (!%p715_p2), %s15864_s3, 1 }
  0x17   : > { %962 = vmatpush1.bf16.msra.mxu0 (!%p715_p2), %v15207_v0  ;;  %v15210_v4 = vld [vmem:[%s18791_s8 + $0x18] sm:$0xff] (!%p715_p2)   ;;  %v15211_v6 = vld [vmem:[%s18791_s8 + $0x20] sm:$0xff] (!%p715_p2)   ;;  %v15212_v7 = vld [vmem:[%s18791_s8 + $0x28] sm:$0xff] (!%p715_p2)  }
  0x18   : > { %963 = vmatprep.subr.bf16.mxu0 %v15716_v1  ;;  %s18807_s4 = smov (!%p785_p3, %s12646_s4), 15  ;;  %v15213_v8 = vld [vmem:[%s18791_s8 + $0x30] sm:$0xff]   ;;  %v15214_v9 = vld [vmem:[%s18791_s8 + $0x38] sm:$0xff]   ;;  %v15215_v10 = vld [vmem:[%s18791_s8 + $0x40] sm:$0xff]   ;;  %s18809_s3 = smov (!%p791_p4, %s15864_s3), 1 }
  0x19   : > { %s13380_s2 = sshll.u32 %s18807_s4, 3  ;;  %v15216_v11 = vld [vmem:[%s18791_s8 + $0x48] sm:$0xff]   ;;  %v15217_v12 = vld [vmem:[%s18791_s8 + $0x50] sm:$0xff]   ;;  %v15218_v13 = vld [vmem:[%s18791_s8 + $0x58] sm:$0xff]   ;;  %s18775_s8 = smov 8  }
  0x1a   : > { %s15884_s28 = scalar_lea.vmem %s18792_s7, %s13380_s2  ;;  %v832_v21 = vld [vmem:[%s18793_s10] sm:$0xff]  ;;  %v833_v23 = vld [vmem:[%s18793_s10 + $0x8] sm:$0xff]  ;;  %v834_v30 = vld [vmem:[%s18793_s10 + $0x10] sm:$0xff]  ;;  %s18800_s7 = sld [smem:[#allocation14_spill]] }
  0x1b   : > { %964 = vmatpush1.bf16.msra.mxu0 %v15208_v2  ;;  %v15221_v5 = vld [vmem:[%s15884_s28 + $0x4] ss:$8 sps:$4 sm:$0xff]   ;;  %v15219_v14 = vld [vmem:[%s15884_s28] ss:$8 sps:$4 sm:$0xff]   ;;  %v15222_v15 = vld [vmem:[%s15884_s28 + $0x14] ss:$8 sps:$4 sm:$0xff]  }
  0x1c   : > { %965 = vmatprep.subr.bf16.mxu0 %v15716_v1  ;;  %12670 = vmatprep.mubr.msk.bf16.mxu0 %vm948_vm0, %v15221_v5  ;;  %v15224_v16 = vld [vmem:[%s15884_s28 + $0x10] ss:$8 sps:$4 sm:$0xff]   ;;  %v15225_v17 = vld [vmem:[%s15884_s28 + $0x24] ss:$8 sps:$4 sm:$0xff]   ;;  %v15227_v18 = vld [vmem:[%s15884_s28 + $0x20] ss:$8 sps:$4 sm:$0xff]  }
  0x1d   : > { %v15228_v19 = vld [vmem:[%s15884_s28 + $0x34] ss:$8 sps:$4 sm:$0xff]   ;;  %v15230_v20 = vld [vmem:[%s15884_s28 + $0x30] ss:$8 sps:$4 sm:$0xff]   ;;  %v836_v40 = vld [vmem:[%s18793_s10 + $0x20] sm:$0xff]  ;;  %s18773_s4 = smov 24  }
  0x1e   : > { %v835_v33 = vld [vmem:[%s18793_s10 + $0x18] sm:$0xff]  ;;  %v837_v43 = vld [vmem:[%s18793_s10 + $0x28] sm:$0xff]  ;;  %v838_v51 = vld [vmem:[%s18793_s10 + $0x30] sm:$0xff]  ;;  %s18803_s28 = smov 16  }
  0x1f   : > { %966 = vmatpush1.bf16.msra.mxu0 %v15209_v3  ;;  %v839_v53 = vld [vmem:[%s18793_s10 + $0x38] sm:$0xff]  ;;  %s12649_s10 = sshll.u32 %s18809_s3, 3 }
  0x20   : > { %967 = vmatprep.subr.bf16.mxu0 %v15716_v1 }
  0x23   : > { %968 = vmatpush1.bf16.msra.mxu0 %v15210_v4 }
  0x24   : > { %969 = vmatprep.subr.bf16.mxu0 %v15716_v1 }
  0x27   : > { %970 = vmatpush1.bf16.msra.mxu0 %v15211_v6 }
  0x28   : > { %971 = vmatprep.subr.bf16.mxu0 %v15716_v1 }
  0x2b   : > { %972 = vmatpush1.bf16.msra.mxu0 %v15212_v7 }
  0x2c   : > { %973 = vmatprep.subr.bf16.mxu0 %v15716_v1 }
  0x2f   : > { %974 = vmatpush1.bf16.msra.mxu0 %v15213_v8 }
  0x30   : > { %975 = vmatprep.subr.bf16.mxu0 %v15716_v1 }
  0x33   : > { %976 = vmatpush1.bf16.msra.mxu0 %v15214_v9 }
  0x34   : > { %977 = vmatprep.subr.bf16.mxu0 %v15716_v1 }
  0x37   : > { %978 = vmatpush1.bf16.msra.mxu0 %v15215_v10 }
  0x38   : > { %979 = vmatprep.subr.bf16.mxu0 %v15716_v1 }
  0x3b   : > { %980 = vmatpush1.bf16.msra.mxu0 %v15216_v11 }
  0x3c   : > { %981 = vmatprep.subr.bf16.mxu0 %v15716_v1 }
  0x3f   : > { %982 = vmatpush1.bf16.msra.mxu0 %v15217_v12 }
  0x40   : > { %983 = vmatprep.subr.bf16.mxu0 %v15716_v1 }
  0x43   : > { %984 = vmatpush1.bf16.msra.mxu0 %v15218_v13 }
  0x46   : > { %994 = vmatmul.mubr.bf16.vlgmr.msra.gmra.mrb[0].mxu0 %v15219_v14 }
  0x47   : > { %12671 = vmatprep.mubr.msk.bf16.mxu0 %vm948_vm0, %v15222_v15 }
  0x4e   : > { %1002 = vmatmul.mubr.bf16.gmra.mrb[4].mxu0 %v15224_v16 }
  0x4f   : > { %12672 = vmatprep.mubr.msk.bf16.mxu0 %vm948_vm0, %v15225_v17 }
  0x56   : > { %1010 = vmatmul.mubr.bf16.gmra.mrb[8].mxu0 %v15227_v18 }
  0x57   : > { %12673 = vmatprep.mubr.msk.bf16.mxu0 %vm948_vm0, %v15228_v19  ;;  %vm12586_vm0 = vcmask 31744  }
  0x5e   : > { %1018 = vmatmul.mubr.bf16.gmra.mrb[12].mxu0 %v15230_v20 }
 0x119   : > { %v995_v22 = vpop.f32.mrb[0].mxu0 }
 0x11a   : > { %v997_v24 = vpop.f32.mrb[1].mxu0  ;;  %v996_v25 = vadd.f32 %v995_v22, %v832_v21 }
 0x11b   : > { %v998_v26 = vpop.f32.mrb[2].mxu0 }
 0x11c   : > { %v1000_v27 = vpop.f32.mrb[3].mxu0  ;;  %v1029_v28 = vsel %vm1028_vm1, %v996_v25, 0.0  ;;  %v999_v29 = vadd.f32 %v998_v26, %v833_v23 }
 0x11d   : > { %1030 = vadd.xlane.f32.xlu0 %v1029_v28 }
 0x11e   : > { %v1032_v31 = vsel %vm1028_vm1, %v999_v29, 0.0 }
 0x121   : > { %v1003_v32 = vpop.f32.mrb[4].mxu0  ;;  %1033 = vadd.xlane.f32.xlu0 %v1032_v31 }
 0x122   : > { %v1005_v34 = vpop.f32.mrb[5].mxu0  ;;  %v1004_v35 = vadd.f32 %v1003_v32, %v834_v30 }
 0x123   : > { %v1006_v36 = vpop.f32.mrb[6].mxu0 }
 0x124   : > { %v1008_v37 = vpop.f32.mrb[7].mxu0  ;;  %v1035_v38 = vsel %vm1028_vm1, %v1004_v35, 0.0  ;;  %v1007_v39 = vadd.f32 %v1006_v36, %v835_v33 }
 0x125   : > { %1036 = vadd.xlane.f32.xlu1 %v1035_v38 }
 0x126   : > { %v1038_v41 = vsel %vm1028_vm1, %v1007_v39, 0.0 }
 0x129   : > { %v1011_v42 = vpop.f32.mrb[8].mxu0  ;;  %1039 = vadd.xlane.f32.xlu1 %v1038_v41 }
 0x12a   : > { %v1013_v44 = vpop.f32.mrb[9].mxu0  ;;  %v1012_v45 = vadd.f32 %v1011_v42, %v836_v40 }
 0x12b   : > { %v1014_v46 = vpop.f32.mrb[10].mxu0 }
 0x12c   : > { %v1016_v47 = vpop.f32.mrb[11].mxu0  ;;  %v1041_v48 = vsel %vm1028_vm1, %v1012_v45, 0.0  ;;  %v1015_v49 = vadd.f32 %v1014_v46, %v837_v43 }
 0x12d   : > { %1042 = vadd.xlane.f32.xlu0 %v1041_v48 }
 0x12e   : > { %v1044_v50 = vsel %vm1028_vm1, %v1015_v49, 0.0 }
 0x12f   : > { %1045 = vadd.xlane.f32.xlu1 %v1044_v50  ;;  %v12674_v50 = vld [vmem:[%s18794_s0] ss:$0 sm:$0xff]  ;;  %s18797_s0 = sld [smem:[#allocation13_spill]] }
 0x131   : > { %v1019_v52 = vpop.f32.mrb[12].mxu0 }
 0x132   : > { %v1021_v54 = vpop.f32.mrb[13].mxu0  ;;  %v1020_v55 = vadd.f32 %v1019_v52, %v838_v51 }
 0x133   : > { %v1022_v56 = vpop.f32.mrb[14].mxu0  ;;  %v12675_v54 = vld [vmem:[%s18795_s30] ss:$0 sm:$0xff]  ;;  %s18798_s30 = sld [smem:[#allocation9_spill]] }
 0x134   : > { %v1024_v57 = vpop.f32.mrb[15].mxu0  ;;  %v1047_v58 = vsel %vm1028_vm1, %v1020_v55, 0.0  ;;  %v1023_v59 = vadd.f32 %v1022_v56, %v839_v53 }
 0x135   : > { %1048 = vadd.xlane.f32.xlu0 %v1047_v58 }
 0x136   : > { %v1050_v60 = vsel %vm1028_vm1, %v1023_v59, 0.0 }
 0x137   : > { %1051 = vadd.xlane.f32.xlu1 %v1050_v60 }
 0x1aa   : > { %v1031_v61 = vpop.xlane.xlu0 %1030 }
 0x1ab   : > { %v1054_v62 = vmul.f32 0.03125, %v1031_v61 }
 0x1ad   : > { %v15954_v63 = vsub.f32 %v996_v25, %v1054_v62 }
 0x1ae   : > { %v1034_v0 = vpop.xlane.xlu0 %1033 }
 0x1af   : > { %v1055_v1 = vmul.f32 0.03125, %v1034_v0  ;;  %v1070_v2 = vmul.f32 %v15954_v63, %v15954_v63 }
 0x1b1   : > { %v15958_v3 = vsub.f32 %v999_v29, %v1055_v1  ;;  %v1078_v4 = vsel %vm1028_vm1, %v1070_v2, 0.0 }
 0x1b2   : > { %v1037_v5 = vpop.xlane.xlu1 %1036  ;;  %1079 = vadd.xlane.f32.xlu0 %v1078_v4 }
 0x1b3   : > { %v1056_v6 = vmul.f32 0.03125, %v1037_v5  ;;  %v1071_v7 = vmul.f32 %v15958_v3, %v15958_v3 }
 0x1b5   : > { %v15963_v8 = vsub.f32 %v1004_v35, %v1056_v6  ;;  %v1081_v9 = vsel %vm1028_vm1, %v1071_v7, 0.0 }
 0x1b6   : > { %v1040_v10 = vpop.xlane.xlu1 %1039  ;;  %1082 = vadd.xlane.f32.xlu1 %v1081_v9 }
 0x1b7   : > { %v1057_v11 = vmul.f32 0.03125, %v1040_v10  ;;  %v1072_v12 = vmul.f32 %v15963_v8, %v15963_v8 }
 0x1b9   : > { %v15968_v13 = vsub.f32 %v1007_v39, %v1057_v11  ;;  %v1084_v14 = vsel %vm1028_vm1, %v1072_v12, 0.0 }
 0x1ba   : > { %1085 = vadd.xlane.f32.xlu0 %v1084_v14  ;;  %v1043_v15 = vpop.xlane.xlu0 %1042 }
 0x1bb   : > { %v1058_v16 = vmul.f32 0.03125, %v1043_v15  ;;  %v1073_v17 = vmul.f32 %v15968_v13, %v15968_v13 }
 0x1bc   : > { %v1046_v18 = vpop.xlane.xlu1 %1045 }
 0x1bd   : > { %v15973_v19 = vsub.f32 %v1012_v45, %v1058_v16  ;;  %v1059_v20 = vmul.f32 0.03125, %v1046_v18  ;;  %v1087_v21 = vsel %vm1028_vm1, %v1073_v17, 0.0 }
 0x1be   : > { %1088 = vadd.xlane.f32.xlu1 %v1087_v21 }
 0x1bf   : > { %v15976_v22 = vsub.f32 %v1015_v49, %v1059_v20  ;;  %v1074_v23 = vmul.f32 %v15973_v19, %v15973_v19 }
 0x1c1   : > { %v1090_v24 = vsel %vm1028_vm1, %v1074_v23, 0.0  ;;  %v1075_v25 = vmul.f32 %v15976_v22, %v15976_v22 }
 0x1c2   : > { %1091 = vadd.xlane.f32.xlu0 %v1090_v24  ;;  %v1049_v26 = vpop.xlane.xlu0 %1048 }
 0x1c3   : > { %v1060_v27 = vmul.f32 0.03125, %v1049_v26  ;;  %v1093_v28 = vsel %vm1028_vm1, %v1075_v25, 0.0 }
 0x1c4   : > { %v1052_v29 = vpop.xlane.xlu1 %1051  ;;  %1094 = vadd.xlane.f32.xlu1 %v1093_v28 }
 0x1c5   : > { %v15984_v30 = vsub.f32 %v1020_v55, %v1060_v27  ;;  %v1061_v31 = vmul.f32 0.03125, %v1052_v29 }
 0x1c7   : > { %v15986_v32 = vsub.f32 %v1023_v59, %v1061_v31  ;;  %v1076_v33 = vmul.f32 %v15984_v30, %v15984_v30 }
 0x1c9   : > { %v1096_v34 = vsel %vm1028_vm1, %v1076_v33, 0.0  ;;  %v1077_v35 = vmul.f32 %v15986_v32, %v15986_v32 }
 0x1ca   : > { %1097 = vadd.xlane.f32.xlu0 %v1096_v34 }
 0x1cb   : > { %v1099_v36 = vsel %vm1028_vm1, %v1077_v35, 0.0 }
 0x1cc   : > { %1100 = vadd.xlane.f32.xlu1 %v1099_v36 }
 0x23f   : > { %v1080_v37 = vpop.xlane.xlu0 %1079 }
 0x240   : > { %v1102_v38 = vmul.f32 0.03125, %v1080_v37 }
 0x242   : > { %v1110_v39 = vadd.f32 1e-05, %v1102_v38 }
 0x243   : > { %v1083_v40 = vpop.xlane.xlu1 %1082 }
 0x244   : > { %15306 = vrsqrt.f32 %v1110_v39  ;;  %v1103_v41 = vmul.f32 0.03125, %v1083_v40 }
 0x246   : > { %v1111_v42 = vadd.f32 1e-05, %v1103_v41 }
 0x247   : > { %v1086_v43 = vpop.xlane.xlu0 %1085 }
 0x248   : > { %15308 = vrsqrt.f32 %v1111_v42  ;;  %v1104_v44 = vmul.f32 0.03125, %v1086_v43 }
 0x24a   : > { %v1112_v45 = vadd.f32 1e-05, %v1104_v44 }
 0x24b   : > { %v1089_v46 = vpop.xlane.xlu1 %1088 }
 0x24c   : > { %15310 = vrsqrt.f32 %v1112_v45  ;;  %v1105_v47 = vmul.f32 0.03125, %v1089_v46 }
 0x24e   : > { %v15307_v48 = vpop.eup %15306  ;;  %v1113_v49 = vadd.f32 1e-05, %v1105_v47 }
 0x24f   : > { %v1092_v51 = vpop.xlane.xlu0 %1091  ;;  %v1126_v52 = vmul.f32 %v15307_v48, %v15954_v63 }
 0x250   : > { %15312 = vrsqrt.f32 %v1113_v49  ;;  %v1106_v53 = vmul.f32 0.03125, %v1092_v51 }
 0x251   : > { %v1095_v55 = vpop.xlane.xlu1 %1094  ;;  %v1140_v56 = vmul.f32 %v12674_v50, %v1126_v52 }
 0x252   : > { %v15309_v57 = vpop.eup %15308  ;;  %v1114_v58 = vadd.f32 1e-05, %v1106_v53  ;;  %v1107_v59 = vmul.f32 0.03125, %v1095_v55 }
 0x253   : > { %v16001_v60 = vadd.f32 %v12675_v54, %v1140_v56  ;;  %v1127_v61 = vmul.f32 %v15309_v57, %v15958_v3 }
 0x254   : > { %15314 = vrsqrt.f32 %v1114_v58  ;;  %v1115_v62 = vadd.f32 1e-05, %v1107_v59 }
 0x255   : > { %v1164_v63 = vsel %vm1028_vm1, %v16001_v60, 0.0  ;;  %v1141_v0 = vmul.f32 %v12674_v50, %v1127_v61 }
 0x256   : > { %v15311_v1 = vpop.eup %15310  ;;  %15316 = vrsqrt.f32 %v1115_v62  ;;  %1165 = vadd.xlane.f32.xlu0 %v1164_v63 }
 0x257   : > { %v1098_v2 = vpop.xlane.xlu0 %1097  ;;  %v16006_v4 = vadd.f32 %v12675_v54, %v1141_v0  ;;  %v1128_v5 = vmul.f32 %v15311_v1, %v15963_v8 }
 0x258   : > { %v1108_v6 = vmul.f32 0.03125, %v1098_v2 }
 0x259   : > { %v1101_v7 = vpop.xlane.xlu1 %1100  ;;  %v1167_v9 = vsel %vm1028_vm1, %v16006_v4, 0.0  ;;  %v1142_v3 = vmul.f32 %v12674_v50, %v1128_v5 }
 0x25a   : > { %v15313_v10 = vpop.eup %15312  ;;  %v1116_v11 = vadd.f32 1e-05, %v1108_v6  ;;  %v1109_v12 = vmul.f32 0.03125, %v1101_v7  ;;  %1168 = vadd.xlane.f32.xlu1 %v1167_v9 }
 0x25b   : > { %v16011_v14 = vadd.f32 %v12675_v54, %v1142_v3  ;;  %v1129_v15 = vmul.f32 %v15313_v10, %v15968_v13 }
 0x25c   : > { %15318 = vrsqrt.f32 %v1116_v11  ;;  %v1117_v16 = vadd.f32 1e-05, %v1109_v12 }
 0x25d   : > { %v1170_v17 = vsel %vm1028_vm1, %v16011_v14, 0.0  ;;  %v1143_v8 = vmul.f32 %v12674_v50, %v1129_v15 }
 0x25e   : > { %v15315_v18 = vpop.eup %15314  ;;  %15320 = vrsqrt.f32 %v1117_v16  ;;  %1171 = vadd.xlane.f32.xlu0 %v1170_v17 }
 0x25f   : > { %v16016_v20 = vadd.f32 %v12675_v54, %v1143_v8  ;;  %v1130_v21 = vmul.f32 %v15315_v18, %v15973_v19 }
 0x260   : > { %v15317_v23 = vpop.eup %15316 }
 0x261   : > { %v1173_v24 = vsel %vm1028_vm1, %v16016_v20, 0.0  ;;  %v1144_v25 = vmul.f32 %v12674_v50, %v1130_v21  ;;  %v1131_v13 = vmul.f32 %v15317_v23, %v15976_v22  ;;  %v15231_v21 = vld [vmem:[%s18796_s6] sm:$0xff]   ;;  %v15232_v23 = vld [vmem:[%s18796_s6 + $0x8] sm:$0xff]  }
 0x262   : > { %1174 = vadd.xlane.f32.xlu1 %v1173_v24  ;;  %14026 = vmatprep.subr.bf16.mxu1 %v15231_v21  ;;  %v16097_v24 = vld [vmem:[%s18797_s0] sm:$0xff]  }
 0x263   : > { %v16022_v26 = vadd.f32 %v12675_v54, %v1144_v25  ;;  %v1145_v27 = vmul.f32 %v12674_v50, %v1131_v13  ;;  %14027 = vmatpush3.bf16.msra.mxu1 %v15231_v21 }
 0x264   : > { %14028 = vmatprep.subr.bf16.mxu1 %v15232_v23 }
 0x265   : > { %v1176_v28 = vsel %vm1028_vm1, %v16022_v26, 0.0  ;;  %v16026_v29 = vadd.f32 %v12675_v54, %v1145_v27 }
 0x266   : > { %v15319_v31 = vpop.eup %15318  ;;  %1177 = vadd.xlane.f32.xlu0 %v1176_v28 }
 0x267   : > { %v1179_v19 = vsel %vm1028_vm1, %v16026_v29, 0.0  ;;  %v1132_v33 = vmul.f32 %v15319_v31, %v15984_v30  ;;  %14029 = vmatpush3.bf16.msra.mxu1 %v15232_v23 }
 0x268   : > { %v15321_v34 = vpop.eup %15320  ;;  %1180 = vadd.xlane.f32.xlu1 %v1179_v19  ;;  %14038 = vmatprep.subr.bf16.mxu1 %v16097_v24 }
 0x269   : > { %v1146_v35 = vmul.f32 %v12674_v50, %v1132_v33  ;;  %v1133_v22 = vmul.f32 %v15321_v34, %v15986_v32 }
 0x26b   : > { %v16032_v36 = vadd.f32 %v12675_v54, %v1146_v35  ;;  %v1147_v37 = vmul.f32 %v12674_v50, %v1133_v22 }
 0x26d   : > { %v1182_v38 = vsel %vm1028_vm1, %v16032_v36, 0.0  ;;  %v16036_v39 = vadd.f32 %v12675_v54, %v1147_v37 }
 0x26e   : > { %1183 = vadd.xlane.f32.xlu0 %v1182_v38 }
 0x26f   : > { %v1185_v40 = vsel %vm1028_vm1, %v16036_v39, 0.0 }
 0x270   : > { %1186 = vadd.xlane.f32.xlu1 %v1185_v40 }
 0x2e3   : > { %v1166_v41 = vpop.xlane.xlu0 %1165 }
 0x2e4   : > { %v1188_v30 = vmul.f32 0.03125, %v1166_v41 }
 0x2e6   : > { %v16041_v42 = vsub.f32 %v16001_v60, %v1188_v30 }
 0x2e7   : > { %v1169_v43 = vpop.xlane.xlu1 %1168 }
 0x2e8   : > { %v1189_v32 = vmul.f32 0.03125, %v1169_v43  ;;  %v1204_v44 = vmul.f32 %v16041_v42, %v16041_v42  ;;  %v12676_v43 = vld [vmem:[%s18798_s30] ss:$0 sm:$0xff] }
 0x2ea   : > { %v16046_v45 = vsub.f32 %v16006_v4, %v1189_v32  ;;  %v1212_v46 = vsel %vm1028_vm1, %v1204_v44, 0.0 }
 0x2eb   : > { %1213 = vadd.xlane.f32.xlu0 %v1212_v46  ;;  %v1172_v47 = vpop.xlane.xlu0 %1171 }
 0x2ec   : > { %v1190_v48 = vmul.f32 0.03125, %v1172_v47  ;;  %v1205_v49 = vmul.f32 %v16046_v45, %v16046_v45 }
 0x2ee   : > { %v16052_v50 = vsub.f32 %v16011_v14, %v1190_v48  ;;  %v1215_v51 = vsel %vm1028_vm1, %v1205_v49, 0.0 }
 0x2ef   : > { %1216 = vadd.xlane.f32.xlu1 %v1215_v51  ;;  %v1175_v52 = vpop.xlane.xlu1 %1174 }
 0x2f0   : > { %v1191_v53 = vmul.f32 0.03125, %v1175_v52  ;;  %v1206_v54 = vmul.f32 %v16052_v50, %v16052_v50  ;;  %v12677_v52 = vld [vmem:[%s18799_s1] ss:$0 sm:$0xff] }
 0x2f2   : > { %v16058_v55 = vsub.f32 %v16016_v20, %v1191_v53  ;;  %v1218_v56 = vsel %vm1028_vm1, %v1206_v54, 0.0 }
 0x2f3   : > { %1219 = vadd.xlane.f32.xlu0 %v1218_v56  ;;  %v1178_v57 = vpop.xlane.xlu0 %1177 }
 0x2f4   : > { %v1192_v58 = vmul.f32 0.03125, %v1178_v57  ;;  %v1207_v59 = vmul.f32 %v16058_v55, %v16058_v55 }
 0x2f5   : > { %v1181_v61 = vpop.xlane.xlu1 %1180 }
 0x2f6   : > { %v16064_v62 = vsub.f32 %v16022_v26, %v1192_v58  ;;  %v1193_v63 = vmul.f32 0.03125, %v1181_v61  ;;  %v1221_v0 = vsel %vm1028_vm1, %v1207_v59, 0.0 }
 0x2f7   : > { %1222 = vadd.xlane.f32.xlu1 %v1221_v0 }
 0x2f8   : > { %v16068_v1 = vsub.f32 %v16026_v29, %v1193_v63  ;;  %v1208_v2 = vmul.f32 %v16064_v62, %v16064_v62 }
 0x2fa   : > { %v1224_v5 = vsel %vm1028_vm1, %v1208_v2, 0.0  ;;  %v1209_v6 = vmul.f32 %v16068_v1, %v16068_v1 }
 0x2fb   : > { %1225 = vadd.xlane.f32.xlu0 %v1224_v5  ;;  %v1184_v7 = vpop.xlane.xlu0 %1183 }
 0x2fc   : > { %v1194_v9 = vmul.f32 0.03125, %v1184_v7  ;;  %v1227_v3 = vsel %vm1028_vm1, %v1209_v6, 0.0 }
 0x2fd   : > { %1228 = vadd.xlane.f32.xlu1 %v1227_v3  ;;  %v1187_v10 = vpop.xlane.xlu1 %1186 }
 0x2fe   : > { %v16077_v11 = vsub.f32 %v16032_v36, %v1194_v9  ;;  %v1195_v12 = vmul.f32 0.03125, %v1187_v10 }
 0x300   : > { %v16080_v15 = vsub.f32 %v16036_v39, %v1195_v12  ;;  %v1210_v16 = vmul.f32 %v16077_v11, %v16077_v11 }
 0x302   : > { %v1230_v17 = vsel %vm1028_vm1, %v1210_v16, 0.0  ;;  %v1211_v8 = vmul.f32 %v16080_v15, %v16080_v15 }
 0x303   : > { %1231 = vadd.xlane.f32.xlu0 %v1230_v17 }
 0x304   : > { %v1233_v18 = vsel %vm1028_vm1, %v1211_v8, 0.0 }
 0x305   : > { %1234 = vadd.xlane.f32.xlu1 %v1233_v18 }
 0x378   : > { %v1214_v25 = vpop.xlane.xlu0 %1213 }
 0x379   : > { %v1236_v13 = vmul.f32 0.03125, %v1214_v25 }
 0x37b   : > { %v1244_v27 = vadd.f32 1e-05, %v1236_v13 }
 0x37c   : > { %v1217_v28 = vpop.xlane.xlu1 %1216 }
 0x37d   : > { %15322 = vrsqrt.f32 %v1244_v27  ;;  %v1237_v31 = vmul.f32 0.03125, %v1217_v28 }
 0x37f   : > { %v1245_v19 = vadd.f32 1e-05, %v1237_v31 }
 0x380   : > { %v1220_v33 = vpop.xlane.xlu0 %1219 }
 0x381   : > { %15324 = vrsqrt.f32 %v1245_v19  ;;  %v1238_v34 = vmul.f32 0.03125, %v1220_v33 }
 0x383   : > { %v1246_v35 = vadd.f32 1e-05, %v1238_v34 }
 0x384   : > { %v1223_v22 = vpop.xlane.xlu1 %1222 }
 0x385   : > { %15326 = vrsqrt.f32 %v1246_v35  ;;  %v1239_v37 = vmul.f32 0.03125, %v1223_v22 }
 0x387   : > { %v15323_v38 = vpop.eup %15322  ;;  %v1247_v40 = vadd.f32 1e-05, %v1239_v37 }
 0x388   : > { %v1260_v41 = vmul.f32 %v15323_v38, %v16041_v42  ;;  %v1226_v30 = vpop.xlane.xlu0 %1225 }
 0x389   : > { %15328 = vrsqrt.f32 %v1247_v40  ;;  %v1240_v32 = vmul.f32 0.03125, %v1226_v30 }
 0x38a   : > { %v1229_v44 = vpop.xlane.xlu1 %1228  ;;  %v1274_v49 = vmul.f32 %v12676_v43, %v1260_v41 }
 0x38b   : > { %v15325_v46 = vpop.eup %15324  ;;  %v1248_v47 = vadd.f32 1e-05, %v1240_v32  ;;  %v1241_v48 = vmul.f32 0.03125, %v1229_v44 }
 0x38c   : > { %v1261_v51 = vmul.f32 %v15325_v46, %v16046_v45  ;;  %v1288_v56 = vadd.f32 %v12677_v52, %v1274_v49  ;;  %v16173_v46 = vld [vmem:[%s18800_s7] ss:$0 sm:$0xff] }
 0x38d   : > { %15330 = vrsqrt.f32 %v1248_v47  ;;  %v1249_v42 = vadd.f32 1e-05, %v1241_v48 }
 0x38e   : > { %v1275_v53 = vmul.f32 %v12676_v43, %v1261_v51 }
 0x38f   : > { %v15327_v54 = vpop.eup %15326  ;;  %15332 = vrsqrt.f32 %v1249_v42 }
 0x390   : > { %v1289_v57 = vadd.f32 %v12677_v52, %v1275_v53  ;;  %v1262_v58 = vmul.f32 %v15327_v54, %v16052_v50  ;;  %v1232_v59 = vpop.xlane.xlu0 %1231  ;;  %v16180_v54 = vld [vmem:[%s18801_s9] ss:$0 sm:$0xff] }
 0x391   : > { %v1242_v61 = vmul.f32 0.03125, %v1232_v59 }
 0x392   : > { %v16109_v63 = vpack.c.bf16 %v1289_v57, %v1288_v56  ;;  %v1235_v0 = vpop.xlane.xlu1 %1234  ;;  %v1276_v6 = vmul.f32 %v12676_v43, %v1262_v58 }
 0x393   : > { %v15329_v2 = vpop.eup %15328  ;;  %v1250_v45 = vadd.f32 1e-05, %v1242_v61  ;;  %v1243_v5 = vmul.f32 0.03125, %v1235_v0 }
 0x394   : > { %v1263_v7 = vmul.f32 %v15329_v2, %v16058_v55  ;;  %14030 = vmatprep.mubr.msk.bf16.mxu1 %vm1028_vm1, %v16109_v63  ;;  %v1290_v50 = vadd.f32 %v12677_v52, %v1276_v6  ;;  %v15234_v55 = vld [vmem:[%s18797_s0 + $0x8] sm:$0xff]  }
 0x395   : > { %15334 = vrsqrt.f32 %v1250_v45  ;;  %v1251_v9 = vadd.f32 1e-05, %v1243_v5 }
 0x396   : > { %v1277_v3 = vmul.f32 %v12676_v43, %v1263_v7 }
 0x397   : > { %v15331_v10 = vpop.eup %15330  ;;  %15336 = vrsqrt.f32 %v1251_v9 }
 0x398   : > { %v1291_v12 = vadd.f32 %v12677_v52, %v1277_v3  ;;  %v1264_v16 = vmul.f32 %v15331_v10, %v16064_v62  ;;  %v15235_v62 = vld [vmem:[%s18746_s11] sm:$0xff]  }
 0x399   : > { %v15333_v17 = vpop.eup %15332 }
 0x39a   : > { %v16115_v8 = vpack.c.bf16 %v1291_v12, %v1290_v50  ;;  %v1278_v18 = vmul.f32 %v12676_v43, %v1264_v16  ;;  %v1265_v21 = vmul.f32 %v15333_v17, %v16068_v1  ;;  %v16198_v17 = vld [vmem:[%s18747_s12] ss:$0 sm:$0xff] }
 0x39c   : > { %v1279_v23 = vmul.f32 %v12676_v43, %v1265_v21  ;;  %14031 = vmatmul.mubr.msk.bf16.vlgmr.msra.gmra.mrb[0].mxu1 %vm1028_vm1, %v16115_v8  ;;  %v1292_v25 = vadd.f32 %v12677_v52, %v1278_v18 }
 0x39d   : > { %14039 = vmatpush3.bf16.msra.mxu1 %v16097_v24 }
 0x39e   : > { %v1293_v13 = vadd.f32 %v12677_v52, %v1279_v23  ;;  %14040 = vmatprep.subr.bf16.mxu1 %v15234_v55 }
 0x39f   : > { %v15335_v27 = vpop.eup %15334 }
 0x3a0   : > { %v16127_v28 = vpack.c.bf16 %v1293_v13, %v1292_v25  ;;  %v1266_v1 = vmul.f32 %v15335_v27, %v16077_v11  ;;  %v15236_v11 = vld [vmem:[%s18746_s11 + $0x8] sm:$0xff]  }
 0x3a1   : > { %v15337_v31 = vpop.eup %15336  ;;  %14041 = vmatpush3.bf16.msra.mxu1 %v15234_v55 }
 0x3a2   : > { %v1280_v19 = vmul.f32 %v12676_v43, %v1266_v1  ;;  %v1267_v33 = vmul.f32 %v15337_v31, %v16080_v15  ;;  %14034 = vmatprep.mubr.msk.bf16.mxu1 %vm1028_vm1, %v16127_v28  ;;  %14050 = vmatprep.subr.bf16.mxu1 %v15235_v62  ;;  %v15717_v15 = vmov 0.0  }
 0x3a3   : > { %14080 = vmatprep.subr.bf16.mxu0 %v15717_v15  ;;  %14082 = vmatprep.mubr.msk.bf16.mxu0 %vm15718_vm2, %v15717_v15 }
 0x3a4   : > { %v1281_v24 = vmul.f32 %v12676_v43, %v1267_v33  ;;  %v1294_v34 = vadd.f32 %v12677_v52, %v1280_v19 }
 0x3a6   : > { %v1295_v35 = vadd.f32 %v12677_v52, %v1281_v24 }
 0x3a8   : > { %v16133_v22 = vpack.c.bf16 %v1295_v35, %v1294_v34 }
 0x3aa   : > { %14035 = vmatmul.mubr.msk.bf16.gmra.mrb[4].mxu1 %vm1028_vm1, %v16133_v22 }
 0x3ab   : > { %14042 = vmatprep.mubr.msk.bf16.mxu1 %vm1028_vm1, %v16109_v63 }
 0x3b2   : > { %14043 = vmatmul.mubr.msk.bf16.vlgmr.msra.gmra.mrb[8].mxu1 %vm1028_vm1, %v16115_v8 }
 0x3b3   : > { %14046 = vmatprep.mubr.msk.bf16.mxu1 %vm1028_vm1, %v16127_v28  ;;  %14051 = vmatpush3.bf16.msra.mxu1 %v15235_v62 }
 0x3b4   : > { %14052 = vmatprep.subr.bf16.mxu1 %v15236_v11 }
 0x3b7   : > { %14053 = vmatpush3.bf16.msra.mxu1 %v15236_v11 }
 0x3b8   : > { %14062 = vmatprep.subr.bf16.mxu1 %v15717_v15 }
 0x3ba   : > { %14047 = vmatmul.mubr.msk.bf16.gmra.mrb[12].mxu1 %vm1028_vm1, %v16133_v22 }
 0x3bb   : > { %14054 = vmatprep.mubr.msk.bf16.mxu1 %vm1028_vm1, %v16109_v63 }
 0x3c2   : > { %14055 = vmatmul.mubr.msk.bf16.vlgmr.msra.gmra.mrb[16].mxu1 %vm1028_vm1, %v16115_v8 }
 0x3c3   : > { %14058 = vmatprep.mubr.msk.bf16.mxu1 %vm1028_vm1, %v16127_v28 }
 0x3ca   : > { %14059 = vmatmul.mubr.msk.bf16.gmra.mrb[20].mxu1 %vm1028_vm1, %v16133_v22 }
 0x3cb   : > { %14064 = vmatprep.mubr.msk.bf16.mxu1 %vm15718_vm2, %v15717_v15 }
 0x46f   : > { %v16162_v37 = vpop.f32.mrb[0].mxu1 }
 0x470   : > { %v1369_v38 = vpop.f32.mrb[1].mxu1 }
 0x471   : > { %v14033_v40 = vpop.f32.mrb[2].mxu1  ;;  %v1370_v61 = vadd.f32 %v16180_v54, %v1369_v38  ;;  %v1378_v38 = vadd.f32 %v16162_v37, %v16180_v54 }
 0x472   : > { %v1372_v41 = vpop.f32.mrb[3].mxu1  ;;  %v1381_v2 = vadd.f32 %v14033_v40, %v16180_v54 }
 0x473   : > { %v13381_v9 = vpack.c.bf16 %v1370_v61, %v1370_v61  ;;  %v1373_v18 = vadd.f32 %v16180_v54, %v1372_v41 }
 0x474   : > { %v13384_v10 = vpack.c.bf16 %v1381_v2, %v1381_v2 }
 0x475   : > { %v13382_v33 = vpack.c.bf16 %v1373_v18, %v1373_v18 }
 0x47d   : > { %v16164_v30 = vpop.f32.mrb[4].mxu1 }
 0x47e   : > { %v16166_v43 = vpop.f32.mrb[5].mxu1 }
 0x47f   : > { %v16168_v32 = vpop.f32.mrb[6].mxu1  ;;  %v1386_v2 = vadd.f32 %v16180_v54, %v16166_v43 }
 0x480   : > { %v1388_v44 = vpop.f32.mrb[7].mxu1  ;;  %v1397_v37 = vadd.f32 %v16168_v32, %v16180_v54 }
 0x481   : > { %v1389_v62 = vadd.f32 %v16180_v54, %v1388_v44 }
 0x483   : > { %v13386_v34 = vpack.c.bf16 %v1389_v62, %v1389_v62 }
 0x485   : > { %v14044_v47 = vpop.f32.mrb[8].mxu1 }
 0x486   : > { %v1461_v48 = vpop.f32.mrb[9].mxu1  ;;  %v1470_v50 = vadd.f32 %v14044_v47, %v16173_v46 }
 0x487   : > { %v1462_v49 = vadd.f32 %v16173_v46, %v1461_v48  ;;  %v14045_v51 = vpop.f32.mrb[10].mxu1 }
 0x488   : > { %v1473_v52 = vadd.f32 %v14045_v51, %v16173_v46  ;;  %v1464_v42 = vpop.f32.mrb[11].mxu1  ;;  %v13391_v27 = vpack.c.bf16 %v1470_v50, %v1470_v50 }
 0x489   : > { %v13389_v53 = vpack.c.bf16 %v1462_v49, %v1462_v49  ;;  %v1465_v57 = vadd.f32 %v16173_v46, %v1464_v42 }
 0x48a   : > { %v13392_v56 = vpack.c.bf16 %v1473_v52, %v1473_v52  ;;  %v1745_v11 = vsel %vm1648_vm3, %v13391_v27, 0 }
 0x48b   : > { %v1653_v58 = vsel %vm1648_vm3, %v13389_v53, 0  ;;  %v13390_v5 = vpack.c.bf16 %v1465_v57, %v1465_v57 }
 0x48c   : > { %14063 = vmatpush3.bf16.xpose.msra.mxu1 %v1653_v58  ;;  %v1791_v59 = vsel %vm1648_vm3, %v13392_v56, 0  ;;  %v13383_v56 = vpack.c.bf16 %v1378_v38, %v1378_v38 }
 0x48d   : > { %v16186_v0 = vpop.f32.mrb[12].mxu1  ;;  %14081 = vmatpush3.bf16.xpose.msra.mxu0 %v1791_v59  ;;  %14068 = vmatprep.subr.bf16.mxu1 %v15717_v15  ;;  %v1699_v16 = vsel %vm1648_vm3, %v13390_v5, 0  ;;  %v13388_v59 = vpack.c.bf16 %v1397_v37, %v1397_v37 }
 0x48e   : > { %v1477_v45 = vpop.f32.mrb[13].mxu1  ;;  %14092 = vmatprep.subr.bf16.mxu0 %v15717_v15  ;;  %v1486_v32 = vadd.f32 %v16186_v0, %v16173_v46  ;;  %v13385_v0 = vpack.c.bf16 %v1386_v2, %v1386_v2 }
 0x48f   : > { %v14049_v6 = vpop.f32.mrb[14].mxu1  ;;  %v1478_v35 = vadd.f32 %v16173_v46, %v1477_v45 }
 0x490   : > { %v1480_v7 = vpop.f32.mrb[15].mxu1  ;;  %v1489_v21 = vadd.f32 %v14049_v6, %v16173_v46  ;;  %v1394_v6 = vadd.f32 %v16164_v30, %v16180_v54 }
 0x491   : > { %v1481_v3 = vadd.f32 %v16173_v46, %v1480_v7  ;;  %v13393_v49 = vpack.c.bf16 %v1478_v35, %v1478_v35  ;;  %v13395_v46 = vpack.c.bf16 %v1486_v32, %v1486_v32 }
 0x492   : > { %v13396_v24 = vpack.c.bf16 %v1489_v21, %v1489_v21 }
 0x493   : > { %v13394_v12 = vpack.c.bf16 %v1481_v3, %v1481_v3  ;;  %14065 = vmatmul.mubr.msk.bf16.vlgmr.msra.gmra.mrb[24].mxu1 %vm1648_vm3, %v13381_v9  ;;  %v1837_v61 = vsel %vm1648_vm3, %v13393_v49, 0  ;;  %v1929_v43 = vsel %vm1648_vm3, %v13395_v46, 0  ;;  %v13387_v9 = vpack.c.bf16 %v1394_v6, %v1394_v6 }
 0x494   : > { %14069 = vmatpush3.bf16.xpose.msra.mxu1 %v1699_v16  ;;  %14083 = vmatmul.mubr.msk.bf16.vlgmr.msra.gmra.mrb[16].mxu0 %vm1648_vm3, %v13384_v10  ;;  %v1975_v44 = vsel %vm1648_vm3, %v13396_v24, 0  ;;  %v796_v10 = vlaneseq  ;;  %v15719_v16 = vmov -1e+30  }
 0x495   : > { %v14056_v55 = vpop.f32.mrb[16].mxu1  ;;  %v1883_v23 = vsel %vm1648_vm3, %v13394_v12, 0  ;;  %14070 = vmatprep.mubr.msk.bf16.mxu1 %vm15718_vm2, %v15717_v15  ;;  %14074 = vmatprep.subr.bf16.mxu1 %v15717_v15 }
 0x496   : > { %v16208_v25 = vadd.f32 %v14056_v55, %v16198_v17  ;;  %v1553_v13 = vpop.f32.mrb[17].mxu1  ;;  %14093 = vmatpush3.bf16.xpose.msra.mxu0 %v1883_v23  ;;  %14094 = vmatprep.mubr.msk.bf16.mxu0 %vm15718_vm2, %v15717_v15  ;;  %v797_v50 = vand.u32 127, %v796_v10 }
 0x497   : > { %v14057_v1 = vpop.f32.mrb[18].mxu1  ;;  %14104 = vmatprep.subr.bf16.mxu0 %v15717_v15  ;;  %v1554_v5 = vadd.f32 %v16198_v17, %v1553_v13 }
 0x498   : > { %v16215_v31 = vadd.f32 %v14057_v1, %v16198_v17  ;;  %v1556_v19 = vpop.f32.mrb[19].mxu1  ;;  %vm798_vm5 = vcmp.lt.s32.totalorder %v797_v50, 5 }
 0x499   : > { %v1557_v40 = vadd.f32 %v16198_v17, %v1556_v19  ;;  %v13397_v7 = vpack.c.bf16 %v1554_v5, %v1554_v5  ;;  %v16272_v30 = vsel %vm798_vm5, 0.0, %v15719_v16 }
 0x49b   : > { %14071 = vmatmul.mubr.msk.bf16.vlgmr.msra.gmra.mrb[28].mxu1 %vm1648_vm3, %v13382_v33  ;;  %v13398_v57 = vpack.c.bf16 %v1557_v40, %v1557_v40  ;;  %v2134_v3 = vsel %vm2132_vm4, %v13397_v7, 0 }
 0x49c   : > { %14075 = vmatpush3.bf16.xpose.msra.mxu1 %v1745_v11  ;;  %14076 = vmatprep.mubr.msk.bf16.mxu1 %vm15718_vm2, %v15717_v15 }
 0x49d   : > { %v14060_v41 = vpop.f32.mrb[20].mxu1  ;;  %14095 = vmatmul.mubr.msk.bf16.vlgmr.msra.gmra.mrb[20].mxu0 %vm1648_vm3, %v13386_v34  ;;  %14086 = vmatprep.subr.bf16.mxu1 %v15717_v15  ;;  %v2180_v45 = vsel %vm2132_vm4, %v13398_v57, 0 }
 0x49e   : > { %v16229_v47 = vadd.f32 %v14060_v41, %v16198_v17  ;;  %v1569_v48 = vpop.f32.mrb[21].mxu1  ;;  %14105 = vmatpush3.bf16.xpose.msra.mxu0 %v1975_v44  ;;  %14106 = vmatprep.mubr.msk.bf16.mxu0 %vm15718_vm2, %v15717_v15 }
 0x49f   : > { %v16236_v51 = vadd.f32 %v16198_v17, %v1569_v48  ;;  %v14061_v52 = vpop.f32.mrb[22].mxu1  ;;  %14116 = vmatprep.subr.bf16.mxu0 %v15717_v15 }
 0x4a0   : > { %v16240_v42 = vadd.f32 %v14061_v52, %v16198_v17  ;;  %v1572_v53 = vpop.f32.mrb[23].mxu1 }
 0x4a1   : > { %v16243_v58 = vadd.f32 %v16198_v17, %v1572_v53 }
 0x4a3   : > { %14077 = vmatmul.mubr.msk.bf16.vlgmr.msra.gmra.mrb[32].mxu1 %vm1648_vm3, %v13383_v56 }
 0x4a4   : > { %14087 = vmatpush3.bf16.xpose.msra.mxu1 %v1837_v61  ;;  %14088 = vmatprep.mubr.msk.bf16.mxu1 %vm15718_vm2, %v15717_v15 }
 0x4a5   : > { %14107 = vmatmul.mubr.msk.bf16.vlgmr.msra.gmra.mrb[24].mxu0 %vm1648_vm3, %v13388_v59  ;;  %14098 = vmatprep.subr.bf16.mxu1 %v15717_v15 }
 0x4a6   : > { %14117 = vmatpush3.bf16.msra.mxu0 %v2180_v45  ;;  %14118 = vmatprep.mubr.msk.bf16.mxu0 %vm15718_vm2, %v15717_v15 }
 0x4a7   : > { %14128 = vmatprep.subr.bf16.mxu0 %v15717_v15 }
 0x4ab   : > { %14089 = vmatmul.mubr.msk.bf16.vlgmr.msra.gmra.mrb[36].mxu1 %vm1648_vm3, %v13385_v0 }
 0x4ac   : > { %14099 = vmatpush3.bf16.xpose.msra.mxu1 %v1929_v43  ;;  %14100 = vmatprep.mubr.msk.bf16.mxu1 %vm15718_vm2, %v15717_v15 }
 0x4ad   : > { %14110 = vmatprep.subr.bf16.mxu1 %v15717_v15 }
 0x4b3   : > { %14101 = vmatmul.mubr.msk.bf16.vlgmr.msra.gmra.mrb[40].mxu1 %vm1648_vm3, %v13387_v9 }
 0x4b4   : > { %14111 = vmatpush3.bf16.msra.mxu1 %v2134_v3  ;;  %14112 = vmatprep.mubr.msk.bf16.mxu1 %vm15718_vm2, %v15717_v15 }
 0x4b5   : > { %14122 = vmatprep.subr.bf16.mxu1 %v15717_v15 }
 0x566   : > { %v1689_v12 = vpop.f32.mrb[24].mxu1 }
 0x567   : > { %v2017_v54 = vmul.f32 0.35355338, %v1689_v12  ;;  %v14066_v17 = vpop.f32.mrb[25].mxu1  ;;  %v1827_v18 = vpop.f32.mrb[16].mxu0 }
 0x568   : > { %v1692_v21 = vpop.f32.mrb[26].mxu1  ;;  %v14084_v55 = vpop.f32.mrb[17].mxu0  ;;  %v2020_v33 = vmul.f32 0.35355338, %v1827_v18 }
 0x569   : > { %v14067_v23 = vpop.f32.mrb[27].mxu1  ;;  %v1830_v13 = vpop.f32.mrb[18].mxu0  ;;  %v2025_v62 = vadd.f32 %v2017_v54, %v16272_v30 }
 0x56a   : > { %v14085_v27 = vpop.f32.mrb[19].mxu0  ;;  %v2028_v52 = vadd.f32 %v2020_v33, %v16272_v30 }
 0x56b   : > { %v2033_v1 = vsel %vm1648_vm3, %v2025_v62, -inf }
 0x56c   : > { %2034 = vmax.xlane.f32.xlu1 %v2033_v1  ;;  %v2042_v59 = vsel %vm1648_vm3, %v2028_v52, -inf }
 0x56e   : > { %v1735_v19 = vpop.f32.mrb[28].mxu1 }
 0x56f   : > { %v2018_v24 = vmul.f32 0.35355338, %v1735_v19  ;;  %v14072_v34 = vpop.f32.mrb[29].mxu1 }
 0x570   : > { %v1738_v35 = vpop.f32.mrb[30].mxu1  ;;  %v1919_v11 = vpop.f32.mrb[20].mxu0 }
 0x571   : > { %v14073_v38 = vpop.f32.mrb[31].mxu1  ;;  %v14096_v40 = vpop.f32.mrb[21].mxu0  ;;  %v2026_v41 = vadd.f32 %v2018_v24, %v16272_v30  ;;  %v2022_v48 = vmul.f32 0.35355338, %v1919_v11 }
 0x572   : > { %v1922_v44 = vpop.f32.mrb[22].mxu0 }
 0x573   : > { %v14097_v37 = vpop.f32.mrb[23].mxu0  ;;  %v2036_v49 = vsel %vm1648_vm3, %v2026_v41, -inf  ;;  %v2030_v32 = vadd.f32 %v2022_v48, %v16272_v30 }
 0x574   : > { %2037 = vmax.xlane.f32.xlu0 %v2036_v49 }
 0x575   : > { %v2048_v9 = vsel %vm1648_vm3, %v2030_v32, -inf }
 0x576   : > { %v1781_v53 = vpop.f32.mrb[32].mxu1 }
 0x577   : > { %v2019_v56 = vmul.f32 0.35355338, %v1781_v53  ;;  %v14078_v57 = vpop.f32.mrb[33].mxu1 }
 0x578   : > { %2043 = vmax.xlane.f32.xlu0 %v2042_v59  ;;  %v1784_v61 = vpop.f32.mrb[34].mxu1  ;;  %v2011_v2 = vpop.f32.mrb[24].mxu0 }
 0x579   : > { %v2024_v45 = vmul.f32 0.35355338, %v2011_v2  ;;  %v14079_v46 = vpop.f32.mrb[35].mxu1  ;;  %v14108_v0 = vpop.f32.mrb[25].mxu0  ;;  %v2027_v5 = vadd.f32 %v2019_v56, %v16272_v30 }
 0x57a   : > { %v2014_v43 = vpop.f32.mrb[26].mxu0 }
 0x57b   : > { %v14109_v6 = vpop.f32.mrb[27].mxu0  ;;  %v2039_v7 = vsel %vm1648_vm3, %v2027_v5, -inf  ;;  %v2032_v3 = vadd.f32 %v2024_v45, %v16272_v30 }
 0x57c   : > { %2040 = vmax.xlane.f32.xlu1 %v2039_v7  ;;  %2049 = vmax.xlane.f32.xlu0 %v2048_v9 }
 0x57d   : > { %v2054_v16 = vsel %vm1648_vm3, %v2032_v3, -inf }
 0x57e   : > { %v1873_v10 = vpop.f32.mrb[36].mxu1 }
 0x57f   : > { %v2021_v50 = vmul.f32 0.35355338, %v1873_v10  ;;  %v14090_v12 = vpop.f32.mrb[37].mxu1 }
 0x580   : > { %2055 = vmax.xlane.f32.xlu0 %v2054_v16  ;;  %v1876_v54 = vpop.f32.mrb[38].mxu1 }
 0x581   : > { %v14091_v17 = vpop.f32.mrb[39].mxu1  ;;  %v2029_v18 = vadd.f32 %v2021_v50, %v16272_v30 }
 0x583   : > { %v2045_v21 = vsel %vm1648_vm3, %v2029_v18, -inf }
 0x584   : > { %2046 = vmax.xlane.f32.xlu1 %v2045_v21 }
 0x586   : > { %v1965_v55 = vpop.f32.mrb[40].mxu1 }
 0x587   : > { %v2023_v23 = vmul.f32 0.35355338, %v1965_v55  ;;  %v14102_v13 = vpop.f32.mrb[41].mxu1 }
 0x588   : > { %v1968_v27 = vpop.f32.mrb[42].mxu1 }
 0x589   : > { %v14103_v1 = vpop.f32.mrb[43].mxu1  ;;  %v2031_v19 = vadd.f32 %v2023_v23, %v16272_v30 }
 0x58b   : > { %v2051_v33 = vsel %vm1648_vm3, %v2031_v19, -inf }
 0x58c   : > { %2052 = vmax.xlane.f32.xlu1 %v2051_v33  ;;  %v13399_v33 = vpack.c.bf16 %v16208_v25, %v16208_v25  ;;  %v13400_v25 = vpack.c.bf16 %v16215_v31, %v16215_v31  ;;  %v13401_v31 = vpack.c.bf16 %v16236_v51, %v16236_v51 }
 0x5f9   : > { %v2035_v24 = vpop.xlane.xlu1 %2034 }
 0x5fa   : > { %v2057_v34 = vsub.f32 %v2025_v62, %v2035_v24 }
 0x5fc   : > { %v2065_v35 = vmul.f32 1.442695, %v2057_v34 }
 0x5fe   : > { %15338 = vpow2.f32 %v2065_v35 }
 0x601   : > { %v2038_v11 = vpop.xlane.xlu0 %2037 }
 0x602   : > { %v2058_v38 = vsub.f32 %v2026_v41, %v2038_v11  ;;  %v2226_v11 = vsel %vm2132_vm4, %v13399_v33, 0 }
 0x604   : > { %v2067_v40 = vmul.f32 1.442695, %v2058_v38 }
 0x605   : > { %v2044_v44 = vpop.xlane.xlu0 %2043 }
 0x606   : > { %15340 = vpow2.f32 %v2067_v40  ;;  %v2060_v48 = vsub.f32 %v2028_v52, %v2044_v44 }
 0x608   : > { %v15339_v37 = vpop.eup %15338  ;;  %v2071_v49 = vmul.f32 1.442695, %v2060_v48 }
 0x609   : > { %v2041_v53 = vpop.xlane.xlu1 %2040  ;;  %v2050_v56 = vpop.xlane.xlu0 %2049  ;;  %v2081_v57 = vsel %vm1648_vm3, %v15339_v37, 0.0 }
 0x60a   : > { %15342 = vpow2.f32 %v2071_v49  ;;  %v2059_v59 = vsub.f32 %v2027_v5, %v2041_v53  ;;  %v2062_v61 = vsub.f32 %v2030_v32, %v2050_v56  ;;  %2082 = vadd.xlane.f32.xlu1 %v2081_v57  ;;  %v2272_v53 = vsel %vm2132_vm4, %v13400_v25, 0 }
 0x60c   : > { %v2069_v2 = vmul.f32 1.442695, %v2059_v59  ;;  %v2075_v62 = vmul.f32 1.442695, %v2062_v61 }
 0x60d   : > { %v2056_v45 = vpop.xlane.xlu0 %2055 }
 0x60e   : > { %15344 = vpow2.f32 %v2069_v2  ;;  %v2064_v46 = vsub.f32 %v2032_v3, %v2056_v45  ;;  %v13402_v2 = vpack.c.bf16 %v16243_v58, %v16243_v58 }
 0x60f   : > { %15346 = vpow2.f32 %v2075_v62 }
 0x610   : > { %v15341_v41 = vpop.eup %15340  ;;  %v2079_v0 = vmul.f32 1.442695, %v2064_v46 }
 0x611   : > { %v2047_v43 = vpop.xlane.xlu1 %2046  ;;  %v2084_v52 = vsel %vm1648_vm3, %v15341_v41, 0.0 }
 0x612   : > { %15348 = vpow2.f32 %v2079_v0  ;;  %v2061_v6 = vsub.f32 %v2029_v18, %v2047_v43  ;;  %2085 = vadd.xlane.f32.xlu0 %v2084_v52  ;;  %v2318_v0 = vsel %vm2132_vm4, %v13401_v31, 0  ;;  %v2364_v43 = vsel %vm2132_vm4, %v13402_v2, 0 }
 0x614   : > { %v15343_v7 = vpop.eup %15342  ;;  %v2073_v9 = vmul.f32 1.442695, %v2061_v6  ;;  %v13403_v6 = vpack.c.bf16 %v16229_v47, %v16229_v47 }
 0x615   : > { %v2090_v5 = vsel %vm1648_vm3, %v15343_v7, 0.0 }
 0x616   : > { %15350 = vpow2.f32 %v2073_v9  ;;  %2091 = vadd.xlane.f32.xlu0 %v2090_v5  ;;  %v2410_v47 = vsel %vm2132_vm4, %v13403_v6, 0 }
 0x618   : > { %v15345_v32 = vpop.eup %15344 }
 0x619   : > { %v16293_v10 = vpop.eup %15346  ;;  %v2053_v50 = vpop.xlane.xlu1 %2052  ;;  %v2087_v3 = vsel %vm1648_vm3, %v15345_v32, 0.0 }
 0x61a   : > { %v2063_v12 = vsub.f32 %v2031_v19, %v2053_v50  ;;  %v2096_v16 = vsel %vm1648_vm3, %v16293_v10, 0.0  ;;  %2088 = vadd.xlane.f32.xlu1 %v2087_v3  ;;  %v15238_v3 = vld [vmem:[%s18797_s0 + $0x10] sm:$0xff]  }
 0x61b   : > { %2097 = vadd.xlane.f32.xlu0 %v2096_v16 }
 0x61c   : > { %v16298_v54 = vpop.eup %15348  ;;  %v2077_v17 = vmul.f32 1.442695, %v2063_v12 }
 0x61d   : > { %v2102_v18 = vsel %vm1648_vm3, %v16298_v54, 0.0 }
 0x61e   : > { %15352 = vpow2.f32 %v2077_v17 }
 0x61f   : > { %2103 = vadd.xlane.f32.xlu0 %v2102_v18 }
 0x620   : > { %v16302_v21 = vpop.eup %15350 }
 0x621   : > { %v2093_v55 = vsel %vm1648_vm3, %v16302_v21, 0.0 }
 0x622   : > { %2094 = vadd.xlane.f32.xlu1 %v2093_v55  ;;  %v15239_v55 = vld [vmem:[%s18796_s6 + $0x18] sm:$0xff]  }
 0x628   : > { %v16306_v23 = vpop.eup %15352 }
 0x629   : > { %v2099_v13 = vsel %vm1648_vm3, %v16306_v23, 0.0 }
 0x62a   : > { %2100 = vadd.xlane.f32.xlu1 %v2099_v13  ;;  %v15240_v13 = vld [vmem:[%s18797_s0 + $0x18] sm:$0xff]  }
 0x697   : > { %v2083_v27 = vpop.xlane.xlu1 %2082 }
 0x698   : > { %15354 = vrcp.f32 %v2083_v27 }
 0x69f   : > { %v2086_v1 = vpop.xlane.xlu0 %2085 }
 0x6a0   : > { %15356 = vrcp.f32 %v2086_v1 }
 0x6a2   : > { %v15355_v19 = vpop.eup %15354 }
 0x6a3   : > { %v2092_v24 = vpop.xlane.xlu0 %2091  ;;  %v2113_v34 = vmul.f32 %v15355_v19, %v15339_v37 }
 0x6a4   : > { %15358 = vrcp.f32 %v2092_v24 }
 0x6a5   : > { %v2121_v35 = vpack.c.bf16 %v2113_v34, %v2113_v34 }
 0x6a7   : > { %14113 = vmatmul.mubr.msk.bf16.vlgmr.msra.gmra.mrb[44].mxu1 %vm1648_vm3, %v2121_v35  ;;  %v2089_v38 = vpop.xlane.xlu1 %2088 }
 0x6a8   : > { %14123 = vmatpush3.bf16.msra.mxu1 %v2226_v11  ;;  %15360 = vrcp.f32 %v2089_v38  ;;  %14124 = vmatprep.mubr.msk.bf16.mxu1 %vm15718_vm2, %v15717_v15  ;;  %v2098_v40 = vpop.xlane.xlu0 %2097 }
 0x6a9   : > { %14134 = vmatprep.subr.bf16.mxu1 %v15717_v15  ;;  %15362 = vrcp.f32 %v2098_v40 }
 0x6aa   : > { %v15357_v44 = vpop.eup %15356 }
 0x6ab   : > { %v2114_v48 = vmul.f32 %v15357_v44, %v15341_v41 }
 0x6ac   : > { %v2104_v57 = vpop.xlane.xlu0 %2103 }
 0x6ad   : > { %v2122_v37 = vpack.c.bf16 %v2114_v48, %v2114_v48 }
 0x6ae   : > { %v15359_v49 = vpop.eup %15358 }
 0x6af   : > { %14119 = vmatmul.mubr.msk.bf16.vlgmr.msra.gmra.mrb[28].mxu0 %vm1648_vm3, %v2122_v37  ;;  %v2095_v56 = vpop.xlane.xlu1 %2094  ;;  %v2116_v59 = vmul.f32 %v15359_v49, %v15343_v7  ;;  %v13404_v7 = vpack.c.bf16 %v16240_v42, %v16240_v42 }
 0x6b0   : > { %14129 = vmatpush3.bf16.msra.mxu0 %v2272_v53  ;;  %15364 = vrcp.f32 %v2095_v56  ;;  %14130 = vmatprep.mubr.msk.bf16.mxu0 %vm15718_vm2, %v15717_v15 }
 0x6b1   : > { %14140 = vmatprep.subr.bf16.mxu0 %v15717_v15  ;;  %15366 = vrcp.f32 %v2104_v57  ;;  %v2124_v46 = vpack.c.bf16 %v2116_v59, %v2116_v59  ;;  %v2456_v42 = vsel %vm2132_vm4, %v13404_v7, 0  ;;  %v16415_v7 = vld [vmem:[%s18800_s7 + $0x1] ss:$0 sm:$0xff] }
 0x6b2   : > { %v15361_v61 = vpop.eup %15360 }
 0x6b3   : > { %v2115_v62 = vmul.f32 %v15361_v61, %v15345_v32  ;;  %v15363_v41 = vpop.eup %15362 }
 0x6b4   : > { %v2118_v51 = vmul.f32 %v15363_v41, %v16293_v10  ;;  %v15237_v10 = vld [vmem:[%s18796_s6 + $0x10] sm:$0xff]  }
 0x6b5   : > { %v2123_v45 = vpack.c.bf16 %v2115_v62, %v2115_v62 }
 0x6b6   : > { %v2126_v32 = vpack.c.bf16 %v2118_v51, %v2118_v51 }
 0x6b7   : > { %14125 = vmatmul.mubr.msk.bf16.vlgmr.msra.gmra.mrb[48].mxu1 %vm1648_vm3, %v2123_v45  ;;  %14131 = vmatmul.mubr.msk.bf16.vlgmr.msra.gmra.mrb[32].mxu0 %vm1648_vm3, %v2124_v46  ;;  %v2101_v52 = vpop.xlane.xlu1 %2100 }
 0x6b8   : > { %14135 = vmatpush3.bf16.msra.mxu1 %v2318_v0  ;;  %14141 = vmatpush3.bf16.msra.mxu0 %v2364_v43  ;;  %15368 = vrcp.f32 %v2101_v52 }
 0x6b9   : > { %14136 = vmatprep.mubr.msk.bf16.mxu1 %vm15718_vm2, %v15717_v15  ;;  %14142 = vmatprep.mubr.msk.bf16.mxu0 %vm15718_vm2, %v15717_v15 }
 0x6ba   : > { %v15365_v58 = vpop.eup %15364  ;;  %14146 = vmatprep.subr.bf16.mxu1 %v15717_v15  ;;  %14152 = vmatprep.subr.bf16.mxu0 %v15717_v15 }
 0x6bb   : > { %v2117_v9 = vmul.f32 %v15365_v58, %v16302_v21  ;;  %v15367_v50 = vpop.eup %15366 }
 0x6bc   : > { %v2120_v12 = vmul.f32 %v15367_v50, %v16298_v54  ;;  %v15241_v54 = vld [vmem:[%s18746_s11 + $0x10] sm:$0xff]  }
 0x6bd   : > { %v2125_v5 = vpack.c.bf16 %v2117_v9, %v2117_v9 }
 0x6be   : > { %v2128_v21 = vpack.c.bf16 %v2120_v12, %v2120_v12 }
 0x6bf   : > { %14137 = vmatmul.mubr.msk.bf16.vlgmr.msra.gmra.mrb[52].mxu1 %vm1648_vm3, %v2125_v5  ;;  %14143 = vmatmul.mubr.msk.bf16.vlgmr.msra.gmra.mrb[36].mxu0 %vm1648_vm3, %v2126_v32 }
 0x6c0   : > { %14147 = vmatpush3.bf16.msra.mxu1 %v2410_v47  ;;  %14153 = vmatpush3.bf16.msra.mxu0 %v2456_v42 }
 0x6c1   : > { %14148 = vmatprep.mubr.msk.bf16.mxu1 %vm15718_vm2, %v15717_v15  ;;  %14154 = vmatprep.mubr.msk.bf16.mxu0 %vm15718_vm2, %v15717_v15 }
 0x6c2   : > { %v15369_v16 = vpop.eup %15368  ;;  %14158 = vmatprep.subr.bf16.mxu1 %v15237_v10  ;;  %14170 = vmatprep.subr.bf16.mxu0 %v15238_v3 }
 0x6c3   : > { %v2119_v17 = vmul.f32 %v15369_v16, %v16306_v23  ;;  %v15242_v23 = vld [vmem:[%s18746_s11 + $0x18] sm:$0xff]  }
 0x6c5   : > { %v2127_v18 = vpack.c.bf16 %v2119_v17, %v2119_v17 }
 0x6c7   : > { %14149 = vmatmul.mubr.msk.bf16.vlgmr.msra.gmra.mrb[56].mxu1 %vm1648_vm3, %v2127_v18  ;;  %14155 = vmatmul.mubr.msk.bf16.vlgmr.msra.gmra.mrb[40].mxu0 %vm1648_vm3, %v2128_v21  ;;  %v16424_v18 = vld [vmem:[%s18801_s9 + $0x1] ss:$0 sm:$0xff] }
 0x6c8   : > { %14159 = vmatpush3.bf16.msra.mxu1 %v15237_v10  ;;  %14162 = vmatprep.mubr.msk.bf16.mxu1 %vm1028_vm1, %v16109_v63 }
 0x6c9   : > { %14171 = vmatpush3.bf16.msra.mxu0 %v15238_v3  ;;  %14174 = vmatprep.mubr.msk.bf16.mxu0 %vm1028_vm1, %v16109_v63 }
 0x6ca   : > { %14160 = vmatprep.subr.bf16.mxu1 %v15239_v55  ;;  %14172 = vmatprep.subr.bf16.mxu0 %v15240_v13 }
 0x6cc   : > { %14161 = vmatpush3.bf16.msra.mxu1 %v15239_v55 }
 0x6cd   : > { %14173 = vmatpush3.bf16.msra.mxu0 %v15240_v13  ;;  %14182 = vmatprep.subr.bf16.mxu1 %v15241_v54 }
 0x6ce   : > { %14194 = vmatprep.subr.bf16.mxu0 %v15717_v15 }
 0x6cf   : > { %14163 = vmatmul.mubr.msk.bf16.vlgmr.msra.gmra.mrb[60].mxu1 %vm1028_vm1, %v16115_v8 }
 0x6d0   : > { %14175 = vmatmul.mubr.msk.bf16.vlgmr.msra.gmra.mrb[44].mxu0 %vm1028_vm1, %v16115_v8  ;;  %14166 = vmatprep.mubr.msk.bf16.mxu1 %vm1028_vm1, %v16127_v28 }
 0x6d1   : > { %14178 = vmatprep.mubr.msk.bf16.mxu0 %vm1028_vm1, %v16127_v28  ;;  %14183 = vmatpush3.bf16.msra.mxu1 %v15241_v54 }
 0x6d2   : > { %14184 = vmatprep.subr.bf16.mxu1 %v15242_v23 }
 0x6d5   : > { %14185 = vmatpush3.bf16.msra.mxu1 %v15242_v23 }
 0x6d6   : > { %14206 = vmatprep.subr.bf16.mxu1 %v15717_v15 }
 0x6d7   : > { %14167 = vmatmul.mubr.msk.bf16.gmra.mrb[64].mxu1 %vm1028_vm1, %v16133_v22 }
 0x6d8   : > { %14179 = vmatmul.mubr.msk.bf16.gmra.mrb[48].mxu0 %vm1028_vm1, %v16133_v22  ;;  %14186 = vmatprep.mubr.msk.bf16.mxu1 %vm1028_vm1, %v16109_v63 }
 0x6d9   : > { %14196 = vmatprep.mubr.msk.bf16.mxu0 %vm15718_vm2, %v15717_v15 }
 0x6df   : > { %14187 = vmatmul.mubr.msk.bf16.vlgmr.msra.gmra.mrb[68].mxu1 %vm1028_vm1, %v16115_v8 }
 0x6e0   : > { %14190 = vmatprep.mubr.msk.bf16.mxu1 %vm1028_vm1, %v16127_v28 }
 0x6e7   : > { %14191 = vmatmul.mubr.msk.bf16.gmra.mrb[72].mxu1 %vm1028_vm1, %v16133_v22 }
 0x6e8   : > { %14208 = vmatprep.mubr.msk.bf16.mxu1 %vm15718_vm2, %v15717_v15 }
 0x77a   : > { %v2170_v27 = vpop.f32.mrb[44].mxu1 }
 0x77b   : > { %2498 = vst.msk [vmem:[#allocation2] sm:$0xff] %vm1648_vm3, %v2170_v27  ;;  %v14114_v1 = vpop.f32.mrb[45].mxu1 }
 0x77c   : > { %v2173_v19 = vpop.f32.mrb[46].mxu1 }
 0x77d   : > { %v14115_v33 = vpop.f32.mrb[47].mxu1 }
 0x782   : > { %v2216_v24 = vpop.f32.mrb[28].mxu0 }
 0x783   : > { %2499 = vst.msk [vmem:[#allocation2 + $0x8] sm:$0xff] %vm1648_vm3, %v2216_v24  ;;  %v14120_v34 = vpop.f32.mrb[29].mxu0 }
 0x784   : > { %v2219_v35 = vpop.f32.mrb[30].mxu0 }
 0x785   : > { %v14121_v11 = vpop.f32.mrb[31].mxu0 }
 0x78a   : > { %v2262_v38 = vpop.f32.mrb[48].mxu1  ;;  %v2308_v40 = vpop.f32.mrb[32].mxu0 }
 0x78b   : > { %2500 = vst.msk [vmem:[#allocation2 + $0x10] sm:$0xff] %vm1648_vm3, %v2262_v38  ;;  %2501 = vst.msk [vmem:[#allocation2 + $0x18] sm:$0xff] %vm1648_vm3, %v2308_v40  ;;  %v14126_v44 = vpop.f32.mrb[49].mxu1  ;;  %v14132_v25 = vpop.f32.mrb[33].mxu0 }
 0x78c   : > { %v2265_v48 = vpop.f32.mrb[50].mxu1  ;;  %v2311_v37 = vpop.f32.mrb[34].mxu0 }
 0x78d   : > { %v14127_v49 = vpop.f32.mrb[51].mxu1  ;;  %v14133_v53 = vpop.f32.mrb[35].mxu0 }
 0x78e   : > { %v16442_v49 = vld [vmem:[%s18747_s12 + $0x1] ss:$0 sm:$0xff] }
 0x792   : > { %v2354_v56 = vpop.f32.mrb[52].mxu1  ;;  %v2400_v57 = vpop.f32.mrb[36].mxu0 }
 0x793   : > { %2502 = vst.msk [vmem:[#allocation2 + $0x20] sm:$0xff] %vm1648_vm3, %v2354_v56  ;;  %2503 = vst.msk [vmem:[#allocation2 + $0x28] sm:$0xff] %vm1648_vm3, %v2400_v57  ;;  %v14138_v59 = vpop.f32.mrb[53].mxu1  ;;  %v14144_v61 = vpop.f32.mrb[37].mxu0 }
 0x794   : > { %v2357_v31 = vpop.f32.mrb[54].mxu1  ;;  %v2403_v2 = vpop.f32.mrb[38].mxu0 }
 0x795   : > { %v14139_v62 = vpop.f32.mrb[55].mxu1  ;;  %v14145_v45 = vpop.f32.mrb[39].mxu0 }
 0x79a   : > { %v2446_v46 = vpop.f32.mrb[56].mxu1  ;;  %v2492_v41 = vpop.f32.mrb[40].mxu0 }
 0x79b   : > { %2504 = vst.msk [vmem:[#allocation2 + $0x30] sm:$0xff] %vm1648_vm3, %v2446_v46  ;;  %2505 = vst.msk [vmem:[#allocation2 + $0x38] sm:$0xff] %vm1648_vm3, %v2492_v41  ;;  %v14150_v0 = vpop.f32.mrb[57].mxu1  ;;  %v14156_v43 = vpop.f32.mrb[41].mxu0 }
 0x79c   : > { %v2449_v52 = vpop.f32.mrb[58].mxu1  ;;  %v2495_v51 = vpop.f32.mrb[42].mxu0 }
 0x79d   : > { %v14151_v58 = vpop.f32.mrb[59].mxu1  ;;  %v14157_v6 = vpop.f32.mrb[43].mxu0 }
 0x7a2   : > { %v14164_v9 = vpop.f32.mrb[60].mxu1 }
 0x7a3   : > { %v14176_v5 = vpop.f32.mrb[44].mxu0  ;;  %v2565_v32 = vpop.f32.mrb[61].mxu1  ;;  %v2574_v23 = vadd.f32 %v14164_v9, %v16424_v18 }
 0x7a4   : > { %v2668_v50 = vadd.f32 %v14176_v5, %v16415_v7  ;;  %v2659_v10 = vpop.f32.mrb[45].mxu0  ;;  %v16418_v3 = vpop.f32.mrb[62].mxu1  ;;  %v2566_v1 = vadd.f32 %v16424_v18, %v2565_v32 }
 0x7a5   : > { %v2660_v47 = vadd.f32 %v16415_v7, %v2659_v10  ;;  %v14177_v42 = vpop.f32.mrb[46].mxu0  ;;  %v2568_v12 = vpop.f32.mrb[63].mxu1  ;;  %v13407_v44 = vpack.c.bf16 %v2574_v23, %v2574_v23  ;;  %v2577_v10 = vadd.f32 %v16418_v3, %v16424_v18 }
 0x7a6   : > { %v13415_v16 = vpack.c.bf16 %v2668_v50, %v2668_v50  ;;  %v2662_v17 = vpop.f32.mrb[47].mxu0  ;;  %v13405_v48 = vpack.c.bf16 %v2566_v1, %v2566_v1  ;;  %v2671_v53 = vadd.f32 %v14177_v42, %v16415_v7  ;;  %v2569_v31 = vadd.f32 %v16424_v18, %v2568_v12 }
 0x7a7   : > { %v13413_v21 = vpack.c.bf16 %v2660_v47, %v2660_v47  ;;  %v2663_v13 = vadd.f32 %v16415_v7, %v2662_v17  ;;  %v13408_v23 = vpack.c.bf16 %v2577_v10, %v2577_v10 }
 0x7a8   : > { %v2944_v55 = vsel %vm1648_vm3, %v13415_v16, 0  ;;  %v13416_v41 = vpack.c.bf16 %v2671_v53, %v2671_v53  ;;  %v13406_v51 = vpack.c.bf16 %v2569_v31, %v2569_v31 }
 0x7a9   : > { %14207 = vmatpush3.bf16.xpose.msra.mxu1 %v2944_v55  ;;  %v2852_v54 = vsel %vm1648_vm3, %v13413_v21, 0  ;;  %v13414_v35 = vpack.c.bf16 %v2663_v13, %v2663_v13 }
 0x7aa   : > { %14195 = vmatpush3.bf16.xpose.msra.mxu0 %v2852_v54  ;;  %v14168_v27 = vpop.f32.mrb[64].mxu1  ;;  %14218 = vmatprep.subr.bf16.mxu1 %v15717_v15  ;;  %v2990_v5 = vsel %vm1648_vm3, %v13416_v41, 0 }
 0x7ab   : > { %v14180_v19 = vpop.f32.mrb[48].mxu0  ;;  %v2581_v33 = vpop.f32.mrb[65].mxu1  ;;  %14200 = vmatprep.subr.bf16.mxu0 %v15717_v15  ;;  %v2898_v57 = vsel %vm1648_vm3, %v13414_v35, 0  ;;  %v2590_v47 = vadd.f32 %v14168_v27, %v16424_v18 }
 0x7ac   : > { %v2675_v24 = vpop.f32.mrb[49].mxu0  ;;  %v16433_v34 = vpop.f32.mrb[66].mxu1  ;;  %v2684_v56 = vadd.f32 %v14180_v19, %v16415_v7  ;;  %v2582_v2 = vadd.f32 %v16424_v18, %v2581_v33 }
 0x7ad   : > { %v2676_v11 = vadd.f32 %v16415_v7, %v2675_v24  ;;  %v14181_v38 = vpop.f32.mrb[50].mxu0  ;;  %v16436_v40 = vpop.f32.mrb[67].mxu1  ;;  %v13411_v27 = vpack.c.bf16 %v2590_v47, %v2590_v47 }
 0x7ae   : > { %v2678_v25 = vpop.f32.mrb[51].mxu0  ;;  %v13419_v0 = vpack.c.bf16 %v2684_v56, %v2684_v56  ;;  %v13409_v58 = vpack.c.bf16 %v2582_v2, %v2582_v2  ;;  %v2687_v1 = vadd.f32 %v14181_v38, %v16415_v7  ;;  %v2585_v24 = vadd.f32 %v16424_v18, %v16436_v40 }
 0x7af   : > { %v13417_v37 = vpack.c.bf16 %v2676_v11, %v2676_v11  ;;  %v2679_v6 = vadd.f32 %v16415_v7, %v2678_v25  ;;  %v2593_v40 = vadd.f32 %v16433_v34, %v16424_v18 }
 0x7b0   : > { %14209 = vmatmul.mubr.msk.bf16.vlgmr.msra.gmra.mrb[76].mxu1 %vm1648_vm3, %v13407_v44  ;;  %v3128_v32 = vsel %vm1648_vm3, %v13419_v0, 0  ;;  %v13420_v7 = vpack.c.bf16 %v2687_v1, %v2687_v1  ;;  %v13410_v35 = vpack.c.bf16 %v2585_v24, %v2585_v24 }
 0x7b1   : > { %14197 = vmatmul.mubr.msk.bf16.vlgmr.msra.gmra.mrb[52].mxu0 %vm1648_vm3, %v13405_v48  ;;  %v3036_v59 = vsel %vm1648_vm3, %v13417_v37, 0  ;;  %14220 = vmatprep.mubr.msk.bf16.mxu1 %vm15718_vm2, %v15717_v15  ;;  %v13418_v3 = vpack.c.bf16 %v2679_v6, %v2679_v6  ;;  %v13412_v25 = vpack.c.bf16 %v2593_v40, %v2593_v40 }
 0x7b2   : > { %14201 = vmatpush3.bf16.xpose.msra.mxu0 %v2898_v57  ;;  %14219 = vmatpush3.bf16.xpose.msra.mxu1 %v3036_v59  ;;  %v14188_v61 = vpop.f32.mrb[68].mxu1  ;;  %v3174_v38 = vsel %vm1648_vm3, %v13420_v7, 0 }
 0x7b3   : > { %v16454_v62 = vadd.f32 %v14188_v61, %v16442_v49  ;;  %v2753_v45 = vpop.f32.mrb[69].mxu1  ;;  %14202 = vmatprep.mubr.msk.bf16.mxu0 %vm15718_vm2, %v15717_v15  ;;  %14212 = vmatprep.subr.bf16.mxu0 %v15717_v15  ;;  %v3082_v19 = vsel %vm1648_vm3, %v13418_v3, 0 }
 0x7b4   : > { %v14189_v46 = vpop.f32.mrb[70].mxu1  ;;  %14230 = vmatprep.subr.bf16.mxu1 %v15717_v15  ;;  %v2754_v9 = vadd.f32 %v16442_v49, %v2753_v45 }
 0x7b5   : > { %v16461_v43 = vadd.f32 %v14189_v46, %v16442_v49  ;;  %v2756_v52 = vpop.f32.mrb[71].mxu1 }
 0x7b6   : > { %v13421_v21 = vpack.c.bf16 %v2754_v9, %v2754_v9  ;;  %v2757_v11 = vadd.f32 %v16442_v49, %v2756_v52 }
 0x7b8   : > { %v3332_v33 = vsel %vm2132_vm4, %v13421_v21, 0  ;;  %v13422_v44 = vpack.c.bf16 %v2757_v11, %v2757_v11 }
 0x7b9   : > { %14203 = vmatmul.mubr.msk.bf16.vlgmr.msra.gmra.mrb[56].mxu0 %vm1648_vm3, %v13406_v51  ;;  %14221 = vmatmul.mubr.msk.bf16.vlgmr.msra.gmra.mrb[80].mxu1 %vm1648_vm3, %v13409_v58 }
 0x7ba   : > { %14213 = vmatpush3.bf16.xpose.msra.mxu0 %v2990_v5  ;;  %14231 = vmatpush3.bf16.xpose.msra.mxu1 %v3128_v32  ;;  %v14192_v50 = vpop.f32.mrb[72].mxu1  ;;  %v3378_v48 = vsel %vm2132_vm4, %v13422_v44, 0 }
 0x7bb   : > { %v16473_v42 = vadd.f32 %v14192_v50, %v16442_v49  ;;  %v2769_v12 = vpop.f32.mrb[73].mxu1  ;;  %14214 = vmatprep.mubr.msk.bf16.mxu0 %vm15718_vm2, %v15717_v15  ;;  %14232 = vmatprep.mubr.msk.bf16.mxu1 %vm15718_vm2, %v15717_v15 }
 0x7bc   : > { %v16480_v16 = vadd.f32 %v16442_v49, %v2769_v12  ;;  %v14193_v17 = vpop.f32.mrb[74].mxu1  ;;  %14224 = vmatprep.subr.bf16.mxu0 %v15717_v15  ;;  %14242 = vmatprep.subr.bf16.mxu1 %v15717_v15 }
 0x7bd   : > { %v16485_v55 = vadd.f32 %v14193_v17, %v16442_v49  ;;  %v2772_v13 = vpop.f32.mrb[75].mxu1 }
 0x7be   : > { %v16488_v54 = vadd.f32 %v16442_v49, %v2772_v13 }
 0x7c1   : > { %14215 = vmatmul.mubr.msk.bf16.vlgmr.msra.gmra.mrb[60].mxu0 %vm1648_vm3, %v13408_v23  ;;  %14233 = vmatmul.mubr.msk.bf16.vlgmr.msra.gmra.mrb[84].mxu1 %vm1648_vm3, %v13411_v27 }
 0x7c2   : > { %14225 = vmatpush3.bf16.xpose.msra.mxu0 %v3082_v19  ;;  %14243 = vmatpush3.bf16.msra.mxu1 %v3332_v33 }
 0x7c3   : > { %14226 = vmatprep.mubr.msk.bf16.mxu0 %vm15718_vm2, %v15717_v15  ;;  %14236 = vmatprep.subr.bf16.mxu0 %v15717_v15 }
 0x7c4   : > { %14244 = vmatprep.mubr.msk.bf16.mxu1 %vm15718_vm2, %v15717_v15  ;;  %14254 = vmatprep.subr.bf16.mxu1 %v15717_v15 }
 0x7c9   : > { %14227 = vmatmul.mubr.msk.bf16.vlgmr.msra.gmra.mrb[64].mxu0 %vm1648_vm3, %v13410_v35 }
 0x7ca   : > { %14237 = vmatpush3.bf16.xpose.msra.mxu0 %v3174_v38  ;;  %14238 = vmatprep.mubr.msk.bf16.mxu0 %vm15718_vm2, %v15717_v15 }
 0x7cb   : > { %14248 = vmatprep.subr.bf16.mxu0 %v15717_v15 }
 0x7d1   : > { %14239 = vmatmul.mubr.msk.bf16.vlgmr.msra.gmra.mrb[68].mxu0 %vm1648_vm3, %v13412_v25 }
 0x7d2   : > { %14249 = vmatpush3.bf16.msra.mxu0 %v3378_v48  ;;  %14250 = vmatprep.mubr.msk.bf16.mxu0 %vm15718_vm2, %v15717_v15 }
 0x7d3   : > { %14260 = vmatprep.subr.bf16.mxu0 %v15717_v15 }
 0x883   : > { %v2980_v37 = vpop.f32.mrb[76].mxu1 }
 0x884   : > { %v3218_v49 = vmul.f32 0.35355338, %v2980_v37  ;;  %v2888_v53 = vpop.f32.mrb[52].mxu0  ;;  %v14210_v56 = vpop.f32.mrb[77].mxu1 }
 0x885   : > { %v3216_v57 = vmul.f32 0.35355338, %v2888_v53  ;;  %v14198_v18 = vpop.f32.mrb[53].mxu0  ;;  %v2983_v34 = vpop.f32.mrb[78].mxu1 }
 0x886   : > { %v2891_v59 = vpop.f32.mrb[54].mxu0  ;;  %v14211_v61 = vpop.f32.mrb[79].mxu1  ;;  %v3226_v45 = vadd.f32 %v3218_v49, %v16272_v30 }
 0x887   : > { %v14199_v31 = vpop.f32.mrb[55].mxu0  ;;  %v3224_v2 = vadd.f32 %v3216_v57, %v16272_v30 }
 0x888   : > { %v3238_v52 = vsel %vm1648_vm3, %v3226_v45, -inf }
 0x889   : > { %v3232_v46 = vsel %vm1648_vm3, %v3224_v2, -inf }
 0x88a   : > { %3233 = vmax.xlane.f32.xlu1 %v3232_v46 }
 0x88c   : > { %v2934_v41 = vpop.f32.mrb[56].mxu0  ;;  %v3072_v0 = vpop.f32.mrb[80].mxu1 }
 0x88d   : > { %v3217_v51 = vmul.f32 0.35355338, %v2934_v41  ;;  %v3220_v58 = vmul.f32 0.35355338, %v3072_v0  ;;  %v14204_v6 = vpop.f32.mrb[57].mxu0  ;;  %v14222_v9 = vpop.f32.mrb[81].mxu1 }
 0x88e   : > { %v3075_v5 = vpop.f32.mrb[82].mxu1  ;;  %3239 = vmax.xlane.f32.xlu1 %v3238_v52  ;;  %v2937_v32 = vpop.f32.mrb[58].mxu0 }
 0x88f   : > { %v14205_v50 = vpop.f32.mrb[59].mxu0  ;;  %v14223_v10 = vpop.f32.mrb[83].mxu1  ;;  %v3228_v47 = vadd.f32 %v3220_v58, %v16272_v30  ;;  %v3225_v12 = vadd.f32 %v3217_v51, %v16272_v30 }
 0x891   : > { %v3244_v17 = vsel %vm1648_vm3, %v3228_v47, -inf  ;;  %v3235_v3 = vsel %vm1648_vm3, %v3225_v12, -inf }
 0x892   : > { %3245 = vmax.xlane.f32.xlu1 %v3244_v17  ;;  %3236 = vmax.xlane.f32.xlu0 %v3235_v3 }
 0x894   : > { %v3026_v21 = vpop.f32.mrb[60].mxu0  ;;  %v3164_v13 = vpop.f32.mrb[84].mxu1 }
 0x895   : > { %v3219_v23 = vmul.f32 0.35355338, %v3026_v21  ;;  %v3222_v27 = vmul.f32 0.35355338, %v3164_v13  ;;  %v14216_v1 = vpop.f32.mrb[61].mxu0  ;;  %v14234_v19 = vpop.f32.mrb[85].mxu1 }
 0x896   : > { %v3029_v33 = vpop.f32.mrb[62].mxu0  ;;  %v3167_v24 = vpop.f32.mrb[86].mxu1 }
 0x897   : > { %v14217_v7 = vpop.f32.mrb[63].mxu0  ;;  %v14235_v35 = vpop.f32.mrb[87].mxu1  ;;  %v3230_v11 = vadd.f32 %v3222_v27, %v16272_v30  ;;  %v3227_v38 = vadd.f32 %v3219_v23, %v16272_v30 }
 0x899   : > { %v3250_v40 = vsel %vm1648_vm3, %v3230_v11, -inf  ;;  %v3241_v44 = vsel %vm1648_vm3, %v3227_v38, -inf }
 0x89a   : > { %3251 = vmax.xlane.f32.xlu1 %v3250_v40  ;;  %3242 = vmax.xlane.f32.xlu0 %v3241_v44 }
 0x89c   : > { %v3118_v25 = vpop.f32.mrb[64].mxu0 }
 0x89d   : > { %v3221_v48 = vmul.f32 0.35355338, %v3118_v25  ;;  %v14228_v37 = vpop.f32.mrb[65].mxu0 }
 0x89e   : > { %v3121_v49 = vpop.f32.mrb[66].mxu0 }
 0x89f   : > { %v14229_v53 = vpop.f32.mrb[67].mxu0  ;;  %v3229_v56 = vadd.f32 %v3221_v48, %v16272_v30 }
 0x8a1   : > { %v3247_v57 = vsel %vm1648_vm3, %v3229_v56, -inf }
 0x8a2   : > { %3248 = vmax.xlane.f32.xlu0 %v3247_v57 }
 0x8a4   : > { %v3210_v18 = vpop.f32.mrb[68].mxu0 }
 0x8a5   : > { %v3223_v34 = vmul.f32 0.35355338, %v3210_v18  ;;  %v14240_v59 = vpop.f32.mrb[69].mxu0 }
 0x8a6   : > { %v3213_v61 = vpop.f32.mrb[70].mxu0 }
 0x8a7   : > { %v14241_v31 = vpop.f32.mrb[71].mxu0  ;;  %v3231_v46 = vadd.f32 %v3223_v34, %v16272_v30 }
 0x8a9   : > { %v3253_v41 = vsel %vm1648_vm3, %v3231_v46, -inf }
 0x8aa   : > { %3254 = vmax.xlane.f32.xlu0 %v3253_v41 }
 0x917   : > { %v3234_v0 = vpop.xlane.xlu1 %3233 }
 0x918   : > { %v3256_v52 = vsub.f32 %v3224_v2, %v3234_v0 }
 0x91a   : > { %v3264_v51 = vmul.f32 1.442695, %v3256_v52  ;;  %v13423_v52 = vpack.c.bf16 %v16454_v62, %v16454_v62  ;;  %v13425_v62 = vpack.c.bf16 %v16480_v16, %v16480_v16 }
 0x91b   : > { %v3240_v58 = vpop.xlane.xlu1 %3239 }
 0x91c   : > { %15370 = vpow2.f32 %v3264_v51  ;;  %v3258_v6 = vsub.f32 %v3226_v45, %v3240_v58 }
 0x91e   : > { %v3268_v9 = vmul.f32 1.442695, %v3258_v6 }
 0x91f   : > { %v3246_v5 = vpop.xlane.xlu1 %3245  ;;  %v3237_v32 = vpop.xlane.xlu0 %3236 }
 0x920   : > { %15372 = vpow2.f32 %v3268_v9  ;;  %v3260_v50 = vsub.f32 %v3228_v47, %v3246_v5  ;;  %v3257_v10 = vsub.f32 %v3225_v12, %v3237_v32  ;;  %v3424_v9 = vsel %vm2132_vm4, %v13423_v52, 0 }
 0x922   : > { %v3272_v17 = vmul.f32 1.442695, %v3260_v50  ;;  %v3266_v3 = vmul.f32 1.442695, %v3257_v10 }
 0x924   : > { %15374 = vpow2.f32 %v3272_v17  ;;  %v13424_v17 = vpack.c.bf16 %v16461_v43, %v16461_v43 }
 0x925   : > { %15376 = vpow2.f32 %v3266_v3 }
 0x926   : > { %v15371_v21 = vpop.eup %15370 }
 0x927   : > { %v3252_v13 = vpop.xlane.xlu1 %3251  ;;  %v3243_v23 = vpop.xlane.xlu0 %3242  ;;  %v3280_v27 = vsel %vm1648_vm3, %v15371_v21, 0.0 }
 0x928   : > { %v3262_v2 = vsub.f32 %v3230_v11, %v3252_v13  ;;  %v3259_v1 = vsub.f32 %v3227_v38, %v3243_v23  ;;  %3281 = vadd.xlane.f32.xlu1 %v3280_v27  ;;  %v3516_v27 = vsel %vm2132_vm4, %v13425_v62, 0 }
 0x92a   : > { %v15373_v19 = vpop.eup %15372  ;;  %v3276_v45 = vmul.f32 1.442695, %v3262_v2  ;;  %v3270_v33 = vmul.f32 1.442695, %v3259_v1  ;;  %v3470_v1 = vsel %vm2132_vm4, %v13424_v17, 0 }
 0x92b   : > { %v3286_v24 = vsel %vm1648_vm3, %v15373_v19, 0.0 }
 0x92c   : > { %15378 = vpow2.f32 %v3276_v45  ;;  %3287 = vadd.xlane.f32.xlu1 %v3286_v24  ;;  %v13426_v45 = vpack.c.bf16 %v16488_v54, %v16488_v54 }
 0x92d   : > { %15380 = vpow2.f32 %v3270_v33 }
 0x92e   : > { %v16534_v47 = vpop.eup %15374 }
 0x92f   : > { %v15377_v12 = vpop.eup %15376  ;;  %v3249_v7 = vpop.xlane.xlu0 %3248  ;;  %v3292_v35 = vsel %vm1648_vm3, %v16534_v47, 0.0 }
 0x930   : > { %v3261_v40 = vsub.f32 %v3229_v56, %v3249_v7  ;;  %3293 = vadd.xlane.f32.xlu1 %v3292_v35  ;;  %v3283_v11 = vsel %vm1648_vm3, %v15377_v12, 0.0 }
 0x931   : > { %3284 = vadd.xlane.f32.xlu0 %v3283_v11 }
 0x932   : > { %v3274_v38 = vmul.f32 1.442695, %v3261_v40  ;;  %v15243_v40 = vld [vmem:[%s18796_s6 + $0x20] sm:$0xff]  }
 0x934   : > { %15382 = vpow2.f32 %v3274_v38 }
 0x936   : > { %v16539_v44 = vpop.eup %15378 }
 0x937   : > { %v15381_v25 = vpop.eup %15380  ;;  %v3255_v48 = vpop.xlane.xlu0 %3254  ;;  %v3298_v37 = vsel %vm1648_vm3, %v16539_v44, 0.0 }
 0x938   : > { %v3263_v49 = vsub.f32 %v3231_v46, %v3255_v48  ;;  %3299 = vadd.xlane.f32.xlu1 %v3298_v37  ;;  %v3289_v53 = vsel %vm1648_vm3, %v15381_v25, 0.0 }
 0x939   : > { %3290 = vadd.xlane.f32.xlu0 %v3289_v53 }
 0x93a   : > { %v3278_v57 = vmul.f32 1.442695, %v3263_v49  ;;  %v15244_v49 = vld [vmem:[%s18796_s6 + $0x28] sm:$0xff]  }
 0x93c   : > { %15384 = vpow2.f32 %v3278_v57 }
 0x93e   : > { %v16544_v56 = vpop.eup %15382 }
 0x93f   : > { %v3295_v18 = vsel %vm1648_vm3, %v16544_v56, 0.0 }
 0x940   : > { %3296 = vadd.xlane.f32.xlu0 %v3295_v18 }
 0x946   : > { %v16548_v34 = vpop.eup %15384 }
 0x947   : > { %v3301_v59 = vsel %vm1648_vm3, %v16548_v34, 0.0 }
 0x948   : > { %3302 = vadd.xlane.f32.xlu0 %v3301_v59  ;;  %v15246_v59 = vld [vmem:[%s18797_s0 + $0x28] sm:$0xff]  }
 0x9b5   : > { %v3282_v61 = vpop.xlane.xlu1 %3281 }
 0x9b6   : > { %15386 = vrcp.f32 %v3282_v61  ;;  %v15248_v61 = vld [vmem:[%s18746_s11 + $0x28] sm:$0xff]  }
 0x9b9   : > { %v3288_v31 = vpop.xlane.xlu1 %3287 }
 0x9ba   : > { %15388 = vrcp.f32 %v3288_v31 }
 0x9bd   : > { %v3294_v41 = vpop.xlane.xlu1 %3293 }
 0x9be   : > { %v3285_v46 = vpop.xlane.xlu0 %3284 }
 0x9bf   : > { %15390 = vrcp.f32 %v3285_v46 }
 0x9c0   : > { %v15387_v0 = vpop.eup %15386  ;;  %15392 = vrcp.f32 %v3294_v41 }
 0x9c1   : > { %v3312_v51 = vmul.f32 %v15387_v0, %v15371_v21 }
 0x9c3   : > { %v3320_v58 = vpack.c.bf16 %v3312_v51, %v3312_v51 }
 0x9c4   : > { %v15389_v6 = vpop.eup %15388 }
 0x9c5   : > { %14245 = vmatmul.mubr.msk.bf16.vlgmr.msra.gmra.mrb[88].mxu1 %vm1648_vm3, %v3320_v58  ;;  %v3300_v32 = vpop.xlane.xlu1 %3299  ;;  %v3314_v50 = vmul.f32 %v15389_v6, %v15373_v19  ;;  %v13427_v19 = vpack.c.bf16 %v16473_v42, %v16473_v42  ;;  %v3562_v42 = vsel %vm2132_vm4, %v13426_v45, 0 }
 0x9c6   : > { %14255 = vmatpush3.bf16.msra.mxu1 %v3424_v9  ;;  %v3291_v5 = vpop.xlane.xlu0 %3290  ;;  %14256 = vmatprep.mubr.msk.bf16.mxu1 %vm15718_vm2, %v15717_v15 }
 0x9c7   : > { %15394 = vrcp.f32 %v3291_v5  ;;  %14266 = vmatprep.subr.bf16.mxu1 %v15717_v15  ;;  %v3322_v21 = vpack.c.bf16 %v3314_v50, %v3314_v50 }
 0x9c8   : > { %15396 = vrcp.f32 %v3300_v32 }
 0x9c9   : > { %v15391_v10 = vpop.eup %15390 }
 0x9ca   : > { %v3313_v3 = vmul.f32 %v15391_v10, %v15377_v12  ;;  %v15393_v13 = vpop.eup %15392 }
 0x9cb   : > { %v3316_v43 = vmul.f32 %v15393_v13, %v16534_v47  ;;  %v3608_v47 = vsel %vm2132_vm4, %v13427_v19, 0 }
 0x9cc   : > { %v3321_v23 = vpack.c.bf16 %v3313_v3, %v3313_v3 }
 0x9cd   : > { %14257 = vmatmul.mubr.msk.bf16.vlgmr.msra.gmra.mrb[92].mxu1 %vm1648_vm3, %v3322_v21  ;;  %v3297_v2 = vpop.xlane.xlu0 %3296  ;;  %v3324_v24 = vpack.c.bf16 %v3316_v43, %v3316_v43 }
 0x9ce   : > { %14251 = vmatmul.mubr.msk.bf16.vlgmr.msra.gmra.mrb[72].mxu0 %vm1648_vm3, %v3321_v23  ;;  %14267 = vmatpush3.bf16.msra.mxu1 %v3516_v27  ;;  %15398 = vrcp.f32 %v3297_v2 }
 0x9cf   : > { %14261 = vmatpush3.bf16.msra.mxu0 %v3470_v1  ;;  %14262 = vmatprep.mubr.msk.bf16.mxu0 %vm15718_vm2, %v15717_v15 }
 0x9d0   : > { %14268 = vmatprep.mubr.msk.bf16.mxu1 %vm15718_vm2, %v15717_v15  ;;  %14272 = vmatprep.subr.bf16.mxu0 %v15717_v15 }
 0x9d1   : > { %v15395_v16 = vpop.eup %15394  ;;  %14278 = vmatprep.subr.bf16.mxu1 %v15717_v15 }
 0x9d2   : > { %v3315_v33 = vmul.f32 %v15395_v16, %v15381_v25  ;;  %v15397_v12 = vpop.eup %15396  ;;  %v13428_v25 = vpack.c.bf16 %v16485_v55, %v16485_v55  ;;  %v15247_v55 = vld [vmem:[%s18746_s11 + $0x20] sm:$0xff]  }
 0x9d3   : > { %v3318_v54 = vmul.f32 %v15397_v12, %v16539_v44  ;;  %v15245_v44 = vld [vmem:[%s18797_s0 + $0x20] sm:$0xff]  }
 0x9d4   : > { %v3323_v7 = vpack.c.bf16 %v3315_v33, %v3315_v33  ;;  %v3654_v53 = vsel %vm2132_vm4, %v13428_v25, 0 }
 0x9d5   : > { %14269 = vmatmul.mubr.msk.bf16.vlgmr.msra.gmra.mrb[96].mxu1 %vm1648_vm3, %v3324_v24  ;;  %v3303_v35 = vpop.xlane.xlu0 %3302  ;;  %v3326_v37 = vpack.c.bf16 %v3318_v54, %v3318_v54 }
 0x9d6   : > { %14263 = vmatmul.mubr.msk.bf16.vlgmr.msra.gmra.mrb[76].mxu0 %vm1648_vm3, %v3323_v7  ;;  %14279 = vmatpush3.bf16.msra.mxu1 %v3608_v47  ;;  %15400 = vrcp.f32 %v3303_v35 }
 0x9d7   : > { %14273 = vmatpush3.bf16.msra.mxu0 %v3562_v42  ;;  %14274 = vmatprep.mubr.msk.bf16.mxu0 %vm15718_vm2, %v15717_v15 }
 0x9d8   : > { %v15399_v11 = vpop.eup %15398  ;;  %14280 = vmatprep.mubr.msk.bf16.mxu1 %vm15718_vm2, %v15717_v15  ;;  %14284 = vmatprep.subr.bf16.mxu0 %v15717_v15 }
 0x9d9   : > { %v3317_v38 = vmul.f32 %v15399_v11, %v16544_v56  ;;  %14290 = vmatprep.subr.bf16.mxu1 %v15243_v40  ;;  %v16667_v11 = vld [vmem:[%s18800_s7 + $0x2] ss:$0 sm:$0xff] }
 0x9db   : > { %v3325_v48 = vpack.c.bf16 %v3317_v38, %v3317_v38 }
 0x9dd   : > { %14281 = vmatmul.mubr.msk.bf16.vlgmr.msra.gmra.mrb[100].mxu1 %vm1648_vm3, %v3326_v37 }
 0x9de   : > { %14275 = vmatmul.mubr.msk.bf16.vlgmr.msra.gmra.mrb[80].mxu0 %vm1648_vm3, %v3325_v48  ;;  %14291 = vmatpush3.bf16.msra.mxu1 %v15243_v40 }
 0x9df   : > { %14285 = vmatpush3.bf16.msra.mxu0 %v3654_v53  ;;  %14294 = vmatprep.mubr.msk.bf16.mxu1 %vm1028_vm1, %v16109_v63 }
 0x9e0   : > { %v15401_v57 = vpop.eup %15400  ;;  %14292 = vmatprep.subr.bf16.mxu1 %v15244_v49  ;;  %14286 = vmatprep.mubr.msk.bf16.mxu0 %vm15718_vm2, %v15717_v15 }
 0x9e1   : > { %v3319_v56 = vmul.f32 %v15401_v57, %v16548_v34  ;;  %14302 = vmatprep.subr.bf16.mxu0 %v15245_v44 }
 0x9e2   : > { %14293 = vmatpush3.bf16.msra.mxu1 %v15244_v49 }
 0x9e3   : > { %v3327_v18 = vpack.c.bf16 %v3319_v56, %v3319_v56  ;;  %14314 = vmatprep.subr.bf16.mxu1 %v15247_v55 }
 0x9e5   : > { %14295 = vmatmul.mubr.msk.bf16.vlgmr.msra.gmra.mrb[104].mxu1 %vm1028_vm1, %v16115_v8 }
 0x9e6   : > { %14287 = vmatmul.mubr.msk.bf16.vlgmr.msra.gmra.mrb[84].mxu0 %vm1648_vm3, %v3327_v18  ;;  %14298 = vmatprep.mubr.msk.bf16.mxu1 %vm1028_vm1, %v16127_v28 }
 0x9e7   : > { %14303 = vmatpush3.bf16.msra.mxu0 %v15245_v44  ;;  %14306 = vmatprep.mubr.msk.bf16.mxu0 %vm1028_vm1, %v16109_v63 }
 0x9e8   : > { %14304 = vmatprep.subr.bf16.mxu0 %v15246_v59  ;;  %14315 = vmatpush3.bf16.msra.mxu1 %v15247_v55 }
 0x9e9   : > { %14316 = vmatprep.subr.bf16.mxu1 %v15248_v61 }
 0x9eb   : > { %14305 = vmatpush3.bf16.msra.mxu0 %v15246_v59  ;;  %v16680_v59 = vld [vmem:[%s18801_s9 + $0x2] ss:$0 sm:$0xff] }
 0x9ec   : > { %14317 = vmatpush3.bf16.msra.mxu1 %v15248_v61  ;;  %14326 = vmatprep.subr.bf16.mxu0 %v15717_v15 }
 0x9ed   : > { %14299 = vmatmul.mubr.msk.bf16.gmra.mrb[108].mxu1 %vm1028_vm1, %v16133_v22  ;;  %14338 = vmatprep.subr.bf16.mxu1 %v15717_v15 }
 0x9ee   : > { %14307 = vmatmul.mubr.msk.bf16.vlgmr.msra.gmra.mrb[88].mxu0 %vm1028_vm1, %v16115_v8  ;;  %14318 = vmatprep.mubr.msk.bf16.mxu1 %vm1028_vm1, %v16109_v63 }
 0x9ef   : > { %14310 = vmatprep.mubr.msk.bf16.mxu0 %vm1028_vm1, %v16127_v28 }
 0x9f5   : > { %14319 = vmatmul.mubr.msk.bf16.vlgmr.msra.gmra.mrb[112].mxu1 %vm1028_vm1, %v16115_v8 }
 0x9f6   : > { %14311 = vmatmul.mubr.msk.bf16.gmra.mrb[92].mxu0 %vm1028_vm1, %v16133_v22  ;;  %14322 = vmatprep.mubr.msk.bf16.mxu1 %vm1028_vm1, %v16127_v28 }
 0x9f7   : > { %14328 = vmatprep.mubr.msk.bf16.mxu0 %vm15718_vm2, %v15717_v15 }
 0x9fd   : > { %14323 = vmatmul.mubr.msk.bf16.gmra.mrb[116].mxu1 %vm1028_vm1, %v16133_v22 }
 0x9fe   : > { %14340 = vmatprep.mubr.msk.bf16.mxu1 %vm15718_vm2, %v15717_v15 }
 0xa98   : > { %v16646_v34 = vpop.f32.mrb[88].mxu1 }
 0xa99   : > { %v14246_v31 = vpop.f32.mrb[89].mxu1 }
 0xa9a   : > { %v3371_v46 = vpop.f32.mrb[90].mxu1 }
 0xa9b   : > { %v14247_v41 = vpop.f32.mrb[91].mxu1  ;;  %v16686_v46 = vld [vmem:[%s18747_s12 + $0x2] ss:$0 sm:$0xff] }
 0xaa0   : > { %v16648_v0 = vpop.f32.mrb[92].mxu1 }
 0xaa1   : > { %v16650_v52 = vpop.f32.mrb[72].mxu0  ;;  %v14258_v51 = vpop.f32.mrb[93].mxu1 }
 0xaa2   : > { %v14252_v58 = vpop.f32.mrb[73].mxu0  ;;  %v3463_v6 = vpop.f32.mrb[94].mxu1 }
 0xaa3   : > { %v3417_v9 = vpop.f32.mrb[74].mxu0  ;;  %v14259_v5 = vpop.f32.mrb[95].mxu1 }
 0xaa4   : > { %v14253_v32 = vpop.f32.mrb[75].mxu0 }
 0xaa8   : > { %v16652_v50 = vpop.f32.mrb[96].mxu1 }
 0xaa9   : > { %v16654_v10 = vpop.f32.mrb[76].mxu0  ;;  %v14270_v62 = vpop.f32.mrb[97].mxu1 }
 0xaaa   : > { %v14264_v17 = vpop.f32.mrb[77].mxu0  ;;  %v3555_v3 = vpop.f32.mrb[98].mxu1 }
 0xaab   : > { %v3509_v21 = vpop.f32.mrb[78].mxu0  ;;  %v14271_v13 = vpop.f32.mrb[99].mxu1 }
 0xaac   : > { %v14265_v23 = vpop.f32.mrb[79].mxu0 }
 0xab0   : > { %v16656_v27 = vpop.f32.mrb[100].mxu1 }
 0xab1   : > { %v16658_v2 = vpop.f32.mrb[80].mxu0  ;;  %v14282_v1 = vpop.f32.mrb[101].mxu1 }
 0xab2   : > { %v14276_v43 = vpop.f32.mrb[81].mxu0  ;;  %v3647_v16 = vpop.f32.mrb[102].mxu1 }
 0xab3   : > { %v3601_v19 = vpop.f32.mrb[82].mxu0  ;;  %v14283_v45 = vpop.f32.mrb[103].mxu1 }
 0xab4   : > { %v14277_v33 = vpop.f32.mrb[83].mxu0 }
 0xab8   : > { %v14296_v24 = vpop.f32.mrb[104].mxu1 }
 0xab9   : > { %v16660_v12 = vpop.f32.mrb[84].mxu0  ;;  %v3796_v7 = vpop.f32.mrb[105].mxu1  ;;  %v3805_v58 = vadd.f32 %v14296_v24, %v16680_v59 }
 0xaba   : > { %v14288_v47 = vpop.f32.mrb[85].mxu0  ;;  %v16662_v35 = vpop.f32.mrb[106].mxu1  ;;  %v3797_v9 = vadd.f32 %v16680_v59, %v3796_v7 }
 0xabb   : > { %v3693_v40 = vpop.f32.mrb[86].mxu0  ;;  %v3799_v42 = vpop.f32.mrb[107].mxu1  ;;  %v13431_v16 = vpack.c.bf16 %v3805_v58, %v3805_v58 }
 0xabc   : > { %v14289_v54 = vpop.f32.mrb[87].mxu0  ;;  %v13429_v45 = vpack.c.bf16 %v3797_v9, %v3797_v9 }
 0xac0   : > { %v16669_v38 = vpop.f32.mrb[108].mxu1 }
 0xac1   : > { %v14308_v25 = vpop.f32.mrb[88].mxu0  ;;  %v3812_v48 = vpop.f32.mrb[109].mxu1 }
 0xac2   : > { %v3899_v37 = vadd.f32 %v14308_v25, %v16667_v11  ;;  %v3890_v49 = vpop.f32.mrb[89].mxu0  ;;  %v16672_v44 = vpop.f32.mrb[110].mxu1  ;;  %v3800_v25 = vadd.f32 %v16680_v59, %v3799_v42 }
 0xac3   : > { %v3891_v53 = vadd.f32 %v16667_v11, %v3890_v49  ;;  %v14309_v55 = vpop.f32.mrb[90].mxu0  ;;  %v16675_v57 = vpop.f32.mrb[111].mxu1 }
 0xac4   : > { %v13439_v56 = vpack.c.bf16 %v3899_v37, %v3899_v37  ;;  %v3893_v18 = vpop.f32.mrb[91].mxu0  ;;  %v3902_v24 = vadd.f32 %v14309_v55, %v16667_v11  ;;  %v3813_v37 = vadd.f32 %v16680_v59, %v3812_v48 }
 0xac5   : > { %v13437_v61 = vpack.c.bf16 %v3891_v53, %v3891_v53  ;;  %v3894_v41 = vadd.f32 %v16667_v11, %v3893_v18 }
 0xac6   : > { %v4175_v31 = vsel %vm1648_vm3, %v13439_v56, 0  ;;  %v13440_v18 = vpack.c.bf16 %v3902_v24, %v3902_v24 }
 0xac7   : > { %14339 = vmatpush3.bf16.xpose.msra.mxu1 %v4175_v31  ;;  %v4083_v51 = vsel %vm1648_vm3, %v13437_v61, 0  ;;  %v13438_v21 = vpack.c.bf16 %v3894_v41, %v3894_v41  ;;  %v13430_v41 = vpack.c.bf16 %v3800_v25, %v3800_v25 }
 0xac8   : > { %14327 = vmatpush3.bf16.xpose.msra.mxu0 %v4083_v51  ;;  %v14320_v6 = vpop.f32.mrb[112].mxu1  ;;  %14350 = vmatprep.subr.bf16.mxu1 %v15717_v15  ;;  %v13433_v51 = vpack.c.bf16 %v3813_v37, %v3813_v37  ;;  %v4221_v9 = vsel %vm1648_vm3, %v13440_v18, 0 }
 0xac9   : > { %v14312_v5 = vpop.f32.mrb[92].mxu0  ;;  %v16694_v32 = vadd.f32 %v14320_v6, %v16686_v46  ;;  %v3984_v62 = vpop.f32.mrb[113].mxu1  ;;  %14332 = vmatprep.subr.bf16.mxu0 %v15717_v15  ;;  %v4129_v47 = vsel %vm1648_vm3, %v13438_v21, 0 }
 0xaca   : > { %v3906_v17 = vpop.f32.mrb[93].mxu0  ;;  %v14321_v3 = vpop.f32.mrb[114].mxu1  ;;  %v3915_v7 = vadd.f32 %v14312_v5, %v16667_v11  ;;  %v3985_v58 = vadd.f32 %v16686_v46, %v3984_v62 }
 0xacb   : > { %v3907_v13 = vadd.f32 %v16667_v11, %v3906_v17  ;;  %v14313_v23 = vpop.f32.mrb[94].mxu0  ;;  %v16699_v1 = vadd.f32 %v14321_v3, %v16686_v46  ;;  %v16701_v43 = vpop.f32.mrb[115].mxu1  ;;  %v3808_v17 = vadd.f32 %v16662_v35, %v16680_v59  ;;  %v3821_v3 = vadd.f32 %v16669_v38, %v16680_v59 }
 0xacc   : > { %v3909_v19 = vpop.f32.mrb[95].mxu0  ;;  %v13443_v61 = vpack.c.bf16 %v3915_v7, %v3915_v7  ;;  %v13445_v62 = vpack.c.bf16 %v3985_v58, %v3985_v58 }
 0xacd   : > { %v13441_v33 = vpack.c.bf16 %v3907_v13, %v3907_v13  ;;  %v3910_v6 = vadd.f32 %v16667_v11, %v3909_v19  ;;  %v13432_v13 = vpack.c.bf16 %v3808_v17, %v3808_v17  ;;  %v3918_v19 = vadd.f32 %v14313_v23, %v16667_v11 }
 0xace   : > { %14341 = vmatmul.mubr.msk.bf16.vlgmr.msra.gmra.mrb[120].mxu1 %vm1648_vm3, %v13431_v16  ;;  %v4359_v5 = vsel %vm1648_vm3, %v13443_v61, 0  ;;  %v13435_v16 = vpack.c.bf16 %v3821_v3, %v3821_v3  ;;  %v4563_v38 = vsel %vm2132_vm4, %v13445_v62, 0 }
 0xacf   : > { %14329 = vmatmul.mubr.msk.bf16.vlgmr.msra.gmra.mrb[96].mxu0 %vm1648_vm3, %v13429_v45  ;;  %v4267_v40 = vsel %vm1648_vm3, %v13441_v33, 0  ;;  %14352 = vmatprep.mubr.msk.bf16.mxu1 %vm15718_vm2, %v15717_v15  ;;  %v13442_v21 = vpack.c.bf16 %v3910_v6, %v3910_v6  ;;  %v3816_v45 = vadd.f32 %v16680_v59, %v16675_v57  ;;  %v13444_v11 = vpack.c.bf16 %v3918_v19, %v3918_v19 }
 0xad0   : > { %14333 = vmatpush3.bf16.xpose.msra.mxu0 %v4129_v47  ;;  %14351 = vmatpush3.bf16.xpose.msra.mxu1 %v4267_v40  ;;  %v14324_v54 = vpop.f32.mrb[116].mxu1  ;;  %v3988_v33 = vadd.f32 %v16686_v46, %v16701_v43  ;;  %v3824_v57 = vadd.f32 %v16672_v44, %v16680_v59 }
 0xad1   : > { %v16714_v49 = vadd.f32 %v14324_v54, %v16686_v46  ;;  %v4000_v53 = vpop.f32.mrb[117].mxu1  ;;  %14334 = vmatprep.mubr.msk.bf16.mxu0 %vm15718_vm2, %v15717_v15  ;;  %14344 = vmatprep.subr.bf16.mxu0 %v15717_v15  ;;  %v4313_v35 = vsel %vm1648_vm3, %v13442_v21, 0  ;;  %v13434_v23 = vpack.c.bf16 %v3816_v45, %v3816_v45  ;;  %v4405_v24 = vsel %vm1648_vm3, %v13444_v11, 0 }
 0xad2   : > { %v16720_v55 = vadd.f32 %v16686_v46, %v4000_v53  ;;  %v14325_v56 = vpop.f32.mrb[118].mxu1  ;;  %14362 = vmatprep.subr.bf16.mxu1 %v15717_v15  ;;  %v13446_v7 = vpack.c.bf16 %v3988_v33, %v3988_v33  ;;  %v13436_v47 = vpack.c.bf16 %v3824_v57, %v3824_v57 }
 0xad3   : > { %v16724_v42 = vadd.f32 %v14325_v56, %v16686_v46  ;;  %v4003_v48 = vpop.f32.mrb[119].mxu1 }
 0xad4   : > { %v16727_v31 = vadd.f32 %v16686_v46, %v4003_v48  ;;  %v4609_v40 = vsel %vm2132_vm4, %v13446_v7, 0 }
 0xad7   : > { %14335 = vmatmul.mubr.msk.bf16.vlgmr.msra.gmra.mrb[100].mxu0 %vm1648_vm3, %v13430_v41  ;;  %14353 = vmatmul.mubr.msk.bf16.vlgmr.msra.gmra.mrb[124].mxu1 %vm1648_vm3, %v13433_v51 }
 0xad8   : > { %14345 = vmatpush3.bf16.xpose.msra.mxu0 %v4221_v9  ;;  %14363 = vmatpush3.bf16.xpose.msra.mxu1 %v4359_v5 }
 0xad9   : > { %14346 = vmatprep.mubr.msk.bf16.mxu0 %vm15718_vm2, %v15717_v15  ;;  %14364 = vmatprep.mubr.msk.bf16.mxu1 %vm15718_vm2, %v15717_v15 }
 0xada   : > { %14356 = vmatprep.subr.bf16.mxu0 %v15717_v15  ;;  %14374 = vmatprep.subr.bf16.mxu1 %v15717_v15 }
 0xadf   : > { %14347 = vmatmul.mubr.msk.bf16.vlgmr.msra.gmra.mrb[104].mxu0 %vm1648_vm3, %v13432_v13  ;;  %14365 = vmatmul.mubr.msk.bf16.vlgmr.msra.gmra.mrb[128].mxu1 %vm1648_vm3, %v13435_v16 }
 0xae0   : > { %14357 = vmatpush3.bf16.xpose.msra.mxu0 %v4313_v35  ;;  %14375 = vmatpush3.bf16.msra.mxu1 %v4563_v38 }
 0xae1   : > { %14358 = vmatprep.mubr.msk.bf16.mxu0 %vm15718_vm2, %v15717_v15  ;;  %14368 = vmatprep.subr.bf16.mxu0 %v15717_v15 }
 0xae2   : > { %14376 = vmatprep.mubr.msk.bf16.mxu1 %vm15718_vm2, %v15717_v15  ;;  %14386 = vmatprep.subr.bf16.mxu1 %v15717_v15 }
 0xae7   : > { %14359 = vmatmul.mubr.msk.bf16.vlgmr.msra.gmra.mrb[108].mxu0 %vm1648_vm3, %v13434_v23 }
 0xae8   : > { %14369 = vmatpush3.bf16.xpose.msra.mxu0 %v4405_v24  ;;  %14370 = vmatprep.mubr.msk.bf16.mxu0 %vm15718_vm2, %v15717_v15 }
 0xae9   : > { %14380 = vmatprep.subr.bf16.mxu0 %v15717_v15 }
 0xaef   : > { %14371 = vmatmul.mubr.msk.bf16.vlgmr.msra.gmra.mrb[112].mxu0 %vm1648_vm3, %v13436_v47 }
 0xaf0   : > { %14381 = vmatpush3.bf16.msra.mxu0 %v4609_v40  ;;  %14382 = vmatprep.mubr.msk.bf16.mxu0 %vm15718_vm2, %v15717_v15 }
 0xaf1   : > { %14392 = vmatprep.subr.bf16.mxu0 %v15717_v15 }
 0xba1   : > { %v4211_v46 = vpop.f32.mrb[120].mxu1 }
 0xba2   : > { %v4449_v43 = vmul.f32 0.35355338, %v4211_v46  ;;  %v4119_v54 = vpop.f32.mrb[96].mxu0  ;;  %v14342_v25 = vpop.f32.mrb[121].mxu1 }
 0xba3   : > { %v4447_v37 = vmul.f32 0.35355338, %v4119_v54  ;;  %v14330_v44 = vpop.f32.mrb[97].mxu0  ;;  %v4214_v59 = vpop.f32.mrb[122].mxu1 }
 0xba4   : > { %v4122_v53 = vpop.f32.mrb[98].mxu0  ;;  %v14343_v56 = vpop.f32.mrb[123].mxu1  ;;  %v4457_v48 = vadd.f32 %v4449_v43, %v16272_v30 }
 0xba5   : > { %v14331_v18 = vpop.f32.mrb[99].mxu0  ;;  %v4455_v61 = vadd.f32 %v4447_v37, %v16272_v30 }
 0xba6   : > { %v4469_v6 = vsel %vm1648_vm3, %v4457_v48, -inf }
 0xba7   : > { %v4463_v41 = vsel %vm1648_vm3, %v4455_v61, -inf }
 0xba8   : > { %4464 = vmax.xlane.f32.xlu1 %v4463_v41 }
 0xbaa   : > { %v4165_v51 = vpop.f32.mrb[100].mxu0  ;;  %v4303_v58 = vpop.f32.mrb[124].mxu1 }
 0xbab   : > { %v4448_v9 = vmul.f32 0.35355338, %v4165_v51  ;;  %v4451_v5 = vmul.f32 0.35355338, %v4303_v58  ;;  %v14336_v17 = vpop.f32.mrb[101].mxu0  ;;  %v14354_v3 = vpop.f32.mrb[125].mxu1 }
 0xbac   : > { %v4306_v62 = vpop.f32.mrb[126].mxu1  ;;  %4470 = vmax.xlane.f32.xlu1 %v4469_v6  ;;  %v4168_v21 = vpop.f32.mrb[102].mxu0 }
 0xbad   : > { %v14337_v13 = vpop.f32.mrb[103].mxu0  ;;  %v14355_v16 = vpop.f32.mrb[127].mxu1  ;;  %v4459_v19 = vadd.f32 %v4451_v5, %v16272_v30  ;;  %v4456_v35 = vadd.f32 %v4448_v9, %v16272_v30 }
 0xbaf   : > { %v4475_v38 = vsel %vm1648_vm3, %v4459_v19, -inf  ;;  %v4466_v45 = vsel %vm1648_vm3, %v4456_v35, -inf }
 0xbb0   : > { %4476 = vmax.xlane.f32.xlu1 %v4475_v38  ;;  %4467 = vmax.xlane.f32.xlu0 %v4466_v45 }
 0xbb2   : > { %v4257_v11 = vpop.f32.mrb[104].mxu0  ;;  %v4395_v23 = vpop.f32.mrb[128].mxu1 }
 0xbb3   : > { %v4450_v33 = vmul.f32 0.35355338, %v4257_v11  ;;  %v4453_v24 = vmul.f32 0.35355338, %v4395_v23  ;;  %v14348_v57 = vpop.f32.mrb[105].mxu0  ;;  %v14366_v7 = vpop.f32.mrb[129].mxu1 }
 0xbb4   : > { %v4260_v47 = vpop.f32.mrb[106].mxu0  ;;  %v4398_v40 = vpop.f32.mrb[130].mxu1 }
 0xbb5   : > { %v14349_v46 = vpop.f32.mrb[107].mxu0  ;;  %v14367_v43 = vpop.f32.mrb[131].mxu1  ;;  %v4461_v54 = vadd.f32 %v4453_v24, %v16272_v30  ;;  %v4458_v25 = vadd.f32 %v4450_v33, %v16272_v30 }
 0xbb7   : > { %v4481_v37 = vsel %vm1648_vm3, %v4461_v54, -inf  ;;  %v4472_v44 = vsel %vm1648_vm3, %v4458_v25, -inf }
 0xbb8   : > { %4482 = vmax.xlane.f32.xlu1 %v4481_v37  ;;  %4473 = vmax.xlane.f32.xlu0 %v4472_v44 }
 0xbba   : > { %v4349_v59 = vpop.f32.mrb[108].mxu0 }
 0xbbb   : > { %v4452_v53 = vmul.f32 0.35355338, %v4349_v59  ;;  %v14360_v56 = vpop.f32.mrb[109].mxu0 }
 0xbbc   : > { %v4352_v18 = vpop.f32.mrb[110].mxu0 }
 0xbbd   : > { %v14361_v41 = vpop.f32.mrb[111].mxu0  ;;  %v4460_v51 = vadd.f32 %v4452_v53, %v16272_v30 }
 0xbbf   : > { %v4478_v58 = vsel %vm1648_vm3, %v4460_v51, -inf }
 0xbc0   : > { %4479 = vmax.xlane.f32.xlu0 %v4478_v58 }
 0xbc2   : > { %v4441_v6 = vpop.f32.mrb[112].mxu0 }
 0xbc3   : > { %v4454_v9 = vmul.f32 0.35355338, %v4441_v6  ;;  %v14372_v5 = vpop.f32.mrb[113].mxu0 }
 0xbc4   : > { %v4444_v17 = vpop.f32.mrb[114].mxu0 }
 0xbc5   : > { %v14373_v3 = vpop.f32.mrb[115].mxu0  ;;  %v4462_v62 = vadd.f32 %v4454_v9, %v16272_v30 }
 0xbc7   : > { %v4484_v21 = vsel %vm1648_vm3, %v4462_v62, -inf }
 0xbc8   : > { %4485 = vmax.xlane.f32.xlu0 %v4484_v21 }
 0xc35   : > { %v4465_v13 = vpop.xlane.xlu1 %4464 }
 0xc36   : > { %v4487_v16 = vsub.f32 %v4455_v61, %v4465_v13 }
 0xc38   : > { %v4495_v38 = vmul.f32 1.442695, %v4487_v16 }
 0xc39   : > { %v4471_v45 = vpop.xlane.xlu1 %4470 }
 0xc3a   : > { %15402 = vpow2.f32 %v4495_v38  ;;  %v4489_v11 = vsub.f32 %v4457_v48, %v4471_v45 }
 0xc3c   : > { %v4499_v23 = vmul.f32 1.442695, %v4489_v11 }
 0xc3d   : > { %v4477_v33 = vpop.xlane.xlu1 %4476  ;;  %v4468_v24 = vpop.xlane.xlu0 %4467 }
 0xc3e   : > { %15404 = vpow2.f32 %v4499_v23  ;;  %v4491_v57 = vsub.f32 %v4459_v19, %v4477_v33  ;;  %v4488_v7 = vsub.f32 %v4456_v35, %v4468_v24 }
 0xc40   : > { %v4503_v47 = vmul.f32 1.442695, %v4491_v57  ;;  %v4497_v40 = vmul.f32 1.442695, %v4488_v7  ;;  %v13447_v7 = vpack.c.bf16 %v16694_v32, %v16694_v32  ;;  %v13449_v32 = vpack.c.bf16 %v16720_v55, %v16720_v55 }
 0xc42   : > { %15406 = vpow2.f32 %v4503_v47 }
 0xc43   : > { %15408 = vpow2.f32 %v4497_v40 }
 0xc44   : > { %v15403_v46 = vpop.eup %15402 }
 0xc45   : > { %v4483_v43 = vpop.xlane.xlu1 %4482  ;;  %v4474_v37 = vpop.xlane.xlu0 %4473  ;;  %v4511_v44 = vsel %vm1648_vm3, %v15403_v46, 0.0 }
 0xc46   : > { %v4493_v61 = vsub.f32 %v4461_v54, %v4483_v43  ;;  %v4490_v59 = vsub.f32 %v4458_v25, %v4474_v37  ;;  %4512 = vadd.xlane.f32.xlu1 %v4511_v44  ;;  %v4655_v37 = vsel %vm2132_vm4, %v13447_v7, 0 }
 0xc48   : > { %v15405_v53 = vpop.eup %15404  ;;  %v4507_v48 = vmul.f32 1.442695, %v4493_v61  ;;  %v4501_v56 = vmul.f32 1.442695, %v4490_v59 }
 0xc49   : > { %v4517_v18 = vsel %vm1648_vm3, %v15405_v53, 0.0 }
 0xc4a   : > { %15410 = vpow2.f32 %v4507_v48  ;;  %4518 = vadd.xlane.f32.xlu1 %v4517_v18 }
 0xc4b   : > { %15412 = vpow2.f32 %v4501_v56 }
 0xc4c   : > { %v16790_v19 = vpop.eup %15406 }
 0xc4d   : > { %v15409_v35 = vpop.eup %15408  ;;  %v4480_v41 = vpop.xlane.xlu0 %4479  ;;  %v4523_v58 = vsel %vm1648_vm3, %v16790_v19, 0.0 }
 0xc4e   : > { %v4492_v6 = vsub.f32 %v4460_v51, %v4480_v41  ;;  %4524 = vadd.xlane.f32.xlu1 %v4523_v58  ;;  %v4514_v54 = vsel %vm1648_vm3, %v15409_v35, 0.0 }
 0xc4f   : > { %4515 = vadd.xlane.f32.xlu0 %v4514_v54 }
 0xc50   : > { %v4505_v25 = vmul.f32 1.442695, %v4492_v6  ;;  %v4747_v6 = vsel %vm2132_vm4, %v13449_v32, 0 }
 0xc52   : > { %15414 = vpow2.f32 %v4505_v25  ;;  %v13450_v25 = vpack.c.bf16 %v16727_v31, %v16727_v31 }
 0xc54   : > { %v16795_v9 = vpop.eup %15410 }
 0xc55   : > { %v15413_v5 = vpop.eup %15412  ;;  %v4486_v17 = vpop.xlane.xlu0 %4485  ;;  %v4529_v3 = vsel %vm1648_vm3, %v16795_v9, 0.0 }
 0xc56   : > { %v4494_v21 = vsub.f32 %v4462_v62, %v4486_v17  ;;  %4530 = vadd.xlane.f32.xlu1 %v4529_v3  ;;  %v4520_v13 = vsel %vm1648_vm3, %v15413_v5, 0.0 }
 0xc57   : > { %4521 = vadd.xlane.f32.xlu0 %v4520_v13 }
 0xc58   : > { %v4509_v16 = vmul.f32 1.442695, %v4494_v21 }
 0xc5a   : > { %15416 = vpow2.f32 %v4509_v16 }
 0xc5c   : > { %v16800_v51 = vpop.eup %15414 }
 0xc5d   : > { %v4526_v38 = vsel %vm1648_vm3, %v16800_v51, 0.0 }
 0xc5e   : > { %4527 = vadd.xlane.f32.xlu0 %v4526_v38  ;;  %v15249_v38 = vld [vmem:[%s18796_s6 + $0x30] sm:$0xff]  }
 0xc64   : > { %v16804_v45 = vpop.eup %15416 }
 0xc65   : > { %v4532_v11 = vsel %vm1648_vm3, %v16804_v45, 0.0 }
 0xc66   : > { %4533 = vadd.xlane.f32.xlu0 %v4532_v11 }
 0xcd3   : > { %v4513_v23 = vpop.xlane.xlu1 %4512 }
 0xcd4   : > { %15418 = vrcp.f32 %v4513_v23  ;;  %v13452_v23 = vpack.c.bf16 %v16724_v42, %v16724_v42  ;;  %v15253_v42 = vld [vmem:[%s18746_s11 + $0x30] sm:$0xff]  }
 0xcd7   : > { %v4519_v62 = vpop.xlane.xlu1 %4518 }
 0xcd8   : > { %15420 = vrcp.f32 %v4519_v62 }
 0xcdb   : > { %v4525_v24 = vpop.xlane.xlu1 %4524 }
 0xcdc   : > { %v4516_v33 = vpop.xlane.xlu0 %4515 }
 0xcdd   : > { %15422 = vrcp.f32 %v4516_v33 }
 0xcde   : > { %v15419_v57 = vpop.eup %15418  ;;  %15424 = vrcp.f32 %v4525_v24  ;;  %v15250_v24 = vld [vmem:[%s18796_s6 + $0x38] sm:$0xff]  }
 0xcdf   : > { %v4543_v47 = vmul.f32 %v15419_v57, %v15403_v46  ;;  %v13448_v46 = vpack.c.bf16 %v16699_v1, %v16699_v1 }
 0xce1   : > { %v4551_v40 = vpack.c.bf16 %v4543_v47, %v4543_v47 }
 0xce2   : > { %v15421_v43 = vpop.eup %15420 }
 0xce3   : > { %14377 = vmatmul.mubr.msk.bf16.vlgmr.msra.gmra.mrb[132].mxu1 %vm1648_vm3, %v4551_v40  ;;  %v4531_v61 = vpop.xlane.xlu1 %4530  ;;  %v4545_v59 = vmul.f32 %v15421_v43, %v15405_v53  ;;  %v4701_v53 = vsel %vm2132_vm4, %v13448_v46, 0  ;;  %v15252_v40 = vld [vmem:[%s18797_s0 + $0x38] sm:$0xff]  }
 0xce4   : > { %14387 = vmatpush3.bf16.msra.mxu1 %v4655_v37  ;;  %v4522_v44 = vpop.xlane.xlu0 %4521  ;;  %14388 = vmatprep.mubr.msk.bf16.mxu1 %vm15718_vm2, %v15717_v15  ;;  %v15254_v43 = vld [vmem:[%s18746_s11 + $0x38] sm:$0xff]  }
 0xce5   : > { %15426 = vrcp.f32 %v4522_v44  ;;  %14398 = vmatprep.subr.bf16.mxu1 %v15717_v15  ;;  %v4553_v18 = vpack.c.bf16 %v4545_v59, %v4545_v59 }
 0xce6   : > { %15428 = vrcp.f32 %v4531_v61 }
 0xce7   : > { %v15423_v48 = vpop.eup %15422 }
 0xce8   : > { %v4544_v56 = vmul.f32 %v15423_v48, %v15409_v35  ;;  %v15425_v41 = vpop.eup %15424  ;;  %v13451_v35 = vpack.c.bf16 %v16714_v49, %v16714_v49  ;;  %v4793_v49 = vsel %vm2132_vm4, %v13450_v25, 0 }
 0xce9   : > { %v4547_v1 = vmul.f32 %v15425_v41, %v16790_v19 }
 0xcea   : > { %v4552_v58 = vpack.c.bf16 %v4544_v56, %v4544_v56  ;;  %v4839_v19 = vsel %vm2132_vm4, %v13451_v35, 0 }
 0xceb   : > { %14389 = vmatmul.mubr.msk.bf16.vlgmr.msra.gmra.mrb[136].mxu1 %vm1648_vm3, %v4553_v18  ;;  %v4528_v54 = vpop.xlane.xlu0 %4527  ;;  %v4555_v3 = vpack.c.bf16 %v4547_v1, %v4547_v1 }
 0xcec   : > { %14383 = vmatmul.mubr.msk.bf16.vlgmr.msra.gmra.mrb[116].mxu0 %vm1648_vm3, %v4552_v58  ;;  %14399 = vmatpush3.bf16.msra.mxu1 %v4747_v6  ;;  %15430 = vrcp.f32 %v4528_v54 }
 0xced   : > { %14393 = vmatpush3.bf16.msra.mxu0 %v4701_v53  ;;  %14394 = vmatprep.mubr.msk.bf16.mxu0 %vm15718_vm2, %v15717_v15 }
 0xcee   : > { %14400 = vmatprep.mubr.msk.bf16.mxu1 %vm15718_vm2, %v15717_v15  ;;  %14404 = vmatprep.subr.bf16.mxu0 %v15717_v15 }
 0xcef   : > { %v15427_v55 = vpop.eup %15426  ;;  %14410 = vmatprep.subr.bf16.mxu1 %v15717_v15 }
 0xcf0   : > { %v4546_v17 = vmul.f32 %v15427_v55, %v15413_v5  ;;  %v15429_v21 = vpop.eup %15428 }
 0xcf1   : > { %v4549_v31 = vmul.f32 %v15429_v21, %v16795_v9  ;;  %v15251_v9 = vld [vmem:[%s18797_s0 + $0x30] sm:$0xff]  }
 0xcf2   : > { %v4554_v13 = vpack.c.bf16 %v4546_v17, %v4546_v17 }
 0xcf3   : > { %14401 = vmatmul.mubr.msk.bf16.vlgmr.msra.gmra.mrb[140].mxu1 %vm1648_vm3, %v4555_v3  ;;  %v4534_v16 = vpop.xlane.xlu0 %4533  ;;  %v4557_v33 = vpack.c.bf16 %v4549_v31, %v4549_v31 }
 0xcf4   : > { %14395 = vmatmul.mubr.msk.bf16.vlgmr.msra.gmra.mrb[120].mxu0 %vm1648_vm3, %v4554_v13  ;;  %14411 = vmatpush3.bf16.msra.mxu1 %v4839_v19  ;;  %15432 = vrcp.f32 %v4534_v16 }
 0xcf5   : > { %14405 = vmatpush3.bf16.msra.mxu0 %v4793_v49  ;;  %14406 = vmatprep.mubr.msk.bf16.mxu0 %vm15718_vm2, %v15717_v15 }
 0xcf6   : > { %v15431_v5 = vpop.eup %15430  ;;  %14412 = vmatprep.mubr.msk.bf16.mxu1 %vm15718_vm2, %v15717_v15  ;;  %14416 = vmatprep.subr.bf16.mxu0 %v15717_v15 }
 0xcf7   : > { %v4548_v11 = vmul.f32 %v15431_v5, %v16800_v51  ;;  %14422 = vmatprep.subr.bf16.mxu1 %v15249_v38  ;;  %v4885_v51 = vsel %vm2132_vm4, %v13452_v23, 0 }
 0xcf9   : > { %v4556_v62 = vpack.c.bf16 %v4548_v11, %v4548_v11 }
 0xcfb   : > { %14413 = vmatmul.mubr.msk.bf16.vlgmr.msra.gmra.mrb[144].mxu1 %vm1648_vm3, %v4557_v33  ;;  %v16923_v33 = vld [vmem:[%s18800_s7 + $0x3] ss:$0 sm:$0xff] }
 0xcfc   : > { %14407 = vmatmul.mubr.msk.bf16.vlgmr.msra.gmra.mrb[124].mxu0 %vm1648_vm3, %v4556_v62  ;;  %14423 = vmatpush3.bf16.msra.mxu1 %v15249_v38 }
 0xcfd   : > { %14417 = vmatpush3.bf16.msra.mxu0 %v4885_v51  ;;  %14426 = vmatprep.mubr.msk.bf16.mxu1 %vm1028_vm1, %v16109_v63 }
 0xcfe   : > { %v15433_v57 = vpop.eup %15432  ;;  %14424 = vmatprep.subr.bf16.mxu1 %v15250_v24  ;;  %14418 = vmatprep.mubr.msk.bf16.mxu0 %vm15718_vm2, %v15717_v15 }
 0xcff   : > { %v4550_v7 = vmul.f32 %v15433_v57, %v16804_v45  ;;  %14434 = vmatprep.subr.bf16.mxu0 %v15251_v9 }
 0xd00   : > { %14425 = vmatpush3.bf16.msra.mxu1 %v15250_v24 }
 0xd01   : > { %v4558_v47 = vpack.c.bf16 %v4550_v7, %v4550_v7  ;;  %14446 = vmatprep.subr.bf16.mxu1 %v15253_v42 }
 0xd03   : > { %14427 = vmatmul.mubr.msk.bf16.vlgmr.msra.gmra.mrb[148].mxu1 %vm1028_vm1, %v16115_v8 }
 0xd04   : > { %14419 = vmatmul.mubr.msk.bf16.vlgmr.msra.gmra.mrb[128].mxu0 %vm1648_vm3, %v4558_v47  ;;  %14430 = vmatprep.mubr.msk.bf16.mxu1 %vm1028_vm1, %v16127_v28 }
 0xd05   : > { %14435 = vmatpush3.bf16.msra.mxu0 %v15251_v9  ;;  %14438 = vmatprep.mubr.msk.bf16.mxu0 %vm1028_vm1, %v16109_v63 }
 0xd06   : > { %14436 = vmatprep.subr.bf16.mxu0 %v15252_v40  ;;  %14447 = vmatpush3.bf16.msra.mxu1 %v15253_v42 }
 0xd07   : > { %14448 = vmatprep.subr.bf16.mxu1 %v15254_v43 }
 0xd09   : > { %14437 = vmatpush3.bf16.msra.mxu0 %v15252_v40 }
 0xd0a   : > { %14449 = vmatpush3.bf16.msra.mxu1 %v15254_v43  ;;  %14458 = vmatprep.subr.bf16.mxu0 %v15717_v15 }
 0xd0b   : > { %14431 = vmatmul.mubr.msk.bf16.gmra.mrb[152].mxu1 %vm1028_vm1, %v16133_v22  ;;  %14470 = vmatprep.subr.bf16.mxu1 %v15717_v15 }
 0xd0c   : > { %14439 = vmatmul.mubr.msk.bf16.vlgmr.msra.gmra.mrb[132].mxu0 %vm1028_vm1, %v16115_v8  ;;  %14450 = vmatprep.mubr.msk.bf16.mxu1 %vm1028_vm1, %v16109_v63 }
 0xd0d   : > { %14442 = vmatprep.mubr.msk.bf16.mxu0 %vm1028_vm1, %v16127_v28 }
 0xd13   : > { %14451 = vmatmul.mubr.msk.bf16.vlgmr.msra.gmra.mrb[156].mxu1 %vm1028_vm1, %v16115_v8 }
 0xd14   : > { %14443 = vmatmul.mubr.msk.bf16.gmra.mrb[136].mxu0 %vm1028_vm1, %v16133_v22  ;;  %14454 = vmatprep.mubr.msk.bf16.mxu1 %vm1028_vm1, %v16127_v28 }
 0xd15   : > { %14460 = vmatprep.mubr.msk.bf16.mxu0 %vm15718_vm2, %v15717_v15 }
 0xd1b   : > { %14455 = vmatmul.mubr.msk.bf16.gmra.mrb[160].mxu1 %vm1028_vm1, %v16133_v22 }
 0xd1c   : > { %14472 = vmatprep.mubr.msk.bf16.mxu1 %vm15718_vm2, %v15717_v15 }
 0xdb6   : > { %v16902_v63 = vpop.f32.mrb[132].mxu1 }
 0xdb7   : > { %v14378_v45 = vpop.f32.mrb[133].mxu1 }
 0xdb8   : > { %v4602_v37 = vpop.f32.mrb[134].mxu1 }
 0xdb9   : > { %v14379_v8 = vpop.f32.mrb[135].mxu1 }
 0xdba   : > { %v16936_v8 = vld [vmem:[%s18801_s9 + $0x3] ss:$0 sm:$0xff] }
 0xdbe   : > { %v16904_v44 = vpop.f32.mrb[136].mxu1 }
 0xdbf   : > { %v16906_v61 = vpop.f32.mrb[116].mxu0  ;;  %v14390_v59 = vpop.f32.mrb[137].mxu1 }
 0xdc0   : > { %v14384_v28 = vpop.f32.mrb[117].mxu0  ;;  %v4694_v48 = vpop.f32.mrb[138].mxu1 }
 0xdc1   : > { %v4648_v32 = vpop.f32.mrb[118].mxu0  ;;  %v14391_v46 = vpop.f32.mrb[139].mxu1  ;;  %v16942_v48 = vld [vmem:[%s18747_s12 + $0x3] ss:$0 sm:$0xff] }
 0xdc2   : > { %v14385_v56 = vpop.f32.mrb[119].mxu0 }
 0xdc6   : > { %v16908_v18 = vpop.f32.mrb[140].mxu1 }
 0xdc7   : > { %v16910_v22 = vpop.f32.mrb[120].mxu0  ;;  %v14402_v41 = vpop.f32.mrb[141].mxu1 }
 0xdc8   : > { %v14396_v58 = vpop.f32.mrb[121].mxu0  ;;  %v4786_v6 = vpop.f32.mrb[142].mxu1 }
 0xdc9   : > { %v4740_v54 = vpop.f32.mrb[122].mxu0  ;;  %v14403_v53 = vpop.f32.mrb[143].mxu1 }
 0xdca   : > { %v14397_v1 = vpop.f32.mrb[123].mxu0 }
 0xdce   : > { %v16912_v55 = vpop.f32.mrb[144].mxu1 }
 0xdcf   : > { %v16914_v35 = vpop.f32.mrb[124].mxu0  ;;  %v14414_v25 = vpop.f32.mrb[145].mxu1 }
 0xdd0   : > { %v14408_v17 = vpop.f32.mrb[125].mxu0  ;;  %v4878_v3 = vpop.f32.mrb[146].mxu1 }
 0xdd1   : > { %v4832_v21 = vpop.f32.mrb[126].mxu0  ;;  %v14415_v13 = vpop.f32.mrb[147].mxu1 }
 0xdd2   : > { %v14409_v19 = vpop.f32.mrb[127].mxu0 }
 0xdd6   : > { %v14428_v16 = vpop.f32.mrb[148].mxu1 }
 0xdd7   : > { %v16916_v38 = vpop.f32.mrb[128].mxu0  ;;  %v5027_v49 = vpop.f32.mrb[149].mxu1  ;;  %v5036_v56 = vadd.f32 %v14428_v16, %v16936_v8 }
 0xdd8   : > { %v14420_v31 = vpop.f32.mrb[129].mxu0  ;;  %v16918_v5 = vpop.f32.mrb[150].mxu1  ;;  %v5028_v58 = vadd.f32 %v16936_v8, %v5027_v49 }
 0xdd9   : > { %v4924_v11 = vpop.f32.mrb[130].mxu0  ;;  %v5030_v23 = vpop.f32.mrb[151].mxu1  ;;  %v13455_v16 = vpack.c.bf16 %v5036_v56, %v5036_v56 }
 0xdda   : > { %v14421_v62 = vpop.f32.mrb[131].mxu0  ;;  %v13453_v31 = vpack.c.bf16 %v5028_v58, %v5028_v58 }
 0xdde   : > { %v16925_v24 = vpop.f32.mrb[152].mxu1 }
 0xddf   : > { %v14440_v9 = vpop.f32.mrb[132].mxu0  ;;  %v5043_v51 = vpop.f32.mrb[153].mxu1 }
 0xde0   : > { %v5130_v42 = vadd.f32 %v14440_v9, %v16923_v33  ;;  %v5121_v57 = vpop.f32.mrb[133].mxu0  ;;  %v16928_v7 = vpop.f32.mrb[154].mxu1 }
 0xde1   : > { %v5122_v47 = vadd.f32 %v16923_v33, %v5121_v57  ;;  %v14441_v40 = vpop.f32.mrb[134].mxu0  ;;  %v16931_v43 = vpop.f32.mrb[155].mxu1 }
 0xde2   : > { %v13463_v45 = vpack.c.bf16 %v5130_v42, %v5130_v42  ;;  %v5124_v37 = vpop.f32.mrb[135].mxu0  ;;  %v5133_v62 = vadd.f32 %v14441_v40, %v16923_v33 }
 0xde3   : > { %v13461_v59 = vpack.c.bf16 %v5122_v47, %v5122_v47  ;;  %v5125_v46 = vadd.f32 %v16923_v33, %v5124_v37  ;;  %v5044_v37 = vadd.f32 %v16936_v8, %v5043_v51 }
 0xde4   : > { %v5406_v28 = vsel %vm1648_vm3, %v13463_v45, 0  ;;  %v5031_v45 = vadd.f32 %v16936_v8, %v5030_v23 }
 0xde5   : > { %v5314_v32 = vsel %vm1648_vm3, %v13461_v59, 0  ;;  %14471 = vmatpush3.bf16.xpose.msra.mxu1 %v5406_v28  ;;  %v13462_v17 = vpack.c.bf16 %v5125_v46, %v5125_v46  ;;  %v13464_v46 = vpack.c.bf16 %v5133_v62, %v5133_v62 }
 0xde6   : > { %14459 = vmatpush3.bf16.xpose.msra.mxu0 %v5314_v32  ;;  %v14452_v41 = vpop.f32.mrb[156].mxu1  ;;  %14482 = vmatprep.subr.bf16.mxu1 %v15717_v15  ;;  %v13454_v58 = vpack.c.bf16 %v5031_v45, %v5031_v45 }
 0xde7   : > { %v14444_v6 = vpop.f32.mrb[136].mxu0  ;;  %v16950_v54 = vadd.f32 %v14452_v41, %v16942_v48  ;;  %v5215_v53 = vpop.f32.mrb[157].mxu1  ;;  %14464 = vmatprep.subr.bf16.mxu0 %v15717_v15  ;;  %v5360_v9 = vsel %vm1648_vm3, %v13462_v17, 0 }
 0xde8   : > { %v5137_v1 = vpop.f32.mrb[137].mxu0  ;;  %v14453_v25 = vpop.f32.mrb[158].mxu1  ;;  %v5146_v42 = vadd.f32 %v14444_v6, %v16923_v33  ;;  %v13457_v6 = vpack.c.bf16 %v5044_v37, %v5044_v37  ;;  %v5216_v17 = vadd.f32 %v16942_v48, %v5215_v53 }
 0xde9   : > { %v5138_v3 = vadd.f32 %v16923_v33, %v5137_v1  ;;  %v14445_v21 = vpop.f32.mrb[138].mxu0  ;;  %v16955_v13 = vadd.f32 %v14453_v25, %v16942_v48  ;;  %v16957_v19 = vpop.f32.mrb[159].mxu1  ;;  %v5452_v1 = vsel %vm1648_vm3, %v13464_v46, 0 }
 0xdea   : > { %v5140_v49 = vpop.f32.mrb[139].mxu0  ;;  %v13467_v56 = vpack.c.bf16 %v5146_v42, %v5146_v42  ;;  %v13469_v53 = vpack.c.bf16 %v5216_v17, %v5216_v17  ;;  %v5047_v42 = vadd.f32 %v16936_v8, %v16931_v43  ;;  %v5055_v43 = vadd.f32 %v16928_v7, %v16936_v8 }
 0xdeb   : > { %v13465_v11 = vpack.c.bf16 %v5138_v3, %v5138_v3  ;;  %v5141_v3 = vadd.f32 %v16923_v33, %v5140_v49 }
 0xdec   : > { %14473 = vmatmul.mubr.msk.bf16.vlgmr.msra.gmra.mrb[164].mxu1 %vm1648_vm3, %v13455_v16  ;;  %v5590_v25 = vsel %vm1648_vm3, %v13467_v56, 0  ;;  %v5039_v16 = vadd.f32 %v16918_v5, %v16936_v8  ;;  %v5149_v5 = vadd.f32 %v14445_v21, %v16923_v33  ;;  %v13458_v21 = vpack.c.bf16 %v5047_v42, %v5047_v42 }
 0xded   : > { %v5498_v57 = vsel %vm1648_vm3, %v13465_v11, 0  ;;  %14461 = vmatmul.mubr.msk.bf16.vlgmr.msra.gmra.mrb[140].mxu0 %vm1648_vm3, %v13453_v31  ;;  %14484 = vmatprep.mubr.msk.bf16.mxu1 %vm15718_vm2, %v15717_v15  ;;  %v5052_v31 = vadd.f32 %v16925_v24, %v16936_v8  ;;  %v13466_v49 = vpack.c.bf16 %v5141_v3, %v5141_v3  ;;  %v13460_v37 = vpack.c.bf16 %v5055_v43, %v5055_v43 }
 0xdee   : > { %14465 = vmatpush3.bf16.xpose.msra.mxu0 %v5360_v9  ;;  %14483 = vmatpush3.bf16.xpose.msra.mxu1 %v5498_v57  ;;  %v14456_v47 = vpop.f32.mrb[160].mxu1  ;;  %v13456_v11 = vpack.c.bf16 %v5039_v16, %v5039_v16  ;;  %v5794_v9 = vsel %vm2132_vm4, %v13469_v53, 0  ;;  %v13468_v33 = vpack.c.bf16 %v5149_v5, %v5149_v5 }
 0xdef   : > { %v16970_v40 = vadd.f32 %v14456_v47, %v16942_v48  ;;  %v5231_v59 = vpop.f32.mrb[161].mxu1  ;;  %14466 = vmatprep.mubr.msk.bf16.mxu0 %vm15718_vm2, %v15717_v15  ;;  %14476 = vmatprep.subr.bf16.mxu0 %v15717_v15  ;;  %v13459_v62 = vpack.c.bf16 %v5052_v31, %v5052_v31  ;;  %v5544_v24 = vsel %vm1648_vm3, %v13466_v49, 0  ;;  %v5219_v47 = vadd.f32 %v16942_v48, %v16957_v19 }
 0xdf0   : > { %v16976_v28 = vadd.f32 %v16942_v48, %v5231_v59  ;;  %v14457_v32 = vpop.f32.mrb[162].mxu1  ;;  %14494 = vmatprep.subr.bf16.mxu1 %v15717_v15  ;;  %v5636_v57 = vsel %vm1648_vm3, %v13468_v33, 0 }
 0xdf1   : > { %v16980_v23 = vadd.f32 %v14457_v32, %v16942_v48  ;;  %v5234_v51 = vpop.f32.mrb[163].mxu1  ;;  %v13470_v45 = vpack.c.bf16 %v5219_v47, %v5219_v47 }
 0xdf2   : > { %v16983_v41 = vadd.f32 %v16942_v48, %v5234_v51 }
 0xdf3   : > { %v5840_v59 = vsel %vm2132_vm4, %v13470_v45, 0 }
 0xdf5   : > { %14467 = vmatmul.mubr.msk.bf16.vlgmr.msra.gmra.mrb[144].mxu0 %vm1648_vm3, %v13454_v58  ;;  %14485 = vmatmul.mubr.msk.bf16.vlgmr.msra.gmra.mrb[168].mxu1 %vm1648_vm3, %v13457_v6 }
 0xdf6   : > { %14477 = vmatpush3.bf16.xpose.msra.mxu0 %v5452_v1  ;;  %14495 = vmatpush3.bf16.xpose.msra.mxu1 %v5590_v25 }
 0xdf7   : > { %14478 = vmatprep.mubr.msk.bf16.mxu0 %vm15718_vm2, %v15717_v15  ;;  %14496 = vmatprep.mubr.msk.bf16.mxu1 %vm15718_vm2, %v15717_v15 }
 0xdf8   : > { %14488 = vmatprep.subr.bf16.mxu0 %v15717_v15  ;;  %14506 = vmatprep.subr.bf16.mxu1 %v15717_v15 }
 0xdfd   : > { %14479 = vmatmul.mubr.msk.bf16.vlgmr.msra.gmra.mrb[148].mxu0 %vm1648_vm3, %v13456_v11  ;;  %14497 = vmatmul.mubr.msk.bf16.vlgmr.msra.gmra.mrb[172].mxu1 %vm1648_vm3, %v13459_v62 }
 0xdfe   : > { %14489 = vmatpush3.bf16.xpose.msra.mxu0 %v5544_v24  ;;  %14507 = vmatpush3.bf16.msra.mxu1 %v5794_v9 }
 0xdff   : > { %14490 = vmatprep.mubr.msk.bf16.mxu0 %vm15718_vm2, %v15717_v15  ;;  %14500 = vmatprep.subr.bf16.mxu0 %v15717_v15 }
 0xe00   : > { %14508 = vmatprep.mubr.msk.bf16.mxu1 %vm15718_vm2, %v15717_v15  ;;  %14518 = vmatprep.subr.bf16.mxu1 %v15717_v15 }
 0xe05   : > { %14491 = vmatmul.mubr.msk.bf16.vlgmr.msra.gmra.mrb[152].mxu0 %vm1648_vm3, %v13458_v21 }
 0xe06   : > { %14501 = vmatpush3.bf16.xpose.msra.mxu0 %v5636_v57  ;;  %14502 = vmatprep.mubr.msk.bf16.mxu0 %vm15718_vm2, %v15717_v15 }
 0xe07   : > { %14512 = vmatprep.subr.bf16.mxu0 %v15717_v15 }
 0xe0d   : > { %14503 = vmatmul.mubr.msk.bf16.vlgmr.msra.gmra.mrb[156].mxu0 %vm1648_vm3, %v13460_v37 }
 0xe0e   : > { %14513 = vmatpush3.bf16.msra.mxu0 %v5840_v59  ;;  %14514 = vmatprep.mubr.msk.bf16.mxu0 %vm15718_vm2, %v15717_v15 }
 0xe0f   : > { %14524 = vmatprep.subr.bf16.mxu0 %v15717_v15 }
 0xebf   : > { %v5442_v48 = vpop.f32.mrb[164].mxu1 }
 0xec0   : > { %v5680_v19 = vmul.f32 0.35355338, %v5442_v48  ;;  %v5350_v32 = vpop.f32.mrb[140].mxu0  ;;  %v14474_v46 = vpop.f32.mrb[165].mxu1 }
 0xec1   : > { %v5678_v56 = vmul.f32 0.35355338, %v5350_v32  ;;  %v14462_v7 = vpop.f32.mrb[141].mxu0  ;;  %v5445_v8 = vpop.f32.mrb[166].mxu1 }
 0xec2   : > { %v5353_v51 = vpop.f32.mrb[142].mxu0  ;;  %v14475_v58 = vpop.f32.mrb[167].mxu1  ;;  %v5688_v25 = vadd.f32 %v5680_v19, %v16272_v30 }
 0xec3   : > { %v14463_v6 = vpop.f32.mrb[143].mxu0  ;;  %v5686_v1 = vadd.f32 %v5678_v56, %v16272_v30 }
 0xec4   : > { %v5700_v31 = vsel %vm1648_vm3, %v5688_v25, -inf }
 0xec5   : > { %v5694_v17 = vsel %vm1648_vm3, %v5686_v1, -inf }
 0xec6   : > { %5695 = vmax.xlane.f32.xlu0 %v5694_v17 }
 0xec8   : > { %v5396_v3 = vpop.f32.mrb[144].mxu0  ;;  %v5534_v16 = vpop.f32.mrb[168].mxu1 }
 0xec9   : > { %v5679_v53 = vmul.f32 0.35355338, %v5396_v3  ;;  %v5682_v49 = vmul.f32 0.35355338, %v5534_v16  ;;  %v14468_v11 = vpop.f32.mrb[145].mxu0  ;;  %v14486_v62 = vpop.f32.mrb[169].mxu1 }
 0xeca   : > { %v5537_v9 = vpop.f32.mrb[170].mxu1  ;;  %5701 = vmax.xlane.f32.xlu0 %v5700_v31  ;;  %v5399_v5 = vpop.f32.mrb[146].mxu0 }
 0xecb   : > { %v14469_v24 = vpop.f32.mrb[147].mxu0  ;;  %v14487_v42 = vpop.f32.mrb[171].mxu1  ;;  %v5690_v33 = vadd.f32 %v5682_v49, %v16272_v30  ;;  %v5687_v21 = vadd.f32 %v5679_v53, %v16272_v30 }
 0xecd   : > { %v5706_v57 = vsel %vm1648_vm3, %v5690_v33, -inf  ;;  %v5697_v47 = vsel %vm1648_vm3, %v5687_v21, -inf }
 0xece   : > { %5707 = vmax.xlane.f32.xlu0 %v5706_v57  ;;  %5698 = vmax.xlane.f32.xlu1 %v5697_v47 }
 0xed0   : > { %v5488_v43 = vpop.f32.mrb[148].mxu0  ;;  %v5626_v45 = vpop.f32.mrb[172].mxu1 }
 0xed1   : > { %v5681_v37 = vmul.f32 0.35355338, %v5488_v43  ;;  %v5684_v59 = vmul.f32 0.35355338, %v5626_v45  ;;  %v14480_v48 = vpop.f32.mrb[149].mxu0  ;;  %v14498_v19 = vpop.f32.mrb[173].mxu1 }
 0xed2   : > { %v5491_v32 = vpop.f32.mrb[150].mxu0  ;;  %v5629_v46 = vpop.f32.mrb[174].mxu1 }
 0xed3   : > { %v14481_v56 = vpop.f32.mrb[151].mxu0  ;;  %v14499_v7 = vpop.f32.mrb[175].mxu1  ;;  %v5692_v8 = vadd.f32 %v5684_v59, %v16272_v30  ;;  %v5689_v51 = vadd.f32 %v5681_v37, %v16272_v30 }
 0xed5   : > { %v5712_v58 = vsel %vm1648_vm3, %v5692_v8, -inf  ;;  %v5703_v6 = vsel %vm1648_vm3, %v5689_v51, -inf }
 0xed6   : > { %5713 = vmax.xlane.f32.xlu0 %v5712_v58  ;;  %5704 = vmax.xlane.f32.xlu1 %v5703_v6 }
 0xed8   : > { %v5580_v17 = vpop.f32.mrb[152].mxu0 }
 0xed9   : > { %v5683_v3 = vmul.f32 0.35355338, %v5580_v17  ;;  %v14492_v16 = vpop.f32.mrb[153].mxu0 }
 0xeda   : > { %v5583_v31 = vpop.f32.mrb[154].mxu0 }
 0xedb   : > { %v14493_v53 = vpop.f32.mrb[155].mxu0  ;;  %v5691_v49 = vadd.f32 %v5683_v3, %v16272_v30 }
 0xedd   : > { %v5709_v11 = vsel %vm1648_vm3, %v5691_v49, -inf }
 0xede   : > { %5710 = vmax.xlane.f32.xlu1 %v5709_v11 }
 0xee0   : > { %v5672_v62 = vpop.f32.mrb[156].mxu0 }
 0xee1   : > { %v5685_v9 = vmul.f32 0.35355338, %v5672_v62  ;;  %v14504_v5 = vpop.f32.mrb[157].mxu0 }
 0xee2   : > { %v5675_v24 = vpop.f32.mrb[158].mxu0 }
 0xee3   : > { %v14505_v42 = vpop.f32.mrb[159].mxu0  ;;  %v5693_v57 = vadd.f32 %v5685_v9, %v16272_v30 }
 0xee5   : > { %v5715_v47 = vsel %vm1648_vm3, %v5693_v57, -inf }
 0xee6   : > { %5716 = vmax.xlane.f32.xlu1 %v5715_v47 }
 0xf53   : > { %v5696_v43 = vpop.xlane.xlu0 %5695 }
 0xf54   : > { %v5718_v45 = vsub.f32 %v5686_v1, %v5696_v43 }
 0xf56   : > { %v5726_v37 = vmul.f32 1.442695, %v5718_v45 }
 0xf57   : > { %v5702_v59 = vpop.xlane.xlu0 %5701 }
 0xf58   : > { %15434 = vpow2.f32 %v5726_v37  ;;  %v5720_v48 = vsub.f32 %v5688_v25, %v5702_v59 }
 0xf5a   : > { %v5730_v19 = vmul.f32 1.442695, %v5720_v48 }
 0xf5b   : > { %v5708_v32 = vpop.xlane.xlu0 %5707  ;;  %v5699_v46 = vpop.xlane.xlu1 %5698 }
 0xf5c   : > { %15436 = vpow2.f32 %v5730_v19  ;;  %v5722_v56 = vsub.f32 %v5690_v33, %v5708_v32  ;;  %v5719_v7 = vsub.f32 %v5687_v21, %v5699_v46 }
 0xf5e   : > { %v5734_v58 = vmul.f32 1.442695, %v5722_v56  ;;  %v5728_v6 = vmul.f32 1.442695, %v5719_v7 }
 0xf60   : > { %15438 = vpow2.f32 %v5734_v58 }
 0xf61   : > { %15440 = vpow2.f32 %v5728_v6 }
 0xf62   : > { %v17044_v17 = vpop.eup %15434 }
 0xf63   : > { %v5714_v3 = vpop.xlane.xlu0 %5713  ;;  %v5705_v16 = vpop.xlane.xlu1 %5704  ;;  %v5742_v1 = vsel %vm1648_vm3, %v17044_v17, 0.0 }
 0xf64   : > { %v5724_v31 = vsub.f32 %v5692_v8, %v5714_v3  ;;  %v5721_v53 = vsub.f32 %v5689_v51, %v5705_v16  ;;  %5743 = vadd.xlane.f32.xlu0 %v5742_v1 }
 0xf66   : > { %v17048_v25 = vpop.eup %15436  ;;  %v5738_v11 = vmul.f32 1.442695, %v5724_v31  ;;  %v5732_v62 = vmul.f32 1.442695, %v5721_v53  ;;  %v13475_v31 = vpack.c.bf16 %v16970_v40, %v16970_v40 }
 0xf67   : > { %v5748_v33 = vsel %vm1648_vm3, %v17048_v25, 0.0 }
 0xf68   : > { %15442 = vpow2.f32 %v5738_v11  ;;  %5749 = vadd.xlane.f32.xlu0 %v5748_v33 }
 0xf69   : > { %15444 = vpow2.f32 %v5732_v62 }
 0xf6a   : > { %v17052_v21 = vpop.eup %15438 }
 0xf6b   : > { %v17054_v9 = vpop.eup %15440  ;;  %v5711_v5 = vpop.xlane.xlu1 %5710  ;;  %v5754_v8 = vsel %vm1648_vm3, %v17052_v21, 0.0 }
 0xf6c   : > { %v5723_v51 = vsub.f32 %v5691_v49, %v5711_v5  ;;  %5755 = vadd.xlane.f32.xlu0 %v5754_v8  ;;  %v5745_v24 = vsel %vm1648_vm3, %v17054_v9, 0.0 }
 0xf6d   : > { %5746 = vadd.xlane.f32.xlu1 %v5745_v24 }
 0xf6e   : > { %v5736_v42 = vmul.f32 1.442695, %v5723_v51 }
 0xf70   : > { %15446 = vpow2.f32 %v5736_v42 }
 0xf72   : > { %v17060_v47 = vpop.eup %15442 }
 0xf73   : > { %v17062_v43 = vpop.eup %15444  ;;  %v5717_v45 = vpop.xlane.xlu1 %5716  ;;  %v5760_v37 = vsel %vm1648_vm3, %v17060_v47, 0.0 }
 0xf74   : > { %v5725_v59 = vsub.f32 %v5693_v57, %v5717_v45  ;;  %5761 = vadd.xlane.f32.xlu0 %v5760_v37  ;;  %v5751_v49 = vsel %vm1648_vm3, %v17062_v43, 0.0  ;;  %v13476_v45 = vpack.c.bf16 %v16980_v23, %v16980_v23 }
 0xf75   : > { %5752 = vadd.xlane.f32.xlu1 %v5751_v49 }
 0xf76   : > { %v5740_v48 = vmul.f32 1.442695, %v5725_v59 }
 0xf78   : > { %15448 = vpow2.f32 %v5740_v48  ;;  %v6116_v48 = vsel %vm2132_vm4, %v13476_v45, 0 }
 0xf7a   : > { %v17068_v19 = vpop.eup %15446 }
 0xf7b   : > { %v5757_v32 = vsel %vm1648_vm3, %v17068_v19, 0.0 }
 0xf7c   : > { %5758 = vadd.xlane.f32.xlu1 %v5757_v32 }
 0xf82   : > { %v17072_v46 = vpop.eup %15448 }
 0xf83   : > { %v5763_v56 = vsel %vm1648_vm3, %v17072_v46, 0.0 }
 0xf84   : > { %5764 = vadd.xlane.f32.xlu1 %v5763_v56 }
 0xf8a   : > { %3704 = vrot.lane.b32.xlu0 %v16646_v34, %s18775_s8 }
 0xf8e   : > { %4935 = vrot.lane.b32.xlu0 %v16902_v63, %s18771_s29 }
 0xf92   : > { %4939 = vrot.lane.b32.xlu0 %v16904_v44, %s18771_s29 }
 0xf95   : > { %3706 = vrot.lane.b32.xlu1 %v16650_v52, %s18775_s8 }
 0xf96   : > { %3712 = vrot.lane.b32.xlu0 %v16652_v50, %s18775_s8 }
 0xf99   : > { %3708 = vrot.lane.b32.xlu1 %v16648_v0, %s18775_s8 }
 0xf9a   : > { %3716 = vrot.lane.b32.xlu0 %v16656_v27, %s18775_s8  ;;  %v13471_v27 = vpack.c.bf16 %v16950_v54, %v16950_v54  ;;  %v13472_v54 = vpack.c.bf16 %v16955_v13, %v16955_v13 }
 0xf9c   : > { %v5886_v44 = vsel %vm2132_vm4, %v13471_v27, 0 }
 0xf9d   : > { %3710 = vrot.lane.b32.xlu1 %v16654_v10, %s18775_s8 }
 0xf9e   : > { %4943 = vrot.lane.b32.xlu0 %v16908_v18, %s18771_s29 }
 0xfa1   : > { %4937 = vrot.lane.b32.xlu1 %v16906_v61, %s18771_s29 }
 0xfa2   : > { %4947 = vrot.lane.b32.xlu0 %v16912_v55, %s18771_s29 }
 0xfa5   : > { %4941 = vrot.lane.b32.xlu1 %v16910_v22, %s18771_s29 }
 0xfa9   : > { %3714 = vrot.lane.b32.xlu1 %v16658_v2, %s18775_s8 }
 0xfad   : > { %3718 = vrot.lane.b32.xlu1 %v16660_v12, %s18775_s8  ;;  %s794_s8 = scalar_lea.vmem %s18761_s26, %s12649_s10 }
 0xfb1   : > { %4945 = vrot.lane.b32.xlu1 %v16914_v35, %s18771_s29  ;;  %v13473_v35 = vpack.c.bf16 %v16976_v28, %v16976_v28  ;;  %v5932_v28 = vsel %vm2132_vm4, %v13472_v54, 0 }
 0xfb5   : > { %4949 = vrot.lane.b32.xlu1 %v16916_v38, %s18771_s29  ;;  %s18804_s29 = smov 24  }
 0xff1   : > { %v5744_v34 = vpop.xlane.xlu0 %5743 }
 0xff2   : > { %15450 = vrcp.f32 %v5744_v34 }
 0xff5   : > { %v5750_v0 = vpop.xlane.xlu0 %5749 }
 0xff6   : > { %15452 = vrcp.f32 %v5750_v0 }
 0xff9   : > { %v5756_v50 = vpop.xlane.xlu0 %5755 }
 0xffa   : > { %v5747_v52 = vpop.xlane.xlu1 %5746 }
 0xffb   : > { %15454 = vrcp.f32 %v5747_v52 }
 0xffc   : > { %v15451_v10 = vpop.eup %15450  ;;  %15456 = vrcp.f32 %v5756_v50 }
 0xffd   : > { %v5774_v2 = vmul.f32 %v15451_v10, %v17044_v17  ;;  %v5978_v17 = vsel %vm2132_vm4, %v13473_v35, 0 }
 0xfff   : > { %v5782_v12 = vpack.c.bf16 %v5774_v2, %v5774_v2 }
0x1000   : > { %v15453_v63 = vpop.eup %15452 }
0x1001   : > { %14509 = vmatmul.mubr.msk.bf16.vlgmr.msra.gmra.mrb[176].mxu1 %vm1648_vm3, %v5782_v12  ;;  %v5762_v61 = vpop.xlane.xlu0 %5761  ;;  %v5776_v22 = vmul.f32 %v15453_v63, %v17048_v25  ;;  %v13474_v25 = vpack.c.bf16 %v16983_v41, %v16983_v41 }
0x1002   : > { %14519 = vmatpush3.bf16.msra.mxu1 %v5886_v44  ;;  %v5753_v18 = vpop.xlane.xlu1 %5752  ;;  %14520 = vmatprep.mubr.msk.bf16.mxu1 %vm15718_vm2, %v15717_v15 }
0x1003   : > { %15458 = vrcp.f32 %v5753_v18  ;;  %14530 = vmatprep.subr.bf16.mxu1 %v15717_v15  ;;  %v5784_v7 = vpack.c.bf16 %v5776_v22, %v5776_v22  ;;  %v6024_v51 = vsel %vm2132_vm4, %v13474_v25, 0  ;;  %v15256_v18 = vld [vmem:[%s18748_s13 + $0x8] sm:$0xff]  }
0x1004   : > { %15460 = vrcp.f32 %v5762_v61  ;;  %v15255_v61 = vld [vmem:[%s18748_s13] sm:$0xff]  }
0x1005   : > { %v15455_v55 = vpop.eup %15454  ;;  %v3705_v38 = vpop.permute.xlu0 %3704 }
0x1006   : > { %3729 = vst.msk [vmem:[#allocation2] sm:$0xff] %vm3728_vm6, %v3705_v38  ;;  %v5775_v57 = vmul.f32 %v15455_v55, %v17054_v9  ;;  %v15457_v58 = vpop.eup %15456  ;;  %v6070_v9 = vsel %vm2132_vm4, %v13475_v31, 0 }
0x1007   : > { %v5778_v13 = vmul.f32 %v15457_v58, %v17052_v21 }
0x1008   : > { %v5783_v6 = vpack.c.bf16 %v5775_v57, %v5775_v57 }
0x1009   : > { %14521 = vmatmul.mubr.msk.bf16.vlgmr.msra.gmra.mrb[180].mxu1 %vm1648_vm3, %v5784_v7  ;;  %v4936_v3 = vpop.permute.xlu0 %4935  ;;  %v5759_v16 = vpop.xlane.xlu1 %5758  ;;  %v5786_v62 = vpack.c.bf16 %v5778_v13, %v5778_v13 }
0x100a   : > { %14531 = vmatpush3.bf16.msra.mxu1 %v5978_v17  ;;  %4960 = vst.msk [vmem:[#allocation2] sm:$0xff] %vm4959_vm7, %v4936_v3  ;;  %14515 = vmatmul.mubr.msk.bf16.vlgmr.msra.gmra.mrb[160].mxu0 %vm1648_vm3, %v5783_v6  ;;  %15462 = vrcp.f32 %v5759_v16 }
0x100b   : > { %14525 = vmatpush3.bf16.msra.mxu0 %v5932_v28  ;;  %14526 = vmatprep.mubr.msk.bf16.mxu0 %vm15718_vm2, %v15717_v15 }
0x100c   : > { %14532 = vmatprep.mubr.msk.bf16.mxu1 %vm15718_vm2, %v15717_v15  ;;  %14536 = vmatprep.subr.bf16.mxu0 %v15717_v15 }
0x100d   : > { %v15459_v1 = vpop.eup %15458  ;;  %v4940_v53 = vpop.permute.xlu0 %4939  ;;  %14542 = vmatprep.subr.bf16.mxu1 %v15717_v15 }
0x100e   : > { %v5777_v11 = vmul.f32 %v15459_v1, %v17062_v43  ;;  %v15461_v33 = vpop.eup %15460 }
0x100f   : > { %v5780_v40 = vmul.f32 %v15461_v33, %v17060_v47 }
0x1010   : > { %v5785_v21 = vpack.c.bf16 %v5777_v11, %v5777_v11 }
0x1011   : > { %14533 = vmatmul.mubr.msk.bf16.vlgmr.msra.gmra.mrb[184].mxu1 %vm1648_vm3, %v5786_v62  ;;  %v3713_v5 = vpop.permute.xlu0 %3712  ;;  %v5765_v8 = vpop.xlane.xlu1 %5764  ;;  %v5788_v37 = vpack.c.bf16 %v5780_v40, %v5780_v40 }
0x1012   : > { %14543 = vmatpush3.bf16.msra.mxu1 %v6070_v9  ;;  %3733 = vst.msk [vmem:[#allocation2 + $0x20] sm:$0xff] %vm3728_vm6, %v3713_v5  ;;  %14527 = vmatmul.mubr.msk.bf16.vlgmr.msra.gmra.mrb[164].mxu0 %vm1648_vm3, %v5785_v21  ;;  %15464 = vrcp.f32 %v5765_v8 }
0x1013   : > { %14537 = vmatpush3.bf16.msra.mxu0 %v6024_v51  ;;  %14538 = vmatprep.mubr.msk.bf16.mxu0 %vm15718_vm2, %v15717_v15 }
0x1014   : > { %v15463_v41 = vpop.eup %15462  ;;  %14544 = vmatprep.mubr.msk.bf16.mxu1 %vm15718_vm2, %v15717_v15  ;;  %14548 = vmatprep.subr.bf16.mxu0 %v15717_v15 }
0x1015   : > { %v3717_v24 = vpop.permute.xlu0 %3716  ;;  %v3707_v42 = vpop.permute.xlu1 %3706  ;;  %v5779_v43 = vmul.f32 %v15463_v41, %v17068_v19  ;;  %14554 = vmatprep.subr.bf16.mxu1 %v15255_v61 }
0x1016   : > { %3735 = vst.msk [vmem:[#allocation2 + $0x30] sm:$0xff] %vm3728_vm6, %v3717_v24  ;;  %3730 = vst.msk [vmem:[#allocation2 + $0x8] sm:$0xff] %vm3728_vm6, %v3707_v42 }
0x1017   : > { %v5787_v59 = vpack.c.bf16 %v5779_v43, %v5779_v43 }
0x1019   : > { %14545 = vmatmul.mubr.msk.bf16.vlgmr.msra.gmra.mrb[188].mxu1 %vm1648_vm3, %v5788_v37  ;;  %v4944_v47 = vpop.permute.xlu0 %4943  ;;  %v3709_v49 = vpop.permute.xlu1 %3708 }
0x101a   : > { %4964 = vst.msk [vmem:[#allocation2 + $0x20] sm:$0xff] %vm4959_vm7, %v4944_v47  ;;  %14539 = vmatmul.mubr.msk.bf16.vlgmr.msra.gmra.mrb[168].mxu0 %vm1648_vm3, %v5787_v59  ;;  %14555 = vmatpush3.bf16.msra.mxu1 %v15255_v61 }
0x101b   : > { %3731 = vst.msk [vmem:[#allocation2 + $0x10] sm:$0xff] %vm3728_vm6, %v3709_v49  ;;  %14549 = vmatpush3.bf16.msra.mxu0 %v6116_v48  ;;  %14550 = vmatprep.mubr.msk.bf16.mxu0 %vm15718_vm2, %v15717_v15 }
0x101c   : > { %4962 = vst.msk [vmem:[#allocation2 + $0x10] sm:$0xff] %vm4959_vm7, %v4940_v53  ;;  %v15465_v23 = vpop.eup %15464  ;;  %14556 = vmatprep.subr.bf16.mxu1 %v15256_v18 }
0x101d   : > { %v4948_v19 = vpop.permute.xlu0 %4947  ;;  %v3711_v32 = vpop.permute.xlu1 %3710  ;;  %v5781_v56 = vmul.f32 %v15465_v23, %v17072_v46 }
0x101e   : > { %4966 = vst.msk [vmem:[#allocation2 + $0x30] sm:$0xff] %vm4959_vm7, %v4948_v19  ;;  %14557 = vmatpush3.bf16.msra.mxu1 %v15256_v18 }
0x101f   : > { %3732 = vst.msk [vmem:[#allocation2 + $0x18] sm:$0xff] %vm3728_vm6, %v3711_v32  ;;  %v5789_v34 = vpack.c.bf16 %v5781_v56, %v5781_v56 }
0x1021   : > { %v4938_v0 = vpop.permute.xlu1 %4937 }
0x1022   : > { %14551 = vmatmul.mubr.msk.bf16.vlgmr.msra.gmra.mrb[172].mxu0 %vm1648_vm3, %v5789_v34  ;;  %4961 = vst.msk [vmem:[#allocation2 + $0x8] sm:$0xff] %vm4959_vm7, %v4938_v0 }
0x1025   : > { %v4942_v52 = vpop.permute.xlu1 %4941 }
0x1026   : > { %4963 = vst.msk [vmem:[#allocation2 + $0x18] sm:$0xff] %vm4959_vm7, %v4942_v52 }
0x1029   : > { %v3715_v50 = vpop.permute.xlu1 %3714 }
0x102a   : > { %3734 = vst.msk [vmem:[#allocation2 + $0x28] sm:$0xff] %vm3728_vm6, %v3715_v50 }
0x102d   : > { %v3719_v10 = vpop.permute.xlu1 %3718 }
0x102e   : > { %3736 = vst.msk [vmem:[#allocation2 + $0x38] sm:$0xff] %vm3728_vm6, %v3719_v10 }
0x1031   : > { %v4946_v46 = vpop.permute.xlu1 %4945 }
0x1032   : > { %4965 = vst.msk [vmem:[#allocation2 + $0x28] sm:$0xff] %vm4959_vm7, %v4946_v46 }
0x1035   : > { %v4950_v27 = vpop.permute.xlu1 %4949 }
0x1036   : > { %4967 = vst.msk [vmem:[#allocation2 + $0x38] sm:$0xff] %vm4959_vm7, %v4950_v27 }
0x10d4   : > { %v5830_v2 = vpop.f32.mrb[176].mxu1 }
0x10d5   : > { %6166 = vrot.lane.b32.xlu0 %v5830_v2, %s18773_s4  ;;  %v14510_v12 = vpop.f32.mrb[177].mxu1  ;;  %v12967_v2 = vld [vmem:[%s18749_s14] ss:$0 sm:$0xff] }
0x10d6   : > { %v5833_v63 = vpop.f32.mrb[178].mxu1 }
0x10d7   : > { %v14511_v44 = vpop.f32.mrb[179].mxu1 }
0x10dc   : > { %v5922_v22 = vpop.f32.mrb[180].mxu1 }
0x10dd   : > { %v5876_v55 = vpop.f32.mrb[160].mxu0  ;;  %6170 = vrot.lane.b32.xlu0 %v5922_v22, %s18773_s4  ;;  %v14522_v35 = vpop.f32.mrb[181].mxu1 }
0x10de   : > { %6168 = vrot.lane.b32.xlu1 %v5876_v55, %s18773_s4  ;;  %v14516_v38 = vpop.f32.mrb[161].mxu0  ;;  %v5925_v54 = vpop.f32.mrb[182].mxu1 }
0x10df   : > { %v5879_v57 = vpop.f32.mrb[162].mxu0  ;;  %v14523_v7 = vpop.f32.mrb[183].mxu1 }
0x10e0   : > { %v14517_v58 = vpop.f32.mrb[163].mxu0 }
0x10e4   : > { %v6014_v6 = vpop.f32.mrb[184].mxu1 }
0x10e5   : > { %v5968_v17 = vpop.f32.mrb[164].mxu0  ;;  %6174 = vrot.lane.b32.xlu0 %v6014_v6, %s18773_s4  ;;  %v14534_v3 = vpop.f32.mrb[185].mxu1 }
0x10e6   : > { %6172 = vrot.lane.b32.xlu1 %v5968_v17, %s18773_s4  ;;  %v14528_v16 = vpop.f32.mrb[165].mxu0  ;;  %v6017_v28 = vpop.f32.mrb[186].mxu1 }
0x10e7   : > { %v5971_v13 = vpop.f32.mrb[166].mxu0  ;;  %v14535_v1 = vpop.f32.mrb[187].mxu1 }
0x10e8   : > { %v14529_v31 = vpop.f32.mrb[167].mxu0 }
0x10ec   : > { %v6106_v53 = vpop.f32.mrb[188].mxu1 }
0x10ed   : > { %v6060_v25 = vpop.f32.mrb[168].mxu0  ;;  %6178 = vrot.lane.b32.xlu0 %v6106_v53, %s18773_s4  ;;  %v14546_v11 = vpop.f32.mrb[189].mxu1 }
0x10ee   : > { %6176 = vrot.lane.b32.xlu1 %v6060_v25, %s18773_s4  ;;  %v14540_v62 = vpop.f32.mrb[169].mxu0  ;;  %v6109_v33 = vpop.f32.mrb[190].mxu1 }
0x10ef   : > { %v6063_v21 = vpop.f32.mrb[170].mxu0  ;;  %v14547_v9 = vpop.f32.mrb[191].mxu1 }
0x10f0   : > { %v14541_v5 = vpop.f32.mrb[171].mxu0 }
0x10f5   : > { %v6152_v8 = vpop.f32.mrb[172].mxu0 }
0x10f6   : > { %6180 = vrot.lane.b32.xlu1 %v6152_v8, %s18773_s4  ;;  %v14552_v51 = vpop.f32.mrb[173].mxu0 }
0x10f7   : > { %v6155_v40 = vpop.f32.mrb[174].mxu0 }
0x10f8   : > { %v14553_v41 = vpop.f32.mrb[175].mxu0 }
0x1147   : > { %v6167_v24 = vpop.permute.xlu0 %6166 }
0x1148   : > { %6191 = vst.msk [vmem:[#allocation2] sm:$0xff] %vm6190_vm8, %v6167_v24 }
0x114f   : > { %v6171_v42 = vpop.permute.xlu0 %6170  ;;  %v6199_v59 = vld [vmem:[#allocation2] sm:$0xff] }
0x1150   : > { %6193 = vst.msk [vmem:[#allocation2 + $0x10] sm:$0xff] %vm6190_vm8, %v6171_v42  ;;  %v6169_v43 = vpop.permute.xlu1 %6168 }
0x1151   : > { %6192 = vst.msk [vmem:[#allocation2 + $0x8] sm:$0xff] %vm6190_vm8, %v6169_v43 }
0x1157   : > { %v6175_v45 = vpop.permute.xlu0 %6174  ;;  %v6201_v19 = vld [vmem:[#allocation2 + $0x10] sm:$0xff] }
0x1158   : > { %6195 = vst.msk [vmem:[#allocation2 + $0x20] sm:$0xff] %vm6190_vm8, %v6175_v45  ;;  %v6173_v37 = vpop.permute.xlu1 %6172  ;;  %v6200_v47 = vld [vmem:[#allocation2 + $0x8] sm:$0xff] }
0x1159   : > { %6194 = vst.msk [vmem:[#allocation2 + $0x18] sm:$0xff] %vm6190_vm8, %v6173_v37  ;;  %v6207_v49 = vpack.c.bf16 %v6200_v47, %v6199_v59 }
0x115b   : > { %14558 = vmatprep.mubr.msk.bf16.mxu1 %vm1028_vm1, %v6207_v49 }
0x115f   : > { %v6179_v48 = vpop.permute.xlu0 %6178  ;;  %v6203_v0 = vld [vmem:[#allocation2 + $0x20] sm:$0xff] }
0x1160   : > { %6197 = vst.msk [vmem:[#allocation2 + $0x30] sm:$0xff] %vm6190_vm8, %v6179_v48  ;;  %v6177_v23 = vpop.permute.xlu1 %6176  ;;  %v6202_v32 = vld [vmem:[#allocation2 + $0x18] sm:$0xff] }
0x1161   : > { %6196 = vst.msk [vmem:[#allocation2 + $0x28] sm:$0xff] %vm6190_vm8, %v6177_v23  ;;  %v6208_v56 = vpack.c.bf16 %v6202_v32, %v6201_v19 }
0x1163   : > { %14559 = vmatmul.mubr.msk.bf16.vlgmr.msra.gmra.mrb[192].mxu1 %vm1028_vm1, %v6208_v56 }
0x1167   : > { %v6205_v10 = vld [vmem:[#allocation2 + $0x30] sm:$0xff] }
0x1168   : > { %v6181_v34 = vpop.permute.xlu1 %6180  ;;  %v6204_v52 = vld [vmem:[#allocation2 + $0x28] sm:$0xff] }
0x1169   : > { %6198 = vst.msk [vmem:[#allocation2 + $0x38] sm:$0xff] %vm6190_vm8, %v6181_v34  ;;  %v6209_v50 = vpack.c.bf16 %v6204_v52, %v6203_v0 }
0x116b   : > { %14562 = vmatprep.mubr.msk.bf16.mxu1 %vm1028_vm1, %v6209_v50 }
0x1170   : > { %v6206_v46 = vld [vmem:[#allocation2 + $0x38] sm:$0xff] }
0x1171   : > { %v6210_v27 = vpack.c.bf16 %v6206_v46, %v6205_v10 }
0x1173   : > { %14563 = vmatmul.mubr.msk.bf16.gmra.mrb[196].mxu1 %vm1028_vm1, %v6210_v27 }
0x1236   : > { %v14560_v12 = vpop.f32.mrb[192].mxu1 }
0x1237   : > { %v6280_v63 = vpop.f32.mrb[193].mxu1  ;;  %v6289_v44 = vadd.f32 %v14560_v12, %v12967_v2 }
0x1238   : > { %v6281_v61 = vadd.f32 %v12967_v2, %v6280_v63  ;;  %v14561_v18 = vpop.f32.mrb[194].mxu1 }
0x1239   : > { %v6283_v22 = vpop.f32.mrb[195].mxu1  ;;  %v17207_v38 = vadd.f32 %v6289_v44, %v16011_v14  ;;  %v6292_v54 = vadd.f32 %v14561_v18, %v12967_v2 }
0x123a   : > { %v17204_v55 = vadd.f32 %v6281_v61, %v16001_v60  ;;  %v6284_v35 = vadd.f32 %v12967_v2, %v6283_v22 }
0x123b   : > { %v17217_v6 = vadd.f32 %v6292_v54, %v16016_v20  ;;  %v6327_v60 = vsel %vm1028_vm1, %v17207_v38, 0.0 }
0x123c   : > { %v17210_v57 = vadd.f32 %v6284_v35, %v16006_v4  ;;  %v6321_v7 = vsel %vm1028_vm1, %v17204_v55, 0.0 }
0x123d   : > { %6322 = vadd.xlane.f32.xlu0 %v6321_v7  ;;  %v6330_v14 = vsel %vm1028_vm1, %v17217_v6, 0.0 }
0x123e   : > { %v6324_v58 = vsel %vm1028_vm1, %v17210_v57, 0.0 }
0x123f   : > { %6325 = vadd.xlane.f32.xlu1 %v6324_v58 }
0x1241   : > { %6328 = vadd.xlane.f32.xlu0 %v6327_v60  ;;  %v15257_v60 = vld [vmem:[%s18752_s17] sm:$0xff]  }
0x1242   : > { %14566 = vmatprep.subr.bf16.mxu0 %v15257_v60 }
0x1243   : > { %14567 = vmatpush3.bf16.msra.mxu0 %v15257_v60 }
0x1245   : > { %6331 = vadd.xlane.f32.xlu0 %v6330_v14  ;;  %v15258_v14 = vld [vmem:[%s18752_s17 + $0x8] sm:$0xff]  }
0x1246   : > { %v14564_v4 = vpop.f32.mrb[196].mxu1  ;;  %14568 = vmatprep.subr.bf16.mxu0 %v15258_v14 }
0x1247   : > { %v6296_v17 = vpop.f32.mrb[197].mxu1  ;;  %v6305_v3 = vadd.f32 %v14564_v4, %v12967_v2  ;;  %14569 = vmatpush3.bf16.msra.mxu0 %v15258_v14 }
0x1248   : > { %v6297_v16 = vadd.f32 %v12967_v2, %v6296_v17  ;;  %v14565_v28 = vpop.f32.mrb[198].mxu1 }
0x1249   : > { %v6299_v13 = vpop.f32.mrb[199].mxu1  ;;  %v6308_v31 = vadd.f32 %v14565_v28, %v12967_v2  ;;  %v17227_v53 = vadd.f32 %v6305_v3, %v16032_v36 }
0x124a   : > { %v17224_v1 = vadd.f32 %v6297_v16, %v16022_v26  ;;  %v6300_v20 = vadd.f32 %v12967_v2, %v6299_v13 }
0x124b   : > { %v17235_v62 = vadd.f32 %v6308_v31, %v16036_v39  ;;  %v6339_v26 = vsel %vm1028_vm1, %v17227_v53, 0.0 }
0x124c   : > { %v17230_v25 = vadd.f32 %v6300_v20, %v16026_v29  ;;  %v6333_v11 = vsel %vm1028_vm1, %v17224_v1, 0.0 }
0x124d   : > { %6334 = vadd.xlane.f32.xlu0 %v6333_v11  ;;  %v6342_v36 = vsel %vm1028_vm1, %v17235_v62, 0.0 }
0x124e   : > { %v6336_v33 = vsel %vm1028_vm1, %v17230_v25, 0.0 }
0x124f   : > { %6337 = vadd.xlane.f32.xlu1 %v6336_v33 }
0x1251   : > { %6340 = vadd.xlane.f32.xlu0 %v6339_v26 }
0x1253   : > { %6343 = vadd.xlane.f32.xlu1 %v6342_v36 }
0x12ca   : > { %v6323_v29 = vpop.xlane.xlu0 %6322 }
0x12cb   : > { %v6345_v21 = vmul.f32 0.03125, %v6323_v29 }
0x12cc   : > { %v6326_v9 = vpop.xlane.xlu1 %6325 }
0x12cd   : > { %v17244_v5 = vsub.f32 %v17204_v55, %v6345_v21  ;;  %v6346_v39 = vmul.f32 0.03125, %v6326_v9  ;;  %v12974_v21 = vld [vmem:[%s18750_s15] ss:$0 sm:$0xff] }
0x12ce   : > { %v6329_v8 = vpop.xlane.xlu0 %6328 }
0x12cf   : > { %v17247_v51 = vsub.f32 %v17210_v57, %v6346_v39  ;;  %v6347_v40 = vmul.f32 0.03125, %v6329_v8  ;;  %v6361_v41 = vmul.f32 %v17244_v5, %v17244_v5 }
0x12d1   : > { %v17252_v24 = vsub.f32 %v17207_v38, %v6347_v40  ;;  %v6369_v42 = vsel %vm1028_vm1, %v6361_v41, 0.0  ;;  %v6362_v43 = vmul.f32 %v17247_v51, %v17247_v51 }
0x12d2   : > { %v6332_v45 = vpop.xlane.xlu0 %6331  ;;  %6370 = vadd.xlane.f32.xlu0 %v6369_v42 }
0x12d3   : > { %v6348_v37 = vmul.f32 0.03125, %v6332_v45  ;;  %v6372_v59 = vsel %vm1028_vm1, %v6362_v43, 0.0  ;;  %v6363_v47 = vmul.f32 %v17252_v24, %v17252_v24 }
0x12d4   : > { %6373 = vadd.xlane.f32.xlu1 %v6372_v59 }
0x12d5   : > { %v17261_v49 = vsub.f32 %v17217_v6, %v6348_v37  ;;  %v6375_v48 = vsel %vm1028_vm1, %v6363_v47, 0.0  ;;  %v12975_v47 = vld [vmem:[%s18751_s16] ss:$0 sm:$0xff] }
0x12d6   : > { %6376 = vadd.xlane.f32.xlu0 %v6375_v48 }
0x12d7   : > { %v6364_v23 = vmul.f32 %v17261_v49, %v17261_v49 }
0x12d9   : > { %v6378_v19 = vsel %vm1028_vm1, %v6364_v23, 0.0 }
0x12da   : > { %v6335_v32 = vpop.xlane.xlu0 %6334  ;;  %6379 = vadd.xlane.f32.xlu1 %v6378_v19 }
0x12db   : > { %v6349_v56 = vmul.f32 0.03125, %v6335_v32 }
0x12dc   : > { %v6338_v34 = vpop.xlane.xlu1 %6337 }
0x12dd   : > { %v17268_v0 = vsub.f32 %v17224_v1, %v6349_v56  ;;  %v6350_v52 = vmul.f32 0.03125, %v6338_v34 }
0x12de   : > { %v6341_v50 = vpop.xlane.xlu0 %6340 }
0x12df   : > { %v17271_v10 = vsub.f32 %v17230_v25, %v6350_v52  ;;  %v6351_v46 = vmul.f32 0.03125, %v6341_v50  ;;  %v6365_v27 = vmul.f32 %v17268_v0, %v17268_v0 }
0x12e0   : > { %v6344_v2 = vpop.xlane.xlu1 %6343 }
0x12e1   : > { %v17276_v12 = vsub.f32 %v17227_v53, %v6351_v46  ;;  %v6352_v63 = vmul.f32 0.03125, %v6344_v2  ;;  %v6381_v44 = vsel %vm1028_vm1, %v6365_v27, 0.0  ;;  %v6366_v61 = vmul.f32 %v17271_v10, %v17271_v10 }
0x12e2   : > { %6382 = vadd.xlane.f32.xlu0 %v6381_v44 }
0x12e3   : > { %v17282_v18 = vsub.f32 %v17235_v62, %v6352_v63  ;;  %v6384_v22 = vsel %vm1028_vm1, %v6366_v61, 0.0  ;;  %v6367_v35 = vmul.f32 %v17276_v12, %v17276_v12 }
0x12e4   : > { %6385 = vadd.xlane.f32.xlu1 %v6384_v22 }
0x12e5   : > { %v6387_v54 = vsel %vm1028_vm1, %v6367_v35, 0.0  ;;  %v6368_v7 = vmul.f32 %v17282_v18, %v17282_v18 }
0x12e6   : > { %6388 = vadd.xlane.f32.xlu0 %v6387_v54 }
0x12e7   : > { %v6390_v58 = vsel %vm1028_vm1, %v6368_v7, 0.0 }
0x12e8   : > { %6391 = vadd.xlane.f32.xlu1 %v6390_v58 }
0x135f   : > { %v6371_v4 = vpop.xlane.xlu0 %6370 }
0x1360   : > { %v6393_v17 = vmul.f32 0.03125, %v6371_v4 }
0x1361   : > { %v6374_v3 = vpop.xlane.xlu1 %6373 }
0x1362   : > { %v6401_v16 = vadd.f32 1e-05, %v6393_v17  ;;  %v6394_v28 = vmul.f32 0.03125, %v6374_v3 }
0x1363   : > { %v6377_v13 = vpop.xlane.xlu0 %6376 }
0x1364   : > { %15466 = vrsqrt.f32 %v6401_v16  ;;  %v6402_v31 = vadd.f32 1e-05, %v6394_v28  ;;  %v6395_v20 = vmul.f32 0.03125, %v6377_v13 }
0x1366   : > { %15468 = vrsqrt.f32 %v6402_v31  ;;  %v6403_v11 = vadd.f32 1e-05, %v6395_v20 }
0x1367   : > { %v6380_v33 = vpop.xlane.xlu1 %6379 }
0x1368   : > { %15470 = vrsqrt.f32 %v6403_v11  ;;  %v6396_v26 = vmul.f32 0.03125, %v6380_v33 }
0x136a   : > { %v6404_v36 = vadd.f32 1e-05, %v6396_v26 }
0x136c   : > { %15472 = vrsqrt.f32 %v6404_v36  ;;  %v15262_v36 = vld [vmem:[%s18754_s19 + $0x18] sm:$0xff]  }
0x136e   : > { %v15467_v29 = vpop.eup %15466 }
0x136f   : > { %v6383_v9 = vpop.xlane.xlu0 %6382  ;;  %v6417_v39 = vmul.f32 %v15467_v29, %v17244_v5  ;;  %v15263_v29 = vld [vmem:[%s18754_s19 + $0x20] sm:$0xff]  }
0x1370   : > { %v15469_v8 = vpop.eup %15468  ;;  %v6397_v40 = vmul.f32 0.03125, %v6383_v9  ;;  %v15265_v9 = vld [vmem:[%s18754_s19 + $0x30] sm:$0xff]  }
0x1371   : > { %v6386_v41 = vpop.xlane.xlu1 %6385  ;;  %v6418_v42 = vmul.f32 %v15469_v8, %v17247_v51  ;;  %v6431_v43 = vmul.f32 %v12974_v21, %v6417_v39  ;;  %v15266_v39 = vld [vmem:[%s18754_s19 + $0x38] sm:$0xff]   ;;  %v12976_v8 = vld [vmem:[%s18753_s18] ss:$0 sm:$0xff] }
0x1372   : > { %v15471_v45 = vpop.eup %15470  ;;  %v6405_v37 = vadd.f32 1e-05, %v6397_v40  ;;  %v6398_v59 = vmul.f32 0.03125, %v6386_v41 }
0x1373   : > { %v6419_v48 = vmul.f32 %v15471_v45, %v17252_v24  ;;  %v6389_v23 = vpop.xlane.xlu0 %6388  ;;  %v6432_v19 = vmul.f32 %v12974_v21, %v6418_v42  ;;  %v6445_v34 = vadd.f32 %v12975_v47, %v6431_v43 }
0x1374   : > { %15474 = vrsqrt.f32 %v6405_v37  ;;  %v6406_v32 = vadd.f32 1e-05, %v6398_v59  ;;  %v6399_v5 = vmul.f32 0.03125, %v6389_v23 }
0x1375   : > { %v6392_v56 = vpop.xlane.xlu1 %6391  ;;  %v6446_v52 = vadd.f32 %v12975_v47, %v6432_v19  ;;  %v6433_v27 = vmul.f32 %v12974_v21, %v6419_v48 }
0x1376   : > { %v15473_v50 = vpop.eup %15472  ;;  %15476 = vrsqrt.f32 %v6406_v32  ;;  %v6407_v51 = vadd.f32 1e-05, %v6399_v5  ;;  %v6400_v46 = vmul.f32 0.03125, %v6392_v56 }
0x1377   : > { %v6420_v2 = vmul.f32 %v15473_v50, %v17261_v49  ;;  %v6453_v63 = vpack.c.bf16 %v6446_v52, %v6445_v34  ;;  %v6447_v24 = vadd.f32 %v12975_v47, %v6433_v27 }
0x1378   : > { %15478 = vrsqrt.f32 %v6407_v51  ;;  %v6408_v44 = vadd.f32 1e-05, %v6400_v46 }
0x1379   : > { %v6434_v61 = vmul.f32 %v12974_v21, %v6420_v2  ;;  %14570 = vmatprep.mubr.msk.bf16.mxu0 %vm1028_vm1, %v6453_v63 }
0x137a   : > { %15480 = vrsqrt.f32 %v6408_v44 }
0x137b   : > { %v6448_v22 = vadd.f32 %v12975_v47, %v6434_v61 }
0x137d   : > { %v6454_v35 = vpack.c.bf16 %v6448_v22, %v6447_v24 }
0x137e   : > { %v15475_v54 = vpop.eup %15474 }
0x137f   : > { %14571 = vmatmul.mubr.msk.bf16.vlgmr.msra.gmra.mrb[176].mxu0 %vm1028_vm1, %v6454_v35  ;;  %v6421_v7 = vmul.f32 %v15475_v54, %v17268_v0 }
0x1380   : > { %v15477_v58 = vpop.eup %15476 }
0x1381   : > { %v6422_v60 = vmul.f32 %v15477_v58, %v17271_v10  ;;  %v6435_v14 = vmul.f32 %v12974_v21, %v6421_v7  ;;  %v15259_v10 = vld [vmem:[%s18754_s19] sm:$0xff]  }
0x1382   : > { %v15479_v49 = vpop.eup %15478  ;;  %14578 = vmatprep.subr.bf16.mxu1 %v15259_v10 }
0x1383   : > { %v6436_v4 = vmul.f32 %v12974_v21, %v6422_v60  ;;  %v6423_v17 = vmul.f32 %v15479_v49, %v17276_v12  ;;  %v6449_v16 = vadd.f32 %v12975_v47, %v6435_v14  ;;  %14579 = vmatpush3.bf16.msra.mxu1 %v15259_v10  ;;  %v15260_v12 = vld [vmem:[%s18754_s19 + $0x8] sm:$0xff]  }
0x1384   : > { %v15481_v3 = vpop.eup %15480  ;;  %14580 = vmatprep.subr.bf16.mxu1 %v15260_v12 }
0x1385   : > { %v6450_v28 = vadd.f32 %v12975_v47, %v6436_v4  ;;  %v6424_v13 = vmul.f32 %v15481_v3, %v17282_v18  ;;  %v6437_v31 = vmul.f32 %v12974_v21, %v6423_v17  ;;  %v15261_v18 = vld [vmem:[%s18754_s19 + $0x10] sm:$0xff]  }
0x1387   : > { %v6455_v20 = vpack.c.bf16 %v6450_v28, %v6449_v16  ;;  %v6438_v11 = vmul.f32 %v12974_v21, %v6424_v13  ;;  %v6451_v33 = vadd.f32 %v12975_v47, %v6437_v31  ;;  %14581 = vmatpush3.bf16.msra.mxu1 %v15260_v12  ;;  %v15264_v21 = vld [vmem:[%s18754_s19 + $0x28] sm:$0xff]  }
0x1388   : > { %14582 = vmatprep.subr.bf16.mxu1 %v15261_v18 }
0x1389   : > { %14574 = vmatprep.mubr.msk.bf16.mxu0 %vm1028_vm1, %v6455_v20  ;;  %v6452_v0 = vadd.f32 %v12975_v47, %v6438_v11 }
0x138b   : > { %v6456_v26 = vpack.c.bf16 %v6452_v0, %v6451_v33  ;;  %14583 = vmatpush3.bf16.msra.mxu1 %v15261_v18 }
0x138c   : > { %14584 = vmatprep.subr.bf16.mxu1 %v15262_v36 }
0x138d   : > { %14575 = vmatmul.mubr.msk.bf16.gmra.mrb[180].mxu0 %vm1028_vm1, %v6456_v26 }
0x138f   : > { %14585 = vmatpush3.bf16.msra.mxu1 %v15262_v36 }
0x1390   : > { %14586 = vmatprep.subr.bf16.mxu1 %v15263_v29 }
0x1393   : > { %14587 = vmatpush3.bf16.msra.mxu1 %v15263_v29 }
0x1394   : > { %14588 = vmatprep.subr.bf16.mxu1 %v15264_v21 }
0x1397   : > { %14589 = vmatpush3.bf16.msra.mxu1 %v15264_v21 }
0x1398   : > { %14590 = vmatprep.subr.bf16.mxu1 %v15265_v9 }
0x139b   : > { %14591 = vmatpush3.bf16.msra.mxu1 %v15265_v9 }
0x139c   : > { %14592 = vmatprep.subr.bf16.mxu1 %v15266_v39 }
0x139f   : > { %14593 = vmatpush3.bf16.msra.mxu1 %v15266_v39 }
0x1452   : > { %v14572_v40 = vpop.f32.mrb[176].mxu0 }
0x1453   : > { %v6535_v41 = vadd.f32 %v14572_v40, %v12976_v8  ;;  %v6526_v42 = vpop.f32.mrb[177].mxu0 }
0x1454   : > { %v6527_v43 = vadd.f32 %v12976_v8, %v6526_v42  ;;  %v14573_v45 = vpop.f32.mrb[178].mxu0 }
0x1455   : > { %v12985_v37 = vmul.f32 -1.702, %v6535_v41  ;;  %v6538_v59 = vadd.f32 %v14573_v45, %v12976_v8  ;;  %v6529_v47 = vpop.f32.mrb[179].mxu0 }
0x1456   : > { %v12983_v48 = vmul.f32 -1.702, %v6527_v43  ;;  %v6530_v23 = vadd.f32 %v12976_v8, %v6529_v47 }
0x1457   : > { %v6577_v19 = vmul.f32 1.442695, %v12985_v37  ;;  %v12986_v32 = vmul.f32 -1.702, %v6538_v59 }
0x1458   : > { %v6573_v5 = vmul.f32 1.442695, %v12983_v48  ;;  %v12984_v56 = vmul.f32 -1.702, %v6530_v23 }
0x1459   : > { %15482 = vpow2.f32 %v6577_v19  ;;  %v6579_v34 = vmul.f32 1.442695, %v12986_v32 }
0x145a   : > { %15484 = vpow2.f32 %v6573_v5  ;;  %v6575_v52 = vmul.f32 1.442695, %v12984_v56 }
0x145b   : > { %15486 = vpow2.f32 %v6579_v34 }
0x145c   : > { %15488 = vpow2.f32 %v6575_v52  ;;  %v12999_v52 = vld [vmem:[%s18755_s20] ss:$0 sm:$0xff] }
0x1460   : > { %v14576_v50 = vpop.f32.mrb[180].mxu0 }
0x1461   : > { %v6551_v51 = vadd.f32 %v14576_v50, %v12976_v8  ;;  %v6542_v46 = vpop.f32.mrb[181].mxu0 }
0x1462   : > { %v6543_v27 = vadd.f32 %v12976_v8, %v6542_v46  ;;  %v14577_v2 = vpop.f32.mrb[182].mxu0 }
0x1463   : > { %v15483_v63 = vpop.eup %15482  ;;  %v12989_v44 = vmul.f32 -1.702, %v6551_v51  ;;  %v6554_v61 = vadd.f32 %v14577_v2, %v12976_v8  ;;  %v6545_v24 = vpop.f32.mrb[183].mxu0 }
0x1464   : > { %v15485_v22 = vpop.eup %15484  ;;  %v6591_v35 = vadd.f32 1.0, %v15483_v63  ;;  %v12987_v54 = vmul.f32 -1.702, %v6543_v27  ;;  %v6546_v7 = vadd.f32 %v12976_v8, %v6545_v24 }
0x1465   : > { %v15487_v58 = vpop.eup %15486  ;;  %v6589_v60 = vadd.f32 1.0, %v15485_v22  ;;  %v12990_v14 = vmul.f32 -1.702, %v6554_v61  ;;  %v6585_v17 = vmul.f32 1.442695, %v12989_v44 }
0x1466   : > { %v15489_v49 = vpop.eup %15488  ;;  %15490 = vrcp.f32 %v6591_v35  ;;  %v6592_v4 = vadd.f32 1.0, %v15487_v58  ;;  %v12988_v3 = vmul.f32 -1.702, %v6546_v7  ;;  %v6581_v28 = vmul.f32 1.442695, %v12987_v54 }
0x1467   : > { %15492 = vrcp.f32 %v6589_v60  ;;  %v6590_v16 = vadd.f32 1.0, %v15489_v49  ;;  %v6587_v13 = vmul.f32 1.442695, %v12990_v14 }
0x1468   : > { %15494 = vrcp.f32 %v6592_v4  ;;  %v6583_v31 = vmul.f32 1.442695, %v12988_v3 }
0x1469   : > { %15496 = vrcp.f32 %v6590_v16 }
0x146a   : > { %15498 = vpow2.f32 %v6585_v17 }
0x146b   : > { %15500 = vpow2.f32 %v6581_v28 }
0x146c   : > { %15502 = vpow2.f32 %v6587_v13 }
0x146d   : > { %15504 = vpow2.f32 %v6583_v31 }
0x1470   : > { %v15491_v20 = vpop.eup %15490 }
0x1471   : > { %v15493_v11 = vpop.eup %15492  ;;  %v6615_v26 = vmul.f32 %v15491_v20, %v6535_v41 }
0x1472   : > { %v15495_v33 = vpop.eup %15494  ;;  %v6613_v18 = vmul.f32 %v15493_v11, %v6527_v43 }
0x1473   : > { %v15497_v0 = vpop.eup %15496  ;;  %v6616_v10 = vmul.f32 %v15495_v33, %v6538_v59 }
0x1474   : > { %v15499_v12 = vpop.eup %15498  ;;  %v6614_v36 = vmul.f32 %v15497_v0, %v6530_v23 }
0x1475   : > { %v15501_v29 = vpop.eup %15500  ;;  %v6622_v21 = vpack.c.bf16 %v6616_v10, %v6615_v26  ;;  %v6595_v9 = vadd.f32 1.0, %v15499_v12 }
0x1476   : > { %v15503_v39 = vpop.eup %15502  ;;  %v6593_v8 = vadd.f32 1.0, %v15501_v29  ;;  %v6621_v40 = vpack.c.bf16 %v6614_v36, %v6613_v18 }
0x1477   : > { %v15505_v42 = vpop.eup %15504  ;;  %15506 = vrcp.f32 %v6595_v9  ;;  %v6596_v45 = vadd.f32 1.0, %v15503_v39 }
0x1478   : > { %15508 = vrcp.f32 %v6593_v8  ;;  %v6594_v37 = vadd.f32 1.0, %v15505_v42  ;;  %14594 = vmatprep.mubr.bf16.mxu1 %v6621_v40 }
0x1479   : > { %15510 = vrcp.f32 %v6596_v45  ;;  %14595 = vmatmul.mubr.bf16.vlgmr.msra.gmra.mrb[200].mxu1 %v6622_v21 }
0x147a   : > { %15512 = vrcp.f32 %v6594_v37 }
0x1481   : > { %v15507_v41 = vpop.eup %15506 }
0x1482   : > { %v15509_v59 = vpop.eup %15508  ;;  %v6619_v48 = vmul.f32 %v15507_v41, %v6551_v51 }
0x1483   : > { %v15511_v47 = vpop.eup %15510  ;;  %v6617_v19 = vmul.f32 %v15509_v59, %v6543_v27 }
0x1484   : > { %v15513_v43 = vpop.eup %15512  ;;  %v6620_v23 = vmul.f32 %v15511_v47, %v6554_v61 }
0x1485   : > { %v6618_v32 = vmul.f32 %v15513_v43, %v6546_v7 }
0x1486   : > { %v6624_v5 = vpack.c.bf16 %v6620_v23, %v6619_v48 }
0x1487   : > { %v6623_v56 = vpack.c.bf16 %v6618_v32, %v6617_v19 }
0x1489   : > { %14598 = vmatprep.mubr.bf16.mxu1 %v6623_v56 }
0x148a   : > { %14599 = vmatmul.mubr.bf16.gmra.mrb[204].mxu1 %v6624_v5 }
0x154c   : > { %v14596_v34 = vpop.f32.mrb[200].mxu1 }
0x154d   : > { %v6723_v50 = vpop.f32.mrb[201].mxu1  ;;  %v6756_v46 = vadd.f32 %v14596_v34, %v17207_v38 }
0x154e   : > { %v6754_v2 = vadd.f32 %v6723_v50, %v17204_v55  ;;  %v14597_v63 = vpop.f32.mrb[202].mxu1 }
0x154f   : > { %v6726_v44 = vpop.f32.mrb[203].mxu1  ;;  %v6757_v27 = vadd.f32 %v14597_v63, %v17217_v6  ;;  %v17351_v24 = vadd.f32 %v12999_v52, %v6756_v46 }
0x1550   : > { %v17347_v51 = vadd.f32 %v12999_v52, %v6754_v2  ;;  %v6755_v61 = vadd.f32 %v6726_v44, %v17210_v57 }
0x1551   : > { %v17357_v54 = vadd.f32 %v12999_v52, %v6757_v27  ;;  %v6787_v38 = vsel %vm1028_vm1, %v17351_v24, 0.0 }
0x1552   : > { %v17353_v22 = vadd.f32 %v12999_v52, %v6755_v61  ;;  %v6781_v35 = vsel %vm1028_vm1, %v17347_v51, 0.0 }
0x1553   : > { %6782 = vadd.xlane.f32.xlu0 %v6781_v35  ;;  %v6790_v57 = vsel %vm1028_vm1, %v17357_v54, 0.0 }
0x1554   : > { %v6784_v55 = vsel %vm1028_vm1, %v17353_v22, 0.0 }
0x1555   : > { %6785 = vadd.xlane.f32.xlu1 %v6784_v55 }
0x1557   : > { %6788 = vadd.xlane.f32.xlu0 %v6787_v38  ;;  %v15267_v38 = vld [vmem:[%s18796_s6 + $0x40] sm:$0xff]  }
0x1558   : > { %14602 = vmatprep.subr.bf16.mxu0 %v15267_v38 }
0x1559   : > { %6791 = vadd.xlane.f32.xlu1 %v6790_v57  ;;  %v15268_v57 = vld [vmem:[%s18746_s11 + $0x40] sm:$0xff]   ;;  %14603 = vmatpush3.bf16.msra.mxu0 %v15267_v38 }
0x155a   : > { %14626 = vmatprep.subr.bf16.mxu1 %v15268_v57 }
0x155b   : > { %14627 = vmatpush3.bf16.msra.mxu1 %v15268_v57 }
0x155d   : > { %v14600_v6 = vpop.f32.mrb[204].mxu1 }
0x155e   : > { %v6739_v7 = vpop.f32.mrb[205].mxu1  ;;  %v6760_v58 = vadd.f32 %v14600_v6, %v17227_v53  ;;  %v15269_v6 = vld [vmem:[%s18796_s6 + $0x48] sm:$0xff]  }
0x155f   : > { %v6758_v60 = vadd.f32 %v6739_v7, %v17224_v1  ;;  %v14601_v14 = vpop.f32.mrb[206].mxu1  ;;  %v15270_v7 = vld [vmem:[%s18746_s11 + $0x48] sm:$0xff]   ;;  %14604 = vmatprep.subr.bf16.mxu0 %v15269_v6 }
0x1560   : > { %v6742_v49 = vpop.f32.mrb[207].mxu1  ;;  %v6761_v17 = vadd.f32 %v14601_v14, %v17235_v62  ;;  %v17371_v16 = vadd.f32 %v12999_v52, %v6760_v58  ;;  %14628 = vmatprep.subr.bf16.mxu1 %v15270_v7  ;;  %14605 = vmatpush3.bf16.msra.mxu0 %v15269_v6  ;;  %v15271_v58 = vld [vmem:[%s18797_s0 + $0x40] sm:$0xff]  }
0x1561   : > { %v17367_v4 = vadd.f32 %v12999_v52, %v6758_v60  ;;  %v6759_v3 = vadd.f32 %v6742_v49, %v17230_v25  ;;  %14629 = vmatpush3.bf16.msra.mxu1 %v15270_v7  ;;  %14614 = vmatprep.subr.bf16.mxu0 %v15271_v58 }
0x1562   : > { %v17377_v31 = vadd.f32 %v12999_v52, %v6761_v17  ;;  %v6799_v53 = vsel %vm1028_vm1, %v17371_v16, 0.0  ;;  %14650 = vmatprep.subr.bf16.mxu1 %v15717_v15 }
0x1563   : > { %v17373_v28 = vadd.f32 %v12999_v52, %v6759_v3  ;;  %v6793_v13 = vsel %vm1028_vm1, %v17367_v4, 0.0 }
0x1564   : > { %6794 = vadd.xlane.f32.xlu0 %v6793_v13  ;;  %v6802_v25 = vsel %vm1028_vm1, %v17377_v31, 0.0 }
0x1565   : > { %v6796_v1 = vsel %vm1028_vm1, %v17373_v28, 0.0 }
0x1566   : > { %6797 = vadd.xlane.f32.xlu1 %v6796_v1 }
0x1568   : > { %6800 = vadd.xlane.f32.xlu0 %v6799_v53 }
0x156a   : > { %6803 = vadd.xlane.f32.xlu1 %v6802_v25 }
0x15e0   : > { %v6783_v62 = vpop.xlane.xlu0 %6782 }
0x15e1   : > { %v6805_v20 = vmul.f32 0.03125, %v6783_v62 }
0x15e2   : > { %v6786_v11 = vpop.xlane.xlu1 %6785 }
0x15e3   : > { %v17386_v33 = vsub.f32 %v17347_v51, %v6805_v20  ;;  %v6806_v0 = vmul.f32 0.03125, %v6786_v11 }
0x15e4   : > { %v6789_v26 = vpop.xlane.xlu0 %6788 }
0x15e5   : > { %v17389_v10 = vsub.f32 %v17353_v22, %v6806_v0  ;;  %v6807_v12 = vmul.f32 0.03125, %v6789_v26  ;;  %v6821_v18 = vmul.f32 %v17386_v33, %v17386_v33  ;;  %v13002_v26 = vld [vmem:[%s18798_s30 + $0x1] ss:$0 sm:$0xff] }
0x15e6   : > { %v6792_v36 = vpop.xlane.xlu1 %6791 }
0x15e7   : > { %v17394_v29 = vsub.f32 %v17351_v24, %v6807_v12  ;;  %v6808_v21 = vmul.f32 0.03125, %v6792_v36  ;;  %v6829_v9 = vsel %vm1028_vm1, %v6821_v18, 0.0  ;;  %v6822_v39 = vmul.f32 %v17389_v10, %v17389_v10 }
0x15e8   : > { %6830 = vadd.xlane.f32.xlu0 %v6829_v9 }
0x15e9   : > { %v17400_v8 = vsub.f32 %v17357_v54, %v6808_v21  ;;  %v6832_v40 = vsel %vm1028_vm1, %v6822_v39, 0.0  ;;  %v6823_v42 = vmul.f32 %v17394_v29, %v17394_v29  ;;  %v13003_v21 = vld [vmem:[%s18799_s1 + $0x1] ss:$0 sm:$0xff] }
0x15ea   : > { %6833 = vadd.xlane.f32.xlu1 %v6832_v40 }
0x15eb   : > { %v6835_v45 = vsel %vm1028_vm1, %v6823_v42, 0.0  ;;  %v6824_v37 = vmul.f32 %v17400_v8, %v17400_v8 }
0x15ec   : > { %6836 = vadd.xlane.f32.xlu0 %v6835_v45 }
0x15ed   : > { %v6838_v41 = vsel %vm1028_vm1, %v6824_v37, 0.0 }
0x15ee   : > { %6839 = vadd.xlane.f32.xlu1 %v6838_v41 }
0x15f1   : > { %v6795_v59 = vpop.xlane.xlu0 %6794 }
0x15f2   : > { %v6809_v47 = vmul.f32 0.03125, %v6795_v59 }
0x15f3   : > { %v6798_v43 = vpop.xlane.xlu1 %6797 }
0x15f4   : > { %v17410_v48 = vsub.f32 %v17367_v4, %v6809_v47  ;;  %v6810_v23 = vmul.f32 0.03125, %v6798_v43 }
0x15f5   : > { %v6801_v19 = vpop.xlane.xlu0 %6800 }
0x15f6   : > { %v17413_v32 = vsub.f32 %v17373_v28, %v6810_v23  ;;  %v6811_v5 = vmul.f32 0.03125, %v6801_v19  ;;  %v6825_v56 = vmul.f32 %v17410_v48, %v17410_v48 }
0x15f7   : > { %v6804_v34 = vpop.xlane.xlu1 %6803 }
0x15f8   : > { %v17418_v52 = vsub.f32 %v17371_v16, %v6811_v5  ;;  %v6812_v50 = vmul.f32 0.03125, %v6804_v34  ;;  %v6841_v46 = vsel %vm1028_vm1, %v6825_v56, 0.0  ;;  %v6826_v2 = vmul.f32 %v17413_v32, %v17413_v32 }
0x15f9   : > { %6842 = vadd.xlane.f32.xlu0 %v6841_v46 }
0x15fa   : > { %v17424_v63 = vsub.f32 %v17377_v31, %v6812_v50  ;;  %v6844_v44 = vsel %vm1028_vm1, %v6826_v2, 0.0  ;;  %v6827_v27 = vmul.f32 %v17418_v52, %v17418_v52 }
0x15fb   : > { %6845 = vadd.xlane.f32.xlu1 %v6844_v44 }
0x15fc   : > { %v6847_v61 = vsel %vm1028_vm1, %v6827_v27, 0.0  ;;  %v6828_v35 = vmul.f32 %v17424_v63, %v17424_v63 }
0x15fd   : > { %6848 = vadd.xlane.f32.xlu0 %v6847_v61 }
0x15fe   : > { %v6850_v55 = vsel %vm1028_vm1, %v6828_v35, 0.0 }
0x15ff   : > { %6851 = vadd.xlane.f32.xlu1 %v6850_v55  ;;  %v15272_v55 = vld [vmem:[%s18797_s0 + $0x48] sm:$0xff]  }
0x1675   : > { %v6831_v60 = vpop.xlane.xlu0 %6830 }
0x1676   : > { %v6853_v14 = vmul.f32 0.03125, %v6831_v60 }
0x1677   : > { %v6834_v49 = vpop.xlane.xlu1 %6833 }
0x1678   : > { %v6861_v17 = vadd.f32 1e-05, %v6853_v14  ;;  %v6854_v3 = vmul.f32 0.03125, %v6834_v49 }
0x1679   : > { %v6837_v13 = vpop.xlane.xlu0 %6836 }
0x167a   : > { %15514 = vrsqrt.f32 %v6861_v17  ;;  %v6862_v1 = vadd.f32 1e-05, %v6854_v3  ;;  %v6855_v53 = vmul.f32 0.03125, %v6837_v13 }
0x167b   : > { %v6840_v25 = vpop.xlane.xlu1 %6839 }
0x167c   : > { %15516 = vrsqrt.f32 %v6862_v1  ;;  %v6863_v62 = vadd.f32 1e-05, %v6855_v53  ;;  %v6856_v20 = vmul.f32 0.03125, %v6840_v25 }
0x167e   : > { %15518 = vrsqrt.f32 %v6863_v62  ;;  %v6864_v11 = vadd.f32 1e-05, %v6856_v20 }
0x1680   : > { %15520 = vrsqrt.f32 %v6864_v11 }
0x1684   : > { %v15515_v0 = vpop.eup %15514 }
0x1685   : > { %v6877_v12 = vmul.f32 %v15515_v0, %v17386_v33 }
0x1686   : > { %v15517_v18 = vpop.eup %15516  ;;  %v6843_v36 = vpop.xlane.xlu0 %6842 }
0x1687   : > { %v6891_v9 = vmul.f32 %v13002_v26, %v6877_v12  ;;  %v6878_v39 = vmul.f32 %v15517_v18, %v17389_v10  ;;  %v6857_v40 = vmul.f32 0.03125, %v6843_v36 }
0x1688   : > { %v15519_v42 = vpop.eup %15518  ;;  %v6846_v45 = vpop.xlane.xlu1 %6845 }
0x1689   : > { %v6892_v37 = vmul.f32 %v13002_v26, %v6878_v39  ;;  %v6879_v41 = vmul.f32 %v15519_v42, %v17394_v29  ;;  %v6865_v59 = vadd.f32 1e-05, %v6857_v40  ;;  %v6905_v43 = vadd.f32 %v13003_v21, %v6891_v9 }
0x168a   : > { %v15521_v47 = vpop.eup %15520  ;;  %v6858_v23 = vmul.f32 0.03125, %v6846_v45  ;;  %v6849_v33 = vpop.xlane.xlu0 %6848 }
0x168b   : > { %v6906_v19 = vadd.f32 %v13003_v21, %v6892_v37  ;;  %v6893_v5 = vmul.f32 %v13002_v26, %v6879_v41  ;;  %v6880_v56 = vmul.f32 %v15521_v47, %v17400_v8  ;;  %15522 = vrsqrt.f32 %v6865_v59 }
0x168c   : > { %v6866_v34 = vadd.f32 1e-05, %v6858_v23  ;;  %v6859_v50 = vmul.f32 0.03125, %v6849_v33  ;;  %v6852_v46 = vpop.xlane.xlu1 %6851 }
0x168d   : > { %v17459_v10 = vpack.c.bf16 %v6906_v19, %v6905_v43  ;;  %v6894_v2 = vmul.f32 %v13002_v26, %v6880_v56  ;;  %v6860_v44 = vmul.f32 0.03125, %v6852_v46  ;;  %v6907_v29 = vadd.f32 %v13003_v21, %v6893_v5  ;;  %v17541_v56 = vld [vmem:[%s18800_s7 + $0x4] ss:$0 sm:$0xff] }
0x168e   : > { %15524 = vrsqrt.f32 %v6866_v34  ;;  %v6867_v27 = vadd.f32 1e-05, %v6859_v50 }
0x168f   : > { %v6908_v61 = vadd.f32 %v13003_v21, %v6894_v2  ;;  %v6868_v35 = vadd.f32 1e-05, %v6860_v44  ;;  %14606 = vmatprep.mubr.msk.bf16.mxu0 %vm1028_vm1, %v17459_v10  ;;  %14630 = vmatprep.mubr.msk.bf16.mxu1 %vm1028_vm1, %v17459_v10 }
0x1690   : > { %15526 = vrsqrt.f32 %v6867_v27 }
0x1691   : > { %v17465_v8 = vpack.c.bf16 %v6908_v61, %v6907_v29  ;;  %15528 = vrsqrt.f32 %v6868_v35  ;;  %v17548_v61 = vld [vmem:[%s18801_s9 + $0x4] ss:$0 sm:$0xff] }
0x1693   : > { %14607 = vmatmul.mubr.msk.bf16.vlgmr.msra.gmra.mrb[184].mxu0 %vm1028_vm1, %v17465_v8  ;;  %14631 = vmatmul.mubr.msk.bf16.vlgmr.msra.gmra.mrb[208].mxu1 %vm1028_vm1, %v17465_v8 }
0x1694   : > { %14615 = vmatpush3.bf16.msra.mxu0 %v15271_v58 }
0x1695   : > { %v15523_v38 = vpop.eup %15522  ;;  %14616 = vmatprep.subr.bf16.mxu0 %v15272_v55 }
0x1696   : > { %v6881_v57 = vmul.f32 %v15523_v38, %v17410_v48 }
0x1698   : > { %v15525_v6 = vpop.eup %15524  ;;  %14617 = vmatpush3.bf16.msra.mxu0 %v15272_v55  ;;  %v6895_v7 = vmul.f32 %v13002_v26, %v6881_v57 }
0x1699   : > { %v6882_v60 = vmul.f32 %v15525_v6, %v17413_v32  ;;  %14638 = vmatprep.subr.bf16.mxu0 %v15717_v15 }
0x169a   : > { %v15527_v14 = vpop.eup %15526  ;;  %v6909_v1 = vadd.f32 %v13003_v21, %v6895_v7 }
0x169b   : > { %v15529_v49 = vpop.eup %15528  ;;  %v6896_v17 = vmul.f32 %v13002_v26, %v6882_v60  ;;  %v6883_v3 = vmul.f32 %v15527_v14, %v17418_v52  ;;  %v17506_v52 = vld [vmem:[%s18747_s12 + $0x4] ss:$0 sm:$0xff] }
0x169c   : > { %v6884_v13 = vmul.f32 %v15529_v49, %v17424_v63 }
0x169d   : > { %v6910_v58 = vadd.f32 %v13003_v21, %v6896_v17  ;;  %v6897_v53 = vmul.f32 %v13002_v26, %v6883_v3 }
0x169e   : > { %v6898_v25 = vmul.f32 %v13002_v26, %v6884_v13 }
0x169f   : > { %v17479_v62 = vpack.c.bf16 %v6910_v58, %v6909_v1  ;;  %v6911_v48 = vadd.f32 %v13003_v21, %v6897_v53 }
0x16a0   : > { %v6912_v20 = vadd.f32 %v13003_v21, %v6898_v25 }
0x16a1   : > { %14610 = vmatprep.mubr.msk.bf16.mxu0 %vm1028_vm1, %v17479_v62  ;;  %14634 = vmatprep.mubr.msk.bf16.mxu1 %vm1028_vm1, %v17479_v62 }
0x16a2   : > { %v17485_v32 = vpack.c.bf16 %v6912_v20, %v6911_v48 }
0x16a4   : > { %14611 = vmatmul.mubr.msk.bf16.gmra.mrb[188].mxu0 %vm1028_vm1, %v17485_v32  ;;  %14635 = vmatmul.mubr.msk.bf16.gmra.mrb[212].mxu1 %vm1028_vm1, %v17485_v32 }
0x16a5   : > { %14618 = vmatprep.mubr.msk.bf16.mxu0 %vm1028_vm1, %v17459_v10  ;;  %14652 = vmatprep.mubr.msk.bf16.mxu1 %vm15718_vm2, %v15717_v15 }
0x16ac   : > { %14619 = vmatmul.mubr.msk.bf16.vlgmr.msra.gmra.mrb[192].mxu0 %vm1028_vm1, %v17465_v8 }
0x16ad   : > { %14622 = vmatprep.mubr.msk.bf16.mxu0 %vm1028_vm1, %v17479_v62 }
0x16b4   : > { %14623 = vmatmul.mubr.msk.bf16.gmra.mrb[196].mxu0 %vm1028_vm1, %v17485_v32 }
0x16b5   : > { %14640 = vmatprep.mubr.msk.bf16.mxu0 %vm15718_vm2, %v15717_v15 }
0x1766   : > { %v14608_v63 = vpop.f32.mrb[184].mxu0  ;;  %v14632_v11 = vpop.f32.mrb[208].mxu1 }
0x1767   : > { %v17509_v0 = vadd.f32 %v14632_v11, %v17506_v52  ;;  %v6988_v26 = vpop.f32.mrb[185].mxu0  ;;  %v17511_v12 = vpop.f32.mrb[209].mxu1  ;;  %v6997_v6 = vadd.f32 %v14608_v63, %v17548_v61 }
0x1768   : > { %v17513_v18 = vpop.f32.mrb[186].mxu0  ;;  %v14633_v36 = vpop.f32.mrb[210].mxu1  ;;  %v6989_v7 = vadd.f32 %v17548_v61, %v6988_v26 }
0x1769   : > { %v17516_v21 = vadd.f32 %v14633_v36, %v17506_v52  ;;  %v6991_v9 = vpop.f32.mrb[187].mxu0  ;;  %v17518_v39 = vpop.f32.mrb[211].mxu1  ;;  %v13479_v13 = vpack.c.bf16 %v6997_v6, %v6997_v6 }
0x176a   : > { %v13477_v58 = vpack.c.bf16 %v6989_v7, %v6989_v7  ;;  %v6992_v11 = vadd.f32 %v17548_v61, %v6991_v9 }
0x1777   : > { %v17520_v40 = vpop.f32.mrb[188].mxu0  ;;  %v14636_v42 = vpop.f32.mrb[212].mxu1 }
0x1778   : > { %v17523_v45 = vadd.f32 %v14636_v42, %v17506_v52  ;;  %v7004_v37 = vpop.f32.mrb[189].mxu0  ;;  %v7192_v41 = vpop.f32.mrb[213].mxu1 }
0x1779   : > { %v17526_v59 = vadd.f32 %v17506_v52, %v7192_v41  ;;  %v17528_v47 = vpop.f32.mrb[190].mxu0  ;;  %v14637_v43 = vpop.f32.mrb[214].mxu1  ;;  %v7005_v26 = vadd.f32 %v17548_v61, %v7004_v37  ;;  %v13478_v41 = vpack.c.bf16 %v6992_v11, %v6992_v11 }
0x177a   : > { %v17531_v23 = vadd.f32 %v14637_v43, %v17506_v52  ;;  %v17533_v33 = vpop.f32.mrb[191].mxu0  ;;  %v7195_v19 = vpop.f32.mrb[215].mxu1 }
0x177b   : > { %v17536_v5 = vadd.f32 %v17506_v52, %v7195_v19  ;;  %v13481_v43 = vpack.c.bf16 %v7005_v26, %v7005_v26  ;;  %v7177_v19 = vadd.f32 %v17506_v52, %v17511_v12 }
0x177d   : > { %v13493_v12 = vpack.c.bf16 %v7177_v19, %v7177_v19 }
0x177f   : > { %v14620_v34 = vpop.f32.mrb[192].mxu0 }
0x1780   : > { %v7091_v50 = vadd.f32 %v14620_v34, %v17541_v56  ;;  %v7082_v46 = vpop.f32.mrb[193].mxu0 }
0x1781   : > { %v7083_v2 = vadd.f32 %v17541_v56, %v7082_v46  ;;  %v14621_v44 = vpop.f32.mrb[194].mxu0  ;;  %v7013_v46 = vadd.f32 %v17520_v40, %v17548_v61 }
0x1782   : > { %v13487_v27 = vpack.c.bf16 %v7091_v50, %v7091_v50  ;;  %v7085_v29 = vpop.f32.mrb[195].mxu0  ;;  %v7094_v25 = vadd.f32 %v14621_v44, %v17541_v56  ;;  %v7000_v50 = vadd.f32 %v17513_v18, %v17548_v61 }
0x1783   : > { %v13485_v35 = vpack.c.bf16 %v7083_v2, %v7083_v2  ;;  %v7086_v57 = vadd.f32 %v17541_v56, %v7085_v29  ;;  %v7755_v29 = vsel %vm2132_vm4, %v13493_v12, 0 }
0x1784   : > { %v7367_v55 = vsel %vm1648_vm3, %v13487_v27, 0  ;;  %v13488_v36 = vpack.c.bf16 %v7094_v25, %v7094_v25  ;;  %v13480_v44 = vpack.c.bf16 %v7000_v50, %v7000_v50  ;;  %v13483_v27 = vpack.c.bf16 %v7013_v46, %v7013_v46 }
0x1785   : > { %v7275_v38 = vsel %vm1648_vm3, %v13485_v35, 0  ;;  %14651 = vmatpush3.bf16.xpose.msra.mxu1 %v7367_v55  ;;  %v13486_v49 = vpack.c.bf16 %v7086_v57, %v7086_v57  ;;  %v7008_v35 = vadd.f32 %v17548_v61, %v17533_v33  ;;  %v7016_v33 = vadd.f32 %v17528_v47, %v17548_v61 }
0x1786   : > { %14639 = vmatpush3.bf16.xpose.msra.mxu0 %v7275_v38  ;;  %14662 = vmatprep.subr.bf16.mxu1 %v15717_v15  ;;  %v7413_v34 = vsel %vm1648_vm3, %v13488_v36, 0  ;;  %v7180_v38 = vadd.f32 %v17506_v52, %v17518_v39 }
0x1787   : > { %v14624_v60 = vpop.f32.mrb[196].mxu0  ;;  %14644 = vmatprep.subr.bf16.mxu0 %v15717_v15  ;;  %v7321_v48 = vsel %vm1648_vm3, %v13486_v49, 0  ;;  %v13482_v55 = vpack.c.bf16 %v7008_v35, %v7008_v35  ;;  %v13484_v7 = vpack.c.bf16 %v7016_v33, %v7016_v33 }
0x1788   : > { %v7098_v14 = vpop.f32.mrb[197].mxu0  ;;  %v7107_v20 = vadd.f32 %v14624_v60, %v17541_v56  ;;  %v13494_v6 = vpack.c.bf16 %v7180_v38, %v7180_v38 }
0x1789   : > { %v7099_v17 = vadd.f32 %v17541_v56, %v7098_v14  ;;  %v14625_v3 = vpop.f32.mrb[198].mxu0 }
0x178a   : > { %v7101_v1 = vpop.f32.mrb[199].mxu0  ;;  %v13491_v42 = vpack.c.bf16 %v7107_v20, %v7107_v20  ;;  %v7110_v18 = vadd.f32 %v14625_v3, %v17541_v56  ;;  %v7801_v60 = vsel %vm2132_vm4, %v13494_v6, 0 }
0x178b   : > { %v13489_v53 = vpack.c.bf16 %v7099_v17, %v7099_v17  ;;  %v7102_v37 = vadd.f32 %v17541_v56, %v7101_v1 }
0x178c   : > { %14653 = vmatmul.mubr.msk.bf16.vlgmr.msra.gmra.mrb[216].mxu1 %vm1648_vm3, %v13479_v13  ;;  %v7551_v9 = vsel %vm1648_vm3, %v13491_v42, 0  ;;  %v13492_v56 = vpack.c.bf16 %v7110_v18, %v7110_v18 }
0x178d   : > { %v7459_v63 = vsel %vm1648_vm3, %v13489_v53, 0  ;;  %14641 = vmatmul.mubr.msk.bf16.vlgmr.msra.gmra.mrb[200].mxu0 %vm1648_vm3, %v13477_v58  ;;  %14664 = vmatprep.mubr.msk.bf16.mxu1 %vm15718_vm2, %v15717_v15  ;;  %v13490_v2 = vpack.c.bf16 %v7102_v37, %v7102_v37 }
0x178e   : > { %14645 = vmatpush3.bf16.xpose.msra.mxu0 %v7321_v48  ;;  %14663 = vmatpush3.bf16.xpose.msra.mxu1 %v7459_v63  ;;  %v7597_v57 = vsel %vm1648_vm3, %v13492_v56, 0 }
0x178f   : > { %14646 = vmatprep.mubr.msk.bf16.mxu0 %vm15718_vm2, %v15717_v15  ;;  %14656 = vmatprep.subr.bf16.mxu0 %v15717_v15  ;;  %v7505_v40 = vsel %vm1648_vm3, %v13490_v2, 0 }
0x1790   : > { %14674 = vmatprep.subr.bf16.mxu1 %v15717_v15 }
0x1795   : > { %14647 = vmatmul.mubr.msk.bf16.vlgmr.msra.gmra.mrb[204].mxu0 %vm1648_vm3, %v13478_v41  ;;  %14665 = vmatmul.mubr.msk.bf16.vlgmr.msra.gmra.mrb[220].mxu1 %vm1648_vm3, %v13481_v43 }
0x1796   : > { %14657 = vmatpush3.bf16.xpose.msra.mxu0 %v7413_v34  ;;  %14675 = vmatpush3.bf16.xpose.msra.mxu1 %v7551_v9 }
0x1797   : > { %14658 = vmatprep.mubr.msk.bf16.mxu0 %vm15718_vm2, %v15717_v15  ;;  %14676 = vmatprep.mubr.msk.bf16.mxu1 %vm15718_vm2, %v15717_v15 }
0x1798   : > { %14668 = vmatprep.subr.bf16.mxu0 %v15717_v15  ;;  %14686 = vmatprep.subr.bf16.mxu1 %v15717_v15 }
0x179d   : > { %14659 = vmatmul.mubr.msk.bf16.vlgmr.msra.gmra.mrb[208].mxu0 %vm1648_vm3, %v13480_v44  ;;  %14677 = vmatmul.mubr.msk.bf16.vlgmr.msra.gmra.mrb[224].mxu1 %vm1648_vm3, %v13483_v27 }
0x179e   : > { %14669 = vmatpush3.bf16.xpose.msra.mxu0 %v7505_v40  ;;  %14687 = vmatpush3.bf16.msra.mxu1 %v7755_v29 }
0x179f   : > { %14670 = vmatprep.mubr.msk.bf16.mxu0 %vm15718_vm2, %v15717_v15  ;;  %14680 = vmatprep.subr.bf16.mxu0 %v15717_v15 }
0x17a0   : > { %14688 = vmatprep.mubr.msk.bf16.mxu1 %vm15718_vm2, %v15717_v15  ;;  %14698 = vmatprep.subr.bf16.mxu1 %v15717_v15 }
0x17a5   : > { %14671 = vmatmul.mubr.msk.bf16.vlgmr.msra.gmra.mrb[212].mxu0 %vm1648_vm3, %v13482_v55 }
0x17a6   : > { %14681 = vmatpush3.bf16.xpose.msra.mxu0 %v7597_v57  ;;  %14682 = vmatprep.mubr.msk.bf16.mxu0 %vm15718_vm2, %v15717_v15 }
0x17a7   : > { %14692 = vmatprep.subr.bf16.mxu0 %v15717_v15 }
0x17ad   : > { %14683 = vmatmul.mubr.msk.bf16.vlgmr.msra.gmra.mrb[216].mxu0 %vm1648_vm3, %v13484_v7 }
0x17ae   : > { %14693 = vmatpush3.bf16.msra.mxu0 %v7801_v60  ;;  %14694 = vmatprep.mubr.msk.bf16.mxu0 %vm15718_vm2, %v15717_v15 }
0x17af   : > { %14704 = vmatprep.subr.bf16.mxu0 %v15717_v15 }
0x185f   : > { %v7403_v52 = vpop.f32.mrb[216].mxu1 }
0x1860   : > { %v7641_v39 = vmul.f32 0.35355338, %v7403_v52  ;;  %v7311_v14 = vpop.f32.mrb[200].mxu0  ;;  %v14654_v49 = vpop.f32.mrb[217].mxu1 }
0x1861   : > { %v7639_v17 = vmul.f32 0.35355338, %v7311_v14  ;;  %v14642_v47 = vpop.f32.mrb[201].mxu0  ;;  %v7406_v61 = vpop.f32.mrb[218].mxu1 }
0x1862   : > { %v7314_v3 = vpop.f32.mrb[202].mxu0  ;;  %v14655_v13 = vpop.f32.mrb[219].mxu1  ;;  %v7649_v53 = vadd.f32 %v7641_v39, %v16272_v30 }
0x1863   : > { %v7647_v1 = vadd.f32 %v7639_v17, %v16272_v30  ;;  %v14643_v58 = vpop.f32.mrb[203].mxu0 }
0x1864   : > { %v7661_v63 = vsel %vm1648_vm3, %v7649_v53, -inf }
0x1865   : > { %v7655_v25 = vsel %vm1648_vm3, %v7647_v1, -inf }
0x1866   : > { %7656 = vmax.xlane.f32.xlu1 %v7655_v25 }
0x1868   : > { %v7357_v48 = vpop.f32.mrb[204].mxu0  ;;  %v7495_v20 = vpop.f32.mrb[220].mxu1 }
0x1869   : > { %v7640_v11 = vmul.f32 0.35355338, %v7357_v48  ;;  %v7643_v26 = vmul.f32 0.35355338, %v7495_v20  ;;  %v14648_v36 = vpop.f32.mrb[205].mxu0  ;;  %v14666_v42 = vpop.f32.mrb[221].mxu1 }
0x186a   : > { %7662 = vmax.xlane.f32.xlu1 %v7661_v63  ;;  %v7360_v41 = vpop.f32.mrb[206].mxu0  ;;  %v7498_v43 = vpop.f32.mrb[222].mxu1 }
0x186b   : > { %v7648_v19 = vadd.f32 %v7640_v11, %v16272_v30  ;;  %v7651_v34 = vadd.f32 %v7643_v26, %v16272_v30  ;;  %v14649_v9 = vpop.f32.mrb[207].mxu0  ;;  %v14667_v37 = vpop.f32.mrb[223].mxu1 }
0x186d   : > { %v7658_v50 = vsel %vm1648_vm3, %v7648_v19, -inf  ;;  %v7667_v46 = vsel %vm1648_vm3, %v7651_v34, -inf }
0x186e   : > { %7659 = vmax.xlane.f32.xlu0 %v7658_v50  ;;  %7668 = vmax.xlane.f32.xlu1 %v7667_v46 }
0x1870   : > { %v7449_v12 = vpop.f32.mrb[208].mxu0  ;;  %v7587_v2 = vpop.f32.mrb[224].mxu1 }
0x1871   : > { %v7642_v44 = vmul.f32 0.35355338, %v7449_v12  ;;  %v7645_v27 = vmul.f32 0.35355338, %v7587_v2  ;;  %v14660_v29 = vpop.f32.mrb[209].mxu0  ;;  %v14678_v18 = vpop.f32.mrb[225].mxu1 }
0x1872   : > { %v7452_v40 = vpop.f32.mrb[210].mxu0  ;;  %v7590_v35 = vpop.f32.mrb[226].mxu1 }
0x1873   : > { %v7650_v56 = vadd.f32 %v7642_v44, %v16272_v30  ;;  %v7653_v55 = vadd.f32 %v7645_v27, %v16272_v30  ;;  %v14661_v38 = vpop.f32.mrb[211].mxu0  ;;  %v14679_v57 = vpop.f32.mrb[227].mxu1 }
0x1875   : > { %v7664_v33 = vsel %vm1648_vm3, %v7650_v56, -inf  ;;  %v7673_v6 = vsel %vm1648_vm3, %v7653_v55, -inf }
0x1876   : > { %7665 = vmax.xlane.f32.xlu0 %v7664_v33  ;;  %7674 = vmax.xlane.f32.xlu1 %v7673_v6 }
0x1878   : > { %v7541_v7 = vpop.f32.mrb[212].mxu0 }
0x1879   : > { %v7644_v60 = vmul.f32 0.35355338, %v7541_v7  ;;  %v14672_v52 = vpop.f32.mrb[213].mxu0 }
0x187a   : > { %v7544_v39 = vpop.f32.mrb[214].mxu0 }
0x187b   : > { %v7652_v14 = vadd.f32 %v7644_v60, %v16272_v30  ;;  %v14673_v49 = vpop.f32.mrb[215].mxu0 }
0x187d   : > { %v7670_v17 = vsel %vm1648_vm3, %v7652_v14, -inf }
0x187e   : > { %7671 = vmax.xlane.f32.xlu0 %v7670_v17 }
0x1880   : > { %v7633_v47 = vpop.f32.mrb[216].mxu0 }
0x1881   : > { %v7646_v61 = vmul.f32 0.35355338, %v7633_v47  ;;  %v14684_v3 = vpop.f32.mrb[217].mxu0 }
0x1882   : > { %v7636_v13 = vpop.f32.mrb[218].mxu0 }
0x1883   : > { %v7654_v58 = vadd.f32 %v7646_v61, %v16272_v30  ;;  %v14685_v25 = vpop.f32.mrb[219].mxu0 }
0x1885   : > { %v7676_v48 = vsel %vm1648_vm3, %v7654_v58, -inf }
0x1886   : > { %7677 = vmax.xlane.f32.xlu0 %v7676_v48 }
0x18f3   : > { %v7657_v20 = vpop.xlane.xlu1 %7656 }
0x18f4   : > { %v7679_v63 = vsub.f32 %v7647_v1, %v7657_v20 }
0x18f6   : > { %v7687_v11 = vmul.f32 1.442695, %v7679_v63  ;;  %v13495_v63 = vpack.c.bf16 %v17509_v0, %v17509_v0  ;;  %v13496_v0 = vpack.c.bf16 %v17516_v21, %v17516_v21 }
0x18f7   : > { %v7663_v26 = vpop.xlane.xlu1 %7662 }
0x18f8   : > { %15530 = vpow2.f32 %v7687_v11  ;;  %v7681_v36 = vsub.f32 %v7649_v53, %v7663_v26 }
0x18fa   : > { %v7691_v42 = vmul.f32 1.442695, %v7681_v36 }
0x18fb   : > { %v7660_v41 = vpop.xlane.xlu0 %7659  ;;  %v7669_v43 = vpop.xlane.xlu1 %7668 }
0x18fc   : > { %15532 = vpow2.f32 %v7691_v42  ;;  %v7680_v9 = vsub.f32 %v7648_v19, %v7660_v41  ;;  %v7683_v37 = vsub.f32 %v7651_v34, %v7669_v43  ;;  %v7847_v42 = vsel %vm2132_vm4, %v13495_v63, 0 }
0x18fe   : > { %v7689_v50 = vmul.f32 1.442695, %v7680_v9  ;;  %v7695_v46 = vmul.f32 1.442695, %v7683_v37 }
0x1900   : > { %15534 = vpow2.f32 %v7689_v50  ;;  %v13497_v50 = vpack.c.bf16 %v17526_v59, %v17526_v59 }
0x1901   : > { %15536 = vpow2.f32 %v7695_v46 }
0x1902   : > { %v15531_v12 = vpop.eup %15530 }
0x1903   : > { %v7666_v2 = vpop.xlane.xlu0 %7665  ;;  %v7675_v44 = vpop.xlane.xlu1 %7674  ;;  %v7703_v27 = vsel %vm1648_vm3, %v15531_v12, 0.0 }
0x1904   : > { %v7682_v1 = vsub.f32 %v7650_v56, %v7666_v2  ;;  %v7685_v29 = vsub.f32 %v7653_v55, %v7675_v44  ;;  %7704 = vadd.xlane.f32.xlu1 %v7703_v27  ;;  %v7893_v27 = vsel %vm2132_vm4, %v13496_v0, 0 }
0x1906   : > { %v15533_v18 = vpop.eup %15532  ;;  %v7693_v53 = vmul.f32 1.442695, %v7682_v1  ;;  %v7699_v40 = vmul.f32 1.442695, %v7685_v29  ;;  %v7939_v1 = vsel %vm2132_vm4, %v13497_v50, 0 }
0x1907   : > { %v7709_v35 = vsel %vm1648_vm3, %v15533_v18, 0.0 }
0x1908   : > { %15538 = vpow2.f32 %v7693_v53  ;;  %7710 = vadd.xlane.f32.xlu1 %v7709_v35  ;;  %v13498_v53 = vpack.c.bf16 %v17536_v5, %v17536_v5 }
0x1909   : > { %15540 = vpow2.f32 %v7699_v40 }
0x190a   : > { %v15535_v19 = vpop.eup %15534 }
0x190b   : > { %v17634_v34 = vpop.eup %15536  ;;  %v7672_v38 = vpop.xlane.xlu0 %7671  ;;  %v7706_v57 = vsel %vm1648_vm3, %v15535_v19, 0.0 }
0x190c   : > { %v7684_v33 = vsub.f32 %v7652_v14, %v7672_v38  ;;  %7707 = vadd.xlane.f32.xlu0 %v7706_v57  ;;  %v7715_v56 = vsel %vm1648_vm3, %v17634_v34, 0.0  ;;  %v15273_v38 = vld [vmem:[%s18796_s6 + $0x50] sm:$0xff]  }
0x190d   : > { %7716 = vadd.xlane.f32.xlu1 %v7715_v56 }
0x190e   : > { %v7697_v55 = vmul.f32 1.442695, %v7684_v33  ;;  %v7985_v33 = vsel %vm2132_vm4, %v13498_v53, 0 }
0x1910   : > { %15542 = vpow2.f32 %v7697_v55  ;;  %v13500_v55 = vpack.c.bf16 %v17531_v23, %v17531_v23  ;;  %v15277_v23 = vld [vmem:[%s18746_s11 + $0x50] sm:$0xff]  }
0x1912   : > { %v15539_v6 = vpop.eup %15538 }
0x1913   : > { %v17639_v7 = vpop.eup %15540  ;;  %v7678_v60 = vpop.xlane.xlu0 %7677  ;;  %v7712_v52 = vsel %vm1648_vm3, %v15539_v6, 0.0 }
0x1914   : > { %v7686_v39 = vsub.f32 %v7654_v58, %v7678_v60  ;;  %7713 = vadd.xlane.f32.xlu0 %v7712_v52  ;;  %v7721_v49 = vsel %vm1648_vm3, %v17639_v7, 0.0 }
0x1915   : > { %7722 = vadd.xlane.f32.xlu1 %v7721_v49  ;;  %v8077_v49 = vsel %vm2132_vm4, %v13500_v55, 0 }
0x1916   : > { %v7701_v14 = vmul.f32 1.442695, %v7686_v39  ;;  %v15275_v39 = vld [vmem:[%s18797_s0 + $0x50] sm:$0xff]  }
0x1918   : > { %15544 = vpow2.f32 %v7701_v14 }
0x191a   : > { %v17644_v17 = vpop.eup %15542 }
0x191b   : > { %v7718_v47 = vsel %vm1648_vm3, %v17644_v17, 0.0 }
0x191c   : > { %7719 = vadd.xlane.f32.xlu0 %v7718_v47 }
0x1922   : > { %v17648_v61 = vpop.eup %15544 }
0x1923   : > { %v7724_v3 = vsel %vm1648_vm3, %v17648_v61, 0.0 }
0x1924   : > { %7725 = vadd.xlane.f32.xlu0 %v7724_v3  ;;  %v15276_v3 = vld [vmem:[%s18797_s0 + $0x58] sm:$0xff]  }
0x1991   : > { %v7705_v13 = vpop.xlane.xlu1 %7704 }
0x1992   : > { %15546 = vrcp.f32 %v7705_v13  ;;  %v15278_v13 = vld [vmem:[%s18746_s11 + $0x58] sm:$0xff]  }
0x1995   : > { %v7711_v58 = vpop.xlane.xlu1 %7710 }
0x1996   : > { %15548 = vrcp.f32 %v7711_v58 }
0x1999   : > { %v7708_v25 = vpop.xlane.xlu0 %7707 }
0x199a   : > { %15550 = vrcp.f32 %v7708_v25  ;;  %v7717_v48 = vpop.xlane.xlu1 %7716 }
0x199b   : > { %15552 = vrcp.f32 %v7717_v48 }
0x199c   : > { %v15547_v20 = vpop.eup %15546 }
0x199d   : > { %v7735_v11 = vmul.f32 %v15547_v20, %v15531_v12 }
0x199f   : > { %v7743_v26 = vpack.c.bf16 %v7735_v11, %v7735_v11 }
0x19a0   : > { %v15549_v36 = vpop.eup %15548 }
0x19a1   : > { %v7714_v41 = vpop.xlane.xlu0 %7713  ;;  %14689 = vmatmul.mubr.msk.bf16.vlgmr.msra.gmra.mrb[228].mxu1 %vm1648_vm3, %v7743_v26  ;;  %v7737_v43 = vmul.f32 %v15549_v36, %v15533_v18  ;;  %v13499_v18 = vpack.c.bf16 %v17523_v45, %v17523_v45 }
0x19a2   : > { %15554 = vrcp.f32 %v7714_v41  ;;  %14699 = vmatpush3.bf16.msra.mxu1 %v7847_v42  ;;  %14700 = vmatprep.mubr.msk.bf16.mxu1 %vm15718_vm2, %v15717_v15  ;;  %v7723_v9 = vpop.xlane.xlu1 %7722 }
0x19a3   : > { %14710 = vmatprep.subr.bf16.mxu1 %v15717_v15  ;;  %15556 = vrcp.f32 %v7723_v9  ;;  %v7745_v2 = vpack.c.bf16 %v7737_v43, %v7737_v43  ;;  %v8031_v57 = vsel %vm2132_vm4, %v13499_v18, 0 }
0x19a4   : > { %v15551_v37 = vpop.eup %15550 }
0x19a5   : > { %v7736_v46 = vmul.f32 %v15551_v37, %v15535_v19  ;;  %v15553_v44 = vpop.eup %15552 }
0x19a6   : > { %v7739_v21 = vmul.f32 %v15553_v44, %v17634_v34 }
0x19a7   : > { %v7744_v12 = vpack.c.bf16 %v7736_v46, %v7736_v46 }
0x19a8   : > { %v7747_v19 = vpack.c.bf16 %v7739_v21, %v7739_v21 }
0x19a9   : > { %14695 = vmatmul.mubr.msk.bf16.vlgmr.msra.gmra.mrb[220].mxu0 %vm1648_vm3, %v7744_v12  ;;  %v7720_v29 = vpop.xlane.xlu0 %7719  ;;  %14701 = vmatmul.mubr.msk.bf16.vlgmr.msra.gmra.mrb[232].mxu1 %vm1648_vm3, %v7745_v2 }
0x19aa   : > { %14705 = vmatpush3.bf16.msra.mxu0 %v7893_v27  ;;  %15558 = vrcp.f32 %v7720_v29  ;;  %14711 = vmatpush3.bf16.msra.mxu1 %v7939_v1 }
0x19ab   : > { %14706 = vmatprep.mubr.msk.bf16.mxu0 %vm15718_vm2, %v15717_v15  ;;  %14712 = vmatprep.mubr.msk.bf16.mxu1 %vm15718_vm2, %v15717_v15 }
0x19ac   : > { %v15555_v59 = vpop.eup %15554  ;;  %14716 = vmatprep.subr.bf16.mxu0 %v15717_v15  ;;  %14722 = vmatprep.subr.bf16.mxu1 %v15717_v15 }
0x19ad   : > { %v7738_v40 = vmul.f32 %v15555_v59, %v15539_v6  ;;  %v15557_v34 = vpop.eup %15556 }
0x19ae   : > { %v7741_v45 = vmul.f32 %v15557_v34, %v17639_v7  ;;  %v15274_v7 = vld [vmem:[%s18796_s6 + $0x58] sm:$0xff]  }
0x19af   : > { %v7746_v35 = vpack.c.bf16 %v7738_v40, %v7738_v40 }
0x19b0   : > { %v7749_v52 = vpack.c.bf16 %v7741_v45, %v7741_v45 }
0x19b1   : > { %14707 = vmatmul.mubr.msk.bf16.vlgmr.msra.gmra.mrb[224].mxu0 %vm1648_vm3, %v7746_v35  ;;  %v7726_v56 = vpop.xlane.xlu0 %7725  ;;  %14713 = vmatmul.mubr.msk.bf16.vlgmr.msra.gmra.mrb[236].mxu1 %vm1648_vm3, %v7747_v19 }
0x19b2   : > { %14717 = vmatpush3.bf16.msra.mxu0 %v7985_v33  ;;  %15560 = vrcp.f32 %v7726_v56  ;;  %14723 = vmatpush3.bf16.msra.mxu1 %v8031_v57 }
0x19b3   : > { %14718 = vmatprep.mubr.msk.bf16.mxu0 %vm15718_vm2, %v15717_v15  ;;  %14724 = vmatprep.mubr.msk.bf16.mxu1 %vm15718_vm2, %v15717_v15 }
0x19b4   : > { %v15559_v5 = vpop.eup %15558  ;;  %14728 = vmatprep.subr.bf16.mxu0 %v15717_v15  ;;  %14734 = vmatprep.subr.bf16.mxu1 %v15273_v38 }
0x19b5   : > { %v7740_v6 = vmul.f32 %v15559_v5, %v17644_v17  ;;  %v17759_v5 = vld [vmem:[%s18800_s7 + $0x5] ss:$0 sm:$0xff] }
0x19b7   : > { %v7748_v60 = vpack.c.bf16 %v7740_v6, %v7740_v6 }
0x19b9   : > { %14719 = vmatmul.mubr.msk.bf16.vlgmr.msra.gmra.mrb[228].mxu0 %vm1648_vm3, %v7748_v60  ;;  %14725 = vmatmul.mubr.msk.bf16.vlgmr.msra.gmra.mrb[240].mxu1 %vm1648_vm3, %v7749_v52 }
0x19ba   : > { %14729 = vmatpush3.bf16.msra.mxu0 %v8077_v49  ;;  %14735 = vmatpush3.bf16.msra.mxu1 %v15273_v38 }
0x19bb   : > { %14738 = vmatprep.mubr.msk.bf16.mxu1 %vm1028_vm1, %v17459_v10  ;;  %14736 = vmatprep.subr.bf16.mxu1 %v15274_v7 }
0x19bc   : > { %v15561_v14 = vpop.eup %15560  ;;  %14730 = vmatprep.mubr.msk.bf16.mxu0 %vm15718_vm2, %v15717_v15  ;;  %14746 = vmatprep.subr.bf16.mxu0 %v15275_v39 }
0x19bd   : > { %v7742_v17 = vmul.f32 %v15561_v14, %v17648_v61 }
0x19be   : > { %14737 = vmatpush3.bf16.msra.mxu1 %v15274_v7 }
0x19bf   : > { %v7750_v47 = vpack.c.bf16 %v7742_v17, %v7742_v17  ;;  %14758 = vmatprep.subr.bf16.mxu1 %v15277_v23 }
0x19c1   : > { %14731 = vmatmul.mubr.msk.bf16.vlgmr.msra.gmra.mrb[232].mxu0 %vm1648_vm3, %v7750_v47  ;;  %14739 = vmatmul.mubr.msk.bf16.vlgmr.msra.gmra.mrb[244].mxu1 %vm1028_vm1, %v17465_v8 }
0x19c2   : > { %14742 = vmatprep.mubr.msk.bf16.mxu1 %vm1028_vm1, %v17479_v62  ;;  %14747 = vmatpush3.bf16.msra.mxu0 %v15275_v39 }
0x19c3   : > { %14750 = vmatprep.mubr.msk.bf16.mxu0 %vm1028_vm1, %v17459_v10  ;;  %14748 = vmatprep.subr.bf16.mxu0 %v15276_v3 }
0x19c4   : > { %14759 = vmatpush3.bf16.msra.mxu1 %v15277_v23 }
0x19c5   : > { %14760 = vmatprep.subr.bf16.mxu1 %v15278_v13 }
0x19c6   : > { %14749 = vmatpush3.bf16.msra.mxu0 %v15276_v3  ;;  %v17772_v3 = vld [vmem:[%s18801_s9 + $0x5] ss:$0 sm:$0xff] }
0x19c7   : > { %14770 = vmatprep.subr.bf16.mxu0 %v15717_v15 }
0x19c8   : > { %14761 = vmatpush3.bf16.msra.mxu1 %v15278_v13 }
0x19c9   : > { %14743 = vmatmul.mubr.msk.bf16.gmra.mrb[248].mxu1 %vm1028_vm1, %v17485_v32  ;;  %14751 = vmatmul.mubr.msk.bf16.vlgmr.msra.gmra.mrb[236].mxu0 %vm1028_vm1, %v17465_v8 }
0x19ca   : > { %14754 = vmatprep.mubr.msk.bf16.mxu0 %vm1028_vm1, %v17479_v62  ;;  %14762 = vmatprep.mubr.msk.bf16.mxu1 %vm1028_vm1, %v17459_v10 }
0x19cb   : > { %14782 = vmatprep.subr.bf16.mxu1 %v15717_v15 }
0x19d1   : > { %14755 = vmatmul.mubr.msk.bf16.gmra.mrb[240].mxu0 %vm1028_vm1, %v17485_v32  ;;  %14763 = vmatmul.mubr.msk.bf16.vlgmr.msra.gmra.mrb[252].mxu1 %vm1028_vm1, %v17465_v8 }
0x19d2   : > { %14766 = vmatprep.mubr.msk.bf16.mxu1 %vm1028_vm1, %v17479_v62  ;;  %14772 = vmatprep.mubr.msk.bf16.mxu0 %vm15718_vm2, %v15717_v15 }
0x19d9   : > { %14767 = vmatmul.mubr.msk.bf16.gmra.mrb[0].mxu1 %vm1028_vm1, %v17485_v32 }
0x19da   : > { %14784 = vmatprep.mubr.msk.bf16.mxu1 %vm15718_vm2, %v15717_v15 }
0x1a74   : > { %v7791_v61 = vpop.f32.mrb[228].mxu1 }
0x1a75   : > { %8119 = vst.msk [vmem:[#allocation2] sm:$0xff] %vm1648_vm3, %v7791_v61  ;;  %v14690_v58 = vpop.f32.mrb[229].mxu1 }
0x1a76   : > { %v7794_v25 = vpop.f32.mrb[230].mxu1 }
0x1a77   : > { %v14691_v48 = vpop.f32.mrb[231].mxu1 }
0x1a78   : > { %v17780_v48 = vld [vmem:[%s18747_s12 + $0x5] ss:$0 sm:$0xff] }
0x1a7c   : > { %v7837_v20 = vpop.f32.mrb[220].mxu0  ;;  %v7883_v63 = vpop.f32.mrb[232].mxu1 }
0x1a7d   : > { %8120 = vst.msk [vmem:[#allocation2 + $0x8] sm:$0xff] %vm1648_vm3, %v7837_v20  ;;  %8121 = vst.msk [vmem:[#allocation2 + $0x10] sm:$0xff] %vm1648_vm3, %v7883_v63  ;;  %v14696_v11 = vpop.f32.mrb[221].mxu0  ;;  %v14702_v26 = vpop.f32.mrb[233].mxu1 }
0x1a7e   : > { %v7840_v36 = vpop.f32.mrb[222].mxu0  ;;  %v7886_v42 = vpop.f32.mrb[234].mxu1 }
0x1a7f   : > { %v14697_v41 = vpop.f32.mrb[223].mxu0  ;;  %v14703_v43 = vpop.f32.mrb[235].mxu1 }
0x1a84   : > { %v7929_v9 = vpop.f32.mrb[224].mxu0  ;;  %v7975_v37 = vpop.f32.mrb[236].mxu1 }
0x1a85   : > { %8122 = vst.msk [vmem:[#allocation2 + $0x18] sm:$0xff] %vm1648_vm3, %v7929_v9  ;;  %8123 = vst.msk [vmem:[#allocation2 + $0x20] sm:$0xff] %vm1648_vm3, %v7975_v37  ;;  %v14708_v0 = vpop.f32.mrb[225].mxu0  ;;  %v14714_v50 = vpop.f32.mrb[237].mxu1 }
0x1a86   : > { %v7932_v46 = vpop.f32.mrb[226].mxu0  ;;  %v7978_v12 = vpop.f32.mrb[238].mxu1 }
0x1a87   : > { %v14709_v2 = vpop.f32.mrb[227].mxu0  ;;  %v14715_v44 = vpop.f32.mrb[239].mxu1 }
0x1a8c   : > { %v8021_v27 = vpop.f32.mrb[228].mxu0  ;;  %v8067_v1 = vpop.f32.mrb[240].mxu1 }
0x1a8d   : > { %8124 = vst.msk [vmem:[#allocation2 + $0x28] sm:$0xff] %vm1648_vm3, %v8021_v27  ;;  %8125 = vst.msk [vmem:[#allocation2 + $0x30] sm:$0xff] %vm1648_vm3, %v8067_v1  ;;  %v14720_v29 = vpop.f32.mrb[229].mxu0  ;;  %v14726_v21 = vpop.f32.mrb[241].mxu1 }
0x1a8e   : > { %v8024_v59 = vpop.f32.mrb[230].mxu0  ;;  %v8070_v18 = vpop.f32.mrb[242].mxu1 }
0x1a8f   : > { %v14721_v53 = vpop.f32.mrb[231].mxu0  ;;  %v14727_v40 = vpop.f32.mrb[243].mxu1 }
0x1a94   : > { %v8113_v35 = vpop.f32.mrb[232].mxu0  ;;  %v14740_v19 = vpop.f32.mrb[244].mxu1 }
0x1a95   : > { %8126 = vst.msk [vmem:[#allocation2 + $0x38] sm:$0xff] %vm1648_vm3, %v8113_v35  ;;  %v14732_v34 = vpop.f32.mrb[233].mxu0  ;;  %v8186_v38 = vpop.f32.mrb[245].mxu1  ;;  %v8195_v20 = vadd.f32 %v14740_v19, %v17772_v3 }
0x1a96   : > { %v8116_v57 = vpop.f32.mrb[234].mxu0  ;;  %v17754_v33 = vpop.f32.mrb[246].mxu1  ;;  %v8187_v63 = vadd.f32 %v17772_v3, %v8186_v38 }
0x1a97   : > { %v14733_v56 = vpop.f32.mrb[235].mxu0  ;;  %v8189_v45 = vpop.f32.mrb[247].mxu1  ;;  %v13503_v50 = vpack.c.bf16 %v8195_v20, %v8195_v20 }
0x1a98   : > { %v13501_v44 = vpack.c.bf16 %v8187_v63, %v8187_v63  ;;  %v8190_v18 = vadd.f32 %v17772_v3, %v8189_v45 }
0x1a9c   : > { %v17761_v55 = vpop.f32.mrb[248].mxu1  ;;  %v14752_v6 = vpop.f32.mrb[236].mxu0 }
0x1a9d   : > { %v8289_v60 = vadd.f32 %v14752_v6, %v17759_v5  ;;  %v8202_v52 = vpop.f32.mrb[249].mxu1  ;;  %v8280_v7 = vpop.f32.mrb[237].mxu0 }
0x1a9e   : > { %v8281_v39 = vadd.f32 %v17759_v5, %v8280_v7  ;;  %v17765_v49 = vpop.f32.mrb[250].mxu1  ;;  %v14753_v23 = vpop.f32.mrb[238].mxu0  ;;  %v8203_v53 = vadd.f32 %v17772_v3, %v8202_v52 }
0x1a9f   : > { %v13511_v14 = vpack.c.bf16 %v8289_v60, %v8289_v60  ;;  %v17767_v17 = vpop.f32.mrb[251].mxu1  ;;  %v8283_v47 = vpop.f32.mrb[239].mxu0  ;;  %v8292_v1 = vadd.f32 %v14753_v23, %v17759_v5  ;;  %v13502_v60 = vpack.c.bf16 %v8190_v18, %v8190_v18 }
0x1aa0   : > { %v13509_v13 = vpack.c.bf16 %v8281_v39, %v8281_v39  ;;  %v8284_v25 = vadd.f32 %v17759_v5, %v8283_v47  ;;  %v13505_v52 = vpack.c.bf16 %v8203_v53, %v8203_v53 }
0x1aa1   : > { %v8565_v61 = vsel %vm1648_vm3, %v13511_v14, 0  ;;  %v13512_v34 = vpack.c.bf16 %v8292_v1, %v8292_v1 }
0x1aa2   : > { %v8473_v58 = vsel %vm1648_vm3, %v13509_v13, 0  ;;  %14783 = vmatpush3.bf16.xpose.msra.mxu1 %v8565_v61  ;;  %v13510_v43 = vpack.c.bf16 %v8284_v25, %v8284_v25  ;;  %v8198_v13 = vadd.f32 %v17754_v33, %v17772_v3  ;;  %v8211_v61 = vadd.f32 %v17761_v55, %v17772_v3 }
0x1aa3   : > { %14771 = vmatpush3.bf16.xpose.msra.mxu0 %v8473_v58  ;;  %14794 = vmatprep.subr.bf16.mxu1 %v15717_v15  ;;  %v8611_v39 = vsel %vm1648_vm3, %v13512_v34, 0 }
0x1aa4   : > { %v14756_v11 = vpop.f32.mrb[240].mxu0  ;;  %v14764_v26 = vpop.f32.mrb[252].mxu1  ;;  %14776 = vmatprep.subr.bf16.mxu0 %v15717_v15  ;;  %v8519_v29 = vsel %vm1648_vm3, %v13510_v43, 0  ;;  %v13504_v20 = vpack.c.bf16 %v8198_v13, %v8198_v13  ;;  %v13507_v63 = vpack.c.bf16 %v8211_v61, %v8211_v61 }
0x1aa5   : > { %v17787_v36 = vadd.f32 %v14764_v26, %v17780_v48  ;;  %v8296_v42 = vpop.f32.mrb[241].mxu0  ;;  %v8374_v41 = vpop.f32.mrb[253].mxu1  ;;  %v8305_v21 = vadd.f32 %v14756_v11, %v17759_v5  ;;  %v8206_v26 = vadd.f32 %v17772_v3, %v17767_v17  ;;  %v8214_v17 = vadd.f32 %v17765_v49, %v17772_v3 }
0x1aa6   : > { %v8297_v9 = vadd.f32 %v17759_v5, %v8296_v42  ;;  %v14757_v37 = vpop.f32.mrb[242].mxu0  ;;  %v14765_v0 = vpop.f32.mrb[254].mxu1  ;;  %v8375_v14 = vadd.f32 %v17780_v48, %v8374_v41 }
0x1aa7   : > { %v17791_v46 = vadd.f32 %v14765_v0, %v17780_v48  ;;  %v8299_v12 = vpop.f32.mrb[243].mxu0  ;;  %v8377_v2 = vpop.f32.mrb[255].mxu1  ;;  %v13515_v38 = vpack.c.bf16 %v8305_v21, %v8305_v21  ;;  %v8308_v33 = vadd.f32 %v14757_v37, %v17759_v5  ;;  %v13506_v42 = vpack.c.bf16 %v8206_v26, %v8206_v26 }
0x1aa8   : > { %v13513_v27 = vpack.c.bf16 %v8297_v9, %v8297_v9  ;;  %v8300_v47 = vadd.f32 %v17759_v5, %v8299_v12  ;;  %v13517_v58 = vpack.c.bf16 %v8375_v14, %v8375_v14  ;;  %v8378_v43 = vadd.f32 %v17780_v48, %v8377_v2 }
0x1aa9   : > { %14785 = vmatmul.mubr.msk.bf16.vlgmr.msra.gmra.mrb[4].mxu1 %vm1648_vm3, %v13503_v50  ;;  %v8749_v23 = vsel %vm1648_vm3, %v13515_v38, 0  ;;  %v13516_v5 = vpack.c.bf16 %v8308_v33, %v8308_v33  ;;  %v13508_v37 = vpack.c.bf16 %v8214_v17, %v8214_v17 }
0x1aaa   : > { %v8657_v59 = vsel %vm1648_vm3, %v13513_v27, 0  ;;  %14773 = vmatmul.mubr.msk.bf16.vlgmr.msra.gmra.mrb[244].mxu0 %vm1648_vm3, %v13501_v44  ;;  %14796 = vmatprep.mubr.msk.bf16.mxu1 %vm15718_vm2, %v15717_v15  ;;  %v13514_v25 = vpack.c.bf16 %v8300_v47, %v8300_v47  ;;  %v8953_v11 = vsel %vm2132_vm4, %v13517_v58, 0  ;;  %v13518_v9 = vpack.c.bf16 %v8378_v43, %v8378_v43 }
0x1aab   : > { %14777 = vmatpush3.bf16.xpose.msra.mxu0 %v8519_v29  ;;  %14795 = vmatpush3.bf16.xpose.msra.mxu1 %v8657_v59  ;;  %v8795_v41 = vsel %vm1648_vm3, %v13516_v5, 0 }
0x1aac   : > { %v14768_v40 = vpop.f32.mrb[0].mxu1  ;;  %14778 = vmatprep.mubr.msk.bf16.mxu0 %vm15718_vm2, %v15717_v15  ;;  %14788 = vmatprep.subr.bf16.mxu0 %v15717_v15  ;;  %v8703_v55 = vsel %vm1648_vm3, %v13514_v25, 0  ;;  %v8999_v0 = vsel %vm2132_vm4, %v13518_v9, 0 }
0x1aad   : > { %v17807_v35 = vadd.f32 %v14768_v40, %v17780_v48  ;;  %v8390_v19 = vpop.f32.mrb[1].mxu1  ;;  %14806 = vmatprep.subr.bf16.mxu1 %v15717_v15 }
0x1aae   : > { %v17811_v57 = vadd.f32 %v17780_v48, %v8390_v19  ;;  %v14769_v56 = vpop.f32.mrb[2].mxu1 }
0x1aaf   : > { %v17814_v45 = vadd.f32 %v14769_v56, %v17780_v48  ;;  %v8393_v6 = vpop.f32.mrb[3].mxu1 }
0x1ab0   : > { %v17817_v7 = vadd.f32 %v17780_v48, %v8393_v6 }
0x1ab2   : > { %14779 = vmatmul.mubr.msk.bf16.vlgmr.msra.gmra.mrb[248].mxu0 %vm1648_vm3, %v13502_v60  ;;  %14797 = vmatmul.mubr.msk.bf16.vlgmr.msra.gmra.mrb[8].mxu1 %vm1648_vm3, %v13505_v52 }
0x1ab3   : > { %14789 = vmatpush3.bf16.xpose.msra.mxu0 %v8611_v39  ;;  %14807 = vmatpush3.bf16.xpose.msra.mxu1 %v8749_v23 }
0x1ab4   : > { %14790 = vmatprep.mubr.msk.bf16.mxu0 %vm15718_vm2, %v15717_v15  ;;  %14808 = vmatprep.mubr.msk.bf16.mxu1 %vm15718_vm2, %v15717_v15 }
0x1ab5   : > { %14800 = vmatprep.subr.bf16.mxu0 %v15717_v15  ;;  %14818 = vmatprep.subr.bf16.mxu1 %v15717_v15 }
0x1aba   : > { %14791 = vmatmul.mubr.msk.bf16.vlgmr.msra.gmra.mrb[252].mxu0 %vm1648_vm3, %v13504_v20  ;;  %14809 = vmatmul.mubr.msk.bf16.vlgmr.msra.gmra.mrb[12].mxu1 %vm1648_vm3, %v13507_v63 }
0x1abb   : > { %14801 = vmatpush3.bf16.xpose.msra.mxu0 %v8703_v55  ;;  %14819 = vmatpush3.bf16.msra.mxu1 %v8953_v11 }
0x1abc   : > { %14802 = vmatprep.mubr.msk.bf16.mxu0 %vm15718_vm2, %v15717_v15  ;;  %14812 = vmatprep.subr.bf16.mxu0 %v15717_v15 }
0x1abd   : > { %14820 = vmatprep.mubr.msk.bf16.mxu1 %vm15718_vm2, %v15717_v15  ;;  %14830 = vmatprep.subr.bf16.mxu1 %v15717_v15 }
0x1ac2   : > { %14803 = vmatmul.mubr.msk.bf16.vlgmr.msra.gmra.mrb[0].mxu0 %vm1648_vm3, %v13506_v42 }
0x1ac3   : > { %14813 = vmatpush3.bf16.xpose.msra.mxu0 %v8795_v41  ;;  %14814 = vmatprep.mubr.msk.bf16.mxu0 %vm15718_vm2, %v15717_v15 }
0x1ac4   : > { %14824 = vmatprep.subr.bf16.mxu0 %v15717_v15 }
0x1aca   : > { %14815 = vmatmul.mubr.msk.bf16.vlgmr.msra.gmra.mrb[4].mxu0 %vm1648_vm3, %v13508_v37 }
0x1acb   : > { %14825 = vmatpush3.bf16.msra.mxu0 %v8999_v0  ;;  %14826 = vmatprep.mubr.msk.bf16.mxu0 %vm15718_vm2, %v15717_v15 }
0x1acc   : > { %14836 = vmatprep.subr.bf16.mxu0 %v15717_v15 }
0x1b7c   : > { %v8601_v48 = vpop.f32.mrb[4].mxu1 }
0x1b7d   : > { %v8839_v50 = vmul.f32 0.35355338, %v8601_v48  ;;  %v8509_v12 = vpop.f32.mrb[244].mxu0  ;;  %v14786_v2 = vpop.f32.mrb[5].mxu1 }
0x1b7e   : > { %v8837_v44 = vmul.f32 0.35355338, %v8509_v12  ;;  %v14774_v49 = vpop.f32.mrb[245].mxu0  ;;  %v8604_v3 = vpop.f32.mrb[6].mxu1 }
0x1b7f   : > { %v8512_v27 = vpop.f32.mrb[246].mxu0  ;;  %v14787_v1 = vpop.f32.mrb[7].mxu1  ;;  %v8847_v59 = vadd.f32 %v8839_v50, %v16272_v30 }
0x1b80   : > { %v8845_v29 = vadd.f32 %v8837_v44, %v16272_v30  ;;  %v14775_v21 = vpop.f32.mrb[247].mxu0 }
0x1b81   : > { %v8859_v19 = vsel %vm1648_vm3, %v8847_v59, -inf }
0x1b82   : > { %v8853_v18 = vsel %vm1648_vm3, %v8845_v29, -inf }
0x1b83   : > { %8854 = vmax.xlane.f32.xlu1 %v8853_v18 }
0x1b85   : > { %v8555_v53 = vpop.f32.mrb[248].mxu0  ;;  %v8693_v40 = vpop.f32.mrb[8].mxu1 }
0x1b86   : > { %v8838_v34 = vmul.f32 0.35355338, %v8555_v53  ;;  %v8841_v38 = vmul.f32 0.35355338, %v8693_v40  ;;  %v14780_v56 = vpop.f32.mrb[249].mxu0  ;;  %v14798_v6 = vpop.f32.mrb[9].mxu1 }
0x1b87   : > { %v8696_v60 = vpop.f32.mrb[10].mxu1  ;;  %8860 = vmax.xlane.f32.xlu1 %v8859_v19  ;;  %v8558_v52 = vpop.f32.mrb[250].mxu0 }
0x1b88   : > { %v8846_v39 = vadd.f32 %v8838_v34, %v16272_v30  ;;  %v8849_v23 = vadd.f32 %v8841_v38, %v16272_v30  ;;  %v14781_v14 = vpop.f32.mrb[251].mxu0  ;;  %v14799_v47 = vpop.f32.mrb[11].mxu1 }
0x1b8a   : > { %v8865_v13 = vsel %vm1648_vm3, %v8849_v23, -inf  ;;  %v8856_v61 = vsel %vm1648_vm3, %v8846_v39, -inf }
0x1b8b   : > { %8866 = vmax.xlane.f32.xlu1 %v8865_v13  ;;  %8857 = vmax.xlane.f32.xlu0 %v8856_v61 }
0x1b8d   : > { %v8647_v58 = vpop.f32.mrb[252].mxu0  ;;  %v8785_v25 = vpop.f32.mrb[12].mxu1 }
0x1b8e   : > { %v8840_v20 = vmul.f32 0.35355338, %v8647_v58  ;;  %v8843_v63 = vmul.f32 0.35355338, %v8785_v25  ;;  %v14792_v11 = vpop.f32.mrb[253].mxu0  ;;  %v14810_v33 = vpop.f32.mrb[13].mxu1 }
0x1b8f   : > { %v8650_v55 = vpop.f32.mrb[254].mxu0  ;;  %v8788_v26 = vpop.f32.mrb[14].mxu1 }
0x1b90   : > { %v8848_v5 = vadd.f32 %v8840_v20, %v16272_v30  ;;  %v8851_v42 = vadd.f32 %v8843_v63, %v16272_v30  ;;  %v14793_v41 = vpop.f32.mrb[255].mxu0  ;;  %v14811_v43 = vpop.f32.mrb[15].mxu1 }
0x1b92   : > { %v8871_v17 = vsel %vm1648_vm3, %v8851_v42, -inf  ;;  %v8862_v9 = vsel %vm1648_vm3, %v8848_v5, -inf }
0x1b93   : > { %8872 = vmax.xlane.f32.xlu1 %v8871_v17  ;;  %8863 = vmax.xlane.f32.xlu0 %v8862_v9 }
0x1b95   : > { %v8739_v37 = vpop.f32.mrb[0].mxu0 }
0x1b96   : > { %v8842_v0 = vmul.f32 0.35355338, %v8739_v37  ;;  %v14804_v48 = vpop.f32.mrb[1].mxu0 }
0x1b97   : > { %v8742_v50 = vpop.f32.mrb[2].mxu0 }
0x1b98   : > { %v8850_v12 = vadd.f32 %v8842_v0, %v16272_v30  ;;  %v14805_v2 = vpop.f32.mrb[3].mxu0 }
0x1b9a   : > { %v8868_v44 = vsel %vm1648_vm3, %v8850_v12, -inf }
0x1b9b   : > { %8869 = vmax.xlane.f32.xlu0 %v8868_v44 }
0x1b9d   : > { %v8831_v49 = vpop.f32.mrb[4].mxu0 }
0x1b9e   : > { %v8844_v3 = vmul.f32 0.35355338, %v8831_v49  ;;  %v14816_v27 = vpop.f32.mrb[5].mxu0 }
0x1b9f   : > { %v8834_v1 = vpop.f32.mrb[6].mxu0 }
0x1ba0   : > { %v8852_v21 = vadd.f32 %v8844_v3, %v16272_v30  ;;  %v14817_v18 = vpop.f32.mrb[7].mxu0 }
0x1ba2   : > { %v8874_v53 = vsel %vm1648_vm3, %v8852_v21, -inf }
0x1ba3   : > { %8875 = vmax.xlane.f32.xlu0 %v8874_v53 }
0x1c10   : > { %v8855_v40 = vpop.xlane.xlu1 %8854 }
0x1c11   : > { %v8877_v19 = vsub.f32 %v8845_v29, %v8855_v40 }
0x1c13   : > { %v8885_v34 = vmul.f32 1.442695, %v8877_v19  ;;  %v13519_v19 = vpack.c.bf16 %v17787_v36, %v17787_v36  ;;  %v13521_v36 = vpack.c.bf16 %v17811_v57, %v17811_v57 }
0x1c14   : > { %v8861_v38 = vpop.xlane.xlu1 %8860 }
0x1c15   : > { %15562 = vpow2.f32 %v8885_v34  ;;  %v8879_v56 = vsub.f32 %v8847_v59, %v8861_v38 }
0x1c17   : > { %v8889_v6 = vmul.f32 1.442695, %v8879_v56 }
0x1c18   : > { %v8867_v60 = vpop.xlane.xlu1 %8866  ;;  %v8858_v52 = vpop.xlane.xlu0 %8857 }
0x1c19   : > { %15564 = vpow2.f32 %v8889_v6  ;;  %v8881_v14 = vsub.f32 %v8849_v23, %v8867_v60  ;;  %v8878_v47 = vsub.f32 %v8846_v39, %v8858_v52  ;;  %v9045_v6 = vsel %vm2132_vm4, %v13519_v19, 0 }
0x1c1b   : > { %v8893_v13 = vmul.f32 1.442695, %v8881_v14  ;;  %v8887_v61 = vmul.f32 1.442695, %v8878_v47 }
0x1c1d   : > { %15566 = vpow2.f32 %v8893_v13  ;;  %v13520_v13 = vpack.c.bf16 %v17791_v46, %v17791_v46 }
0x1c1e   : > { %15568 = vpow2.f32 %v8887_v61 }
0x1c1f   : > { %v15563_v58 = vpop.eup %15562 }
0x1c20   : > { %v8873_v25 = vpop.xlane.xlu1 %8872  ;;  %v8864_v20 = vpop.xlane.xlu0 %8863  ;;  %v8901_v63 = vsel %vm1648_vm3, %v15563_v58, 0.0 }
0x1c21   : > { %v8883_v29 = vsub.f32 %v8851_v42, %v8873_v25  ;;  %v8880_v11 = vsub.f32 %v8848_v5, %v8864_v20  ;;  %8902 = vadd.xlane.f32.xlu1 %v8901_v63  ;;  %v9137_v63 = vsel %vm2132_vm4, %v13521_v36, 0 }
0x1c23   : > { %v15565_v33 = vpop.eup %15564  ;;  %v8897_v59 = vmul.f32 1.442695, %v8883_v29  ;;  %v8891_v55 = vmul.f32 1.442695, %v8880_v11  ;;  %v9091_v11 = vsel %vm2132_vm4, %v13520_v13, 0 }
0x1c24   : > { %v8907_v26 = vsel %vm1648_vm3, %v15565_v33, 0.0 }
0x1c25   : > { %15570 = vpow2.f32 %v8897_v59  ;;  %8908 = vadd.xlane.f32.xlu1 %v8907_v26  ;;  %v13522_v59 = vpack.c.bf16 %v17817_v7, %v17817_v7 }
0x1c26   : > { %15572 = vpow2.f32 %v8891_v55 }
0x1c27   : > { %v17879_v39 = vpop.eup %15566 }
0x1c28   : > { %v15569_v23 = vpop.eup %15568  ;;  %v8870_v41 = vpop.xlane.xlu0 %8869  ;;  %v8913_v43 = vsel %vm1648_vm3, %v17879_v39, 0.0 }
0x1c29   : > { %v8882_v17 = vsub.f32 %v8850_v12, %v8870_v41  ;;  %8914 = vadd.xlane.f32.xlu1 %v8913_v43  ;;  %v8904_v5 = vsel %vm1648_vm3, %v15569_v23, 0.0 }
0x1c2a   : > { %8905 = vadd.xlane.f32.xlu0 %v8904_v5 }
0x1c2b   : > { %v8895_v42 = vmul.f32 1.442695, %v8882_v17  ;;  %v15279_v17 = vld [vmem:[%s18796_s6 + $0x60] sm:$0xff]  }
0x1c2d   : > { %15574 = vpow2.f32 %v8895_v42 }
0x1c2f   : > { %v17884_v9 = vpop.eup %15570 }
0x1c30   : > { %v15573_v37 = vpop.eup %15572  ;;  %v8876_v0 = vpop.xlane.xlu0 %8875  ;;  %v8919_v48 = vsel %vm1648_vm3, %v17884_v9, 0.0 }
0x1c31   : > { %v8884_v50 = vsub.f32 %v8852_v21, %v8876_v0  ;;  %8920 = vadd.xlane.f32.xlu1 %v8919_v48  ;;  %v8910_v2 = vsel %vm1648_vm3, %v15573_v37, 0.0 }
0x1c32   : > { %8911 = vadd.xlane.f32.xlu0 %v8910_v2 }
0x1c33   : > { %v8899_v44 = vmul.f32 1.442695, %v8884_v50  ;;  %v15281_v50 = vld [vmem:[%s18797_s0 + $0x60] sm:$0xff]  }
0x1c35   : > { %15576 = vpow2.f32 %v8899_v44 }
0x1c37   : > { %v17889_v12 = vpop.eup %15574 }
0x1c38   : > { %v8916_v49 = vsel %vm1648_vm3, %v17889_v12, 0.0 }
0x1c39   : > { %8917 = vadd.xlane.f32.xlu0 %v8916_v49 }
0x1c3f   : > { %v17893_v3 = vpop.eup %15576 }
0x1c40   : > { %v8922_v27 = vsel %vm1648_vm3, %v17893_v3, 0.0 }
0x1c41   : > { %8923 = vadd.xlane.f32.xlu0 %v8922_v27  ;;  %v15282_v27 = vld [vmem:[%s18797_s0 + $0x68] sm:$0xff]  }
0x1cae   : > { %v8903_v1 = vpop.xlane.xlu1 %8902 }
0x1caf   : > { %15578 = vrcp.f32 %v8903_v1  ;;  %v15284_v1 = vld [vmem:[%s18746_s11 + $0x68] sm:$0xff]  }
0x1cb2   : > { %v8909_v21 = vpop.xlane.xlu1 %8908 }
0x1cb3   : > { %15580 = vrcp.f32 %v8909_v21 }
0x1cb6   : > { %v8915_v53 = vpop.xlane.xlu1 %8914 }
0x1cb7   : > { %v8906_v18 = vpop.xlane.xlu0 %8905 }
0x1cb8   : > { %15582 = vrcp.f32 %v8906_v18 }
0x1cb9   : > { %v15579_v40 = vpop.eup %15578  ;;  %15584 = vrcp.f32 %v8915_v53 }
0x1cba   : > { %v8933_v34 = vmul.f32 %v15579_v40, %v15563_v58 }
0x1cbc   : > { %v8941_v38 = vpack.c.bf16 %v8933_v34, %v8933_v34 }
0x1cbd   : > { %v15581_v56 = vpop.eup %15580 }
0x1cbe   : > { %14821 = vmatmul.mubr.msk.bf16.vlgmr.msra.gmra.mrb[16].mxu1 %vm1648_vm3, %v8941_v38  ;;  %v8935_v52 = vmul.f32 %v15581_v56, %v15565_v33  ;;  %v8921_v14 = vpop.xlane.xlu1 %8920  ;;  %v13523_v33 = vpack.c.bf16 %v17807_v35, %v17807_v35  ;;  %v9183_v35 = vsel %vm2132_vm4, %v13522_v59, 0 }
0x1cbf   : > { %14831 = vmatpush3.bf16.msra.mxu1 %v9045_v6  ;;  %v8912_v60 = vpop.xlane.xlu0 %8911  ;;  %14832 = vmatprep.mubr.msk.bf16.mxu1 %vm15718_vm2, %v15717_v15 }
0x1cc0   : > { %15586 = vrcp.f32 %v8912_v60  ;;  %14842 = vmatprep.subr.bf16.mxu1 %v15717_v15  ;;  %v8943_v58 = vpack.c.bf16 %v8935_v52, %v8935_v52  ;;  %v9229_v41 = vsel %vm2132_vm4, %v13523_v33, 0 }
0x1cc1   : > { %15588 = vrcp.f32 %v8921_v14 }
0x1cc2   : > { %v15583_v47 = vpop.eup %15582 }
0x1cc3   : > { %v8934_v61 = vmul.f32 %v15583_v47, %v15569_v23  ;;  %v15585_v25 = vpop.eup %15584 }
0x1cc4   : > { %v8937_v57 = vmul.f32 %v15585_v25, %v17879_v39 }
0x1cc5   : > { %v8942_v20 = vpack.c.bf16 %v8934_v61, %v8934_v61 }
0x1cc6   : > { %14833 = vmatmul.mubr.msk.bf16.vlgmr.msra.gmra.mrb[20].mxu1 %vm1648_vm3, %v8943_v58  ;;  %v8918_v29 = vpop.xlane.xlu0 %8917  ;;  %v8945_v26 = vpack.c.bf16 %v8937_v57, %v8937_v57 }
0x1cc7   : > { %14827 = vmatmul.mubr.msk.bf16.vlgmr.msra.gmra.mrb[8].mxu0 %vm1648_vm3, %v8942_v20  ;;  %14843 = vmatpush3.bf16.msra.mxu1 %v9137_v63  ;;  %15590 = vrcp.f32 %v8918_v29 }
0x1cc8   : > { %14837 = vmatpush3.bf16.msra.mxu0 %v9091_v11  ;;  %14838 = vmatprep.mubr.msk.bf16.mxu0 %vm15718_vm2, %v15717_v15 }
0x1cc9   : > { %14844 = vmatprep.mubr.msk.bf16.mxu1 %vm15718_vm2, %v15717_v15  ;;  %14848 = vmatprep.subr.bf16.mxu0 %v15717_v15 }
0x1cca   : > { %v15587_v46 = vpop.eup %15586  ;;  %14854 = vmatprep.subr.bf16.mxu1 %v15717_v15 }
0x1ccb   : > { %v8936_v55 = vmul.f32 %v15587_v46, %v15573_v37  ;;  %v15589_v39 = vpop.eup %15588  ;;  %v13524_v37 = vpack.c.bf16 %v17814_v45, %v17814_v45  ;;  %v15283_v45 = vld [vmem:[%s18746_s11 + $0x60] sm:$0xff]  }
0x1ccc   : > { %v8939_v7 = vmul.f32 %v15589_v39, %v17884_v9  ;;  %v15280_v9 = vld [vmem:[%s18796_s6 + $0x68] sm:$0xff]  }
0x1ccd   : > { %v8944_v23 = vpack.c.bf16 %v8936_v55, %v8936_v55  ;;  %v9275_v2 = vsel %vm2132_vm4, %v13524_v37, 0 }
0x1cce   : > { %14845 = vmatmul.mubr.msk.bf16.vlgmr.msra.gmra.mrb[24].mxu1 %vm1648_vm3, %v8945_v26  ;;  %v8924_v43 = vpop.xlane.xlu0 %8923  ;;  %v8947_v0 = vpack.c.bf16 %v8939_v7, %v8939_v7 }
0x1ccf   : > { %14839 = vmatmul.mubr.msk.bf16.vlgmr.msra.gmra.mrb[12].mxu0 %vm1648_vm3, %v8944_v23  ;;  %14855 = vmatpush3.bf16.msra.mxu1 %v9229_v41  ;;  %15592 = vrcp.f32 %v8924_v43 }
0x1cd0   : > { %14849 = vmatpush3.bf16.msra.mxu0 %v9183_v35  ;;  %14850 = vmatprep.mubr.msk.bf16.mxu0 %vm15718_vm2, %v15717_v15 }
0x1cd1   : > { %v15591_v5 = vpop.eup %15590  ;;  %14856 = vmatprep.mubr.msk.bf16.mxu1 %vm15718_vm2, %v15717_v15  ;;  %14860 = vmatprep.subr.bf16.mxu0 %v15717_v15 }
0x1cd2   : > { %v8938_v42 = vmul.f32 %v15591_v5, %v17889_v12  ;;  %14866 = vmatprep.subr.bf16.mxu1 %v15279_v17  ;;  %v18012_v5 = vld [vmem:[%s18800_s7 + $0x6] ss:$0 sm:$0xff] }
0x1cd4   : > { %v8946_v48 = vpack.c.bf16 %v8938_v42, %v8938_v42 }
0x1cd6   : > { %14857 = vmatmul.mubr.msk.bf16.vlgmr.msra.gmra.mrb[28].mxu1 %vm1648_vm3, %v8947_v0 }
0x1cd7   : > { %14851 = vmatmul.mubr.msk.bf16.vlgmr.msra.gmra.mrb[16].mxu0 %vm1648_vm3, %v8946_v48  ;;  %14867 = vmatpush3.bf16.msra.mxu1 %v15279_v17 }
0x1cd8   : > { %14861 = vmatpush3.bf16.msra.mxu0 %v9275_v2  ;;  %14870 = vmatprep.mubr.msk.bf16.mxu1 %vm1028_vm1, %v17459_v10 }
0x1cd9   : > { %v15593_v44 = vpop.eup %15592  ;;  %14868 = vmatprep.subr.bf16.mxu1 %v15280_v9  ;;  %14862 = vmatprep.mubr.msk.bf16.mxu0 %vm15718_vm2, %v15717_v15 }
0x1cda   : > { %v8940_v12 = vmul.f32 %v15593_v44, %v17893_v3  ;;  %14878 = vmatprep.subr.bf16.mxu0 %v15281_v50 }
0x1cdb   : > { %14869 = vmatpush3.bf16.msra.mxu1 %v15280_v9 }
0x1cdc   : > { %v8948_v49 = vpack.c.bf16 %v8940_v12, %v8940_v12  ;;  %14890 = vmatprep.subr.bf16.mxu1 %v15283_v45 }
0x1cde   : > { %14871 = vmatmul.mubr.msk.bf16.vlgmr.msra.gmra.mrb[32].mxu1 %vm1028_vm1, %v17465_v8 }
0x1cdf   : > { %14863 = vmatmul.mubr.msk.bf16.vlgmr.msra.gmra.mrb[20].mxu0 %vm1648_vm3, %v8948_v49  ;;  %14874 = vmatprep.mubr.msk.bf16.mxu1 %vm1028_vm1, %v17479_v62 }
0x1ce0   : > { %14879 = vmatpush3.bf16.msra.mxu0 %v15281_v50  ;;  %14882 = vmatprep.mubr.msk.bf16.mxu0 %vm1028_vm1, %v17459_v10 }
0x1ce1   : > { %14880 = vmatprep.subr.bf16.mxu0 %v15282_v27  ;;  %14891 = vmatpush3.bf16.msra.mxu1 %v15283_v45 }
0x1ce2   : > { %14892 = vmatprep.subr.bf16.mxu1 %v15284_v1 }
0x1ce4   : > { %14881 = vmatpush3.bf16.msra.mxu0 %v15282_v27  ;;  %v18025_v27 = vld [vmem:[%s18801_s9 + $0x6] ss:$0 sm:$0xff] }
0x1ce5   : > { %14893 = vmatpush3.bf16.msra.mxu1 %v15284_v1  ;;  %14902 = vmatprep.subr.bf16.mxu0 %v15717_v15 }
0x1ce6   : > { %14875 = vmatmul.mubr.msk.bf16.gmra.mrb[36].mxu1 %vm1028_vm1, %v17485_v32  ;;  %14914 = vmatprep.subr.bf16.mxu1 %v15717_v15 }
0x1ce7   : > { %14883 = vmatmul.mubr.msk.bf16.vlgmr.msra.gmra.mrb[24].mxu0 %vm1028_vm1, %v17465_v8  ;;  %14894 = vmatprep.mubr.msk.bf16.mxu1 %vm1028_vm1, %v17459_v10 }
0x1ce8   : > { %14886 = vmatprep.mubr.msk.bf16.mxu0 %vm1028_vm1, %v17479_v62 }
0x1cee   : > { %14895 = vmatmul.mubr.msk.bf16.vlgmr.msra.gmra.mrb[40].mxu1 %vm1028_vm1, %v17465_v8 }
0x1cef   : > { %14887 = vmatmul.mubr.msk.bf16.gmra.mrb[28].mxu0 %vm1028_vm1, %v17485_v32  ;;  %14898 = vmatprep.mubr.msk.bf16.mxu1 %vm1028_vm1, %v17479_v62 }
0x1cf0   : > { %14904 = vmatprep.mubr.msk.bf16.mxu0 %vm15718_vm2, %v15717_v15 }
0x1cf6   : > { %14899 = vmatmul.mubr.msk.bf16.gmra.mrb[44].mxu1 %vm1028_vm1, %v17485_v32 }
0x1cf7   : > { %14916 = vmatprep.mubr.msk.bf16.mxu1 %vm15718_vm2, %v15717_v15 }
0x1d91   : > { %v17991_v3 = vpop.f32.mrb[16].mxu1 }
0x1d92   : > { %v14822_v21 = vpop.f32.mrb[17].mxu1 }
0x1d93   : > { %v8992_v18 = vpop.f32.mrb[18].mxu1 }
0x1d94   : > { %v14823_v53 = vpop.f32.mrb[19].mxu1  ;;  %v18031_v18 = vld [vmem:[%s18747_s12 + $0x6] ss:$0 sm:$0xff] }
0x1d99   : > { %v17993_v40 = vpop.f32.mrb[20].mxu1 }
0x1d9a   : > { %v17995_v19 = vpop.f32.mrb[8].mxu0  ;;  %v14834_v34 = vpop.f32.mrb[21].mxu1 }
0x1d9b   : > { %v14828_v38 = vpop.f32.mrb[9].mxu0  ;;  %v9084_v56 = vpop.f32.mrb[22].mxu1 }
0x1d9c   : > { %v9038_v6 = vpop.f32.mrb[10].mxu0  ;;  %v14835_v60 = vpop.f32.mrb[23].mxu1 }
0x1d9d   : > { %v14829_v52 = vpop.f32.mrb[11].mxu0 }
0x1da1   : > { %v17997_v14 = vpop.f32.mrb[24].mxu1 }
0x1da2   : > { %v17999_v47 = vpop.f32.mrb[12].mxu0  ;;  %v14846_v36 = vpop.f32.mrb[25].mxu1 }
0x1da3   : > { %v14840_v13 = vpop.f32.mrb[13].mxu0  ;;  %v9176_v61 = vpop.f32.mrb[26].mxu1 }
0x1da4   : > { %v9130_v58 = vpop.f32.mrb[14].mxu0  ;;  %v14847_v25 = vpop.f32.mrb[27].mxu1 }
0x1da5   : > { %v14841_v20 = vpop.f32.mrb[15].mxu0 }
0x1da9   : > { %v18001_v63 = vpop.f32.mrb[28].mxu1 }
0x1daa   : > { %v18003_v29 = vpop.f32.mrb[16].mxu0  ;;  %v14858_v11 = vpop.f32.mrb[29].mxu1 }
0x1dab   : > { %v14852_v57 = vpop.f32.mrb[17].mxu0  ;;  %v9268_v46 = vpop.f32.mrb[30].mxu1 }
0x1dac   : > { %v9222_v33 = vpop.f32.mrb[18].mxu0  ;;  %v14859_v59 = vpop.f32.mrb[31].mxu1 }
0x1dad   : > { %v14853_v55 = vpop.f32.mrb[19].mxu0 }
0x1db1   : > { %v14872_v26 = vpop.f32.mrb[32].mxu1 }
0x1db2   : > { %v18005_v39 = vpop.f32.mrb[20].mxu0  ;;  %v9416_v23 = vpop.f32.mrb[33].mxu1  ;;  %v9425_v38 = vadd.f32 %v14872_v26, %v18025_v27 }
0x1db3   : > { %v14864_v41 = vpop.f32.mrb[21].mxu0  ;;  %v18007_v43 = vpop.f32.mrb[34].mxu1  ;;  %v9417_v6 = vadd.f32 %v18025_v27, %v9416_v23 }
0x1db4   : > { %v9314_v17 = vpop.f32.mrb[22].mxu0  ;;  %v9419_v35 = vpop.f32.mrb[35].mxu1  ;;  %v13527_v46 = vpack.c.bf16 %v9425_v38, %v9425_v38 }
0x1db5   : > { %v14865_v7 = vpop.f32.mrb[23].mxu0  ;;  %v13525_v59 = vpack.c.bf16 %v9417_v6, %v9417_v6 }
0x1db9   : > { %v18014_v42 = vpop.f32.mrb[36].mxu1 }
0x1dba   : > { %v14884_v37 = vpop.f32.mrb[24].mxu0  ;;  %v9432_v0 = vpop.f32.mrb[37].mxu1 }
0x1dbb   : > { %v9519_v48 = vadd.f32 %v14884_v37, %v18012_v5  ;;  %v9510_v9 = vpop.f32.mrb[25].mxu0  ;;  %v18017_v50 = vpop.f32.mrb[38].mxu1  ;;  %v9420_v37 = vadd.f32 %v18025_v27, %v9419_v35 }
0x1dbc   : > { %v9511_v2 = vadd.f32 %v18012_v5, %v9510_v9  ;;  %v14885_v45 = vpop.f32.mrb[26].mxu0  ;;  %v18020_v44 = vpop.f32.mrb[39].mxu1 }
0x1dbd   : > { %v13535_v12 = vpack.c.bf16 %v9519_v48, %v9519_v48  ;;  %v9513_v49 = vpop.f32.mrb[27].mxu0  ;;  %v9522_v26 = vadd.f32 %v14885_v45, %v18012_v5  ;;  %v9433_v48 = vadd.f32 %v18025_v27, %v9432_v0 }
0x1dbe   : > { %v13533_v1 = vpack.c.bf16 %v9511_v2, %v9511_v2  ;;  %v9514_v34 = vadd.f32 %v18012_v5, %v9513_v49 }
0x1dbf   : > { %v9795_v21 = vsel %vm1648_vm3, %v13535_v12, 0  ;;  %v13536_v49 = vpack.c.bf16 %v9522_v26, %v9522_v26 }
0x1dc0   : > { %v9703_v53 = vsel %vm1648_vm3, %v13533_v1, 0  ;;  %14915 = vmatpush3.bf16.xpose.msra.mxu1 %v9795_v21  ;;  %v13534_v58 = vpack.c.bf16 %v9514_v34, %v9514_v34  ;;  %v13529_v34 = vpack.c.bf16 %v9433_v48, %v9433_v48 }
0x1dc1   : > { %14903 = vmatpush3.bf16.xpose.msra.mxu0 %v9703_v53  ;;  %v14896_v56 = vpop.f32.mrb[40].mxu1  ;;  %14926 = vmatprep.subr.bf16.mxu1 %v15717_v15  ;;  %v13526_v53 = vpack.c.bf16 %v9420_v37, %v9420_v37  ;;  %v9841_v38 = vsel %vm1648_vm3, %v13536_v49, 0 }
0x1dc2   : > { %v14888_v60 = vpop.f32.mrb[28].mxu0  ;;  %v18039_v52 = vadd.f32 %v14896_v56, %v18031_v18  ;;  %v9604_v36 = vpop.f32.mrb[41].mxu1  ;;  %14908 = vmatprep.subr.bf16.mxu0 %v15717_v15  ;;  %v9749_v23 = vsel %vm1648_vm3, %v13534_v58, 0 }
0x1dc3   : > { %v9526_v13 = vpop.f32.mrb[29].mxu0  ;;  %v14897_v61 = vpop.f32.mrb[42].mxu1  ;;  %v9535_v41 = vadd.f32 %v14888_v60, %v18012_v5  ;;  %v9605_v6 = vadd.f32 %v18031_v18, %v9604_v36 }
0x1dc4   : > { %v9527_v25 = vadd.f32 %v18012_v5, %v9526_v13  ;;  %v14889_v20 = vpop.f32.mrb[30].mxu0  ;;  %v18044_v11 = vadd.f32 %v14897_v61, %v18031_v18  ;;  %v18046_v57 = vpop.f32.mrb[43].mxu1  ;;  %v9428_v13 = vadd.f32 %v18007_v43, %v18025_v27  ;;  %v9441_v61 = vadd.f32 %v18014_v42, %v18025_v27 }
0x1dc5   : > { %v9529_v33 = vpop.f32.mrb[31].mxu0  ;;  %v13539_v1 = vpack.c.bf16 %v9535_v41, %v9535_v41  ;;  %v13541_v36 = vpack.c.bf16 %v9605_v6, %v9605_v6  ;;  %v9538_v43 = vadd.f32 %v14889_v20, %v18012_v5  ;;  %v9608_v26 = vadd.f32 %v18031_v18, %v18046_v57 }
0x1dc6   : > { %v13537_v55 = vpack.c.bf16 %v9527_v25, %v9527_v25  ;;  %v9530_v60 = vadd.f32 %v18012_v5, %v9529_v33  ;;  %v13528_v25 = vpack.c.bf16 %v9428_v13, %v9428_v13 }
0x1dc7   : > { %14917 = vmatmul.mubr.msk.bf16.vlgmr.msra.gmra.mrb[48].mxu1 %vm1648_vm3, %v13527_v46  ;;  %v9979_v56 = vsel %vm1648_vm3, %v13539_v1, 0  ;;  %v13531_v46 = vpack.c.bf16 %v9441_v61, %v9441_v61  ;;  %v10183_v33 = vsel %vm2132_vm4, %v13541_v36, 0  ;;  %v13540_v5 = vpack.c.bf16 %v9538_v43, %v9538_v43 }
0x1dc8   : > { %v9887_v17 = vsel %vm1648_vm3, %v13537_v55, 0  ;;  %14905 = vmatmul.mubr.msk.bf16.vlgmr.msra.gmra.mrb[32].mxu0 %vm1648_vm3, %v13525_v59  ;;  %14928 = vmatprep.mubr.msk.bf16.mxu1 %vm15718_vm2, %v15717_v15  ;;  %v13538_v58 = vpack.c.bf16 %v9530_v60, %v9530_v60  ;;  %v9436_v59 = vadd.f32 %v18025_v27, %v18020_v44  ;;  %v9444_v44 = vadd.f32 %v18017_v50, %v18025_v27 }
0x1dc9   : > { %14909 = vmatpush3.bf16.xpose.msra.mxu0 %v9749_v23  ;;  %14927 = vmatpush3.bf16.xpose.msra.mxu1 %v9887_v17  ;;  %v14900_v7 = vpop.f32.mrb[44].mxu1  ;;  %v10025_v55 = vsel %vm1648_vm3, %v13540_v5, 0  ;;  %v13542_v23 = vpack.c.bf16 %v9608_v26, %v9608_v26 }
0x1dca   : > { %v18059_v9 = vadd.f32 %v14900_v7, %v18031_v18  ;;  %v9620_v2 = vpop.f32.mrb[45].mxu1  ;;  %14910 = vmatprep.mubr.msk.bf16.mxu0 %vm15718_vm2, %v15717_v15  ;;  %14920 = vmatprep.subr.bf16.mxu0 %v15717_v15  ;;  %v9933_v42 = vsel %vm1648_vm3, %v13538_v58, 0  ;;  %v13530_v20 = vpack.c.bf16 %v9436_v59, %v9436_v59  ;;  %v13532_v41 = vpack.c.bf16 %v9444_v44, %v9444_v44 }
0x1dcb   : > { %v18065_v45 = vadd.f32 %v18031_v18, %v9620_v2  ;;  %v14901_v12 = vpop.f32.mrb[46].mxu1  ;;  %14938 = vmatprep.subr.bf16.mxu1 %v15717_v15  ;;  %v10229_v17 = vsel %vm2132_vm4, %v13542_v23, 0 }
0x1dcc   : > { %v18069_v35 = vadd.f32 %v14901_v12, %v18031_v18  ;;  %v9623_v0 = vpop.f32.mrb[47].mxu1 }
0x1dcd   : > { %v18072_v21 = vadd.f32 %v18031_v18, %v9623_v0 }
0x1dd0   : > { %14911 = vmatmul.mubr.msk.bf16.vlgmr.msra.gmra.mrb[36].mxu0 %vm1648_vm3, %v13526_v53  ;;  %14929 = vmatmul.mubr.msk.bf16.vlgmr.msra.gmra.mrb[52].mxu1 %vm1648_vm3, %v13529_v34 }
0x1dd1   : > { %14921 = vmatpush3.bf16.xpose.msra.mxu0 %v9841_v38  ;;  %14939 = vmatpush3.bf16.xpose.msra.mxu1 %v9979_v56 }
0x1dd2   : > { %14922 = vmatprep.mubr.msk.bf16.mxu0 %vm15718_vm2, %v15717_v15  ;;  %14940 = vmatprep.mubr.msk.bf16.mxu1 %vm15718_vm2, %v15717_v15 }
0x1dd3   : > { %14932 = vmatprep.subr.bf16.mxu0 %v15717_v15  ;;  %14950 = vmatprep.subr.bf16.mxu1 %v15717_v15 }
0x1dd8   : > { %14923 = vmatmul.mubr.msk.bf16.vlgmr.msra.gmra.mrb[40].mxu0 %vm1648_vm3, %v13528_v25  ;;  %14941 = vmatmul.mubr.msk.bf16.vlgmr.msra.gmra.mrb[56].mxu1 %vm1648_vm3, %v13531_v46 }
0x1dd9   : > { %14933 = vmatpush3.bf16.xpose.msra.mxu0 %v9933_v42  ;;  %14951 = vmatpush3.bf16.msra.mxu1 %v10183_v33 }
0x1dda   : > { %14934 = vmatprep.mubr.msk.bf16.mxu0 %vm15718_vm2, %v15717_v15  ;;  %14944 = vmatprep.subr.bf16.mxu0 %v15717_v15 }
0x1ddb   : > { %14952 = vmatprep.mubr.msk.bf16.mxu1 %vm15718_vm2, %v15717_v15  ;;  %14962 = vmatprep.subr.bf16.mxu1 %v15717_v15 }
0x1de0   : > { %14935 = vmatmul.mubr.msk.bf16.vlgmr.msra.gmra.mrb[44].mxu0 %vm1648_vm3, %v13530_v20 }
0x1de1   : > { %14945 = vmatpush3.bf16.xpose.msra.mxu0 %v10025_v55  ;;  %14946 = vmatprep.mubr.msk.bf16.mxu0 %vm15718_vm2, %v15717_v15 }
0x1de2   : > { %14956 = vmatprep.subr.bf16.mxu0 %v15717_v15 }
0x1de8   : > { %14947 = vmatmul.mubr.msk.bf16.vlgmr.msra.gmra.mrb[48].mxu0 %vm1648_vm3, %v13532_v41 }
0x1de9   : > { %14957 = vmatpush3.bf16.msra.mxu0 %v10229_v17  ;;  %14958 = vmatprep.mubr.msk.bf16.mxu0 %vm15718_vm2, %v15717_v15 }
0x1dea   : > { %14968 = vmatprep.subr.bf16.mxu0 %v15717_v15 }
0x1e9a   : > { %v9831_v18 = vpop.f32.mrb[48].mxu1 }
0x1e9b   : > { %v10069_v57 = vmul.f32 0.35355338, %v9831_v18  ;;  %v9739_v7 = vpop.f32.mrb[32].mxu0  ;;  %v14918_v37 = vpop.f32.mrb[49].mxu1 }
0x1e9c   : > { %v10067_v48 = vmul.f32 0.35355338, %v9739_v7  ;;  %v14906_v50 = vpop.f32.mrb[33].mxu0  ;;  %v9834_v27 = vpop.f32.mrb[50].mxu1 }
0x1e9d   : > { %v9742_v2 = vpop.f32.mrb[34].mxu0  ;;  %v14919_v12 = vpop.f32.mrb[51].mxu1  ;;  %v10077_v0 = vadd.f32 %v10069_v57, %v16272_v30 }
0x1e9e   : > { %v10075_v49 = vadd.f32 %v10067_v48, %v16272_v30  ;;  %v14907_v1 = vpop.f32.mrb[35].mxu0 }
0x1e9f   : > { %v10089_v56 = vsel %vm1648_vm3, %v10077_v0, -inf }
0x1ea0   : > { %v10083_v53 = vsel %vm1648_vm3, %v10075_v49, -inf }
0x1ea1   : > { %10084 = vmax.xlane.f32.xlu1 %v10083_v53 }
0x1ea3   : > { %v9785_v34 = vpop.f32.mrb[36].mxu0  ;;  %v9923_v38 = vpop.f32.mrb[52].mxu1 }
0x1ea4   : > { %v10068_v6 = vmul.f32 0.35355338, %v9785_v34  ;;  %v10071_v60 = vmul.f32 0.35355338, %v9923_v38  ;;  %v14912_v13 = vpop.f32.mrb[37].mxu0  ;;  %v14930_v61 = vpop.f32.mrb[53].mxu1 }
0x1ea5   : > { %v9926_v36 = vpop.f32.mrb[54].mxu1  ;;  %10090 = vmax.xlane.f32.xlu1 %v10089_v56  ;;  %v9788_v58 = vpop.f32.mrb[38].mxu0 }
0x1ea6   : > { %v10076_v25 = vadd.f32 %v10068_v6, %v16272_v30  ;;  %v10079_v46 = vadd.f32 %v10071_v60, %v16272_v30  ;;  %v14913_v33 = vpop.f32.mrb[39].mxu0  ;;  %v14931_v43 = vpop.f32.mrb[55].mxu1 }
0x1ea8   : > { %v10095_v42 = vsel %vm1648_vm3, %v10079_v46, -inf  ;;  %v10086_v59 = vsel %vm1648_vm3, %v10076_v25, -inf }
0x1ea9   : > { %10096 = vmax.xlane.f32.xlu1 %v10095_v42  ;;  %10087 = vmax.xlane.f32.xlu0 %v10086_v59 }
0x1eab   : > { %v9877_v5 = vpop.f32.mrb[40].mxu0  ;;  %v10015_v20 = vpop.f32.mrb[56].mxu1 }
0x1eac   : > { %v10070_v55 = vmul.f32 0.35355338, %v9877_v5  ;;  %v10073_v26 = vmul.f32 0.35355338, %v10015_v20  ;;  %v14924_v44 = vpop.f32.mrb[41].mxu0  ;;  %v14942_v23 = vpop.f32.mrb[57].mxu1 }
0x1ead   : > { %v9880_v41 = vpop.f32.mrb[42].mxu0  ;;  %v10018_v17 = vpop.f32.mrb[58].mxu1 }
0x1eae   : > { %v10078_v18 = vadd.f32 %v10070_v55, %v16272_v30  ;;  %v10081_v57 = vadd.f32 %v10073_v26, %v16272_v30  ;;  %v14925_v7 = vpop.f32.mrb[43].mxu0  ;;  %v14943_v37 = vpop.f32.mrb[59].mxu1 }
0x1eb0   : > { %v10101_v48 = vsel %vm1648_vm3, %v10081_v57, -inf  ;;  %v10092_v50 = vsel %vm1648_vm3, %v10078_v18, -inf }
0x1eb1   : > { %10102 = vmax.xlane.f32.xlu1 %v10101_v48  ;;  %10093 = vmax.xlane.f32.xlu0 %v10092_v50 }
0x1eb3   : > { %v9969_v27 = vpop.f32.mrb[44].mxu0 }
0x1eb4   : > { %v10072_v2 = vmul.f32 0.35355338, %v9969_v27  ;;  %v14936_v12 = vpop.f32.mrb[45].mxu0 }
0x1eb5   : > { %v9972_v1 = vpop.f32.mrb[46].mxu0 }
0x1eb6   : > { %v10080_v53 = vadd.f32 %v10072_v2, %v16272_v30  ;;  %v14937_v34 = vpop.f32.mrb[47].mxu0 }
0x1eb8   : > { %v10098_v38 = vsel %vm1648_vm3, %v10080_v53, -inf }
0x1eb9   : > { %10099 = vmax.xlane.f32.xlu0 %v10098_v38 }
0x1ebb   : > { %v10061_v56 = vpop.f32.mrb[48].mxu0 }
0x1ebc   : > { %v10074_v6 = vmul.f32 0.35355338, %v10061_v56  ;;  %v14948_v60 = vpop.f32.mrb[49].mxu0 }
0x1ebd   : > { %v10064_v13 = vpop.f32.mrb[50].mxu0 }
0x1ebe   : > { %v10082_v61 = vadd.f32 %v10074_v6, %v16272_v30  ;;  %v14949_v36 = vpop.f32.mrb[51].mxu0 }
0x1ec0   : > { %v10104_v58 = vsel %vm1648_vm3, %v10082_v61, -inf }
0x1ec1   : > { %10105 = vmax.xlane.f32.xlu0 %v10104_v58 }
0x1f2e   : > { %v10085_v33 = vpop.xlane.xlu1 %10084 }
0x1f2f   : > { %v10107_v43 = vsub.f32 %v10075_v49, %v10085_v33 }
0x1f31   : > { %v10115_v42 = vmul.f32 1.442695, %v10107_v43 }
0x1f32   : > { %v10091_v59 = vpop.xlane.xlu1 %10090 }
0x1f33   : > { %15594 = vpow2.f32 %v10115_v42  ;;  %v10109_v5 = vsub.f32 %v10077_v0, %v10091_v59 }
0x1f35   : > { %v10119_v20 = vmul.f32 1.442695, %v10109_v5 }
0x1f36   : > { %v10097_v55 = vpop.xlane.xlu1 %10096  ;;  %v10088_v26 = vpop.xlane.xlu0 %10087 }
0x1f37   : > { %15596 = vpow2.f32 %v10119_v20  ;;  %v10111_v44 = vsub.f32 %v10079_v46, %v10097_v55  ;;  %v10108_v23 = vsub.f32 %v10076_v25, %v10088_v26 }
0x1f39   : > { %v10123_v41 = vmul.f32 1.442695, %v10111_v44  ;;  %v10117_v17 = vmul.f32 1.442695, %v10108_v23  ;;  %v13543_v23 = vpack.c.bf16 %v18039_v52, %v18039_v52  ;;  %v13545_v52 = vpack.c.bf16 %v18065_v45, %v18065_v45 }
0x1f3b   : > { %15598 = vpow2.f32 %v10123_v41 }
0x1f3c   : > { %15600 = vpow2.f32 %v10117_v17 }
0x1f3d   : > { %v15595_v7 = vpop.eup %15594 }
0x1f3e   : > { %v10103_v37 = vpop.xlane.xlu1 %10102  ;;  %v10094_v48 = vpop.xlane.xlu0 %10093  ;;  %v10131_v50 = vsel %vm1648_vm3, %v15595_v7, 0.0 }
0x1f3f   : > { %v10113_v49 = vsub.f32 %v10081_v57, %v10103_v37  ;;  %v10110_v27 = vsub.f32 %v10078_v18, %v10094_v48  ;;  %10132 = vadd.xlane.f32.xlu1 %v10131_v50  ;;  %v10275_v48 = vsel %vm2132_vm4, %v13543_v23, 0 }
0x1f41   : > { %v15597_v2 = vpop.eup %15596  ;;  %v10127_v0 = vmul.f32 1.442695, %v10113_v49  ;;  %v10121_v12 = vmul.f32 1.442695, %v10110_v27 }
0x1f42   : > { %v10137_v1 = vsel %vm1648_vm3, %v15597_v2, 0.0 }
0x1f43   : > { %15602 = vpow2.f32 %v10127_v0  ;;  %10138 = vadd.xlane.f32.xlu1 %v10137_v1 }
0x1f44   : > { %15604 = vpow2.f32 %v10121_v12 }
0x1f45   : > { %v18135_v25 = vpop.eup %15598 }
0x1f46   : > { %v15601_v46 = vpop.eup %15600  ;;  %v10100_v34 = vpop.xlane.xlu0 %10099  ;;  %v10143_v38 = vsel %vm1648_vm3, %v18135_v25, 0.0 }
0x1f47   : > { %v10112_v56 = vsub.f32 %v10080_v53, %v10100_v34  ;;  %10144 = vadd.xlane.f32.xlu1 %v10143_v38  ;;  %v10134_v18 = vsel %vm1648_vm3, %v15601_v46, 0.0 }
0x1f48   : > { %10135 = vadd.xlane.f32.xlu0 %v10134_v18 }
0x1f49   : > { %v10125_v57 = vmul.f32 1.442695, %v10112_v56  ;;  %v10367_v56 = vsel %vm2132_vm4, %v13545_v52, 0 }
0x1f4b   : > { %15606 = vpow2.f32 %v10125_v57  ;;  %v13546_v57 = vpack.c.bf16 %v18072_v21, %v18072_v21 }
0x1f4d   : > { %v18140_v6 = vpop.eup %15602 }
0x1f4e   : > { %v15605_v60 = vpop.eup %15604  ;;  %v10106_v13 = vpop.xlane.xlu0 %10105  ;;  %v10149_v36 = vsel %vm1648_vm3, %v18140_v6, 0.0 }
0x1f4f   : > { %v10114_v58 = vsub.f32 %v10082_v61, %v10106_v13  ;;  %10150 = vadd.xlane.f32.xlu1 %v10149_v36  ;;  %v10140_v33 = vsel %vm1648_vm3, %v15605_v60, 0.0 }
0x1f50   : > { %10141 = vadd.xlane.f32.xlu0 %v10140_v33 }
0x1f51   : > { %v10129_v43 = vmul.f32 1.442695, %v10114_v58 }
0x1f53   : > { %15608 = vpow2.f32 %v10129_v43 }
0x1f55   : > { %v18145_v53 = vpop.eup %15606 }
0x1f56   : > { %v10146_v42 = vsel %vm1648_vm3, %v18145_v53, 0.0 }
0x1f57   : > { %10147 = vadd.xlane.f32.xlu0 %v10146_v42  ;;  %v15285_v42 = vld [vmem:[%s18796_s6 + $0x70] sm:$0xff]  }
0x1f5d   : > { %v18149_v59 = vpop.eup %15608 }
0x1f5e   : > { %v10152_v5 = vsel %vm1648_vm3, %v18149_v59, 0.0 }
0x1f5f   : > { %10153 = vadd.xlane.f32.xlu0 %v10152_v5 }
0x1fcc   : > { %v10133_v20 = vpop.xlane.xlu1 %10132 }
0x1fcd   : > { %15610 = vrcp.f32 %v10133_v20  ;;  %v13548_v20 = vpack.c.bf16 %v18069_v35, %v18069_v35  ;;  %v15289_v35 = vld [vmem:[%s18746_s11 + $0x70] sm:$0xff]  }
0x1fd0   : > { %v10139_v61 = vpop.xlane.xlu1 %10138 }
0x1fd1   : > { %15612 = vrcp.f32 %v10139_v61 }
0x1fd4   : > { %v10145_v26 = vpop.xlane.xlu1 %10144 }
0x1fd5   : > { %v10136_v55 = vpop.xlane.xlu0 %10135 }
0x1fd6   : > { %15614 = vrcp.f32 %v10136_v55 }
0x1fd7   : > { %v15611_v44 = vpop.eup %15610  ;;  %15616 = vrcp.f32 %v10145_v26  ;;  %v15287_v26 = vld [vmem:[%s18797_s0 + $0x70] sm:$0xff]  }
0x1fd8   : > { %v10163_v41 = vmul.f32 %v15611_v44, %v15595_v7  ;;  %v13544_v7 = vpack.c.bf16 %v18044_v11, %v18044_v11  ;;  %v10505_v44 = vsel %vm2132_vm4, %v13548_v20, 0 }
0x1fda   : > { %v10171_v17 = vpack.c.bf16 %v10163_v41, %v10163_v41  ;;  %v10321_v18 = vsel %vm2132_vm4, %v13544_v7, 0 }
0x1fdb   : > { %v15613_v37 = vpop.eup %15612 }
0x1fdc   : > { %14953 = vmatmul.mubr.msk.bf16.vlgmr.msra.gmra.mrb[60].mxu1 %vm1648_vm3, %v10171_v17  ;;  %v10165_v49 = vmul.f32 %v15613_v37, %v15597_v2  ;;  %v10151_v27 = vpop.xlane.xlu1 %10150  ;;  %v15288_v17 = vld [vmem:[%s18797_s0 + $0x78] sm:$0xff]  }
0x1fdd   : > { %14963 = vmatpush3.bf16.msra.mxu1 %v10275_v48  ;;  %v10142_v50 = vpop.xlane.xlu0 %10141  ;;  %14964 = vmatprep.mubr.msk.bf16.mxu1 %vm15718_vm2, %v15717_v15  ;;  %v15290_v37 = vld [vmem:[%s18746_s11 + $0x78] sm:$0xff]  }
0x1fde   : > { %15618 = vrcp.f32 %v10142_v50  ;;  %14974 = vmatprep.subr.bf16.mxu1 %v15717_v15  ;;  %v10173_v1 = vpack.c.bf16 %v10165_v49, %v10165_v49 }
0x1fdf   : > { %15620 = vrcp.f32 %v10151_v27 }
0x1fe0   : > { %v15615_v0 = vpop.eup %15614 }
0x1fe1   : > { %v10164_v12 = vmul.f32 %v15615_v0, %v15601_v46  ;;  %v15617_v34 = vpop.eup %15616  ;;  %v13547_v46 = vpack.c.bf16 %v18059_v9, %v18059_v9  ;;  %v10413_v9 = vsel %vm2132_vm4, %v13546_v57, 0 }
0x1fe2   : > { %v10167_v45 = vmul.f32 %v15617_v34, %v18135_v25 }
0x1fe3   : > { %v10172_v38 = vpack.c.bf16 %v10164_v12, %v10164_v12  ;;  %v10459_v33 = vsel %vm2132_vm4, %v13547_v46, 0 }
0x1fe4   : > { %14965 = vmatmul.mubr.msk.bf16.vlgmr.msra.gmra.mrb[64].mxu1 %vm1648_vm3, %v10173_v1  ;;  %v10148_v2 = vpop.xlane.xlu0 %10147  ;;  %v10175_v25 = vpack.c.bf16 %v10167_v45, %v10167_v45 }
0x1fe5   : > { %14959 = vmatmul.mubr.msk.bf16.vlgmr.msra.gmra.mrb[52].mxu0 %vm1648_vm3, %v10172_v38  ;;  %14975 = vmatpush3.bf16.msra.mxu1 %v10367_v56  ;;  %15622 = vrcp.f32 %v10148_v2 }
0x1fe6   : > { %14969 = vmatpush3.bf16.msra.mxu0 %v10321_v18  ;;  %14970 = vmatprep.mubr.msk.bf16.mxu0 %vm15718_vm2, %v15717_v15 }
0x1fe7   : > { %14976 = vmatprep.mubr.msk.bf16.mxu1 %vm15718_vm2, %v15717_v15  ;;  %14980 = vmatprep.subr.bf16.mxu0 %v15717_v15 }
0x1fe8   : > { %v15619_v11 = vpop.eup %15618  ;;  %14986 = vmatprep.subr.bf16.mxu1 %v15717_v15 }
0x1fe9   : > { %v10166_v13 = vmul.f32 %v15619_v11, %v15605_v60  ;;  %v15621_v36 = vpop.eup %15620 }
0x1fea   : > { %v10169_v21 = vmul.f32 %v15621_v36, %v18140_v6  ;;  %v15286_v6 = vld [vmem:[%s18796_s6 + $0x78] sm:$0xff]  }
0x1feb   : > { %v10174_v58 = vpack.c.bf16 %v10166_v13, %v10166_v13 }
0x1fec   : > { %14977 = vmatmul.mubr.msk.bf16.vlgmr.msra.gmra.mrb[68].mxu1 %vm1648_vm3, %v10175_v25  ;;  %v10154_v43 = vpop.xlane.xlu0 %10153  ;;  %v10177_v61 = vpack.c.bf16 %v10169_v21, %v10169_v21 }
0x1fed   : > { %14971 = vmatmul.mubr.msk.bf16.vlgmr.msra.gmra.mrb[56].mxu0 %vm1648_vm3, %v10174_v58  ;;  %14987 = vmatpush3.bf16.msra.mxu1 %v10459_v33  ;;  %15624 = vrcp.f32 %v10154_v43 }
0x1fee   : > { %14981 = vmatpush3.bf16.msra.mxu0 %v10413_v9  ;;  %14982 = vmatprep.mubr.msk.bf16.mxu0 %vm15718_vm2, %v15717_v15 }
0x1fef   : > { %v15623_v60 = vpop.eup %15622  ;;  %14988 = vmatprep.mubr.msk.bf16.mxu1 %vm15718_vm2, %v15717_v15  ;;  %14992 = vmatprep.subr.bf16.mxu0 %v15717_v15 }
0x1ff0   : > { %v10168_v5 = vmul.f32 %v15623_v60, %v18145_v53  ;;  %14998 = vmatprep.subr.bf16.mxu1 %v15285_v42 }
0x1ff2   : > { %v10176_v55 = vpack.c.bf16 %v10168_v5, %v10168_v5 }
0x1ff4   : > { %14989 = vmatmul.mubr.msk.bf16.vlgmr.msra.gmra.mrb[72].mxu1 %vm1648_vm3, %v10177_v61 }
0x1ff5   : > { %14983 = vmatmul.mubr.msk.bf16.vlgmr.msra.gmra.mrb[60].mxu0 %vm1648_vm3, %v10176_v55  ;;  %14999 = vmatpush3.bf16.msra.mxu1 %v15285_v42  ;;  %v18268_v55 = vld [vmem:[%s18800_s7 + $0x7] ss:$0 sm:$0xff] }
0x1ff6   : > { %14993 = vmatpush3.bf16.msra.mxu0 %v10505_v44  ;;  %15002 = vmatprep.mubr.msk.bf16.mxu1 %vm1028_vm1, %v17459_v10 }
0x1ff7   : > { %v15625_v53 = vpop.eup %15624  ;;  %15000 = vmatprep.subr.bf16.mxu1 %v15286_v6  ;;  %14994 = vmatprep.mubr.msk.bf16.mxu0 %vm15718_vm2, %v15717_v15 }
0x1ff8   : > { %v10170_v23 = vmul.f32 %v15625_v53, %v18149_v59  ;;  %15010 = vmatprep.subr.bf16.mxu0 %v15287_v26 }
0x1ff9   : > { %15001 = vmatpush3.bf16.msra.mxu1 %v15286_v6 }
0x1ffa   : > { %v10178_v41 = vpack.c.bf16 %v10170_v23, %v10170_v23  ;;  %15022 = vmatprep.subr.bf16.mxu1 %v15289_v35 }
0x1ffc   : > { %15003 = vmatmul.mubr.msk.bf16.vlgmr.msra.gmra.mrb[76].mxu1 %vm1028_vm1, %v17465_v8 }
0x1ffd   : > { %14995 = vmatmul.mubr.msk.bf16.vlgmr.msra.gmra.mrb[64].mxu0 %vm1648_vm3, %v10178_v41  ;;  %15006 = vmatprep.mubr.msk.bf16.mxu1 %vm1028_vm1, %v17479_v62 }
0x1ffe   : > { %15011 = vmatpush3.bf16.msra.mxu0 %v15287_v26  ;;  %15014 = vmatprep.mubr.msk.bf16.mxu0 %vm1028_vm1, %v17459_v10 }
0x1fff   : > { %15012 = vmatprep.subr.bf16.mxu0 %v15288_v17  ;;  %15023 = vmatpush3.bf16.msra.mxu1 %v15289_v35 }
0x2000   : > { %15024 = vmatprep.subr.bf16.mxu1 %v15290_v37 }
0x2002   : > { %15013 = vmatpush3.bf16.msra.mxu0 %v15288_v17 }
0x2003   : > { %15025 = vmatpush3.bf16.msra.mxu1 %v15290_v37  ;;  %15034 = vmatprep.subr.bf16.mxu0 %v15717_v15 }
0x2004   : > { %15007 = vmatmul.mubr.msk.bf16.gmra.mrb[80].mxu1 %vm1028_vm1, %v17485_v32  ;;  %15046 = vmatprep.subr.bf16.mxu1 %v15717_v15 }
0x2005   : > { %15015 = vmatmul.mubr.msk.bf16.vlgmr.msra.gmra.mrb[68].mxu0 %vm1028_vm1, %v17465_v8  ;;  %15026 = vmatprep.mubr.msk.bf16.mxu1 %vm1028_vm1, %v17459_v10 }
0x2006   : > { %15018 = vmatprep.mubr.msk.bf16.mxu0 %vm1028_vm1, %v17479_v62 }
0x200c   : > { %15027 = vmatmul.mubr.msk.bf16.vlgmr.msra.gmra.mrb[84].mxu1 %vm1028_vm1, %v17465_v8 }
0x200d   : > { %15019 = vmatmul.mubr.msk.bf16.gmra.mrb[72].mxu0 %vm1028_vm1, %v17485_v32  ;;  %15030 = vmatprep.mubr.msk.bf16.mxu1 %vm1028_vm1, %v17479_v62 }
0x200e   : > { %15036 = vmatprep.mubr.msk.bf16.mxu0 %vm15718_vm2, %v15717_v15 }
0x2014   : > { %15031 = vmatmul.mubr.msk.bf16.gmra.mrb[88].mxu1 %vm1028_vm1, %v17485_v32 }
0x2015   : > { %15048 = vmatprep.mubr.msk.bf16.mxu1 %vm15718_vm2, %v15717_v15 }
0x20af   : > { %v18247_v10 = vpop.f32.mrb[60].mxu1 }
0x20b0   : > { %v14954_v59 = vpop.f32.mrb[61].mxu1 }
0x20b1   : > { %v10222_v48 = vpop.f32.mrb[62].mxu1 }
0x20b2   : > { %v14955_v8 = vpop.f32.mrb[63].mxu1 }
0x20b3   : > { %v18281_v8 = vld [vmem:[%s18801_s9 + $0x7] ss:$0 sm:$0xff] }
0x20b7   : > { %v18249_v50 = vpop.f32.mrb[64].mxu1 }
0x20b8   : > { %v18251_v49 = vpop.f32.mrb[52].mxu0  ;;  %v14966_v27 = vpop.f32.mrb[65].mxu1 }
0x20b9   : > { %v14960_v62 = vpop.f32.mrb[53].mxu0  ;;  %v10314_v0 = vpop.f32.mrb[66].mxu1 }
0x20ba   : > { %v10268_v52 = vpop.f32.mrb[54].mxu0  ;;  %v14967_v7 = vpop.f32.mrb[67].mxu1  ;;  %v18287_v0 = vld [vmem:[%s18747_s12 + $0x7] ss:$0 sm:$0xff] }
0x20bb   : > { %v14961_v12 = vpop.f32.mrb[55].mxu0 }
0x20bf   : > { %v18253_v1 = vpop.f32.mrb[68].mxu1 }
0x20c0   : > { %v18255_v32 = vpop.f32.mrb[56].mxu0  ;;  %v14978_v34 = vpop.f32.mrb[69].mxu1 }
0x20c1   : > { %v14972_v38 = vpop.f32.mrb[57].mxu0  ;;  %v10406_v56 = vpop.f32.mrb[70].mxu1 }
0x20c2   : > { %v10360_v2 = vpop.f32.mrb[58].mxu0  ;;  %v14979_v18 = vpop.f32.mrb[71].mxu1 }
0x20c3   : > { %v14973_v45 = vpop.f32.mrb[59].mxu0 }
0x20c7   : > { %v18257_v11 = vpop.f32.mrb[72].mxu1 }
0x20c8   : > { %v18259_v46 = vpop.f32.mrb[60].mxu0  ;;  %v14990_v57 = vpop.f32.mrb[73].mxu1 }
0x20c9   : > { %v14984_v13 = vpop.f32.mrb[61].mxu0  ;;  %v10498_v25 = vpop.f32.mrb[74].mxu1 }
0x20ca   : > { %v10452_v36 = vpop.f32.mrb[62].mxu0  ;;  %v14991_v58 = vpop.f32.mrb[75].mxu1 }
0x20cb   : > { %v14985_v33 = vpop.f32.mrb[63].mxu0 }
0x20cf   : > { %v15004_v43 = vpop.f32.mrb[76].mxu1 }
0x20d0   : > { %v18261_v42 = vpop.f32.mrb[64].mxu0  ;;  %v10646_v9 = vpop.f32.mrb[77].mxu1  ;;  %v10655_v12 = vadd.f32 %v15004_v43, %v18281_v8 }
0x20d1   : > { %v14996_v21 = vpop.f32.mrb[65].mxu0  ;;  %v18263_v60 = vpop.f32.mrb[78].mxu1  ;;  %v10647_v38 = vadd.f32 %v18281_v8, %v10646_v9 }
0x20d2   : > { %v10544_v5 = vpop.f32.mrb[66].mxu0  ;;  %v10649_v20 = vpop.f32.mrb[79].mxu1  ;;  %v13551_v43 = vpack.c.bf16 %v10655_v12, %v10655_v12 }
0x20d3   : > { %v14997_v61 = vpop.f32.mrb[67].mxu0  ;;  %v13549_v21 = vpack.c.bf16 %v10647_v38, %v10647_v38 }
0x20d7   : > { %v18270_v6 = vpop.f32.mrb[80].mxu1 }
0x20d8   : > { %v15016_v26 = vpop.f32.mrb[68].mxu0  ;;  %v10662_v44 = vpop.f32.mrb[81].mxu1 }
0x20d9   : > { %v10749_v35 = vadd.f32 %v15016_v26, %v18268_v55  ;;  %v10740_v53 = vpop.f32.mrb[69].mxu0  ;;  %v18273_v23 = vpop.f32.mrb[82].mxu1 }
0x20da   : > { %v10741_v41 = vadd.f32 %v18268_v55, %v10740_v53  ;;  %v15017_v17 = vpop.f32.mrb[70].mxu0  ;;  %v18276_v37 = vpop.f32.mrb[83].mxu1 }
0x20db   : > { %v13559_v59 = vpack.c.bf16 %v10749_v35, %v10749_v35  ;;  %v10743_v48 = vpop.f32.mrb[71].mxu0  ;;  %v10752_v61 = vadd.f32 %v15017_v17, %v18268_v55 }
0x20dc   : > { %v13557_v27 = vpack.c.bf16 %v10741_v41, %v10741_v41  ;;  %v10744_v7 = vadd.f32 %v18268_v55, %v10743_v48  ;;  %v10663_v48 = vadd.f32 %v18281_v8, %v10662_v44 }
0x20dd   : > { %v11025_v62 = vsel %vm1648_vm3, %v13559_v59, 0  ;;  %v10650_v59 = vadd.f32 %v18281_v8, %v10649_v20 }
0x20de   : > { %v10933_v52 = vsel %vm1648_vm3, %v13557_v27, 0  ;;  %15047 = vmatpush3.bf16.xpose.msra.mxu1 %v11025_v62  ;;  %v13558_v13 = vpack.c.bf16 %v10744_v7, %v10744_v7  ;;  %v13560_v7 = vpack.c.bf16 %v10752_v61, %v10752_v61 }
0x20df   : > { %15035 = vmatpush3.bf16.xpose.msra.mxu0 %v10933_v52  ;;  %v15028_v34 = vpop.f32.mrb[84].mxu1  ;;  %15058 = vmatprep.subr.bf16.mxu1 %v15717_v15  ;;  %v13550_v38 = vpack.c.bf16 %v10650_v59, %v10650_v59 }
0x20e0   : > { %v15020_v56 = vpop.f32.mrb[72].mxu0  ;;  %v18295_v2 = vadd.f32 %v15028_v34, %v18287_v0  ;;  %v10834_v18 = vpop.f32.mrb[85].mxu1  ;;  %15040 = vmatprep.subr.bf16.mxu0 %v15717_v15  ;;  %v10979_v26 = vsel %vm1648_vm3, %v13558_v13, 0 }
0x20e1   : > { %v10756_v45 = vpop.f32.mrb[73].mxu0  ;;  %v15029_v57 = vpop.f32.mrb[86].mxu1  ;;  %v10765_v35 = vadd.f32 %v15020_v56, %v18268_v55  ;;  %v13553_v56 = vpack.c.bf16 %v10663_v48, %v10663_v48  ;;  %v10835_v13 = vadd.f32 %v18287_v0, %v10834_v18 }
0x20e2   : > { %v10757_v25 = vadd.f32 %v18268_v55, %v10756_v45  ;;  %v15021_v36 = vpop.f32.mrb[74].mxu0  ;;  %v18300_v58 = vadd.f32 %v15029_v57, %v18287_v0  ;;  %v18302_v33 = vpop.f32.mrb[87].mxu1  ;;  %v11071_v45 = vsel %vm1648_vm3, %v13560_v7, 0 }
0x20e3   : > { %v10759_v9 = vpop.f32.mrb[75].mxu0  ;;  %v13563_v12 = vpack.c.bf16 %v10765_v35, %v10765_v35  ;;  %v13565_v18 = vpack.c.bf16 %v10835_v13, %v10835_v13  ;;  %v10666_v35 = vadd.f32 %v18281_v8, %v18276_v37  ;;  %v10674_v37 = vadd.f32 %v18273_v23, %v18281_v8 }
0x20e4   : > { %v13561_v5 = vpack.c.bf16 %v10757_v25, %v10757_v25  ;;  %v10760_v25 = vadd.f32 %v18268_v55, %v10759_v9 }
0x20e5   : > { %15049 = vmatmul.mubr.msk.bf16.vlgmr.msra.gmra.mrb[92].mxu1 %vm1648_vm3, %v13551_v43  ;;  %v11209_v57 = vsel %vm1648_vm3, %v13563_v12, 0  ;;  %v10658_v43 = vadd.f32 %v18263_v60, %v18281_v8  ;;  %v10768_v60 = vadd.f32 %v15021_v36, %v18268_v55  ;;  %v13554_v36 = vpack.c.bf16 %v10666_v35, %v10666_v35 }
0x20e6   : > { %v11117_v53 = vsel %vm1648_vm3, %v13561_v5, 0  ;;  %15037 = vmatmul.mubr.msk.bf16.vlgmr.msra.gmra.mrb[76].mxu0 %vm1648_vm3, %v13549_v21  ;;  %15060 = vmatprep.mubr.msk.bf16.mxu1 %vm15718_vm2, %v15717_v15  ;;  %v10671_v21 = vadd.f32 %v18270_v6, %v18281_v8  ;;  %v13562_v9 = vpack.c.bf16 %v10760_v25, %v10760_v25  ;;  %v13556_v48 = vpack.c.bf16 %v10674_v37, %v10674_v37 }
0x20e7   : > { %15041 = vmatpush3.bf16.xpose.msra.mxu0 %v10979_v26  ;;  %15059 = vmatpush3.bf16.xpose.msra.mxu1 %v11117_v53  ;;  %v15032_v41 = vpop.f32.mrb[88].mxu1  ;;  %v13552_v5 = vpack.c.bf16 %v10658_v43, %v10658_v43  ;;  %v11413_v26 = vsel %vm2132_vm4, %v13565_v18, 0  ;;  %v13564_v55 = vpack.c.bf16 %v10768_v60, %v10768_v60 }
0x20e8   : > { %v18315_v17 = vadd.f32 %v15032_v41, %v18287_v0  ;;  %v10850_v27 = vpop.f32.mrb[89].mxu1  ;;  %15042 = vmatprep.mubr.msk.bf16.mxu0 %vm15718_vm2, %v15717_v15  ;;  %15052 = vmatprep.subr.bf16.mxu0 %v15717_v15  ;;  %v13555_v61 = vpack.c.bf16 %v10671_v21, %v10671_v21  ;;  %v11163_v6 = vsel %vm1648_vm3, %v13562_v9, 0  ;;  %v10838_v41 = vadd.f32 %v18287_v0, %v18302_v33 }
0x20e9   : > { %v18321_v62 = vadd.f32 %v18287_v0, %v10850_v27  ;;  %v15033_v52 = vpop.f32.mrb[90].mxu1  ;;  %15070 = vmatprep.subr.bf16.mxu1 %v15717_v15  ;;  %v11255_v53 = vsel %vm1648_vm3, %v13564_v55, 0 }
0x20ea   : > { %v18325_v20 = vadd.f32 %v15033_v52, %v18287_v0  ;;  %v10853_v44 = vpop.f32.mrb[91].mxu1  ;;  %v13566_v59 = vpack.c.bf16 %v10838_v41, %v10838_v41 }
0x20eb   : > { %v18328_v34 = vadd.f32 %v18287_v0, %v10853_v44 }
0x20ec   : > { %v11459_v27 = vsel %vm2132_vm4, %v13566_v59, 0 }
0x20ee   : > { %15043 = vmatmul.mubr.msk.bf16.vlgmr.msra.gmra.mrb[80].mxu0 %vm1648_vm3, %v13550_v38  ;;  %15061 = vmatmul.mubr.msk.bf16.vlgmr.msra.gmra.mrb[96].mxu1 %vm1648_vm3, %v13553_v56 }
0x20ef   : > { %15053 = vmatpush3.bf16.xpose.msra.mxu0 %v11071_v45  ;;  %15071 = vmatpush3.bf16.xpose.msra.mxu1 %v11209_v57 }
0x20f0   : > { %15054 = vmatprep.mubr.msk.bf16.mxu0 %vm15718_vm2, %v15717_v15  ;;  %15072 = vmatprep.mubr.msk.bf16.mxu1 %vm15718_vm2, %v15717_v15 }
0x20f1   : > { %15064 = vmatprep.subr.bf16.mxu0 %v15717_v15  ;;  %15082 = vmatprep.subr.bf16.mxu1 %v15717_v15 }
0x20f6   : > { %15055 = vmatmul.mubr.msk.bf16.vlgmr.msra.gmra.mrb[84].mxu0 %vm1648_vm3, %v13552_v5  ;;  %15073 = vmatmul.mubr.msk.bf16.vlgmr.msra.gmra.mrb[100].mxu1 %vm1648_vm3, %v13555_v61 }
0x20f7   : > { %15065 = vmatpush3.bf16.xpose.msra.mxu0 %v11163_v6  ;;  %15083 = vmatpush3.bf16.msra.mxu1 %v11413_v26 }
0x20f8   : > { %15066 = vmatprep.mubr.msk.bf16.mxu0 %vm15718_vm2, %v15717_v15  ;;  %15076 = vmatprep.subr.bf16.mxu0 %v15717_v15 }
0x20f9   : > { %15084 = vmatprep.mubr.msk.bf16.mxu1 %vm15718_vm2, %v15717_v15  ;;  %15094 = vmatprep.subr.bf16.mxu1 %v15717_v15 }
0x20fe   : > { %15067 = vmatmul.mubr.msk.bf16.vlgmr.msra.gmra.mrb[88].mxu0 %vm1648_vm3, %v13554_v36 }
0x20ff   : > { %15077 = vmatpush3.bf16.xpose.msra.mxu0 %v11255_v53  ;;  %15078 = vmatprep.mubr.msk.bf16.mxu0 %vm15718_vm2, %v15717_v15 }
0x2100   : > { %15088 = vmatprep.subr.bf16.mxu0 %v15717_v15 }
0x2106   : > { %15079 = vmatmul.mubr.msk.bf16.vlgmr.msra.gmra.mrb[92].mxu0 %vm1648_vm3, %v13556_v48 }
0x2107   : > { %15089 = vmatpush3.bf16.msra.mxu0 %v11459_v27  ;;  %15090 = vmatprep.mubr.msk.bf16.mxu0 %vm15718_vm2, %v15717_v15 }
0x2108   : > { %15100 = vmatprep.subr.bf16.mxu0 %v15717_v15 }
0x21b8   : > { %v11061_v0 = vpop.f32.mrb[92].mxu1 }
0x21b9   : > { %v11299_v33 = vmul.f32 0.35355338, %v11061_v0  ;;  %v10969_v52 = vpop.f32.mrb[76].mxu0  ;;  %v15050_v7 = vpop.f32.mrb[93].mxu1 }
0x21ba   : > { %v11297_v12 = vmul.f32 0.35355338, %v10969_v52  ;;  %v15038_v23 = vpop.f32.mrb[77].mxu0  ;;  %v11064_v8 = vpop.f32.mrb[94].mxu1 }
0x21bb   : > { %v10972_v44 = vpop.f32.mrb[78].mxu0  ;;  %v15051_v38 = vpop.f32.mrb[95].mxu1  ;;  %v11307_v57 = vadd.f32 %v11299_v33, %v16272_v30 }
0x21bc   : > { %v11305_v56 = vadd.f32 %v11297_v12, %v16272_v30  ;;  %v15039_v45 = vpop.f32.mrb[79].mxu0 }
0x21bd   : > { %v11319_v21 = vsel %vm1648_vm3, %v11307_v57, -inf }
0x21be   : > { %v11313_v13 = vsel %vm1648_vm3, %v11305_v56, -inf }
0x21bf   : > { %11314 = vmax.xlane.f32.xlu0 %v11313_v13 }
0x21c1   : > { %v11015_v25 = vpop.f32.mrb[80].mxu0  ;;  %v11153_v43 = vpop.f32.mrb[96].mxu1 }
0x21c2   : > { %v11298_v18 = vmul.f32 0.35355338, %v11015_v25  ;;  %v11301_v9 = vmul.f32 0.35355338, %v11153_v43  ;;  %v15044_v5 = vpop.f32.mrb[81].mxu0  ;;  %v15062_v61 = vpop.f32.mrb[97].mxu1 }
0x21c3   : > { %v11156_v26 = vpop.f32.mrb[98].mxu1  ;;  %11320 = vmax.xlane.f32.xlu0 %v11319_v21  ;;  %v11018_v60 = vpop.f32.mrb[82].mxu0 }
0x21c4   : > { %v11306_v6 = vadd.f32 %v11298_v18, %v16272_v30  ;;  %v11309_v35 = vadd.f32 %v11301_v9, %v16272_v30  ;;  %v15045_v55 = vpop.f32.mrb[83].mxu0  ;;  %v15063_v36 = vpop.f32.mrb[99].mxu1 }
0x21c6   : > { %v11325_v53 = vsel %vm1648_vm3, %v11309_v35, -inf  ;;  %v11316_v41 = vsel %vm1648_vm3, %v11306_v6, -inf }
0x21c7   : > { %11326 = vmax.xlane.f32.xlu0 %v11325_v53  ;;  %11317 = vmax.xlane.f32.xlu1 %v11316_v41 }
0x21c9   : > { %v11107_v37 = vpop.f32.mrb[84].mxu0  ;;  %v11245_v59 = vpop.f32.mrb[100].mxu1 }
0x21ca   : > { %v11300_v48 = vmul.f32 0.35355338, %v11107_v37  ;;  %v11303_v27 = vmul.f32 0.35355338, %v11245_v59  ;;  %v15056_v0 = vpop.f32.mrb[85].mxu0  ;;  %v15074_v33 = vpop.f32.mrb[101].mxu1 }
0x21cb   : > { %v11110_v52 = vpop.f32.mrb[86].mxu0  ;;  %v11248_v7 = vpop.f32.mrb[102].mxu1 }
0x21cc   : > { %v11308_v12 = vadd.f32 %v11300_v48, %v16272_v30  ;;  %v11311_v23 = vadd.f32 %v11303_v27, %v16272_v30  ;;  %v15057_v8 = vpop.f32.mrb[87].mxu0  ;;  %v15075_v44 = vpop.f32.mrb[103].mxu1 }
0x21ce   : > { %v11331_v38 = vsel %vm1648_vm3, %v11311_v23, -inf  ;;  %v11322_v45 = vsel %vm1648_vm3, %v11308_v12, -inf }
0x21cf   : > { %11332 = vmax.xlane.f32.xlu0 %v11331_v38  ;;  %11323 = vmax.xlane.f32.xlu1 %v11322_v45 }
0x21d1   : > { %v11199_v13 = vpop.f32.mrb[88].mxu0 }
0x21d2   : > { %v11302_v25 = vmul.f32 0.35355338, %v11199_v13  ;;  %v15068_v43 = vpop.f32.mrb[89].mxu0 }
0x21d3   : > { %v11202_v21 = vpop.f32.mrb[90].mxu0 }
0x21d4   : > { %v11310_v18 = vadd.f32 %v11302_v25, %v16272_v30  ;;  %v15069_v9 = vpop.f32.mrb[91].mxu0 }
0x21d6   : > { %v11328_v5 = vsel %vm1648_vm3, %v11310_v18, -inf }
0x21d7   : > { %11329 = vmax.xlane.f32.xlu1 %v11328_v5 }
0x21d9   : > { %v11291_v61 = vpop.f32.mrb[92].mxu0 }
0x21da   : > { %v11304_v26 = vmul.f32 0.35355338, %v11291_v61  ;;  %v15080_v60 = vpop.f32.mrb[93].mxu0 }
0x21db   : > { %v11294_v55 = vpop.f32.mrb[94].mxu0 }
0x21dc   : > { %v11312_v36 = vadd.f32 %v11304_v26, %v16272_v30  ;;  %v15081_v53 = vpop.f32.mrb[95].mxu0 }
0x21de   : > { %v11334_v41 = vsel %vm1648_vm3, %v11312_v36, -inf }
0x21df   : > { %11335 = vmax.xlane.f32.xlu1 %v11334_v41 }
0x224c   : > { %v11315_v37 = vpop.xlane.xlu0 %11314 }
0x224d   : > { %v11337_v59 = vsub.f32 %v11305_v56, %v11315_v37 }
0x224f   : > { %v11345_v48 = vmul.f32 1.442695, %v11337_v59 }
0x2250   : > { %v11321_v27 = vpop.xlane.xlu0 %11320 }
0x2251   : > { %15626 = vpow2.f32 %v11345_v48  ;;  %v11339_v0 = vsub.f32 %v11307_v57, %v11321_v27 }
0x2253   : > { %v11349_v33 = vmul.f32 1.442695, %v11339_v0 }
0x2254   : > { %v11327_v52 = vpop.xlane.xlu0 %11326  ;;  %v11318_v7 = vpop.xlane.xlu1 %11317 }
0x2255   : > { %15628 = vpow2.f32 %v11349_v33  ;;  %v11341_v8 = vsub.f32 %v11309_v35, %v11327_v52  ;;  %v11338_v44 = vsub.f32 %v11306_v6, %v11318_v7 }
0x2257   : > { %v11353_v38 = vmul.f32 1.442695, %v11341_v8  ;;  %v11347_v45 = vmul.f32 1.442695, %v11338_v44 }
0x2259   : > { %15630 = vpow2.f32 %v11353_v38 }
0x225a   : > { %15632 = vpow2.f32 %v11347_v45 }
0x225b   : > { %v18389_v30 = vpop.eup %15626 }
0x225c   : > { %v11333_v13 = vpop.xlane.xlu0 %11332  ;;  %v11324_v25 = vpop.xlane.xlu1 %11323  ;;  %v11361_v56 = vsel %vm1648_vm3, %v18389_v30, 0.0 }
0x225d   : > { %v11343_v43 = vsub.f32 %v11311_v23, %v11333_v13  ;;  %v11340_v21 = vsub.f32 %v11308_v12, %v11324_v25  ;;  %11362 = vadd.xlane.f32.xlu0 %v11361_v56  ;;  %v13571_v56 = vpack.c.bf16 %v18315_v17, %v18315_v17 }
0x225f   : > { %v18393_v57 = vpop.eup %15628  ;;  %v11357_v9 = vmul.f32 1.442695, %v11343_v43  ;;  %v11351_v5 = vmul.f32 1.442695, %v11340_v21  ;;  %v13570_v21 = vpack.c.bf16 %v18328_v34, %v18328_v34 }
0x2260   : > { %v11367_v6 = vsel %vm1648_vm3, %v18393_v57, 0.0 }
0x2261   : > { %15634 = vpow2.f32 %v11357_v9  ;;  %11368 = vadd.xlane.f32.xlu0 %v11367_v6 }
0x2262   : > { %15636 = vpow2.f32 %v11351_v5 }
0x2263   : > { %v18397_v35 = vpop.eup %15630 }
0x2264   : > { %v18399_v61 = vpop.eup %15632  ;;  %v11330_v26 = vpop.xlane.xlu1 %11329  ;;  %v11373_v23 = vsel %vm1648_vm3, %v18397_v35, 0.0 }
0x2265   : > { %v11342_v12 = vsub.f32 %v11310_v18, %v11330_v26  ;;  %11374 = vadd.xlane.f32.xlu0 %v11373_v23  ;;  %v11364_v60 = vsel %vm1648_vm3, %v18399_v61, 0.0  ;;  %v11643_v23 = vsel %vm2132_vm4, %v13570_v21, 0 }
0x2266   : > { %11365 = vadd.xlane.f32.xlu1 %v11364_v60 }
0x2267   : > { %v11355_v55 = vmul.f32 1.442695, %v11342_v12 }
0x2269   : > { %15638 = vpow2.f32 %v11355_v55 }
0x226b   : > { %v18405_v53 = vpop.eup %15634 }
0x226c   : > { %v18407_v41 = vpop.eup %15636  ;;  %v11336_v37 = vpop.xlane.xlu1 %11335  ;;  %v11379_v59 = vsel %vm1648_vm3, %v18405_v53, 0.0 }
0x226d   : > { %v11344_v48 = vsub.f32 %v11312_v36, %v11336_v37  ;;  %11380 = vadd.xlane.f32.xlu0 %v11379_v59  ;;  %v11370_v18 = vsel %vm1648_vm3, %v18407_v41, 0.0 }
0x226e   : > { %11371 = vadd.xlane.f32.xlu1 %v11370_v18 }
0x226f   : > { %v11359_v27 = vmul.f32 1.442695, %v11344_v48 }
0x2271   : > { %15640 = vpow2.f32 %v11359_v27 }
0x2273   : > { %v18413_v0 = vpop.eup %15638 }
0x2274   : > { %v11376_v33 = vsel %vm1648_vm3, %v18413_v0, 0.0 }
0x2275   : > { %11377 = vadd.xlane.f32.xlu1 %v11376_v33 }
0x227b   : > { %v18417_v52 = vpop.eup %15640 }
0x227c   : > { %v11382_v7 = vsel %vm1648_vm3, %v18417_v52, 0.0 }
0x227d   : > { %11383 = vadd.xlane.f32.xlu1 %v11382_v7 }
0x2283   : > { %9325 = vrot.lane.b32.xlu0 %v17991_v3, %s18802_s5 }
0x2287   : > { %10555 = vrot.lane.b32.xlu0 %v18247_v10, %s18803_s28 }
0x228b   : > { %10559 = vrot.lane.b32.xlu0 %v18249_v50, %s18803_s28 }
0x228e   : > { %9327 = vrot.lane.b32.xlu1 %v17995_v19, %s18802_s5 }
0x228f   : > { %9333 = vrot.lane.b32.xlu0 %v17997_v14, %s18802_s5 }
0x2292   : > { %9329 = vrot.lane.b32.xlu1 %v17993_v40, %s18802_s5 }
0x2293   : > { %9337 = vrot.lane.b32.xlu0 %v18001_v63, %s18802_s5  ;;  %v13567_v63 = vpack.c.bf16 %v18295_v2, %v18295_v2  ;;  %v13568_v2 = vpack.c.bf16 %v18300_v58, %v18300_v58 }
0x2295   : > { %v11505_v50 = vsel %vm2132_vm4, %v13567_v63, 0 }
0x2296   : > { %9331 = vrot.lane.b32.xlu1 %v17999_v47, %s18802_s5 }
0x2297   : > { %10563 = vrot.lane.b32.xlu0 %v18253_v1, %s18803_s28 }
0x229a   : > { %10557 = vrot.lane.b32.xlu1 %v18251_v49, %s18803_s28 }
0x229b   : > { %10567 = vrot.lane.b32.xlu0 %v18257_v11, %s18803_s28 }
0x229e   : > { %10561 = vrot.lane.b32.xlu1 %v18255_v32, %s18803_s28 }
0x22a2   : > { %9335 = vrot.lane.b32.xlu1 %v18003_v29, %s18802_s5 }
0x22a6   : > { %9339 = vrot.lane.b32.xlu1 %v18005_v39, %s18802_s5 }
0x22aa   : > { %10565 = vrot.lane.b32.xlu1 %v18259_v46, %s18803_s28  ;;  %v13569_v46 = vpack.c.bf16 %v18321_v62, %v18321_v62  ;;  %v11551_v62 = vsel %vm2132_vm4, %v13568_v2, 0 }
0x22ac   : > { %v11597_v45 = vsel %vm2132_vm4, %v13569_v46, 0 }
0x22ae   : > { %10569 = vrot.lane.b32.xlu1 %v18261_v42, %s18803_s28 }
0x22ea   : > { %v11363_v3 = vpop.xlane.xlu0 %11362 }
0x22eb   : > { %15642 = vrcp.f32 %v11363_v3 }
0x22ee   : > { %v11369_v40 = vpop.xlane.xlu0 %11368 }
0x22ef   : > { %15644 = vrcp.f32 %v11369_v40 }
0x22f2   : > { %v11375_v14 = vpop.xlane.xlu0 %11374 }
0x22f3   : > { %v11366_v19 = vpop.xlane.xlu1 %11365 }
0x22f4   : > { %15646 = vrcp.f32 %v11366_v19 }
0x22f5   : > { %v15643_v47 = vpop.eup %15642  ;;  %15648 = vrcp.f32 %v11375_v14 }
0x22f6   : > { %v11393_v29 = vmul.f32 %v15643_v47, %v18389_v30 }
0x22f8   : > { %v11401_v39 = vpack.c.bf16 %v11393_v29, %v11393_v29 }
0x22f9   : > { %v15645_v10 = vpop.eup %15644 }
0x22fa   : > { %15085 = vmatmul.mubr.msk.bf16.vlgmr.msra.gmra.mrb[104].mxu1 %vm1648_vm3, %v11401_v39  ;;  %v11381_v49 = vpop.xlane.xlu0 %11380  ;;  %v11395_v32 = vmul.f32 %v15645_v10, %v18393_v57 }
0x22fb   : > { %15095 = vmatpush3.bf16.msra.mxu1 %v11505_v50  ;;  %v11372_v1 = vpop.xlane.xlu1 %11371  ;;  %15096 = vmatprep.mubr.msk.bf16.mxu1 %vm15718_vm2, %v15717_v15  ;;  %v15291_v50 = vld [vmem:[%s18748_s13 + $0x10] sm:$0xff]  }
0x22fc   : > { %15650 = vrcp.f32 %v11372_v1  ;;  %15106 = vmatprep.subr.bf16.mxu1 %v15717_v15  ;;  %v11403_v8 = vpack.c.bf16 %v11395_v32, %v11395_v32 }
0x22fd   : > { %15652 = vrcp.f32 %v11381_v49 }
0x22fe   : > { %v15647_v11 = vpop.eup %15646  ;;  %v9326_v42 = vpop.permute.xlu0 %9325 }
0x22ff   : > { %v11394_v36 = vmul.f32 %v15647_v11, %v18399_v61  ;;  %9349 = vst.msk [vmem:[#allocation2] sm:$0xff] %vm3728_vm6, %v9326_v42  ;;  %v15649_v44 = vpop.eup %15648  ;;  %v15292_v42 = vld [vmem:[%s18748_s13 + $0x18] sm:$0xff]  }
0x2300   : > { %v11397_v58 = vmul.f32 %v15649_v44, %v18397_v35  ;;  %v11689_v35 = vsel %vm2132_vm4, %v13571_v56, 0 }
0x2301   : > { %v11402_v38 = vpack.c.bf16 %v11394_v36, %v11394_v36 }
0x2302   : > { %15097 = vmatmul.mubr.msk.bf16.vlgmr.msra.gmra.mrb[108].mxu1 %vm1648_vm3, %v11403_v8  ;;  %v10556_v30 = vpop.permute.xlu0 %10555  ;;  %v11378_v13 = vpop.xlane.xlu1 %11377  ;;  %v11405_v9 = vpack.c.bf16 %v11397_v58, %v11397_v58 }
0x2303   : > { %15107 = vmatpush3.bf16.msra.mxu1 %v11597_v45  ;;  %10579 = vst.msk [vmem:[#allocation2] sm:$0xff] %vm4959_vm7, %v10556_v30  ;;  %15091 = vmatmul.mubr.msk.bf16.vlgmr.msra.gmra.mrb[96].mxu0 %vm1648_vm3, %v11402_v38  ;;  %15654 = vrcp.f32 %v11378_v13 }
0x2304   : > { %15101 = vmatpush3.bf16.msra.mxu0 %v11551_v62  ;;  %15102 = vmatprep.mubr.msk.bf16.mxu0 %vm15718_vm2, %v15717_v15 }
0x2305   : > { %15108 = vmatprep.mubr.msk.bf16.mxu1 %vm15718_vm2, %v15717_v15  ;;  %15112 = vmatprep.subr.bf16.mxu0 %v15717_v15 }
0x2306   : > { %v15651_v25 = vpop.eup %15650  ;;  %v10560_v43 = vpop.permute.xlu0 %10559  ;;  %15118 = vmatprep.subr.bf16.mxu1 %v15717_v15 }
0x2307   : > { %v11396_v57 = vmul.f32 %v15651_v25, %v18407_v41  ;;  %v15653_v5 = vpop.eup %15652  ;;  %v13572_v41 = vpack.c.bf16 %v18325_v20, %v18325_v20 }
0x2308   : > { %v11399_v17 = vmul.f32 %v15653_v5, %v18405_v53 }
0x2309   : > { %v11404_v6 = vpack.c.bf16 %v11396_v57, %v11396_v57  ;;  %v11735_v18 = vsel %vm2132_vm4, %v13572_v41, 0 }
0x230a   : > { %15109 = vmatmul.mubr.msk.bf16.vlgmr.msra.gmra.mrb[112].mxu1 %vm1648_vm3, %v11405_v9  ;;  %v9334_v61 = vpop.permute.xlu0 %9333  ;;  %v11384_v26 = vpop.xlane.xlu1 %11383  ;;  %v11407_v53 = vpack.c.bf16 %v11399_v17, %v11399_v17 }
0x230b   : > { %15119 = vmatpush3.bf16.msra.mxu1 %v11689_v35  ;;  %9353 = vst.msk [vmem:[#allocation2 + $0x20] sm:$0xff] %vm3728_vm6, %v9334_v61  ;;  %15103 = vmatmul.mubr.msk.bf16.vlgmr.msra.gmra.mrb[100].mxu0 %vm1648_vm3, %v11404_v6  ;;  %15656 = vrcp.f32 %v11384_v26 }
0x230c   : > { %15113 = vmatpush3.bf16.msra.mxu0 %v11643_v23  ;;  %15114 = vmatprep.mubr.msk.bf16.mxu0 %vm15718_vm2, %v15717_v15 }
0x230d   : > { %v15655_v34 = vpop.eup %15654  ;;  %15120 = vmatprep.mubr.msk.bf16.mxu1 %vm15718_vm2, %v15717_v15  ;;  %15124 = vmatprep.subr.bf16.mxu0 %v15717_v15 }
0x230e   : > { %v11398_v12 = vmul.f32 %v15655_v34, %v18413_v0  ;;  %v9338_v60 = vpop.permute.xlu0 %9337  ;;  %v9328_v55 = vpop.permute.xlu1 %9327  ;;  %15130 = vmatprep.subr.bf16.mxu1 %v15291_v50 }
0x230f   : > { %9355 = vst.msk [vmem:[#allocation2 + $0x30] sm:$0xff] %vm3728_vm6, %v9338_v60  ;;  %9350 = vst.msk [vmem:[#allocation2 + $0x8] sm:$0xff] %vm3728_vm6, %v9328_v55 }
0x2310   : > { %v11406_v37 = vpack.c.bf16 %v11398_v12, %v11398_v12 }
0x2312   : > { %15121 = vmatmul.mubr.msk.bf16.vlgmr.msra.gmra.mrb[116].mxu1 %vm1648_vm3, %v11407_v53  ;;  %v10564_v59 = vpop.permute.xlu0 %10563  ;;  %v9330_v48 = vpop.permute.xlu1 %9329 }
0x2313   : > { %10583 = vst.msk [vmem:[#allocation2 + $0x20] sm:$0xff] %vm4959_vm7, %v10564_v59  ;;  %15115 = vmatmul.mubr.msk.bf16.vlgmr.msra.gmra.mrb[104].mxu0 %vm1648_vm3, %v11406_v37  ;;  %15131 = vmatpush3.bf16.msra.mxu1 %v15291_v50 }
0x2314   : > { %9351 = vst.msk [vmem:[#allocation2 + $0x10] sm:$0xff] %vm3728_vm6, %v9330_v48  ;;  %15125 = vmatpush3.bf16.msra.mxu0 %v11735_v18  ;;  %15126 = vmatprep.mubr.msk.bf16.mxu0 %vm15718_vm2, %v15717_v15 }
0x2315   : > { %10581 = vst.msk [vmem:[#allocation2 + $0x10] sm:$0xff] %vm4959_vm7, %v10560_v43  ;;  %v15657_v20 = vpop.eup %15656  ;;  %15132 = vmatprep.subr.bf16.mxu1 %v15292_v42 }
0x2316   : > { %v11400_v27 = vmul.f32 %v15657_v20, %v18417_v52  ;;  %v10568_v0 = vpop.permute.xlu0 %10567  ;;  %v9332_v33 = vpop.permute.xlu1 %9331 }
0x2317   : > { %10585 = vst.msk [vmem:[#allocation2 + $0x30] sm:$0xff] %vm4959_vm7, %v10568_v0  ;;  %15133 = vmatpush3.bf16.msra.mxu1 %v15292_v42 }
0x2318   : > { %9352 = vst.msk [vmem:[#allocation2 + $0x18] sm:$0xff] %vm3728_vm6, %v9332_v33  ;;  %v11408_v7 = vpack.c.bf16 %v11400_v27, %v11400_v27 }
0x231a   : > { %v10558_v3 = vpop.permute.xlu1 %10557 }
0x231b   : > { %15127 = vmatmul.mubr.msk.bf16.vlgmr.msra.gmra.mrb[108].mxu0 %vm1648_vm3, %v11408_v7  ;;  %10580 = vst.msk [vmem:[#allocation2 + $0x8] sm:$0xff] %vm4959_vm7, %v10558_v3 }
0x231e   : > { %v10562_v40 = vpop.permute.xlu1 %10561 }
0x231f   : > { %10582 = vst.msk [vmem:[#allocation2 + $0x18] sm:$0xff] %vm4959_vm7, %v10562_v40 }
0x2322   : > { %v9336_v19 = vpop.permute.xlu1 %9335 }
0x2323   : > { %9354 = vst.msk [vmem:[#allocation2 + $0x28] sm:$0xff] %vm3728_vm6, %v9336_v19 }
0x2326   : > { %v9340_v14 = vpop.permute.xlu1 %9339 }
0x2327   : > { %9356 = vst.msk [vmem:[#allocation2 + $0x38] sm:$0xff] %vm3728_vm6, %v9340_v14 }
0x232a   : > { %v10566_v52 = vpop.permute.xlu1 %10565 }
0x232b   : > { %10584 = vst.msk [vmem:[#allocation2 + $0x28] sm:$0xff] %vm4959_vm7, %v10566_v52 }
0x232e   : > { %v10570_v47 = vpop.permute.xlu1 %10569 }
0x232f   : > { %10586 = vst.msk [vmem:[#allocation2 + $0x38] sm:$0xff] %vm4959_vm7, %v10570_v47  ;;  %v13313_v47 = vld [vmem:[%s18749_s14 + $0x1] ss:$0 sm:$0xff] }
0x23cd   : > { %v11449_v63 = vpop.f32.mrb[104].mxu1 }
0x23ce   : > { %11785 = vrot.lane.b32.xlu0 %v11449_v63, %s18804_s29  ;;  %v15086_v29 = vpop.f32.mrb[105].mxu1 }
0x23cf   : > { %v11452_v39 = vpop.f32.mrb[106].mxu1 }
0x23d0   : > { %v15087_v10 = vpop.f32.mrb[107].mxu1 }
0x23d5   : > { %v11541_v49 = vpop.f32.mrb[108].mxu1 }
0x23d6   : > { %v11495_v1 = vpop.f32.mrb[96].mxu0  ;;  %11789 = vrot.lane.b32.xlu0 %v11541_v49, %s18804_s29  ;;  %v15098_v32 = vpop.f32.mrb[109].mxu1 }
0x23d7   : > { %11787 = vrot.lane.b32.xlu1 %v11495_v1, %s18804_s29  ;;  %v15092_v11 = vpop.f32.mrb[97].mxu0  ;;  %v11544_v46 = vpop.f32.mrb[110].mxu1 }
0x23d8   : > { %v11498_v2 = vpop.f32.mrb[98].mxu0  ;;  %v15099_v36 = vpop.f32.mrb[111].mxu1 }
0x23d9   : > { %v15093_v8 = vpop.f32.mrb[99].mxu0 }
0x23dd   : > { %v11633_v44 = vpop.f32.mrb[112].mxu1 }
0x23de   : > { %v11587_v38 = vpop.f32.mrb[100].mxu0  ;;  %11793 = vrot.lane.b32.xlu0 %v11633_v44, %s18804_s29  ;;  %v15110_v45 = vpop.f32.mrb[113].mxu1 }
0x23df   : > { %11791 = vrot.lane.b32.xlu1 %v11587_v38, %s18804_s29  ;;  %v15104_v30 = vpop.f32.mrb[101].mxu0  ;;  %v11636_v13 = vpop.f32.mrb[114].mxu1 }
0x23e0   : > { %v11590_v62 = vpop.f32.mrb[102].mxu0  ;;  %v15111_v58 = vpop.f32.mrb[115].mxu1 }
0x23e1   : > { %v15105_v25 = vpop.f32.mrb[103].mxu0 }
0x23e5   : > { %v11725_v56 = vpop.f32.mrb[116].mxu1 }
0x23e6   : > { %v11679_v43 = vpop.f32.mrb[104].mxu0  ;;  %11797 = vrot.lane.b32.xlu0 %v11725_v56, %s18804_s29  ;;  %v15122_v21 = vpop.f32.mrb[117].mxu1 }
0x23e7   : > { %11795 = vrot.lane.b32.xlu1 %v11679_v43, %s18804_s29  ;;  %v15116_v57 = vpop.f32.mrb[105].mxu0  ;;  %v11728_v9 = vpop.f32.mrb[118].mxu1 }
0x23e8   : > { %v11682_v5 = vpop.f32.mrb[106].mxu0  ;;  %v15123_v6 = vpop.f32.mrb[119].mxu1 }
0x23e9   : > { %v15117_v35 = vpop.f32.mrb[107].mxu0 }
0x23ee   : > { %v11771_v61 = vpop.f32.mrb[108].mxu0 }
0x23ef   : > { %11799 = vrot.lane.b32.xlu1 %v11771_v61, %s18804_s29  ;;  %v15128_v26 = vpop.f32.mrb[109].mxu0 }
0x23f0   : > { %v11774_v23 = vpop.f32.mrb[110].mxu0 }
0x23f1   : > { %v15129_v17 = vpop.f32.mrb[111].mxu0 }
0x2440   : > { %v11786_v34 = vpop.permute.xlu0 %11785 }
0x2441   : > { %11809 = vst.msk [vmem:[#allocation2] sm:$0xff] %vm6190_vm8, %v11786_v34 }
0x2448   : > { %v11790_v12 = vpop.permute.xlu0 %11789  ;;  %v11817_v53 = vld [vmem:[#allocation2] sm:$0xff] }
0x2449   : > { %11811 = vst.msk [vmem:[#allocation2 + $0x10] sm:$0xff] %vm6190_vm8, %v11790_v12  ;;  %v11788_v60 = vpop.permute.xlu1 %11787 }
0x244a   : > { %11810 = vst.msk [vmem:[#allocation2 + $0x8] sm:$0xff] %vm6190_vm8, %v11788_v60 }
0x2450   : > { %v11794_v55 = vpop.permute.xlu0 %11793  ;;  %v11819_v18 = vld [vmem:[#allocation2 + $0x10] sm:$0xff] }
0x2451   : > { %11813 = vst.msk [vmem:[#allocation2 + $0x20] sm:$0xff] %vm6190_vm8, %v11794_v55  ;;  %v11792_v41 = vpop.permute.xlu1 %11791  ;;  %v11818_v37 = vld [vmem:[#allocation2 + $0x8] sm:$0xff] }
0x2452   : > { %11812 = vst.msk [vmem:[#allocation2 + $0x18] sm:$0xff] %vm6190_vm8, %v11792_v41  ;;  %v11825_v59 = vpack.c.bf16 %v11818_v37, %v11817_v53 }
0x2454   : > { %15134 = vmatprep.mubr.msk.bf16.mxu1 %vm1028_vm1, %v11825_v59 }
0x2458   : > { %v11798_v48 = vpop.permute.xlu0 %11797  ;;  %v11821_v7 = vld [vmem:[#allocation2 + $0x20] sm:$0xff] }
0x2459   : > { %v11820_v20 = vld [vmem:[#allocation2 + $0x18] sm:$0xff]  ;;  %11815 = vst.msk [vmem:[#allocation2 + $0x30] sm:$0xff] %vm6190_vm8, %v11798_v48  ;;  %v11796_v27 = vpop.permute.xlu1 %11795 }
0x245a   : > { %v11826_v0 = vpack.c.bf16 %v11820_v20, %v11819_v18  ;;  %11814 = vst.msk [vmem:[#allocation2 + $0x28] sm:$0xff] %vm6190_vm8, %v11796_v27 }
0x245c   : > { %15135 = vmatmul.mubr.msk.bf16.vlgmr.msra.gmra.mrb[120].mxu1 %vm1028_vm1, %v11826_v0 }
0x2460   : > { %v11823_v19 = vld [vmem:[#allocation2 + $0x30] sm:$0xff] }
0x2461   : > { %v11800_v33 = vpop.permute.xlu1 %11799  ;;  %v11822_v3 = vld [vmem:[#allocation2 + $0x28] sm:$0xff] }
0x2462   : > { %11816 = vst.msk [vmem:[#allocation2 + $0x38] sm:$0xff] %vm6190_vm8, %v11800_v33  ;;  %v11827_v40 = vpack.c.bf16 %v11822_v3, %v11821_v7 }
0x2464   : > { %15138 = vmatprep.mubr.msk.bf16.mxu1 %vm1028_vm1, %v11827_v40 }
0x2469   : > { %v11824_v14 = vld [vmem:[#allocation2 + $0x38] sm:$0xff] }
0x246a   : > { %v11828_v52 = vpack.c.bf16 %v11824_v14, %v11823_v19 }
0x246c   : > { %15139 = vmatmul.mubr.msk.bf16.gmra.mrb[124].mxu1 %vm1028_vm1, %v11828_v52 }
0x252f   : > { %v15136_v63 = vpop.f32.mrb[120].mxu1 }
0x2530   : > { %v11900_v29 = vpop.f32.mrb[121].mxu1  ;;  %v11909_v39 = vadd.f32 %v15136_v63, %v13313_v47 }
0x2531   : > { %v11901_v10 = vadd.f32 %v13313_v47, %v11900_v29  ;;  %v15137_v50 = vpop.f32.mrb[122].mxu1 }
0x2532   : > { %v11903_v49 = vpop.f32.mrb[123].mxu1  ;;  %v18552_v11 = vadd.f32 %v11909_v39, %v17351_v24  ;;  %v11912_v46 = vadd.f32 %v15137_v50, %v13313_v47 }
0x2533   : > { %v18549_v1 = vadd.f32 %v11901_v10, %v17347_v51  ;;  %v11904_v32 = vadd.f32 %v13313_v47, %v11903_v49 }
0x2534   : > { %v18562_v8 = vadd.f32 %v11912_v46, %v17357_v54  ;;  %v11949_v51 = vsel %vm1028_vm1, %v18552_v11, 0.0 }
0x2535   : > { %v18555_v42 = vadd.f32 %v11904_v32, %v17353_v22  ;;  %v11943_v2 = vsel %vm1028_vm1, %v18549_v1, 0.0 }
0x2536   : > { %11944 = vadd.xlane.f32.xlu0 %v11943_v2  ;;  %v11952_v24 = vsel %vm1028_vm1, %v18562_v8, 0.0 }
0x2537   : > { %v11946_v36 = vsel %vm1028_vm1, %v18555_v42, 0.0 }
0x2538   : > { %11947 = vadd.xlane.f32.xlu1 %v11946_v36  ;;  %v15293_v36 = vld [vmem:[%s18752_s17 + $0x10] sm:$0xff]  }
0x2539   : > { %15142 = vmatprep.subr.bf16.mxu0 %v15293_v36 }
0x253a   : > { %11950 = vadd.xlane.f32.xlu0 %v11949_v51  ;;  %15143 = vmatpush3.bf16.msra.mxu0 %v15293_v36  ;;  %v15294_v51 = vld [vmem:[%s18752_s17 + $0x18] sm:$0xff]  }
0x253b   : > { %15144 = vmatprep.subr.bf16.mxu0 %v15294_v51 }
0x253e   : > { %11953 = vadd.xlane.f32.xlu0 %v11952_v24  ;;  %15145 = vmatpush3.bf16.msra.mxu0 %v15294_v51 }
0x253f   : > { %v15140_v22 = vpop.f32.mrb[124].mxu1  ;;  %15178 = vmatprep.subr.bf16.mxu0 %v15717_v15 }
0x2540   : > { %v11916_v44 = vpop.f32.mrb[125].mxu1  ;;  %v11925_v38 = vadd.f32 %v15140_v22, %v13313_v47 }
0x2541   : > { %v11917_v45 = vadd.f32 %v13313_v47, %v11916_v44  ;;  %v15141_v30 = vpop.f32.mrb[126].mxu1 }
0x2542   : > { %v11919_v13 = vpop.f32.mrb[127].mxu1  ;;  %v11928_v58 = vadd.f32 %v15141_v30, %v13313_v47  ;;  %v18572_v25 = vadd.f32 %v11925_v38, %v17371_v16 }
0x2543   : > { %v18569_v62 = vadd.f32 %v11917_v45, %v17367_v4  ;;  %v11920_v54 = vadd.f32 %v13313_v47, %v11919_v13 }
0x2544   : > { %v18580_v21 = vadd.f32 %v11928_v58, %v17377_v31  ;;  %v11961_v4 = vsel %vm1028_vm1, %v18572_v25, 0.0 }
0x2545   : > { %v18575_v56 = vadd.f32 %v11920_v54, %v17373_v28  ;;  %v11955_v43 = vsel %vm1028_vm1, %v18569_v62, 0.0 }
0x2546   : > { %11956 = vadd.xlane.f32.xlu0 %v11955_v43  ;;  %v11964_v16 = vsel %vm1028_vm1, %v18580_v21, 0.0 }
0x2547   : > { %v11958_v57 = vsel %vm1028_vm1, %v18575_v56, 0.0 }
0x2548   : > { %11959 = vadd.xlane.f32.xlu1 %v11958_v57 }
0x254a   : > { %11962 = vadd.xlane.f32.xlu0 %v11961_v4 }
0x254c   : > { %11965 = vadd.xlane.f32.xlu1 %v11964_v16 }
0x25c3   : > { %v11945_v28 = vpop.xlane.xlu0 %11944 }
0x25c4   : > { %v11967_v9 = vmul.f32 0.03125, %v11945_v28  ;;  %v13322_v28 = vld [vmem:[%s18750_s15 + $0x1] ss:$0 sm:$0xff] }
0x25c5   : > { %v11948_v5 = vpop.xlane.xlu1 %11947 }
0x25c6   : > { %v18589_v6 = vsub.f32 %v18549_v1, %v11967_v9  ;;  %v11968_v31 = vmul.f32 0.03125, %v11948_v5 }
0x25c7   : > { %v11951_v35 = vpop.xlane.xlu0 %11950 }
0x25c8   : > { %v18592_v61 = vsub.f32 %v18555_v42, %v11968_v31  ;;  %v11969_v26 = vmul.f32 0.03125, %v11951_v35  ;;  %v11983_v23 = vmul.f32 %v18589_v6, %v18589_v6 }
0x25ca   : > { %v18597_v17 = vsub.f32 %v18552_v11, %v11969_v26  ;;  %v11991_v34 = vsel %vm1028_vm1, %v11983_v23, 0.0  ;;  %v11984_v12 = vmul.f32 %v18592_v61, %v18592_v61 }
0x25cb   : > { %v11954_v60 = vpop.xlane.xlu0 %11953  ;;  %11992 = vadd.xlane.f32.xlu0 %v11991_v34 }
0x25cc   : > { %v11970_v55 = vmul.f32 0.03125, %v11954_v60  ;;  %v11994_v41 = vsel %vm1028_vm1, %v11984_v12, 0.0  ;;  %v11985_v53 = vmul.f32 %v18597_v17, %v18597_v17  ;;  %v13323_v60 = vld [vmem:[%s18751_s16 + $0x1] ss:$0 sm:$0xff] }
0x25cd   : > { %11995 = vadd.xlane.f32.xlu1 %v11994_v41 }
0x25ce   : > { %v18606_v37 = vsub.f32 %v18562_v8, %v11970_v55  ;;  %v11997_v59 = vsel %vm1028_vm1, %v11985_v53, 0.0 }
0x25cf   : > { %11998 = vadd.xlane.f32.xlu0 %v11997_v59 }
0x25d0   : > { %v11986_v48 = vmul.f32 %v18606_v37, %v18606_v37 }
0x25d2   : > { %v12000_v18 = vsel %vm1028_vm1, %v11986_v48, 0.0 }
0x25d3   : > { %v11957_v20 = vpop.xlane.xlu0 %11956  ;;  %12001 = vadd.xlane.f32.xlu1 %v12000_v18 }
0x25d4   : > { %v11971_v27 = vmul.f32 0.03125, %v11957_v20 }
0x25d5   : > { %v11960_v0 = vpop.xlane.xlu1 %11959 }
0x25d6   : > { %v18613_v33 = vsub.f32 %v18569_v62, %v11971_v27  ;;  %v11972_v7 = vmul.f32 0.03125, %v11960_v0 }
0x25d7   : > { %v11963_v3 = vpop.xlane.xlu0 %11962 }
0x25d8   : > { %v18616_v40 = vsub.f32 %v18575_v56, %v11972_v7  ;;  %v11973_v19 = vmul.f32 0.03125, %v11963_v3  ;;  %v11987_v14 = vmul.f32 %v18613_v33, %v18613_v33 }
0x25d9   : > { %v11966_v52 = vpop.xlane.xlu1 %11965 }
0x25da   : > { %v18621_v47 = vsub.f32 %v18572_v25, %v11973_v19  ;;  %v11974_v63 = vmul.f32 0.03125, %v11966_v52  ;;  %v12003_v29 = vsel %vm1028_vm1, %v11987_v14, 0.0  ;;  %v11988_v39 = vmul.f32 %v18616_v40, %v18616_v40 }
0x25db   : > { %12004 = vadd.xlane.f32.xlu0 %v12003_v29 }
0x25dc   : > { %v18627_v10 = vsub.f32 %v18580_v21, %v11974_v63  ;;  %v12006_v50 = vsel %vm1028_vm1, %v11988_v39, 0.0  ;;  %v11989_v49 = vmul.f32 %v18621_v47, %v18621_v47 }
0x25dd   : > { %12007 = vadd.xlane.f32.xlu1 %v12006_v50 }
0x25de   : > { %v12009_v32 = vsel %vm1028_vm1, %v11989_v49, 0.0  ;;  %v11990_v46 = vmul.f32 %v18627_v10, %v18627_v10 }
0x25df   : > { %12010 = vadd.xlane.f32.xlu0 %v12009_v32 }
0x25e0   : > { %v12012_v2 = vsel %vm1028_vm1, %v11990_v46, 0.0 }
0x25e1   : > { %12013 = vadd.xlane.f32.xlu1 %v12012_v2 }
0x2658   : > { %v11993_v24 = vpop.xlane.xlu0 %11992 }
0x2659   : > { %v12015_v22 = vmul.f32 0.03125, %v11993_v24 }
0x265a   : > { %v11996_v44 = vpop.xlane.xlu1 %11995 }
0x265b   : > { %v12023_v38 = vadd.f32 1e-05, %v12015_v22  ;;  %v12016_v45 = vmul.f32 0.03125, %v11996_v44 }
0x265c   : > { %v11999_v30 = vpop.xlane.xlu0 %11998 }
0x265d   : > { %15658 = vrsqrt.f32 %v12023_v38  ;;  %v12024_v13 = vadd.f32 1e-05, %v12016_v45  ;;  %v12017_v58 = vmul.f32 0.03125, %v11999_v30 }
0x265f   : > { %15660 = vrsqrt.f32 %v12024_v13  ;;  %v12025_v54 = vadd.f32 1e-05, %v12017_v58 }
0x2660   : > { %v12002_v43 = vpop.xlane.xlu1 %12001 }
0x2661   : > { %15662 = vrsqrt.f32 %v12025_v54  ;;  %v12018_v57 = vmul.f32 0.03125, %v12002_v43 }
0x2663   : > { %v12026_v4 = vadd.f32 1e-05, %v12018_v57  ;;  %v15298_v57 = vld [vmem:[%s18754_s19 + $0x58] sm:$0xff]  }
0x2665   : > { %15664 = vrsqrt.f32 %v12026_v4  ;;  %v15299_v4 = vld [vmem:[%s18754_s19 + $0x60] sm:$0xff]  }
0x2667   : > { %v15659_v16 = vpop.eup %15658 }
0x2668   : > { %v12039_v9 = vmul.f32 %v15659_v16, %v18589_v6  ;;  %v12005_v5 = vpop.xlane.xlu0 %12004  ;;  %v15300_v16 = vld [vmem:[%s18754_s19 + $0x68] sm:$0xff]  }
0x2669   : > { %v15661_v31 = vpop.eup %15660  ;;  %v12019_v35 = vmul.f32 0.03125, %v12005_v5  ;;  %v13329_v5 = vld [vmem:[%s18753_s18 + $0x1] ss:$0 sm:$0xff] }
0x266a   : > { %v12040_v26 = vmul.f32 %v15661_v31, %v18592_v61  ;;  %v12008_v23 = vpop.xlane.xlu1 %12007  ;;  %v12053_v34 = vmul.f32 %v13322_v28, %v12039_v9  ;;  %v15302_v9 = vld [vmem:[%s18754_s19 + $0x78] sm:$0xff]  }
0x266b   : > { %v15663_v12 = vpop.eup %15662  ;;  %v12027_v55 = vadd.f32 1e-05, %v12019_v35  ;;  %v12020_v41 = vmul.f32 0.03125, %v12008_v23 }
0x266c   : > { %v12041_v53 = vmul.f32 %v15663_v12, %v18597_v17  ;;  %v12011_v59 = vpop.xlane.xlu0 %12010  ;;  %v12054_v48 = vmul.f32 %v13322_v28, %v12040_v26  ;;  %v12067_v27 = vadd.f32 %v13323_v60, %v12053_v34 }
0x266d   : > { %15666 = vrsqrt.f32 %v12027_v55  ;;  %v12028_v6 = vadd.f32 1e-05, %v12020_v41  ;;  %v12021_v18 = vmul.f32 0.03125, %v12011_v59 }
0x266e   : > { %v12014_v20 = vpop.xlane.xlu1 %12013  ;;  %v12068_v0 = vadd.f32 %v13323_v60, %v12054_v48  ;;  %v12055_v19 = vmul.f32 %v13322_v28, %v12041_v53 }
0x266f   : > { %v15665_v61 = vpop.eup %15664  ;;  %15668 = vrsqrt.f32 %v12028_v6  ;;  %v12029_v7 = vadd.f32 1e-05, %v12021_v18  ;;  %v12022_v3 = vmul.f32 0.03125, %v12014_v20 }
0x2670   : > { %v12042_v14 = vmul.f32 %v15665_v61, %v18606_v37  ;;  %v12075_v52 = vpack.c.bf16 %v12068_v0, %v12067_v27  ;;  %v12069_v17 = vadd.f32 %v13323_v60, %v12055_v19 }
0x2671   : > { %15670 = vrsqrt.f32 %v12029_v7  ;;  %v12030_v63 = vadd.f32 1e-05, %v12022_v3 }
0x2672   : > { %v12056_v29 = vmul.f32 %v13322_v28, %v12042_v14  ;;  %15146 = vmatprep.mubr.msk.bf16.mxu0 %vm1028_vm1, %v12075_v52 }
0x2673   : > { %15672 = vrsqrt.f32 %v12030_v63 }
0x2674   : > { %v12070_v39 = vadd.f32 %v13323_v60, %v12056_v29 }
0x2676   : > { %v12076_v50 = vpack.c.bf16 %v12070_v39, %v12069_v17 }
0x2677   : > { %v15667_v49 = vpop.eup %15666 }
0x2678   : > { %v12043_v32 = vmul.f32 %v15667_v49, %v18613_v33  ;;  %15147 = vmatmul.mubr.msk.bf16.vlgmr.msra.gmra.mrb[112].mxu0 %vm1028_vm1, %v12076_v50 }
0x2679   : > { %v15669_v46 = vpop.eup %15668 }
0x267a   : > { %v12044_v2 = vmul.f32 %v15669_v46, %v18616_v40  ;;  %v12057_v36 = vmul.f32 %v13322_v28, %v12043_v32  ;;  %v15295_v40 = vld [vmem:[%s18754_s19 + $0x40] sm:$0xff]  }
0x267b   : > { %v15671_v37 = vpop.eup %15670  ;;  %15154 = vmatprep.subr.bf16.mxu1 %v15295_v40 }
0x267c   : > { %v12045_v51 = vmul.f32 %v15671_v37, %v18621_v47  ;;  %v12058_v24 = vmul.f32 %v13322_v28, %v12044_v2  ;;  %v12071_v45 = vadd.f32 %v13323_v60, %v12057_v36  ;;  %15155 = vmatpush3.bf16.msra.mxu1 %v15295_v40  ;;  %v15296_v47 = vld [vmem:[%s18754_s19 + $0x48] sm:$0xff]  }
0x267d   : > { %v15673_v22 = vpop.eup %15672  ;;  %15156 = vmatprep.subr.bf16.mxu1 %v15296_v47 }
0x267e   : > { %v12059_v44 = vmul.f32 %v13322_v28, %v12045_v51  ;;  %v12046_v38 = vmul.f32 %v15673_v22, %v18627_v10  ;;  %v12072_v30 = vadd.f32 %v13323_v60, %v12058_v24  ;;  %v15297_v10 = vld [vmem:[%s18754_s19 + $0x50] sm:$0xff]  }
0x2680   : > { %v12060_v13 = vmul.f32 %v13322_v28, %v12046_v38  ;;  %v12077_v58 = vpack.c.bf16 %v12072_v30, %v12071_v45  ;;  %v12073_v54 = vadd.f32 %v13323_v60, %v12059_v44  ;;  %15157 = vmatpush3.bf16.msra.mxu1 %v15296_v47  ;;  %v15301_v28 = vld [vmem:[%s18754_s19 + $0x70] sm:$0xff]  }
0x2681   : > { %15158 = vmatprep.subr.bf16.mxu1 %v15297_v10 }
0x2682   : > { %v12074_v33 = vadd.f32 %v13323_v60, %v12060_v13  ;;  %15150 = vmatprep.mubr.msk.bf16.mxu0 %vm1028_vm1, %v12077_v58 }
0x2684   : > { %v12078_v43 = vpack.c.bf16 %v12074_v33, %v12073_v54  ;;  %15159 = vmatpush3.bf16.msra.mxu1 %v15297_v10 }
0x2685   : > { %15160 = vmatprep.subr.bf16.mxu1 %v15298_v57 }
0x2686   : > { %15151 = vmatmul.mubr.msk.bf16.gmra.mrb[116].mxu0 %vm1028_vm1, %v12078_v43 }
0x2687   : > { %15182 = vmatprep.mubr.msk.bf16.mxu0 %vm15718_vm2, %v15717_v15 }
0x2688   : > { %15161 = vmatpush3.bf16.msra.mxu1 %v15298_v57 }
0x2689   : > { %15162 = vmatprep.subr.bf16.mxu1 %v15299_v4 }
0x268c   : > { %15163 = vmatpush3.bf16.msra.mxu1 %v15299_v4 }
0x268d   : > { %15164 = vmatprep.subr.bf16.mxu1 %v15300_v16 }
0x2690   : > { %15165 = vmatpush3.bf16.msra.mxu1 %v15300_v16 }
0x2691   : > { %15166 = vmatprep.subr.bf16.mxu1 %v15301_v28 }
0x2694   : > { %15167 = vmatpush3.bf16.msra.mxu1 %v15301_v28 }
0x2695   : > { %15168 = vmatprep.subr.bf16.mxu1 %v15302_v9 }
0x2698   : > { %15169 = vmatpush3.bf16.msra.mxu1 %v15302_v9 }
0x274b   : > { %v15148_v31 = vpop.f32.mrb[112].mxu0 }
0x274c   : > { %v12159_v35 = vadd.f32 %v15148_v31, %v13329_v5  ;;  %v12150_v26 = vpop.f32.mrb[113].mxu0 }
0x274d   : > { %v12151_v23 = vadd.f32 %v13329_v5, %v12150_v26  ;;  %v15149_v34 = vpop.f32.mrb[114].mxu0 }
0x274e   : > { %v13338_v12 = vmul.f32 -1.702, %v12159_v35  ;;  %v12162_v60 = vadd.f32 %v15149_v34, %v13329_v5  ;;  %v12153_v55 = vpop.f32.mrb[115].mxu0 }
0x274f   : > { %v13336_v41 = vmul.f32 -1.702, %v12151_v23  ;;  %v12154_v53 = vadd.f32 %v13329_v5, %v12153_v55 }
0x2750   : > { %v12201_v59 = vmul.f32 1.442695, %v13338_v12  ;;  %v13339_v48 = vmul.f32 -1.702, %v12162_v60 }
0x2751   : > { %v12197_v6 = vmul.f32 1.442695, %v13336_v41  ;;  %v13337_v18 = vmul.f32 -1.702, %v12154_v53 }
0x2752   : > { %15674 = vpow2.f32 %v12201_v59  ;;  %v12203_v20 = vmul.f32 1.442695, %v13339_v48 }
0x2753   : > { %15676 = vpow2.f32 %v12197_v6  ;;  %v12199_v27 = vmul.f32 1.442695, %v13337_v18 }
0x2754   : > { %15678 = vpow2.f32 %v12203_v20 }
0x2755   : > { %15680 = vpow2.f32 %v12199_v27 }
0x2759   : > { %v15152_v0 = vpop.f32.mrb[116].mxu0 }
0x275a   : > { %v12175_v61 = vadd.f32 %v15152_v0, %v13329_v5  ;;  %v12166_v7 = vpop.f32.mrb[117].mxu0  ;;  %v13369_v0 = vld [vmem:[%s18755_s20 + $0x1] ss:$0 sm:$0xff] }
0x275b   : > { %v12167_v3 = vadd.f32 %v13329_v5, %v12166_v7  ;;  %v15153_v19 = vpop.f32.mrb[118].mxu0 }
0x275c   : > { %v15675_v14 = vpop.eup %15674  ;;  %v13342_v52 = vmul.f32 -1.702, %v12175_v61  ;;  %v12178_v63 = vadd.f32 %v15153_v19, %v13329_v5  ;;  %v12169_v29 = vpop.f32.mrb[119].mxu0 }
0x275d   : > { %v15677_v17 = vpop.eup %15676  ;;  %v12215_v39 = vadd.f32 1.0, %v15675_v14  ;;  %v13340_v50 = vmul.f32 -1.702, %v12167_v3  ;;  %v12170_v49 = vadd.f32 %v13329_v5, %v12169_v29 }
0x275e   : > { %v15679_v32 = vpop.eup %15678  ;;  %v12213_v46 = vadd.f32 1.0, %v15677_v17  ;;  %v13343_v2 = vmul.f32 -1.702, %v12178_v63  ;;  %v12209_v51 = vmul.f32 1.442695, %v13342_v52 }
0x275f   : > { %v15681_v36 = vpop.eup %15680  ;;  %15682 = vrcp.f32 %v12215_v39  ;;  %v12216_v37 = vadd.f32 1.0, %v15679_v32  ;;  %v13341_v24 = vmul.f32 -1.702, %v12170_v49  ;;  %v12205_v44 = vmul.f32 1.442695, %v13340_v50 }
0x2760   : > { %15684 = vrcp.f32 %v12213_v46  ;;  %v12214_v22 = vadd.f32 1.0, %v15681_v36  ;;  %v12211_v38 = vmul.f32 1.442695, %v13343_v2 }
0x2761   : > { %15686 = vrcp.f32 %v12216_v37  ;;  %v12207_v45 = vmul.f32 1.442695, %v13341_v24 }
0x2762   : > { %15688 = vrcp.f32 %v12214_v22 }
0x2763   : > { %15690 = vpow2.f32 %v12209_v51 }
0x2764   : > { %15692 = vpow2.f32 %v12205_v44 }
0x2765   : > { %15694 = vpow2.f32 %v12211_v38 }
0x2766   : > { %15696 = vpow2.f32 %v12207_v45 }
0x2769   : > { %v15683_v30 = vpop.eup %15682 }
0x276a   : > { %v15685_v13 = vpop.eup %15684  ;;  %v12239_v33 = vmul.f32 %v15683_v30, %v12159_v35 }
0x276b   : > { %v15687_v58 = vpop.eup %15686  ;;  %v12237_v47 = vmul.f32 %v15685_v13, %v12151_v23 }
0x276c   : > { %v15689_v54 = vpop.eup %15688  ;;  %v12240_v43 = vmul.f32 %v15687_v58, %v12162_v60 }
0x276d   : > { %v15691_v40 = vpop.eup %15690  ;;  %v12238_v10 = vmul.f32 %v15689_v54, %v12154_v53 }
0x276e   : > { %v15693_v57 = vpop.eup %15692  ;;  %v12246_v4 = vpack.c.bf16 %v12240_v43, %v12239_v33  ;;  %v12219_v16 = vadd.f32 1.0, %v15691_v40 }
0x276f   : > { %v15695_v28 = vpop.eup %15694  ;;  %v12217_v9 = vadd.f32 1.0, %v15693_v57  ;;  %v12245_v5 = vpack.c.bf16 %v12238_v10, %v12237_v47 }
0x2770   : > { %v15697_v31 = vpop.eup %15696  ;;  %15698 = vrcp.f32 %v12219_v16  ;;  %v12220_v26 = vadd.f32 1.0, %v15695_v28  ;;  %v15304_v16 = vld [vmem:[%s18758_s23 + $0x8] sm:$0xff]  }
0x2771   : > { %15700 = vrcp.f32 %v12217_v9  ;;  %v12218_v34 = vadd.f32 1.0, %v15697_v31  ;;  %15170 = vmatprep.mubr.bf16.mxu1 %v12245_v5 }
0x2772   : > { %15702 = vrcp.f32 %v12220_v26  ;;  %15171 = vmatmul.mubr.bf16.vlgmr.msra.gmra.mrb[128].mxu1 %v12246_v4  ;;  %v15303_v4 = vld [vmem:[%s18758_s23] sm:$0xff]  }
0x2773   : > { %15704 = vrcp.f32 %v12218_v34  ;;  %15179 = vmatpush3.bf16.msra.mxu0 %v15303_v4  ;;  %v13370_v26 = vld [vmem:[%s18756_s21] ss:$0 sm:$0xff] }
0x2774   : > { %15180 = vmatprep.subr.bf16.mxu0 %v15717_v15 }
0x2777   : > { %15181 = vmatpush3.bf16.msra.mxu0 %v15304_v16 }
0x2778   : > { %15186 = vmatprep.subr.bf16.mxu0 %v15717_v15 }
0x277a   : > { %v15699_v35 = vpop.eup %15698 }
0x277b   : > { %v15701_v12 = vpop.eup %15700  ;;  %v12243_v55 = vmul.f32 %v15699_v35, %v12175_v61  ;;  %v13371_v35 = vld [vmem:[%s18757_s22] ss:$0 sm:$0xff] }
0x277c   : > { %v15703_v60 = vpop.eup %15702  ;;  %v12241_v53 = vmul.f32 %v15701_v12, %v12167_v3 }
0x277d   : > { %v15705_v23 = vpop.eup %15704  ;;  %v12244_v41 = vmul.f32 %v15703_v60, %v12178_v63 }
0x277e   : > { %v12242_v59 = vmul.f32 %v15705_v23, %v12170_v49 }
0x277f   : > { %v12248_v48 = vpack.c.bf16 %v12244_v41, %v12243_v55  ;;  %v15305_v55 = vld [vmem:[%s18759_s24] sm:$0xff]  }
0x2780   : > { %v12247_v6 = vpack.c.bf16 %v12242_v59, %v12241_v53 }
0x2782   : > { %15174 = vmatprep.mubr.bf16.mxu1 %v12247_v6 }
0x2783   : > { %15175 = vmatmul.mubr.bf16.gmra.mrb[132].mxu1 %v12248_v48 }
0x2845   : > { %v15172_v18 = vpop.f32.mrb[128].mxu1 }
0x2846   : > { %v12381_v20 = vadd.f32 %v15172_v18, %v18552_v11  ;;  %v12348_v27 = vpop.f32.mrb[129].mxu1  ;;  %v13375_v18 = vld [vmem:[%s18760_s25] ss:$0 sm:$0xff] }
0x2847   : > { %v15173_v7 = vpop.f32.mrb[130].mxu1  ;;  %v12379_v61 = vadd.f32 %v12348_v27, %v18549_v1 }
0x2848   : > { %v12382_v19 = vadd.f32 %v15173_v7, %v18562_v8  ;;  %v12351_v14 = vpop.f32.mrb[131].mxu1  ;;  %v12397_v52 = vadd.f32 %v13369_v0, %v12381_v20 }
0x2849   : > { %v12380_v3 = vadd.f32 %v12351_v14, %v18555_v42  ;;  %v12395_v17 = vadd.f32 %v13369_v0, %v12379_v61 }
0x284a   : > { %v12398_v63 = vadd.f32 %v13369_v0, %v12382_v19  ;;  %v12407_v11 = vrot.slane %v12397_v52, 6 }
0x284b   : > { %v12396_v29 = vadd.f32 %v13369_v0, %v12380_v3 }
0x284c   : > { %v12410_v50 = vrot.slane %v12398_v63, 5 }
0x284d   : > { %v12404_v39 = vrot.slane %v12396_v29, 7 }
0x284f   : > { %v12425_v49 = vsel %vm12424_vm9, %v12395_v17, %v12404_v39 }
0x2850   : > { %v12427_v32 = vsel %vm12426_vm10, %v12425_v49, %v12407_v11 }
0x2851   : > { %v12429_v46 = vsel %vm12428_vm11, %v12427_v32, %v12410_v50 }
0x2856   : > { %v15176_v2 = vpop.f32.mrb[132].mxu1 }
0x2857   : > { %v12385_v8 = vadd.f32 %v15176_v2, %v18572_v25  ;;  %v12364_v36 = vpop.f32.mrb[133].mxu1 }
0x2858   : > { %v12383_v1 = vadd.f32 %v12364_v36, %v18569_v62  ;;  %v15177_v42 = vpop.f32.mrb[134].mxu1 }
0x2859   : > { %v12386_v37 = vadd.f32 %v15177_v42, %v18580_v21  ;;  %v12367_v51 = vpop.f32.mrb[135].mxu1  ;;  %v12401_v44 = vadd.f32 %v13369_v0, %v12385_v8 }
0x285a   : > { %v12399_v24 = vadd.f32 %v13369_v0, %v12383_v1  ;;  %v12384_v22 = vadd.f32 %v12367_v51, %v18575_v56 }
0x285b   : > { %v12402_v45 = vadd.f32 %v13369_v0, %v12386_v37  ;;  %v12419_v25 = vrot.slane %v12401_v44, 2 }
0x285c   : > { %v12413_v38 = vrot.slane %v12399_v24, 4  ;;  %v12400_v30 = vadd.f32 %v13369_v0, %v12384_v22 }
0x285d   : > { %v12422_v54 = vrot.slane %v12402_v45, 1 }
0x285e   : > { %v12430_v13 = vsel %vm2132_vm4, %v12429_v46, %v12413_v38  ;;  %v12416_v58 = vrot.slane %v12400_v30, 3 }
0x2860   : > { %v12432_v62 = vsel %vm12431_vm12, %v12430_v13, %v12416_v58 }
0x2861   : > { %v12434_v33 = vsel %vm12433_vm13, %v12432_v62, %v12419_v25 }
0x2862   : > { %v12436_v43 = vsel %vm12435_vm14, %v12434_v33, %v12422_v54 }
0x2863   : > { %v12439_v21 = vsel %vm1028_vm1, %v12436_v43, 0.0 }
0x2864   : > { %12440 = vadd.xlane.f32.xlu0 %v12439_v21 }
0x28f1   : > { %v12441_v40 = vpop.xlane.xlu0 %12440 }
0x28f2   : > { %v12442_v56 = vmul.f32 0.03125, %v12441_v40 }
0x28f4   : > { %v12443_v47 = vsub.f32 %v12436_v43, %v12442_v56 }
0x28f6   : > { %v12444_v10 = vmul.f32 %v12443_v47, %v12443_v47 }
0x28f8   : > { %v12445_v57 = vsel %vm1028_vm1, %v12444_v10, 0.0 }
0x28f9   : > { %12446 = vadd.xlane.f32.xlu1 %v12445_v57 }
0x2986   : > { %v12447_v28 = vpop.xlane.xlu1 %12446 }
0x2987   : > { %v12448_v9 = vmul.f32 0.03125, %v12447_v28 }
0x2989   : > { %v12449_v5 = vadd.f32 1e-05, %v12448_v9 }
0x298b   : > { %15706 = vrsqrt.f32 %v12449_v5 }
0x2995   : > { %v15707_v31 = vpop.eup %15706 }
0x2996   : > { %v12451_v34 = vmul.f32 %v15707_v31, %v12443_v47 }
0x2998   : > { %v12458_v12 = vmul.f32 %v13370_v26, %v12451_v34 }
0x299a   : > { %v12465_v60 = vadd.f32 %v13371_v35, %v12458_v12 }
0x299c   : > { %v12466_v23 = vpack.c.bf16 %v12465_v60, %v12465_v60 }
0x299e   : > { %15183 = vmatmul.mubr.msk.bf16.vlgmr.msra.gmra.mrb[120].mxu0 %vm1028_vm1, %v12466_v23 }
0x299f   : > { %15188 = vmatprep.mubr.msk.bf16.mxu0 %vm15718_vm2, %v15717_v15  ;;  %15187 = vmatpush3.bf16.msra.mxu0 %v15305_v55 }
0x2a71   : > { %v12520_v41 = vpop.f32.mrb[120].mxu0 }
0x2a72   : > { %v12526_v53 = vpack.c.bf16 %v12520_v41, %v12520_v41  ;;  %v15184_v59 = vpop.f32.mrb[121].mxu0 }
0x2a73   : > { %v12523_v48 = vpop.f32.mrb[122].mxu0 }
0x2a74   : > { %v15185_v6 = vpop.f32.mrb[123].mxu0  ;;  %15189 = vmatmul.mubr.msk.bf16.vlgmr.msra.gmra.mrb[124].mxu0 %vm12542_vm15, %v12526_v53 }
0x2b47   : > { %v12580_v15 = vpop.f32.mrb[124].mxu0 }
0x2b48   : > { %v12581_v20 = vadd.f32 %v13375_v18, %v12580_v15  ;;  %v15190_v27 = vpop.f32.mrb[125].mxu0 }
0x2b49   : > { %v12583_v0 = vpop.f32.mrb[126].mxu0 }
0x2b4a   : > { %12587 = vst.msk [vmem:[%s794_s8] sm:$0xff] %vm12586_vm0, %v12581_v20  ;;  %v15191_v7 = vpop.f32.mrb[127].mxu0 }
0x2b4b PF: > { %s18805_s4 = sld [smem:[#allocation3_spill]] }
0x2b51   : > { %s36_s27 = sadd.s32 1, %s18805_s4  }
0x2b52   : > { %p33_p5 = scmp.ge.s32.totalorder %s36_s27, 4  }
0x2b54   :  { %35 = sbr.rel (!%p33_p5) target bundleno = 12 (0xc), region = 206 }

</bundles_post_ra>
